<compile_context>
chip_gen: v7x
topology: tpu7x:2x2x1
jax: 0.10.0
libtpu: 0.0.40
codegen_flags: <defaults>
</compile_context>

<pallas_src>
import functools

import jax
import jax.numpy as jnp
from jax.experimental import pallas as pl
from jax.experimental.pallas import tpu as pltpu

BN_EPS = 1e-5
NUM_CLASSES = 200
STAGES = [(64, 1), (128, 2), (256, 2), (512, 2)]  # (out_channels, first-block stride)

K_SINGLE = 1152   # largest K handled as one full-extent K block (no K padding)
TK = 512          # K tile when K > K_SINGLE (layer3/layer4 3x3 convs)


def _round_up(x, m):
    return ((x + m - 1) // m) * m


# ----------------------------------------------------------------------------
# Pallas kernels
# ----------------------------------------------------------------------------
def _gemm_bn_kernel(a_ref, b_ref, scale_ref, shift_ref, o_ref, acc_ref, *, relu):
    # a: (tm, tk) bf16 patches, b: (tk, tn) bf16 weights, scale/shift: (1, tn) f32.
    k = pl.program_id(2)

    @pl.when(k == 0)
    def _init():
        acc_ref[...] = jnp.zeros_like(acc_ref)

    acc_ref[...] += jnp.dot(a_ref[...], b_ref[...], preferred_element_type=jnp.float32)

    @pl.when(k == pl.num_programs(2) - 1)
    def _finalize():
        y = acc_ref[...] * scale_ref[...] + shift_ref[...]
        if relu:
            y = jnp.maximum(y, 0.0)
        o_ref[...] = y.astype(o_ref.dtype)


def _gemm_bn_res_kernel(a_ref, b_ref, scale_ref, shift_ref, res_ref, o_ref, acc_ref,
                        *, relu):
    # Same as above plus a residual add in the f32 epilogue (BasicBlock conv2).
    k = pl.program_id(2)

    @pl.when(k == 0)
    def _init():
        acc_ref[...] = jnp.zeros_like(acc_ref)

    acc_ref[...] += jnp.dot(a_ref[...], b_ref[...], preferred_element_type=jnp.float32)

    @pl.when(k == pl.num_programs(2) - 1)
    def _finalize():
        y = acc_ref[...] * scale_ref[...] + shift_ref[...] + res_ref[...].astype(jnp.float32)
        if relu:
            y = jnp.maximum(y, 0.0)
        o_ref[...] = y.astype(o_ref.dtype)


def _maxpool_kernel(x_ref, o_ref):
    # x: (9, tm, C) shifted window taps -> elementwise max over the 9 taps.
    m = x_ref[0]
    for i in range(1, x_ref.shape[0]):
        m = jnp.maximum(m, x_ref[i])
    o_ref[...] = m


def _avgpool_kernel(x_ref, o_ref):
    # x: (H*W, N, C) -> mean over spatial positions, f32 accumulation.
    acc = x_ref[0].astype(jnp.float32)
    for i in range(1, x_ref.shape[0]):
        acc = acc + x_ref[i].astype(jnp.float32)
    o_ref[...] = (acc * (1.0 / x_ref.shape[0])).astype(o_ref.dtype)


# ----------------------------------------------------------------------------
# Kernel wrappers
# ----------------------------------------------------------------------------
def gemm_bn(a, fold, n_out, *, relu, res=None, out_dtype=jnp.bfloat16):
    """(M,K) @ pre-folded (Kp,Np) bf16 weights, fused BN scale/shift, optional
    residual and ReLU.  f32 accumulation over a K grid axis with VMEM scratch."""
    b_p, sc_p, sh_p = fold["w"], fold["scale"], fold["shift"]
    M, K = a.shape
    Kp, Np = b_p.shape

    tm = min(256, _round_up(M, 8))
    Mp = _round_up(M, tm)
    tn = 256 if (Np >= 256 and Np % 256 == 0) else 128
    tk = Kp if Kp <= K_SINGLE else TK          # Kp % TK == 0 guaranteed at fold time

    a_bf = a.astype(jnp.bfloat16)
    if (Mp, Kp) != (M, K):
        a_bf = jnp.pad(a_bf, ((0, Mp - M), (0, Kp - K)))

    grid = (Mp // tm, Np // tn, Kp // tk)
    in_specs = [
        pl.BlockSpec((tm, tk), lambda i, j, k: (i, k)),
        pl.BlockSpec((tk, tn), lambda i, j, k: (k, j)),
        pl.BlockSpec((1, tn), lambda i, j, k: (0, j)),
        pl.BlockSpec((1, tn), lambda i, j, k: (0, j)),
    ]
    operands = [a_bf, b_p, sc_p, sh_p]

    if res is not None:
        r = res.astype(jnp.bfloat16)
        if r.shape != (Mp, Np):
            r = jnp.pad(r, ((0, Mp - r.shape[0]), (0, Np - r.shape[1])))
        in_specs.append(pl.BlockSpec((tm, tn), lambda i, j, k: (i, j)))
        operands.append(r)
        kernel = functools.partial(_gemm_bn_res_kernel, relu=relu)
    else:
        kernel = functools.partial(_gemm_bn_kernel, relu=relu)

    out = pl.pallas_call(
        kernel,
        out_shape=jax.ShapeDtypeStruct((Mp, Np), out_dtype),
        grid=grid,
        in_specs=in_specs,
        out_specs=pl.BlockSpec((tm, tn), lambda i, j, k: (i, j)),
        scratch_shapes=[pltpu.VMEM((tm, tn), jnp.float32)],
        compiler_params=pltpu.CompilerParams(
            dimension_semantics=("parallel", "parallel", "arbitrary")),
    )(*operands)

    if (Mp, Np) != (M, n_out):
        out = out[:M, :n_out]
    return out


def conv_bn(x, fold, *, kh, kw, cout, stride, padding, relu, residual=None):
    """NHWC conv via im2col + fused Pallas GEMM/BN[/res][/relu]."""
    N, H, W, Cin = x.shape
    Ho = (H + 2 * padding - kh) // stride + 1
    Wo = (W + 2 * padding - kw) // stride + 1

    if kh == 1 and kw == 1 and padding == 0:
        a = x[:, ::stride, ::stride, :][:, :Ho, :Wo, :].reshape(N * Ho * Wo, Cin)
    else:
        # TODO(synk): stream the KHxKW taps through a grid axis instead of
        # materializing im2col patches in HBM (needs strided windows in index_map).
        xp = jnp.pad(x, ((0, 0), (padding, padding), (padding, padding), (0, 0)))
        taps = []
        for ki in range(kh):
            for kj in range(kw):
                taps.append(
                    xp[:, ki:ki + stride * (Ho - 1) + 1:stride,
                          kj:kj + stride * (Wo - 1) + 1:stride, :]
                )
        a = jnp.concatenate(taps, axis=-1).reshape(N * Ho * Wo, kh * kw * Cin)

    res = None if residual is None else residual.reshape(N * Ho * Wo, cout)
    y = gemm_bn(a, fold, cout, relu=relu, res=res)
    return y.reshape(N, Ho, Wo, cout)


def maxpool_3x3_s2(x):
    """MaxPool2d(kernel=3, stride=2, padding=1) on NHWC (bf16), tiled over rows."""
    N, H, W, C = x.shape
    Ho = (H + 2 - 3) // 2 + 1
    Wo = (W + 2 - 3) // 2 + 1
    neg = float(jnp.finfo(x.dtype).min)
    xp = jnp.pad(x, ((0, 0), (1, 1), (1, 1), (0, 0)), constant_values=neg)
    taps = []
    for ki in range(3):
        for kj in range(3):
            taps.append(xp[:, ki:ki + 2 * (Ho - 1) + 1:2, kj:kj + 2 * (Wo - 1) + 1:2, :])
    M = N * Ho * Wo
    stacked = jnp.stack(taps, axis=0).reshape(9, M, C)

    tm = min(512, _round_up(M, 8))
    Mp = _round_up(M, tm)
    if Mp != M:
        stacked = jnp.pad(stacked, ((0, 0), (0, Mp - M), (0, 0)), constant_values=neg)

    out = pl.pallas_call(
        _maxpool_kernel,
        out_shape=jax.ShapeDtypeStruct((Mp, C), x.dtype),
        grid=(Mp // tm,),
        in_specs=[pl.BlockSpec((9, tm, C), lambda i: (0, i, 0))],
        out_specs=pl.BlockSpec((tm, C), lambda i: (i, 0)),
        compiler_params=pltpu.CompilerParams(dimension_semantics=("parallel",)),
    )(stacked)
    return out[:M].reshape(N, Ho, Wo, C)


def adaptive_avgpool_1x1(x):
    """AdaptiveAvgPool2d((1,1)) + flatten: NHWC -> (N, C). Tiny tensor: one block."""
    N, H, W, C = x.shape
    xr = jnp.transpose(x.reshape(N, H * W, C), (1, 0, 2))  # (HW, N, C)
    return pl.pallas_call(
        _avgpool_kernel,
        out_shape=jax.ShapeDtypeStruct((N, C), x.dtype),
        in_specs=[pl.BlockSpec(memory_space=pltpu.MemorySpace.VMEM)],
        out_specs=pl.BlockSpec(memory_space=pltpu.MemorySpace.VMEM),
    )(xr)


# ----------------------------------------------------------------------------
# Deterministic parameter construction + one-time weight folding
# ----------------------------------------------------------------------------
def _he_conv(key, cout, cin, kh, kw):
    fan_in = cin * kh * kw
    return jax.random.normal(key, (cout, cin, kh, kw), jnp.float32) * jnp.sqrt(2.0 / fan_in)


def _bn_fold(key, c):
    k1, k2, k3, k4 = jax.random.split(key, 4)
    gamma = 1.0 + 0.1 * jax.random.normal(k1, (c,), jnp.float32)
    beta = 0.1 * jax.random.normal(k2, (c,), jnp.float32)
    mean = 0.1 * jax.random.normal(k3, (c,), jnp.float32)
    var = 1.0 + 0.1 * jnp.abs(jax.random.normal(k4, (c,), jnp.float32))
    scale = gamma / jnp.sqrt(var + BN_EPS)
    shift = beta - mean * scale
    return scale, shift


def _fold_conv(w, scale, shift):
    """Pre-transpose/pad weights to (Kp, Np) bf16; scale/shift to (1, Np) f32."""
    cout, cin, kh, kw = w.shape
    K = kh * kw * cin
    Kp = _round_up(K, 16) if K <= K_SINGLE else _round_up(K, TK)
    Np = _round_up(cout, 128)
    b = jnp.transpose(w, (2, 3, 1, 0)).reshape(K, cout).astype(jnp.bfloat16)
    b_p = jnp.zeros((Kp, Np), jnp.bfloat16).at[:K, :cout].set(b)
    sc = jnp.zeros((1, Np), jnp.float32).at[0, :cout].set(scale)
    sh = jnp.zeros((1, Np), jnp.float32).at[0, :cout].set(shift)
    return {"w": b_p, "scale": sc, "shift": sh}


def make_resnet18_params(key, num_classes=NUM_CLASSES):
    keys = iter(jax.random.split(key, 128))
    params = {}
    w = _he_conv(next(keys), 64, 3, 7, 7)
    sc, sh = _bn_fold(next(keys), 64)
    params["conv1"] = _fold_conv(w, sc, sh)

    params["layers"] = []
    cin = 64
    for cout, stride in STAGES:
        blocks = []
        for b in range(2):
            s = stride if b == 0 else 1
            ci = cin if b == 0 else cout
            blk = {}
            w = _he_conv(next(keys), cout, ci, 3, 3)
            sc, sh = _bn_fold(next(keys), cout)
            blk["conv1"] = _fold_conv(w, sc, sh)
            w = _he_conv(next(keys), cout, cout, 3, 3)
            sc, sh = _bn_fold(next(keys), cout)
            blk["conv2"] = _fold_conv(w, sc, sh)
            if s != 1 or ci != cout:
                w = _he_conv(next(keys), cout, ci, 1, 1)
                sc, sh = _bn_fold(next(keys), cout)
                blk["ds"] = _fold_conv(w, sc, sh)
            blocks.append(blk)
        params["layers"].append(blocks)
        cin = cout

    # fc: He init, zero bias (matches init_weights(self.fc, 'He')); reuse the
    # conv fold (scale=1, shift=bias) so it runs through the same GEMM kernel.
    fc_w = jax.random.normal(next(keys), (num_classes, 512), jnp.float32) * jnp.sqrt(2.0 / 512)
    fc_b = jnp.zeros((num_classes,), jnp.float32)
    params["fc"] = _fold_conv(fc_w[:, :, None, None],
                              jnp.ones((num_classes,), jnp.float32), fc_b)
    return params


# ----------------------------------------------------------------------------
# Forward pass (mirrors ResNet.forward: backbone -> neck -> fc)
# ----------------------------------------------------------------------------
@jax.jit
def resnet_forward(params, x_nchw):
    x = jnp.transpose(x_nchw, (0, 2, 3, 1)).astype(jnp.bfloat16)  # NCHW -> NHWC bf16
    # stem: conv1 -> bn1 -> relu -> maxpool
    x = conv_bn(x, params["conv1"], kh=7, kw=7, cout=64, stride=2, padding=3, relu=True)
    x = maxpool_3x3_s2(x)
    # layer1..layer4 (BasicBlocks)
    # TODO(synk): fuse conv1 + downsample of the first block of each stage into
    # one GEMM (shared input) to further cut launch count in this tiny-M regime.
    for li, (cout, stride) in enumerate(STAGES):
        for bi in range(2):
            blk = params["layers"][li][bi]
            s = stride if bi == 0 else 1
            identity = x
            out = conv_bn(x, blk["conv1"], kh=3, kw=3, cout=cout,
                          stride=s, padding=1, relu=True)
            if "ds" in blk:
                identity = conv_bn(x, blk["ds"], kh=1, kw=1, cout=cout,
                                   stride=s, padding=0, relu=False)
            x = conv_bn(out, blk["conv2"], kh=3, kw=3, cout=cout,
                        stride=1, padding=1, relu=True, residual=identity)
    # neck: AdaptiveAvgPool2d((1,1)) + flatten
    feat = adaptive_avgpool_1x1(x)  # (N, 512) bf16
    # fc: linear classifier (f32 logits)
    logits = gemm_bn(feat, params["fc"], NUM_CLASSES, relu=False, out_dtype=jnp.float32)
    return logits


if __name__ == "__main__":
    key = jax.random.PRNGKey(0)
    kx, kp = jax.random.split(key)
    # Small but architecture-consistent input: batch=2, 3 channels, 32x32 spatial.
    x = jax.random.normal(kx, (2, 3, 32, 32), jnp.float32)
    params = make_resnet18_params(kp, num_classes=NUM_CLASSES)

    logits = resnet_forward(params, x)
    logits = jax.block_until_ready(logits)
    assert logits.shape == (2, NUM_CLASSES), logits.shape
    assert bool(jnp.all(jnp.isfinite(logits)))
    print("KERNEL_OK")
</pallas_src>

<mosaic_0001>
module attributes {stable_mosaic.version = 11 : i64} {
  func.func @_gemm_bn_kernel(%arg0: i32, %arg1: i32, %arg2: i32, %arg3: memref<256x160xbf16, #tpu.memory_space<vmem>>, %arg4: memref<160x128xbf16, #tpu.memory_space<vmem>>, %arg5: memref<1x128xf32, #tpu.memory_space<vmem>>, %arg6: memref<1x128xf32, #tpu.memory_space<vmem>>, %arg7: memref<256x128xbf16, #tpu.memory_space<vmem>>, %arg8: memref<256x128xf32, #tpu.memory_space<vmem>>) attributes {dimension_semantics = [#tpu.dimension_semantics<parallel>, #tpu.dimension_semantics<parallel>, #tpu.dimension_semantics<arbitrary>], iteration_bounds = array<i64: 2, 1, 1>, scalar_prefetch = 0 : i64, scratch_operands = 1 : i64, tpu.core_type = #tpu.core_type<tc>, window_params = [{transform_indices = @transform_0, window_bounds = array<i64: 256, 160>}, {transform_indices = @transform_1, window_bounds = array<i64: 160, 128>}, {transform_indices = @transform_2, window_bounds = array<i64: 1, 128>}, {transform_indices = @transform_3, window_bounds = array<i64: 1, 128>}, {transform_indices = @transform_4, window_bounds = array<i64: 256, 128>}]} {
    %c0_i32 = arith.constant 0 : i32
    %0 = arith.cmpi eq, %arg2, %c0_i32 : i32
    %1 = arith.extui %0 : i1 to i32
    %c0_i32_0 = arith.constant 0 : i32
    %2 = arith.cmpi ne, %1, %c0_i32_0 : i32
    scf.if %2 {
      %cst_10 = arith.constant 0.000000e+00 : f32
      %12 = vector.broadcast %cst_10 : f32 to vector<256x128xf32>
      %c0_11 = arith.constant 0 : index
      %c0_12 = arith.constant 0 : index
      %13 = vector.load %arg8[%c0_11, %c0_12] : memref<256x128xf32, #tpu.memory_space<vmem>>, vector<256x128xf32>
      tpu.vector_store %arg8[%c0_11, %c0_12], %12 {strides = array<i32>} : memref<256x128xf32, #tpu.memory_space<vmem>>, vector<256x128xf32>,
    } else {
    }
    %c0 = arith.constant 0 : index
    %c0_1 = arith.constant 0 : index
    %3 = vector.load %arg8[%c0, %c0_1] : memref<256x128xf32, #tpu.memory_space<vmem>>, vector<256x128xf32>
    %c0_2 = arith.constant 0 : index
    %c0_3 = arith.constant 0 : index
    %4 = vector.load %arg3[%c0_2, %c0_3] : memref<256x160xbf16, #tpu.memory_space<vmem>>, vector<256x160xbf16>
    %c0_4 = arith.constant 0 : index
    %c0_5 = arith.constant 0 : index
    %5 = vector.load %arg4[%c0_4, %c0_5] : memref<160x128xbf16, #tpu.memory_space<vmem>>, vector<160x128xbf16>
    %cst = arith.constant dense<0.000000e+00> : vector<256x128xf32>
    %6 = tpu.matmul %4, %5, %cst {dimension_numbers = #tpu.dot_dimension_numbers<[1], [0], [0], [1], [0, 0, 1, 1], [], []>} : vector<256x160xbf16>, vector<160x128xbf16>, vector<256x128xf32> -> vector<256x128xf32>
    %7 = arith.addf %3, %6 : vector<256x128xf32>
    %c0_6 = arith.constant 0 : index
    %c0_7 = arith.constant 0 : index
    %8 = vector.load %arg8[%c0_6, %c0_7] : memref<256x128xf32, #tpu.memory_space<vmem>>, vector<256x128xf32>
    tpu.vector_store %arg8[%c0_6, %c0_7], %7 {strides = array<i32>} : memref<256x128xf32, #tpu.memory_space<vmem>>, vector<256x128xf32>,
    %c0_i32_8 = arith.constant 0 : i32
    %9 = arith.cmpi eq, %arg2, %c0_i32_8 : i32
    %10 = arith.extui %9 : i1 to i32
    %c0_i32_9 = arith.constant 0 : i32
    %11 = arith.cmpi ne, %10, %c0_i32_9 : i32
    scf.if %11 {
      %c0_10 = arith.constant 0 : index
      %c0_11 = arith.constant 0 : index
      %12 = vector.load %arg8[%c0_10, %c0_11] : memref<256x128xf32, #tpu.memory_space<vmem>>, vector<256x128xf32>
      %c0_12 = arith.constant 0 : index
      %c0_13 = arith.constant 0 : index
      %13 = vector.load %arg5[%c0_12, %c0_13] : memref<1x128xf32, #tpu.memory_space<vmem>>, vector<1x128xf32>
      %14 = vector.broadcast %13 : vector<1x128xf32> to vector<256x128xf32>
      %15 = arith.mulf %12, %14 : vector<256x128xf32>
      %c0_14 = arith.constant 0 : index
      %c0_15 = arith.constant 0 : index
      %16 = vector.load %arg6[%c0_14, %c0_15] : memref<1x128xf32, #tpu.memory_space<vmem>>, vector<1x128xf32>
      %17 = vector.broadcast %16 : vector<1x128xf32> to vector<256x128xf32>
      %18 = arith.addf %15, %17 : vector<256x128xf32>
      %cst_16 = arith.constant 0.000000e+00 : f32
      %19 = vector.broadcast %cst_16 : f32 to vector<256x128xf32>
      %20 = arith.maximumf %18, %19 : vector<256x128xf32>
      %21 = arith.truncf %20 : vector<256x128xf32> to vector<256x128xbf16>
      %c0_17 = arith.constant 0 : index
      %c0_18 = arith.constant 0 : index
      %22 = vector.load %arg7[%c0_17, %c0_18] : memref<256x128xbf16, #tpu.memory_space<vmem>>, vector<256x128xbf16>
      tpu.vector_store %arg7[%c0_17, %c0_18], %21 {strides = array<i32>} : memref<256x128xbf16, #tpu.memory_space<vmem>>, vector<256x128xbf16>,
    } else {
    }
    return
  }
  func.func @transform_0(%arg0: i32, %arg1: i32, %arg2: i32) -> (i32, i32) {
    %c0_i32 = arith.constant 0 : i32
    return %arg0, %arg2 : i32, i32
  }
  func.func @transform_1(%arg0: i32, %arg1: i32, %arg2: i32) -> (i32, i32) {
    %c0_i32 = arith.constant 0 : i32
    return %arg2, %arg1 : i32, i32
  }
  func.func @transform_2(%arg0: i32, %arg1: i32, %arg2: i32) -> (i32, i32) {
    %c0_i32 = arith.constant 0 : i32
    %c0_i32_0 = arith.constant 0 : i32
    return %c0_i32, %arg1 : i32, i32
  }
  func.func @transform_3(%arg0: i32, %arg1: i32, %arg2: i32) -> (i32, i32) {
    %c0_i32 = arith.constant 0 : i32
    %c0_i32_0 = arith.constant 0 : i32
    return %c0_i32, %arg1 : i32, i32
  }
  func.func @transform_4(%arg0: i32, %arg1: i32, %arg2: i32) -> (i32, i32) {
    %c0_i32 = arith.constant 0 : i32
    return %arg0, %arg1 : i32, i32
  }
}

module attributes {stable_mosaic.version = 11 : i64} {
  func.func @_maxpool_kernel(%arg0: i32, %arg1: memref<9x128x64xbf16, #tpu.memory_space<vmem>>, %arg2: memref<128x64xbf16, #tpu.memory_space<vmem>>) attributes {dimension_semantics = [#tpu.dimension_semantics<parallel>], iteration_bounds = array<i64: 1>, scalar_prefetch = 0 : i64, scratch_operands = 0 : i64, tpu.core_type = #tpu.core_type<tc>, window_params = [{transform_indices = @transform_0, window_bounds = array<i64: 9, 128, 64>}, {transform_indices = @transform_1, window_bounds = array<i64: 128, 64>}]} {
    %c0 = arith.constant 0 : index
    %c0_0 = arith.constant 0 : index
    %c0_1 = arith.constant 0 : index
    %0 = vector.load %arg1[%c0, %c0_0, %c0_1] : memref<9x128x64xbf16, #tpu.memory_space<vmem>>, vector<1x128x64xbf16>
    %1 = vector.shape_cast %0 : vector<1x128x64xbf16> to vector<128x64xbf16>
    %c1 = arith.constant 1 : index
    %c0_2 = arith.constant 0 : index
    %c0_3 = arith.constant 0 : index
    %2 = vector.load %arg1[%c1, %c0_2, %c0_3] : memref<9x128x64xbf16, #tpu.memory_space<vmem>>, vector<1x128x64xbf16>
    %3 = vector.shape_cast %2 : vector<1x128x64xbf16> to vector<128x64xbf16>
    %4 = arith.maximumf %1, %3 : vector<128x64xbf16>
    %c2 = arith.constant 2 : index
    %c0_4 = arith.constant 0 : index
    %c0_5 = arith.constant 0 : index
    %5 = vector.load %arg1[%c2, %c0_4, %c0_5] : memref<9x128x64xbf16, #tpu.memory_space<vmem>>, vector<1x128x64xbf16>
    %6 = vector.shape_cast %5 : vector<1x128x64xbf16> to vector<128x64xbf16>
    %7 = arith.maximumf %4, %6 : vector<128x64xbf16>
    %c3 = arith.constant 3 : index
    %c0_6 = arith.constant 0 : index
    %c0_7 = arith.constant 0 : index
    %8 = vector.load %arg1[%c3, %c0_6, %c0_7] : memref<9x128x64xbf16, #tpu.memory_space<vmem>>, vector<1x128x64xbf16>
    %9 = vector.shape_cast %8 : vector<1x128x64xbf16> to vector<128x64xbf16>
    %10 = arith.maximumf %7, %9 : vector<128x64xbf16>
    %c4 = arith.constant 4 : index
    %c0_8 = arith.constant 0 : index
    %c0_9 = arith.constant 0 : index
    %11 = vector.load %arg1[%c4, %c0_8, %c0_9] : memref<9x128x64xbf16, #tpu.memory_space<vmem>>, vector<1x128x64xbf16>
    %12 = vector.shape_cast %11 : vector<1x128x64xbf16> to vector<128x64xbf16>
    %13 = arith.maximumf %10, %12 : vector<128x64xbf16>
    %c5 = arith.constant 5 : index
    %c0_10 = arith.constant 0 : index
    %c0_11 = arith.constant 0 : index
    %14 = vector.load %arg1[%c5, %c0_10, %c0_11] : memref<9x128x64xbf16, #tpu.memory_space<vmem>>, vector<1x128x64xbf16>
    %15 = vector.shape_cast %14 : vector<1x128x64xbf16> to vector<128x64xbf16>
    %16 = arith.maximumf %13, %15 : vector<128x64xbf16>
    %c6 = arith.constant 6 : index
    %c0_12 = arith.constant 0 : index
    %c0_13 = arith.constant 0 : index
    %17 = vector.load %arg1[%c6, %c0_12, %c0_13] : memref<9x128x64xbf16, #tpu.memory_space<vmem>>, vector<1x128x64xbf16>
    %18 = vector.shape_cast %17 : vector<1x128x64xbf16> to vector<128x64xbf16>
    %19 = arith.maximumf %16, %18 : vector<128x64xbf16>
    %c7 = arith.constant 7 : index
    %c0_14 = arith.constant 0 : index
    %c0_15 = arith.constant 0 : index
    %20 = vector.load %arg1[%c7, %c0_14, %c0_15] : memref<9x128x64xbf16, #tpu.memory_space<vmem>>, vector<1x128x64xbf16>
    %21 = vector.shape_cast %20 : vector<1x128x64xbf16> to vector<128x64xbf16>
    %22 = arith.maximumf %19, %21 : vector<128x64xbf16>
    %c8 = arith.constant 8 : index
    %c0_16 = arith.constant 0 : index
    %c0_17 = arith.constant 0 : index
    %23 = vector.load %arg1[%c8, %c0_16, %c0_17] : memref<9x128x64xbf16, #tpu.memory_space<vmem>>, vector<1x128x64xbf16>
    %24 = vector.shape_cast %23 : vector<1x128x64xbf16> to vector<128x64xbf16>
    %25 = arith.maximumf %22, %24 : vector<128x64xbf16>
    %c0_18 = arith.constant 0 : index
    %c0_19 = arith.constant 0 : index
    %26 = vector.load %arg2[%c0_18, %c0_19] : memref<128x64xbf16, #tpu.memory_space<vmem>>, vector<128x64xbf16>
    tpu.vector_store %arg2[%c0_18, %c0_19], %25 {strides = array<i32>} : memref<128x64xbf16, #tpu.memory_space<vmem>>, vector<128x64xbf16>,
    return
  }
  func.func @transform_0(%arg0: i32) -> (i32, i32, i32) {
    %c0_i32 = arith.constant 0 : i32
    %c0_i32_0 = arith.constant 0 : i32
    %c0_i32_1 = arith.constant 0 : i32
    return %c0_i32, %arg0, %c0_i32_0 : i32, i32, i32
  }
  func.func @transform_1(%arg0: i32) -> (i32, i32) {
    %c0_i32 = arith.constant 0 : i32
    %c0_i32_0 = arith.constant 0 : i32
    return %arg0, %c0_i32 : i32, i32
  }
}

module attributes {stable_mosaic.version = 11 : i64} {
  func.func @_gemm_bn_kernel(%arg0: i32, %arg1: i32, %arg2: i32, %arg3: memref<128x576xbf16, #tpu.memory_space<vmem>>, %arg4: memref<576x128xbf16, #tpu.memory_space<vmem>>, %arg5: memref<1x128xf32, #tpu.memory_space<vmem>>, %arg6: memref<1x128xf32, #tpu.memory_space<vmem>>, %arg7: memref<128x128xbf16, #tpu.memory_space<vmem>>, %arg8: memref<128x128xf32, #tpu.memory_space<vmem>>) attributes {dimension_semantics = [#tpu.dimension_semantics<parallel>, #tpu.dimension_semantics<parallel>, #tpu.dimension_semantics<arbitrary>], iteration_bounds = array<i64: 1, 1, 1>, scalar_prefetch = 0 : i64, scratch_operands = 1 : i64, tpu.core_type = #tpu.core_type<tc>, window_params = [{transform_indices = @transform_0, window_bounds = array<i64: 128, 576>}, {transform_indices = @transform_1, window_bounds = array<i64: 576, 128>}, {transform_indices = @transform_2, window_bounds = array<i64: 1, 128>}, {transform_indices = @transform_3, window_bounds = array<i64: 1, 128>}, {transform_indices = @transform_4, window_bounds = array<i64: 128, 128>}]} {
    %c0_i32 = arith.constant 0 : i32
    %0 = arith.cmpi eq, %arg2, %c0_i32 : i32
    %1 = arith.extui %0 : i1 to i32
    %c0_i32_0 = arith.constant 0 : i32
    %2 = arith.cmpi ne, %1, %c0_i32_0 : i32
    scf.if %2 {
      %cst_10 = arith.constant 0.000000e+00 : f32
      %12 = vector.broadcast %cst_10 : f32 to vector<128x128xf32>
      %c0_11 = arith.constant 0 : index
      %c0_12 = arith.constant 0 : index
      %13 = vector.load %arg8[%c0_11, %c0_12] : memref<128x128xf32, #tpu.memory_space<vmem>>, vector<128x128xf32>
      tpu.vector_store %arg8[%c0_11, %c0_12], %12 {strides = array<i32>} : memref<128x128xf32, #tpu.memory_space<vmem>>, vector<128x128xf32>,
    } else {
    }
    %c0 = arith.constant 0 : index
    %c0_1 = arith.constant 0 : index
    %3 = vector.load %arg8[%c0, %c0_1] : memref<128x128xf32, #tpu.memory_space<vmem>>, vector<128x128xf32>
    %c0_2 = arith.constant 0 : index
    %c0_3 = arith.constant 0 : index
    %4 = vector.load %arg3[%c0_2, %c0_3] : memref<128x576xbf16, #tpu.memory_space<vmem>>, vector<128x576xbf16>
    %c0_4 = arith.constant 0 : index
    %c0_5 = arith.constant 0 : index
    %5 = vector.load %arg4[%c0_4, %c0_5] : memref<576x128xbf16, #tpu.memory_space<vmem>>, vector<576x128xbf16>
    %cst = arith.constant dense<0.000000e+00> : vector<128x128xf32>
    %6 = tpu.matmul %4, %5, %cst {dimension_numbers = #tpu.dot_dimension_numbers<[1], [0], [0], [1], [0, 0, 1, 1], [], []>} : vector<128x576xbf16>, vector<576x128xbf16>, vector<128x128xf32> -> vector<128x128xf32>
    %7 = arith.addf %3, %6 : vector<128x128xf32>
    %c0_6 = arith.constant 0 : index
    %c0_7 = arith.constant 0 : index
    %8 = vector.load %arg8[%c0_6, %c0_7] : memref<128x128xf32, #tpu.memory_space<vmem>>, vector<128x128xf32>
    tpu.vector_store %arg8[%c0_6, %c0_7], %7 {strides = array<i32>} : memref<128x128xf32, #tpu.memory_space<vmem>>, vector<128x128xf32>,
    %c0_i32_8 = arith.constant 0 : i32
    %9 = arith.cmpi eq, %arg2, %c0_i32_8 : i32
    %10 = arith.extui %9 : i1 to i32
    %c0_i32_9 = arith.constant 0 : i32
    %11 = arith.cmpi ne, %10, %c0_i32_9 : i32
    scf.if %11 {
      %c0_10 = arith.constant 0 : index
      %c0_11 = arith.constant 0 : index
      %12 = vector.load %arg8[%c0_10, %c0_11] : memref<128x128xf32, #tpu.memory_space<vmem>>, vector<128x128xf32>
      %c0_12 = arith.constant 0 : index
      %c0_13 = arith.constant 0 : index
      %13 = vector.load %arg5[%c0_12, %c0_13] : memref<1x128xf32, #tpu.memory_space<vmem>>, vector<1x128xf32>
      %14 = vector.broadcast %13 : vector<1x128xf32> to vector<128x128xf32>
      %15 = arith.mulf %12, %14 : vector<128x128xf32>
      %c0_14 = arith.constant 0 : index
      %c0_15 = arith.constant 0 : index
      %16 = vector.load %arg6[%c0_14, %c0_15] : memref<1x128xf32, #tpu.memory_space<vmem>>, vector<1x128xf32>
      %17 = vector.broadcast %16 : vector<1x128xf32> to vector<128x128xf32>
      %18 = arith.addf %15, %17 : vector<128x128xf32>
      %cst_16 = arith.constant 0.000000e+00 : f32
      %19 = vector.broadcast %cst_16 : f32 to vector<128x128xf32>
      %20 = arith.maximumf %18, %19 : vector<128x128xf32>
      %21 = arith.truncf %20 : vector<128x128xf32> to vector<128x128xbf16>
      %c0_17 = arith.constant 0 : index
      %c0_18 = arith.constant 0 : index
      %22 = vector.load %arg7[%c0_17, %c0_18] : memref<128x128xbf16, #tpu.memory_space<vmem>>, vector<128x128xbf16>
      tpu.vector_store %arg7[%c0_17, %c0_18], %21 {strides = array<i32>} : memref<128x128xbf16, #tpu.memory_space<vmem>>, vector<128x128xbf16>,
    } else {
    }
    return
  }
  func.func @transform_0(%arg0: i32, %arg1: i32, %arg2: i32) -> (i32, i32) {
    %c0_i32 = arith.constant 0 : i32
    return %arg0, %arg2 : i32, i32
  }
  func.func @transform_1(%arg0: i32, %arg1: i32, %arg2: i32) -> (i32, i32) {
    %c0_i32 = arith.constant 0 : i32
    return %arg2, %arg1 : i32, i32
  }
  func.func @transform_2(%arg0: i32, %arg1: i32, %arg2: i32) -> (i32, i32) {
    %c0_i32 = arith.constant 0 : i32
    %c0_i32_0 = arith.constant 0 : i32
    return %c0_i32, %arg1 : i32, i32
  }
  func.func @transform_3(%arg0: i32, %arg1: i32, %arg2: i32) -> (i32, i32) {
    %c0_i32 = arith.constant 0 : i32
    %c0_i32_0 = arith.constant 0 : i32
    return %c0_i32, %arg1 : i32, i32
  }
  func.func @transform_4(%arg0: i32, %arg1: i32, %arg2: i32) -> (i32, i32) {
    %c0_i32 = arith.constant 0 : i32
    return %arg0, %arg1 : i32, i32
  }
}

module attributes {stable_mosaic.version = 11 : i64} {
  func.func @_gemm_bn_res_kernel(%arg0: i32, %arg1: i32, %arg2: i32, %arg3: memref<128x576xbf16, #tpu.memory_space<vmem>>, %arg4: memref<576x128xbf16, #tpu.memory_space<vmem>>, %arg5: memref<1x128xf32, #tpu.memory_space<vmem>>, %arg6: memref<1x128xf32, #tpu.memory_space<vmem>>, %arg7: memref<128x128xbf16, #tpu.memory_space<vmem>>, %arg8: memref<128x128xbf16, #tpu.memory_space<vmem>>, %arg9: memref<128x128xf32, #tpu.memory_space<vmem>>) attributes {dimension_semantics = [#tpu.dimension_semantics<parallel>, #tpu.dimension_semantics<parallel>, #tpu.dimension_semantics<arbitrary>], iteration_bounds = array<i64: 1, 1, 1>, scalar_prefetch = 0 : i64, scratch_operands = 1 : i64, tpu.core_type = #tpu.core_type<tc>, window_params = [{transform_indices = @transform_0, window_bounds = array<i64: 128, 576>}, {transform_indices = @transform_1, window_bounds = array<i64: 576, 128>}, {transform_indices = @transform_2, window_bounds = array<i64: 1, 128>}, {transform_indices = @transform_3, window_bounds = array<i64: 1, 128>}, {transform_indices = @transform_4, window_bounds = array<i64: 128, 128>}, {transform_indices = @transform_5, window_bounds = array<i64: 128, 128>}]} {
    %c0_i32 = arith.constant 0 : i32
    %0 = arith.cmpi eq, %arg2, %c0_i32 : i32
    %1 = arith.extui %0 : i1 to i32
    %c0_i32_0 = arith.constant 0 : i32
    %2 = arith.cmpi ne, %1, %c0_i32_0 : i32
    scf.if %2 {
      %cst_10 = arith.constant 0.000000e+00 : f32
      %12 = vector.broadcast %cst_10 : f32 to vector<128x128xf32>
      %c0_11 = arith.constant 0 : index
      %c0_12 = arith.constant 0 : index
      %13 = vector.load %arg9[%c0_11, %c0_12] : memref<128x128xf32, #tpu.memory_space<vmem>>, vector<128x128xf32>
      tpu.vector_store %arg9[%c0_11, %c0_12], %12 {strides = array<i32>} : memref<128x128xf32, #tpu.memory_space<vmem>>, vector<128x128xf32>,
    } else {
    }
    %c0 = arith.constant 0 : index
    %c0_1 = arith.constant 0 : index
    %3 = vector.load %arg9[%c0, %c0_1] : memref<128x128xf32, #tpu.memory_space<vmem>>, vector<128x128xf32>
    %c0_2 = arith.constant 0 : index
    %c0_3 = arith.constant 0 : index
    %4 = vector.load %arg3[%c0_2, %c0_3] : memref<128x576xbf16, #tpu.memory_space<vmem>>, vector<128x576xbf16>
    %c0_4 = arith.constant 0 : index
    %c0_5 = arith.constant 0 : index
    %5 = vector.load %arg4[%c0_4, %c0_5] : memref<576x128xbf16, #tpu.memory_space<vmem>>, vector<576x128xbf16>
    %cst = arith.constant dense<0.000000e+00> : vector<128x128xf32>
    %6 = tpu.matmul %4, %5, %cst {dimension_numbers = #tpu.dot_dimension_numbers<[1], [0], [0], [1], [0, 0, 1, 1], [], []>} : vector<128x576xbf16>, vector<576x128xbf16>, vector<128x128xf32> -> vector<128x128xf32>
    %7 = arith.addf %3, %6 : vector<128x128xf32>
    %c0_6 = arith.constant 0 : index
    %c0_7 = arith.constant 0 : index
    %8 = vector.load %arg9[%c0_6, %c0_7] : memref<128x128xf32, #tpu.memory_space<vmem>>, vector<128x128xf32>
    tpu.vector_store %arg9[%c0_6, %c0_7], %7 {strides = array<i32>} : memref<128x128xf32, #tpu.memory_space<vmem>>, vector<128x128xf32>,
    %c0_i32_8 = arith.constant 0 : i32
    %9 = arith.cmpi eq, %arg2, %c0_i32_8 : i32
    %10 = arith.extui %9 : i1 to i32
    %c0_i32_9 = arith.constant 0 : i32
    %11 = arith.cmpi ne, %10, %c0_i32_9 : i32
    scf.if %11 {
      %c0_10 = arith.constant 0 : index
      %c0_11 = arith.constant 0 : index
      %12 = vector.load %arg9[%c0_10, %c0_11] : memref<128x128xf32, #tpu.memory_space<vmem>>, vector<128x128xf32>
      %c0_12 = arith.constant 0 : index
      %c0_13 = arith.constant 0 : index
      %13 = vector.load %arg5[%c0_12, %c0_13] : memref<1x128xf32, #tpu.memory_space<vmem>>, vector<1x128xf32>
      %14 = vector.broadcast %13 : vector<1x128xf32> to vector<128x128xf32>
      %15 = arith.mulf %12, %14 : vector<128x128xf32>
      %c0_14 = arith.constant 0 : index
      %c0_15 = arith.constant 0 : index
      %16 = vector.load %arg6[%c0_14, %c0_15] : memref<1x128xf32, #tpu.memory_space<vmem>>, vector<1x128xf32>
      %17 = vector.broadcast %16 : vector<1x128xf32> to vector<128x128xf32>
      %18 = arith.addf %15, %17 : vector<128x128xf32>
      %c0_16 = arith.constant 0 : index
      %c0_17 = arith.constant 0 : index
      %19 = vector.load %arg7[%c0_16, %c0_17] : memref<128x128xbf16, #tpu.memory_space<vmem>>, vector<128x128xbf16>
      %20 = arith.extf %19 : vector<128x128xbf16> to vector<128x128xf32>
      %21 = arith.addf %18, %20 : vector<128x128xf32>
      %cst_18 = arith.constant 0.000000e+00 : f32
      %22 = vector.broadcast %cst_18 : f32 to vector<128x128xf32>
      %23 = arith.maximumf %21, %22 : vector<128x128xf32>
      %24 = arith.truncf %23 : vector<128x128xf32> to vector<128x128xbf16>
      %c0_19 = arith.constant 0 : index
      %c0_20 = arith.constant 0 : index
      %25 = vector.load %arg8[%c0_19, %c0_20] : memref<128x128xbf16, #tpu.memory_space<vmem>>, vector<128x128xbf16>
      tpu.vector_store %arg8[%c0_19, %c0_20], %24 {strides = array<i32>} : memref<128x128xbf16, #tpu.memory_space<vmem>>, vector<128x128xbf16>,
    } else {
    }
    return
  }
  func.func @transform_0(%arg0: i32, %arg1: i32, %arg2: i32) -> (i32, i32) {
    %c0_i32 = arith.constant 0 : i32
    return %arg0, %arg2 : i32, i32
  }
  func.func @transform_1(%arg0: i32, %arg1: i32, %arg2: i32) -> (i32, i32) {
    %c0_i32 = arith.constant 0 : i32
    return %arg2, %arg1 : i32, i32
  }
  func.func @transform_2(%arg0: i32, %arg1: i32, %arg2: i32) -> (i32, i32) {
    %c0_i32 = arith.constant 0 : i32
    %c0_i32_0 = arith.constant 0 : i32
    return %c0_i32, %arg1 : i32, i32
  }
  func.func @transform_3(%arg0: i32, %arg1: i32, %arg2: i32) -> (i32, i32) {
    %c0_i32 = arith.constant 0 : i32
    %c0_i32_0 = arith.constant 0 : i32
    return %c0_i32, %arg1 : i32, i32
  }
  func.func @transform_4(%arg0: i32, %arg1: i32, %arg2: i32) -> (i32, i32) {
    %c0_i32 = arith.constant 0 : i32
    return %arg0, %arg1 : i32, i32
  }
  func.func @transform_5(%arg0: i32, %arg1: i32, %arg2: i32) -> (i32, i32) {
    %c0_i32 = arith.constant 0 : i32
    return %arg0, %arg1 : i32, i32
  }
}

module attributes {stable_mosaic.version = 11 : i64} {
  func.func @_gemm_bn_kernel(%arg0: i32, %arg1: i32, %arg2: i32, %arg3: memref<32x576xbf16, #tpu.memory_space<vmem>>, %arg4: memref<576x128xbf16, #tpu.memory_space<vmem>>, %arg5: memref<1x128xf32, #tpu.memory_space<vmem>>, %arg6: memref<1x128xf32, #tpu.memory_space<vmem>>, %arg7: memref<32x128xbf16, #tpu.memory_space<vmem>>, %arg8: memref<32x128xf32, #tpu.memory_space<vmem>>) attributes {dimension_semantics = [#tpu.dimension_semantics<parallel>, #tpu.dimension_semantics<parallel>, #tpu.dimension_semantics<arbitrary>], iteration_bounds = array<i64: 1, 1, 1>, scalar_prefetch = 0 : i64, scratch_operands = 1 : i64, tpu.core_type = #tpu.core_type<tc>, window_params = [{transform_indices = @transform_0, window_bounds = array<i64: 32, 576>}, {transform_indices = @transform_1, window_bounds = array<i64: 576, 128>}, {transform_indices = @transform_2, window_bounds = array<i64: 1, 128>}, {transform_indices = @transform_3, window_bounds = array<i64: 1, 128>}, {transform_indices = @transform_4, window_bounds = array<i64: 32, 128>}]} {
    %c0_i32 = arith.constant 0 : i32
    %0 = arith.cmpi eq, %arg2, %c0_i32 : i32
    %1 = arith.extui %0 : i1 to i32
    %c0_i32_0 = arith.constant 0 : i32
    %2 = arith.cmpi ne, %1, %c0_i32_0 : i32
    scf.if %2 {
      %cst_10 = arith.constant 0.000000e+00 : f32
      %12 = vector.broadcast %cst_10 : f32 to vector<32x128xf32>
      %c0_11 = arith.constant 0 : index
      %c0_12 = arith.constant 0 : index
      %13 = vector.load %arg8[%c0_11, %c0_12] : memref<32x128xf32, #tpu.memory_space<vmem>>, vector<32x128xf32>
      tpu.vector_store %arg8[%c0_11, %c0_12], %12 {strides = array<i32>} : memref<32x128xf32, #tpu.memory_space<vmem>>, vector<32x128xf32>,
    } else {
    }
    %c0 = arith.constant 0 : index
    %c0_1 = arith.constant 0 : index
    %3 = vector.load %arg8[%c0, %c0_1] : memref<32x128xf32, #tpu.memory_space<vmem>>, vector<32x128xf32>
    %c0_2 = arith.constant 0 : index
    %c0_3 = arith.constant 0 : index
    %4 = vector.load %arg3[%c0_2, %c0_3] : memref<32x576xbf16, #tpu.memory_space<vmem>>, vector<32x576xbf16>
    %c0_4 = arith.constant 0 : index
    %c0_5 = arith.constant 0 : index
    %5 = vector.load %arg4[%c0_4, %c0_5] : memref<576x128xbf16, #tpu.memory_space<vmem>>, vector<576x128xbf16>
    %cst = arith.constant dense<0.000000e+00> : vector<32x128xf32>
    %6 = tpu.matmul %4, %5, %cst {dimension_numbers = #tpu.dot_dimension_numbers<[1], [0], [0], [1], [0, 0, 1, 1], [], []>} : vector<32x576xbf16>, vector<576x128xbf16>, vector<32x128xf32> -> vector<32x128xf32>
    %7 = arith.addf %3, %6 : vector<32x128xf32>
    %c0_6 = arith.constant 0 : index
    %c0_7 = arith.constant 0 : index
    %8 = vector.load %arg8[%c0_6, %c0_7] : memref<32x128xf32, #tpu.memory_space<vmem>>, vector<32x128xf32>
    tpu.vector_store %arg8[%c0_6, %c0_7], %7 {strides = array<i32>} : memref<32x128xf32, #tpu.memory_space<vmem>>, vector<32x128xf32>,
    %c0_i32_8 = arith.constant 0 : i32
    %9 = arith.cmpi eq, %arg2, %c0_i32_8 : i32
    %10 = arith.extui %9 : i1 to i32
    %c0_i32_9 = arith.constant 0 : i32
    %11 = arith.cmpi ne, %10, %c0_i32_9 : i32
    scf.if %11 {
      %c0_10 = arith.constant 0 : index
      %c0_11 = arith.constant 0 : index
      %12 = vector.load %arg8[%c0_10, %c0_11] : memref<32x128xf32, #tpu.memory_space<vmem>>, vector<32x128xf32>
      %c0_12 = arith.constant 0 : index
      %c0_13 = arith.constant 0 : index
      %13 = vector.load %arg5[%c0_12, %c0_13] : memref<1x128xf32, #tpu.memory_space<vmem>>, vector<1x128xf32>
      %14 = vector.broadcast %13 : vector<1x128xf32> to vector<32x128xf32>
      %15 = arith.mulf %12, %14 : vector<32x128xf32>
      %c0_14 = arith.constant 0 : index
      %c0_15 = arith.constant 0 : index
      %16 = vector.load %arg6[%c0_14, %c0_15] : memref<1x128xf32, #tpu.memory_space<vmem>>, vector<1x128xf32>
      %17 = vector.broadcast %16 : vector<1x128xf32> to vector<32x128xf32>
      %18 = arith.addf %15, %17 : vector<32x128xf32>
      %cst_16 = arith.constant 0.000000e+00 : f32
      %19 = vector.broadcast %cst_16 : f32 to vector<32x128xf32>
      %20 = arith.maximumf %18, %19 : vector<32x128xf32>
      %21 = arith.truncf %20 : vector<32x128xf32> to vector<32x128xbf16>
      %c0_17 = arith.constant 0 : index
      %c0_18 = arith.constant 0 : index
      %22 = vector.load %arg7[%c0_17, %c0_18] : memref<32x128xbf16, #tpu.memory_space<vmem>>, vector<32x128xbf16>
      tpu.vector_store %arg7[%c0_17, %c0_18], %21 {strides = array<i32>} : memref<32x128xbf16, #tpu.memory_space<vmem>>, vector<32x128xbf16>,
    } else {
    }
    return
  }
  func.func @transform_0(%arg0: i32, %arg1: i32, %arg2: i32) -> (i32, i32) {
    %c0_i32 = arith.constant 0 : i32
    return %arg0, %arg2 : i32, i32
  }
  func.func @transform_1(%arg0: i32, %arg1: i32, %arg2: i32) -> (i32, i32) {
    %c0_i32 = arith.constant 0 : i32
    return %arg2, %arg1 : i32, i32
  }
  func.func @transform_2(%arg0: i32, %arg1: i32, %arg2: i32) -> (i32, i32) {
    %c0_i32 = arith.constant 0 : i32
    %c0_i32_0 = arith.constant 0 : i32
    return %c0_i32, %arg1 : i32, i32
  }
  func.func @transform_3(%arg0: i32, %arg1: i32, %arg2: i32) -> (i32, i32) {
    %c0_i32 = arith.constant 0 : i32
    %c0_i32_0 = arith.constant 0 : i32
    return %c0_i32, %arg1 : i32, i32
  }
  func.func @transform_4(%arg0: i32, %arg1: i32, %arg2: i32) -> (i32, i32) {
    %c0_i32 = arith.constant 0 : i32
    return %arg0, %arg1 : i32, i32
  }
}

module attributes {stable_mosaic.version = 11 : i64} {
  func.func @_gemm_bn_kernel(%arg0: i32, %arg1: i32, %arg2: i32, %arg3: memref<32x64xbf16, #tpu.memory_space<vmem>>, %arg4: memref<64x128xbf16, #tpu.memory_space<vmem>>, %arg5: memref<1x128xf32, #tpu.memory_space<vmem>>, %arg6: memref<1x128xf32, #tpu.memory_space<vmem>>, %arg7: memref<32x128xbf16, #tpu.memory_space<vmem>>, %arg8: memref<32x128xf32, #tpu.memory_space<vmem>>) attributes {dimension_semantics = [#tpu.dimension_semantics<parallel>, #tpu.dimension_semantics<parallel>, #tpu.dimension_semantics<arbitrary>], iteration_bounds = array<i64: 1, 1, 1>, scalar_prefetch = 0 : i64, scratch_operands = 1 : i64, tpu.core_type = #tpu.core_type<tc>, window_params = [{transform_indices = @transform_0, window_bounds = array<i64: 32, 64>}, {transform_indices = @transform_1, window_bounds = array<i64: 64, 128>}, {transform_indices = @transform_2, window_bounds = array<i64: 1, 128>}, {transform_indices = @transform_3, window_bounds = array<i64: 1, 128>}, {transform_indices = @transform_4, window_bounds = array<i64: 32, 128>}]} {
    %c0_i32 = arith.constant 0 : i32
    %0 = arith.cmpi eq, %arg2, %c0_i32 : i32
    %1 = arith.extui %0 : i1 to i32
    %c0_i32_0 = arith.constant 0 : i32
    %2 = arith.cmpi ne, %1, %c0_i32_0 : i32
    scf.if %2 {
      %cst_10 = arith.constant 0.000000e+00 : f32
      %12 = vector.broadcast %cst_10 : f32 to vector<32x128xf32>
      %c0_11 = arith.constant 0 : index
      %c0_12 = arith.constant 0 : index
      %13 = vector.load %arg8[%c0_11, %c0_12] : memref<32x128xf32, #tpu.memory_space<vmem>>, vector<32x128xf32>
      tpu.vector_store %arg8[%c0_11, %c0_12], %12 {strides = array<i32>} : memref<32x128xf32, #tpu.memory_space<vmem>>, vector<32x128xf32>,
    } else {
    }
    %c0 = arith.constant 0 : index
    %c0_1 = arith.constant 0 : index
    %3 = vector.load %arg8[%c0, %c0_1] : memref<32x128xf32, #tpu.memory_space<vmem>>, vector<32x128xf32>
    %c0_2 = arith.constant 0 : index
    %c0_3 = arith.constant 0 : index
    %4 = vector.load %arg3[%c0_2, %c0_3] : memref<32x64xbf16, #tpu.memory_space<vmem>>, vector<32x64xbf16>
    %c0_4 = arith.constant 0 : index
    %c0_5 = arith.constant 0 : index
    %5 = vector.load %arg4[%c0_4, %c0_5] : memref<64x128xbf16, #tpu.memory_space<vmem>>, vector<64x128xbf16>
    %cst = arith.constant dense<0.000000e+00> : vector<32x128xf32>
    %6 = tpu.matmul %4, %5, %cst {dimension_numbers = #tpu.dot_dimension_numbers<[1], [0], [0], [1], [0, 0, 1, 1], [], []>} : vector<32x64xbf16>, vector<64x128xbf16>, vector<32x128xf32> -> vector<32x128xf32>
    %7 = arith.addf %3, %6 : vector<32x128xf32>
    %c0_6 = arith.constant 0 : index
    %c0_7 = arith.constant 0 : index
    %8 = vector.load %arg8[%c0_6, %c0_7] : memref<32x128xf32, #tpu.memory_space<vmem>>, vector<32x128xf32>
    tpu.vector_store %arg8[%c0_6, %c0_7], %7 {strides = array<i32>} : memref<32x128xf32, #tpu.memory_space<vmem>>, vector<32x128xf32>,
    %c0_i32_8 = arith.constant 0 : i32
    %9 = arith.cmpi eq, %arg2, %c0_i32_8 : i32
    %10 = arith.extui %9 : i1 to i32
    %c0_i32_9 = arith.constant 0 : i32
    %11 = arith.cmpi ne, %10, %c0_i32_9 : i32
    scf.if %11 {
      %c0_10 = arith.constant 0 : index
      %c0_11 = arith.constant 0 : index
      %12 = vector.load %arg8[%c0_10, %c0_11] : memref<32x128xf32, #tpu.memory_space<vmem>>, vector<32x128xf32>
      %c0_12 = arith.constant 0 : index
      %c0_13 = arith.constant 0 : index
      %13 = vector.load %arg5[%c0_12, %c0_13] : memref<1x128xf32, #tpu.memory_space<vmem>>, vector<1x128xf32>
      %14 = vector.broadcast %13 : vector<1x128xf32> to vector<32x128xf32>
      %15 = arith.mulf %12, %14 : vector<32x128xf32>
      %c0_14 = arith.constant 0 : index
      %c0_15 = arith.constant 0 : index
      %16 = vector.load %arg6[%c0_14, %c0_15] : memref<1x128xf32, #tpu.memory_space<vmem>>, vector<1x128xf32>
      %17 = vector.broadcast %16 : vector<1x128xf32> to vector<32x128xf32>
      %18 = arith.addf %15, %17 : vector<32x128xf32>
      %19 = arith.truncf %18 : vector<32x128xf32> to vector<32x128xbf16>
      %c0_16 = arith.constant 0 : index
      %c0_17 = arith.constant 0 : index
      %20 = vector.load %arg7[%c0_16, %c0_17] : memref<32x128xbf16, #tpu.memory_space<vmem>>, vector<32x128xbf16>
      tpu.vector_store %arg7[%c0_16, %c0_17], %19 {strides = array<i32>} : memref<32x128xbf16, #tpu.memory_space<vmem>>, vector<32x128xbf16>,
    } else {
    }
    return
  }
  func.func @transform_0(%arg0: i32, %arg1: i32, %arg2: i32) -> (i32, i32) {
    %c0_i32 = arith.constant 0 : i32
    return %arg0, %arg2 : i32, i32
  }
  func.func @transform_1(%arg0: i32, %arg1: i32, %arg2: i32) -> (i32, i32) {
    %c0_i32 = arith.constant 0 : i32
    return %arg2, %arg1 : i32, i32
  }
  func.func @transform_2(%arg0: i32, %arg1: i32, %arg2: i32) -> (i32, i32) {
    %c0_i32 = arith.constant 0 : i32
    %c0_i32_0 = arith.constant 0 : i32
    return %c0_i32, %arg1 : i32, i32
  }
  func.func @transform_3(%arg0: i32, %arg1: i32, %arg2: i32) -> (i32, i32) {
    %c0_i32 = arith.constant 0 : i32
    %c0_i32_0 = arith.constant 0 : i32
    return %c0_i32, %arg1 : i32, i32
  }
  func.func @transform_4(%arg0: i32, %arg1: i32, %arg2: i32) -> (i32, i32) {
    %c0_i32 = arith.constant 0 : i32
    return %arg0, %arg1 : i32, i32
  }
}

module attributes {stable_mosaic.version = 11 : i64} {
  func.func @_gemm_bn_kernel(%arg0: i32, %arg1: i32, %arg2: i32, %arg3: memref<32x1152xbf16, #tpu.memory_space<vmem>>, %arg4: memref<1152x128xbf16, #tpu.memory_space<vmem>>, %arg5: memref<1x128xf32, #tpu.memory_space<vmem>>, %arg6: memref<1x128xf32, #tpu.memory_space<vmem>>, %arg7: memref<32x128xbf16, #tpu.memory_space<vmem>>, %arg8: memref<32x128xf32, #tpu.memory_space<vmem>>) attributes {dimension_semantics = [#tpu.dimension_semantics<parallel>, #tpu.dimension_semantics<parallel>, #tpu.dimension_semantics<arbitrary>], iteration_bounds = array<i64: 1, 1, 1>, scalar_prefetch = 0 : i64, scratch_operands = 1 : i64, tpu.core_type = #tpu.core_type<tc>, window_params = [{transform_indices = @transform_0, window_bounds = array<i64: 32, 1152>}, {transform_indices = @transform_1, window_bounds = array<i64: 1152, 128>}, {transform_indices = @transform_2, window_bounds = array<i64: 1, 128>}, {transform_indices = @transform_3, window_bounds = array<i64: 1, 128>}, {transform_indices = @transform_4, window_bounds = array<i64: 32, 128>}]} {
    %c0_i32 = arith.constant 0 : i32
    %0 = arith.cmpi eq, %arg2, %c0_i32 : i32
    %1 = arith.extui %0 : i1 to i32
    %c0_i32_0 = arith.constant 0 : i32
    %2 = arith.cmpi ne, %1, %c0_i32_0 : i32
    scf.if %2 {
      %cst_10 = arith.constant 0.000000e+00 : f32
      %12 = vector.broadcast %cst_10 : f32 to vector<32x128xf32>
      %c0_11 = arith.constant 0 : index
      %c0_12 = arith.constant 0 : index
      %13 = vector.load %arg8[%c0_11, %c0_12] : memref<32x128xf32, #tpu.memory_space<vmem>>, vector<32x128xf32>
      tpu.vector_store %arg8[%c0_11, %c0_12], %12 {strides = array<i32>} : memref<32x128xf32, #tpu.memory_space<vmem>>, vector<32x128xf32>,
    } else {
    }
    %c0 = arith.constant 0 : index
    %c0_1 = arith.constant 0 : index
    %3 = vector.load %arg8[%c0, %c0_1] : memref<32x128xf32, #tpu.memory_space<vmem>>, vector<32x128xf32>
    %c0_2 = arith.constant 0 : index
    %c0_3 = arith.constant 0 : index
    %4 = vector.load %arg3[%c0_2, %c0_3] : memref<32x1152xbf16, #tpu.memory_space<vmem>>, vector<32x1152xbf16>
    %c0_4 = arith.constant 0 : index
    %c0_5 = arith.constant 0 : index
    %5 = vector.load %arg4[%c0_4, %c0_5] : memref<1152x128xbf16, #tpu.memory_space<vmem>>, vector<1152x128xbf16>
    %cst = arith.constant dense<0.000000e+00> : vector<32x128xf32>
    %6 = tpu.matmul %4, %5, %cst {dimension_numbers = #tpu.dot_dimension_numbers<[1], [0], [0], [1], [0, 0, 1, 1], [], []>} : vector<32x1152xbf16>, vector<1152x128xbf16>, vector<32x128xf32> -> vector<32x128xf32>
    %7 = arith.addf %3, %6 : vector<32x128xf32>
    %c0_6 = arith.constant 0 : index
    %c0_7 = arith.constant 0 : index
    %8 = vector.load %arg8[%c0_6, %c0_7] : memref<32x128xf32, #tpu.memory_space<vmem>>, vector<32x128xf32>
    tpu.vector_store %arg8[%c0_6, %c0_7], %7 {strides = array<i32>} : memref<32x128xf32, #tpu.memory_space<vmem>>, vector<32x128xf32>,
    %c0_i32_8 = arith.constant 0 : i32
    %9 = arith.cmpi eq, %arg2, %c0_i32_8 : i32
    %10 = arith.extui %9 : i1 to i32
    %c0_i32_9 = arith.constant 0 : i32
    %11 = arith.cmpi ne, %10, %c0_i32_9 : i32
    scf.if %11 {
      %c0_10 = arith.constant 0 : index
      %c0_11 = arith.constant 0 : index
      %12 = vector.load %arg8[%c0_10, %c0_11] : memref<32x128xf32, #tpu.memory_space<vmem>>, vector<32x128xf32>
      %c0_12 = arith.constant 0 : index
      %c0_13 = arith.constant 0 : index
      %13 = vector.load %arg5[%c0_12, %c0_13] : memref<1x128xf32, #tpu.memory_space<vmem>>, vector<1x128xf32>
      %14 = vector.broadcast %13 : vector<1x128xf32> to vector<32x128xf32>
      %15 = arith.mulf %12, %14 : vector<32x128xf32>
      %c0_14 = arith.constant 0 : index
      %c0_15 = arith.constant 0 : index
      %16 = vector.load %arg6[%c0_14, %c0_15] : memref<1x128xf32, #tpu.memory_space<vmem>>, vector<1x128xf32>
      %17 = vector.broadcast %16 : vector<1x128xf32> to vector<32x128xf32>
      %18 = arith.addf %15, %17 : vector<32x128xf32>
      %cst_16 = arith.constant 0.000000e+00 : f32
      %19 = vector.broadcast %cst_16 : f32 to vector<32x128xf32>
      %20 = arith.maximumf %18, %19 : vector<32x128xf32>
      %21 = arith.truncf %20 : vector<32x128xf32> to vector<32x128xbf16>
      %c0_17 = arith.constant 0 : index
      %c0_18 = arith.constant 0 : index
      %22 = vector.load %arg7[%c0_17, %c0_18] : memref<32x128xbf16, #tpu.memory_space<vmem>>, vector<32x128xbf16>
      tpu.vector_store %arg7[%c0_17, %c0_18], %21 {strides = array<i32>} : memref<32x128xbf16, #tpu.memory_space<vmem>>, vector<32x128xbf16>,
    } else {
    }
    return
  }
  func.func @transform_0(%arg0: i32, %arg1: i32, %arg2: i32) -> (i32, i32) {
    %c0_i32 = arith.constant 0 : i32
    return %arg0, %arg2 : i32, i32
  }
  func.func @transform_1(%arg0: i32, %arg1: i32, %arg2: i32) -> (i32, i32) {
    %c0_i32 = arith.constant 0 : i32
    return %arg2, %arg1 : i32, i32
  }
  func.func @transform_2(%arg0: i32, %arg1: i32, %arg2: i32) -> (i32, i32) {
    %c0_i32 = arith.constant 0 : i32
    %c0_i32_0 = arith.constant 0 : i32
    return %c0_i32, %arg1 : i32, i32
  }
  func.func @transform_3(%arg0: i32, %arg1: i32, %arg2: i32) -> (i32, i32) {
    %c0_i32 = arith.constant 0 : i32
    %c0_i32_0 = arith.constant 0 : i32
    return %c0_i32, %arg1 : i32, i32
  }
  func.func @transform_4(%arg0: i32, %arg1: i32, %arg2: i32) -> (i32, i32) {
    %c0_i32 = arith.constant 0 : i32
    return %arg0, %arg1 : i32, i32
  }
}

module attributes {stable_mosaic.version = 11 : i64} {
  func.func @_gemm_bn_res_kernel(%arg0: i32, %arg1: i32, %arg2: i32, %arg3: memref<32x1152xbf16, #tpu.memory_space<vmem>>, %arg4: memref<1152x128xbf16, #tpu.memory_space<vmem>>, %arg5: memref<1x128xf32, #tpu.memory_space<vmem>>, %arg6: memref<1x128xf32, #tpu.memory_space<vmem>>, %arg7: memref<32x128xbf16, #tpu.memory_space<vmem>>, %arg8: memref<32x128xbf16, #tpu.memory_space<vmem>>, %arg9: memref<32x128xf32, #tpu.memory_space<vmem>>) attributes {dimension_semantics = [#tpu.dimension_semantics<parallel>, #tpu.dimension_semantics<parallel>, #tpu.dimension_semantics<arbitrary>], iteration_bounds = array<i64: 1, 1, 1>, scalar_prefetch = 0 : i64, scratch_operands = 1 : i64, tpu.core_type = #tpu.core_type<tc>, window_params = [{transform_indices = @transform_0, window_bounds = array<i64: 32, 1152>}, {transform_indices = @transform_1, window_bounds = array<i64: 1152, 128>}, {transform_indices = @transform_2, window_bounds = array<i64: 1, 128>}, {transform_indices = @transform_3, window_bounds = array<i64: 1, 128>}, {transform_indices = @transform_4, window_bounds = array<i64: 32, 128>}, {transform_indices = @transform_5, window_bounds = array<i64: 32, 128>}]} {
    %c0_i32 = arith.constant 0 : i32
    %0 = arith.cmpi eq, %arg2, %c0_i32 : i32
    %1 = arith.extui %0 : i1 to i32
    %c0_i32_0 = arith.constant 0 : i32
    %2 = arith.cmpi ne, %1, %c0_i32_0 : i32
    scf.if %2 {
      %cst_10 = arith.constant 0.000000e+00 : f32
      %12 = vector.broadcast %cst_10 : f32 to vector<32x128xf32>
      %c0_11 = arith.constant 0 : index
      %c0_12 = arith.constant 0 : index
      %13 = vector.load %arg9[%c0_11, %c0_12] : memref<32x128xf32, #tpu.memory_space<vmem>>, vector<32x128xf32>
      tpu.vector_store %arg9[%c0_11, %c0_12], %12 {strides = array<i32>} : memref<32x128xf32, #tpu.memory_space<vmem>>, vector<32x128xf32>,
    } else {
    }
    %c0 = arith.constant 0 : index
    %c0_1 = arith.constant 0 : index
    %3 = vector.load %arg9[%c0, %c0_1] : memref<32x128xf32, #tpu.memory_space<vmem>>, vector<32x128xf32>
    %c0_2 = arith.constant 0 : index
    %c0_3 = arith.constant 0 : index
    %4 = vector.load %arg3[%c0_2, %c0_3] : memref<32x1152xbf16, #tpu.memory_space<vmem>>, vector<32x1152xbf16>
    %c0_4 = arith.constant 0 : index
    %c0_5 = arith.constant 0 : index
    %5 = vector.load %arg4[%c0_4, %c0_5] : memref<1152x128xbf16, #tpu.memory_space<vmem>>, vector<1152x128xbf16>
    %cst = arith.constant dense<0.000000e+00> : vector<32x128xf32>
    %6 = tpu.matmul %4, %5, %cst {dimension_numbers = #tpu.dot_dimension_numbers<[1], [0], [0], [1], [0, 0, 1, 1], [], []>} : vector<32x1152xbf16>, vector<1152x128xbf16>, vector<32x128xf32> -> vector<32x128xf32>
    %7 = arith.addf %3, %6 : vector<32x128xf32>
    %c0_6 = arith.constant 0 : index
    %c0_7 = arith.constant 0 : index
    %8 = vector.load %arg9[%c0_6, %c0_7] : memref<32x128xf32, #tpu.memory_space<vmem>>, vector<32x128xf32>
    tpu.vector_store %arg9[%c0_6, %c0_7], %7 {strides = array<i32>} : memref<32x128xf32, #tpu.memory_space<vmem>>, vector<32x128xf32>,
    %c0_i32_8 = arith.constant 0 : i32
    %9 = arith.cmpi eq, %arg2, %c0_i32_8 : i32
    %10 = arith.extui %9 : i1 to i32
    %c0_i32_9 = arith.constant 0 : i32
    %11 = arith.cmpi ne, %10, %c0_i32_9 : i32
    scf.if %11 {
      %c0_10 = arith.constant 0 : index
      %c0_11 = arith.constant 0 : index
      %12 = vector.load %arg9[%c0_10, %c0_11] : memref<32x128xf32, #tpu.memory_space<vmem>>, vector<32x128xf32>
      %c0_12 = arith.constant 0 : index
      %c0_13 = arith.constant 0 : index
      %13 = vector.load %arg5[%c0_12, %c0_13] : memref<1x128xf32, #tpu.memory_space<vmem>>, vector<1x128xf32>
      %14 = vector.broadcast %13 : vector<1x128xf32> to vector<32x128xf32>
      %15 = arith.mulf %12, %14 : vector<32x128xf32>
      %c0_14 = arith.constant 0 : index
      %c0_15 = arith.constant 0 : index
      %16 = vector.load %arg6[%c0_14, %c0_15] : memref<1x128xf32, #tpu.memory_space<vmem>>, vector<1x128xf32>
      %17 = vector.broadcast %16 : vector<1x128xf32> to vector<32x128xf32>
      %18 = arith.addf %15, %17 : vector<32x128xf32>
      %c0_16 = arith.constant 0 : index
      %c0_17 = arith.constant 0 : index
      %19 = vector.load %arg7[%c0_16, %c0_17] : memref<32x128xbf16, #tpu.memory_space<vmem>>, vector<32x128xbf16>
      %20 = arith.extf %19 : vector<32x128xbf16> to vector<32x128xf32>
      %21 = arith.addf %18, %20 : vector<32x128xf32>
      %cst_18 = arith.constant 0.000000e+00 : f32
      %22 = vector.broadcast %cst_18 : f32 to vector<32x128xf32>
      %23 = arith.maximumf %21, %22 : vector<32x128xf32>
      %24 = arith.truncf %23 : vector<32x128xf32> to vector<32x128xbf16>
      %c0_19 = arith.constant 0 : index
      %c0_20 = arith.constant 0 : index
      %25 = vector.load %arg8[%c0_19, %c0_20] : memref<32x128xbf16, #tpu.memory_space<vmem>>, vector<32x128xbf16>
      tpu.vector_store %arg8[%c0_19, %c0_20], %24 {strides = array<i32>} : memref<32x128xbf16, #tpu.memory_space<vmem>>, vector<32x128xbf16>,
    } else {
    }
    return
  }
  func.func @transform_0(%arg0: i32, %arg1: i32, %arg2: i32) -> (i32, i32) {
    %c0_i32 = arith.constant 0 : i32
    return %arg0, %arg2 : i32, i32
  }
  func.func @transform_1(%arg0: i32, %arg1: i32, %arg2: i32) -> (i32, i32) {
    %c0_i32 = arith.constant 0 : i32
    return %arg2, %arg1 : i32, i32
  }
  func.func @transform_2(%arg0: i32, %arg1: i32, %arg2: i32) -> (i32, i32) {
    %c0_i32 = arith.constant 0 : i32
    %c0_i32_0 = arith.constant 0 : i32
    return %c0_i32, %arg1 : i32, i32
  }
  func.func @transform_3(%arg0: i32, %arg1: i32, %arg2: i32) -> (i32, i32) {
    %c0_i32 = arith.constant 0 : i32
    %c0_i32_0 = arith.constant 0 : i32
    return %c0_i32, %arg1 : i32, i32
  }
  func.func @transform_4(%arg0: i32, %arg1: i32, %arg2: i32) -> (i32, i32) {
    %c0_i32 = arith.constant 0 : i32
    return %arg0, %arg1 : i32, i32
  }
  func.func @transform_5(%arg0: i32, %arg1: i32, %arg2: i32) -> (i32, i32) {
    %c0_i32 = arith.constant 0 : i32
    return %arg0, %arg1 : i32, i32
  }
}

module attributes {stable_mosaic.version = 11 : i64} {
  func.func @_gemm_bn_kernel(%arg0: i32, %arg1: i32, %arg2: i32, %arg3: memref<8x1152xbf16, #tpu.memory_space<vmem>>, %arg4: memref<1152x256xbf16, #tpu.memory_space<vmem>>, %arg5: memref<1x256xf32, #tpu.memory_space<vmem>>, %arg6: memref<1x256xf32, #tpu.memory_space<vmem>>, %arg7: memref<8x256xbf16, #tpu.memory_space<vmem>>, %arg8: memref<8x256xf32, #tpu.memory_space<vmem>>) attributes {dimension_semantics = [#tpu.dimension_semantics<parallel>, #tpu.dimension_semantics<parallel>, #tpu.dimension_semantics<arbitrary>], iteration_bounds = array<i64: 1, 1, 1>, scalar_prefetch = 0 : i64, scratch_operands = 1 : i64, tpu.core_type = #tpu.core_type<tc>, window_params = [{transform_indices = @transform_0, window_bounds = array<i64: 8, 1152>}, {transform_indices = @transform_1, window_bounds = array<i64: 1152, 256>}, {transform_indices = @transform_2, window_bounds = array<i64: 1, 256>}, {transform_indices = @transform_3, window_bounds = array<i64: 1, 256>}, {transform_indices = @transform_4, window_bounds = array<i64: 8, 256>}]} {
    %c0_i32 = arith.constant 0 : i32
    %0 = arith.cmpi eq, %arg2, %c0_i32 : i32
    %1 = arith.extui %0 : i1 to i32
    %c0_i32_0 = arith.constant 0 : i32
    %2 = arith.cmpi ne, %1, %c0_i32_0 : i32
    scf.if %2 {
      %cst_10 = arith.constant 0.000000e+00 : f32
      %12 = vector.broadcast %cst_10 : f32 to vector<8x256xf32>
      %c0_11 = arith.constant 0 : index
      %c0_12 = arith.constant 0 : index
      %13 = vector.load %arg8[%c0_11, %c0_12] : memref<8x256xf32, #tpu.memory_space<vmem>>, vector<8x256xf32>
      tpu.vector_store %arg8[%c0_11, %c0_12], %12 {strides = array<i32>} : memref<8x256xf32, #tpu.memory_space<vmem>>, vector<8x256xf32>,
    } else {
    }
    %c0 = arith.constant 0 : index
    %c0_1 = arith.constant 0 : index
    %3 = vector.load %arg8[%c0, %c0_1] : memref<8x256xf32, #tpu.memory_space<vmem>>, vector<8x256xf32>
    %c0_2 = arith.constant 0 : index
    %c0_3 = arith.constant 0 : index
    %4 = vector.load %arg3[%c0_2, %c0_3] : memref<8x1152xbf16, #tpu.memory_space<vmem>>, vector<8x1152xbf16>
    %c0_4 = arith.constant 0 : index
    %c0_5 = arith.constant 0 : index
    %5 = vector.load %arg4[%c0_4, %c0_5] : memref<1152x256xbf16, #tpu.memory_space<vmem>>, vector<1152x256xbf16>
    %cst = arith.constant dense<0.000000e+00> : vector<8x256xf32>
    %6 = tpu.matmul %4, %5, %cst {dimension_numbers = #tpu.dot_dimension_numbers<[1], [0], [0], [1], [0, 0, 1, 1], [], []>} : vector<8x1152xbf16>, vector<1152x256xbf16>, vector<8x256xf32> -> vector<8x256xf32>
    %7 = arith.addf %3, %6 : vector<8x256xf32>
    %c0_6 = arith.constant 0 : index
    %c0_7 = arith.constant 0 : index
    %8 = vector.load %arg8[%c0_6, %c0_7] : memref<8x256xf32, #tpu.memory_space<vmem>>, vector<8x256xf32>
    tpu.vector_store %arg8[%c0_6, %c0_7], %7 {strides = array<i32>} : memref<8x256xf32, #tpu.memory_space<vmem>>, vector<8x256xf32>,
    %c0_i32_8 = arith.constant 0 : i32
    %9 = arith.cmpi eq, %arg2, %c0_i32_8 : i32
    %10 = arith.extui %9 : i1 to i32
    %c0_i32_9 = arith.constant 0 : i32
    %11 = arith.cmpi ne, %10, %c0_i32_9 : i32
    scf.if %11 {
      %c0_10 = arith.constant 0 : index
      %c0_11 = arith.constant 0 : index
      %12 = vector.load %arg8[%c0_10, %c0_11] : memref<8x256xf32, #tpu.memory_space<vmem>>, vector<8x256xf32>
      %c0_12 = arith.constant 0 : index
      %c0_13 = arith.constant 0 : index
      %13 = vector.load %arg5[%c0_12, %c0_13] : memref<1x256xf32, #tpu.memory_space<vmem>>, vector<1x256xf32>
      %14 = vector.broadcast %13 : vector<1x256xf32> to vector<8x256xf32>
      %15 = arith.mulf %12, %14 : vector<8x256xf32>
      %c0_14 = arith.constant 0 : index
      %c0_15 = arith.constant 0 : index
      %16 = vector.load %arg6[%c0_14, %c0_15] : memref<1x256xf32, #tpu.memory_space<vmem>>, vector<1x256xf32>
      %17 = vector.broadcast %16 : vector<1x256xf32> to vector<8x256xf32>
      %18 = arith.addf %15, %17 : vector<8x256xf32>
      %cst_16 = arith.constant 0.000000e+00 : f32
      %19 = vector.broadcast %cst_16 : f32 to vector<8x256xf32>
      %20 = arith.maximumf %18, %19 : vector<8x256xf32>
      %21 = arith.truncf %20 : vector<8x256xf32> to vector<8x256xbf16>
      %c0_17 = arith.constant 0 : index
      %c0_18 = arith.constant 0 : index
      %22 = vector.load %arg7[%c0_17, %c0_18] : memref<8x256xbf16, #tpu.memory_space<vmem>>, vector<8x256xbf16>
      tpu.vector_store %arg7[%c0_17, %c0_18], %21 {strides = array<i32>} : memref<8x256xbf16, #tpu.memory_space<vmem>>, vector<8x256xbf16>,
    } else {
    }
    return
  }
  func.func @transform_0(%arg0: i32, %arg1: i32, %arg2: i32) -> (i32, i32) {
    %c0_i32 = arith.constant 0 : i32
    return %arg0, %arg2 : i32, i32
  }
  func.func @transform_1(%arg0: i32, %arg1: i32, %arg2: i32) -> (i32, i32) {
    %c0_i32 = arith.constant 0 : i32
    return %arg2, %arg1 : i32, i32
  }
  func.func @transform_2(%arg0: i32, %arg1: i32, %arg2: i32) -> (i32, i32) {
    %c0_i32 = arith.constant 0 : i32
    %c0_i32_0 = arith.constant 0 : i32
    return %c0_i32, %arg1 : i32, i32
  }
  func.func @transform_3(%arg0: i32, %arg1: i32, %arg2: i32) -> (i32, i32) {
    %c0_i32 = arith.constant 0 : i32
    %c0_i32_0 = arith.constant 0 : i32
    return %c0_i32, %arg1 : i32, i32
  }
  func.func @transform_4(%arg0: i32, %arg1: i32, %arg2: i32) -> (i32, i32) {
    %c0_i32 = arith.constant 0 : i32
    return %arg0, %arg1 : i32, i32
  }
}

module attributes {stable_mosaic.version = 11 : i64} {
  func.func @_gemm_bn_kernel(%arg0: i32, %arg1: i32, %arg2: i32, %arg3: memref<8x128xbf16, #tpu.memory_space<vmem>>, %arg4: memref<128x256xbf16, #tpu.memory_space<vmem>>, %arg5: memref<1x256xf32, #tpu.memory_space<vmem>>, %arg6: memref<1x256xf32, #tpu.memory_space<vmem>>, %arg7: memref<8x256xbf16, #tpu.memory_space<vmem>>, %arg8: memref<8x256xf32, #tpu.memory_space<vmem>>) attributes {dimension_semantics = [#tpu.dimension_semantics<parallel>, #tpu.dimension_semantics<parallel>, #tpu.dimension_semantics<arbitrary>], iteration_bounds = array<i64: 1, 1, 1>, scalar_prefetch = 0 : i64, scratch_operands = 1 : i64, tpu.core_type = #tpu.core_type<tc>, window_params = [{transform_indices = @transform_0, window_bounds = array<i64: 8, 128>}, {transform_indices = @transform_1, window_bounds = array<i64: 128, 256>}, {transform_indices = @transform_2, window_bounds = array<i64: 1, 256>}, {transform_indices = @transform_3, window_bounds = array<i64: 1, 256>}, {transform_indices = @transform_4, window_bounds = array<i64: 8, 256>}]} {
    %c0_i32 = arith.constant 0 : i32
    %0 = arith.cmpi eq, %arg2, %c0_i32 : i32
    %1 = arith.extui %0 : i1 to i32
    %c0_i32_0 = arith.constant 0 : i32
    %2 = arith.cmpi ne, %1, %c0_i32_0 : i32
    scf.if %2 {
      %cst_10 = arith.constant 0.000000e+00 : f32
      %12 = vector.broadcast %cst_10 : f32 to vector<8x256xf32>
      %c0_11 = arith.constant 0 : index
      %c0_12 = arith.constant 0 : index
      %13 = vector.load %arg8[%c0_11, %c0_12] : memref<8x256xf32, #tpu.memory_space<vmem>>, vector<8x256xf32>
      tpu.vector_store %arg8[%c0_11, %c0_12], %12 {strides = array<i32>} : memref<8x256xf32, #tpu.memory_space<vmem>>, vector<8x256xf32>,
    } else {
    }
    %c0 = arith.constant 0 : index
    %c0_1 = arith.constant 0 : index
    %3 = vector.load %arg8[%c0, %c0_1] : memref<8x256xf32, #tpu.memory_space<vmem>>, vector<8x256xf32>
    %c0_2 = arith.constant 0 : index
    %c0_3 = arith.constant 0 : index
    %4 = vector.load %arg3[%c0_2, %c0_3] : memref<8x128xbf16, #tpu.memory_space<vmem>>, vector<8x128xbf16>
    %c0_4 = arith.constant 0 : index
    %c0_5 = arith.constant 0 : index
    %5 = vector.load %arg4[%c0_4, %c0_5] : memref<128x256xbf16, #tpu.memory_space<vmem>>, vector<128x256xbf16>
    %cst = arith.constant dense<0.000000e+00> : vector<8x256xf32>
    %6 = tpu.matmul %4, %5, %cst {dimension_numbers = #tpu.dot_dimension_numbers<[1], [0], [0], [1], [0, 0, 1, 1], [], []>} : vector<8x128xbf16>, vector<128x256xbf16>, vector<8x256xf32> -> vector<8x256xf32>
    %7 = arith.addf %3, %6 : vector<8x256xf32>
    %c0_6 = arith.constant 0 : index
    %c0_7 = arith.constant 0 : index
    %8 = vector.load %arg8[%c0_6, %c0_7] : memref<8x256xf32, #tpu.memory_space<vmem>>, vector<8x256xf32>
    tpu.vector_store %arg8[%c0_6, %c0_7], %7 {strides = array<i32>} : memref<8x256xf32, #tpu.memory_space<vmem>>, vector<8x256xf32>,
    %c0_i32_8 = arith.constant 0 : i32
    %9 = arith.cmpi eq, %arg2, %c0_i32_8 : i32
    %10 = arith.extui %9 : i1 to i32
    %c0_i32_9 = arith.constant 0 : i32
    %11 = arith.cmpi ne, %10, %c0_i32_9 : i32
    scf.if %11 {
      %c0_10 = arith.constant 0 : index
      %c0_11 = arith.constant 0 : index
      %12 = vector.load %arg8[%c0_10, %c0_11] : memref<8x256xf32, #tpu.memory_space<vmem>>, vector<8x256xf32>
      %c0_12 = arith.constant 0 : index
      %c0_13 = arith.constant 0 : index
      %13 = vector.load %arg5[%c0_12, %c0_13] : memref<1x256xf32, #tpu.memory_space<vmem>>, vector<1x256xf32>
      %14 = vector.broadcast %13 : vector<1x256xf32> to vector<8x256xf32>
      %15 = arith.mulf %12, %14 : vector<8x256xf32>
      %c0_14 = arith.constant 0 : index
      %c0_15 = arith.constant 0 : index
      %16 = vector.load %arg6[%c0_14, %c0_15] : memref<1x256xf32, #tpu.memory_space<vmem>>, vector<1x256xf32>
      %17 = vector.broadcast %16 : vector<1x256xf32> to vector<8x256xf32>
      %18 = arith.addf %15, %17 : vector<8x256xf32>
      %19 = arith.truncf %18 : vector<8x256xf32> to vector<8x256xbf16>
      %c0_16 = arith.constant 0 : index
      %c0_17 = arith.constant 0 : index
      %20 = vector.load %arg7[%c0_16, %c0_17] : memref<8x256xbf16, #tpu.memory_space<vmem>>, vector<8x256xbf16>
      tpu.vector_store %arg7[%c0_16, %c0_17], %19 {strides = array<i32>} : memref<8x256xbf16, #tpu.memory_space<vmem>>, vector<8x256xbf16>,
    } else {
    }
    return
  }
  func.func @transform_0(%arg0: i32, %arg1: i32, %arg2: i32) -> (i32, i32) {
    %c0_i32 = arith.constant 0 : i32
    return %arg0, %arg2 : i32, i32
  }
  func.func @transform_1(%arg0: i32, %arg1: i32, %arg2: i32) -> (i32, i32) {
    %c0_i32 = arith.constant 0 : i32
    return %arg2, %arg1 : i32, i32
  }
  func.func @transform_2(%arg0: i32, %arg1: i32, %arg2: i32) -> (i32, i32) {
    %c0_i32 = arith.constant 0 : i32
    %c0_i32_0 = arith.constant 0 : i32
    return %c0_i32, %arg1 : i32, i32
  }
  func.func @transform_3(%arg0: i32, %arg1: i32, %arg2: i32) -> (i32, i32) {
    %c0_i32 = arith.constant 0 : i32
    %c0_i32_0 = arith.constant 0 : i32
    return %c0_i32, %arg1 : i32, i32
  }
  func.func @transform_4(%arg0: i32, %arg1: i32, %arg2: i32) -> (i32, i32) {
    %c0_i32 = arith.constant 0 : i32
    return %arg0, %arg1 : i32, i32
  }
}

module attributes {stable_mosaic.version = 11 : i64} {
  func.func @_gemm_bn_res_kernel(%arg0: i32, %arg1: i32, %arg2: i32, %arg3: memref<8x512xbf16, #tpu.memory_space<vmem>>, %arg4: memref<512x256xbf16, #tpu.memory_space<vmem>>, %arg5: memref<1x256xf32, #tpu.memory_space<vmem>>, %arg6: memref<1x256xf32, #tpu.memory_space<vmem>>, %arg7: memref<8x256xbf16, #tpu.memory_space<vmem>>, %arg8: memref<8x256xbf16, #tpu.memory_space<vmem>>, %arg9: memref<8x256xf32, #tpu.memory_space<vmem>>) attributes {dimension_semantics = [#tpu.dimension_semantics<parallel>, #tpu.dimension_semantics<parallel>, #tpu.dimension_semantics<arbitrary>], iteration_bounds = array<i64: 1, 1, 5>, scalar_prefetch = 0 : i64, scratch_operands = 1 : i64, tpu.core_type = #tpu.core_type<tc>, window_params = [{transform_indices = @transform_0, window_bounds = array<i64: 8, 512>}, {transform_indices = @transform_1, window_bounds = array<i64: 512, 256>}, {transform_indices = @transform_2, window_bounds = array<i64: 1, 256>}, {transform_indices = @transform_3, window_bounds = array<i64: 1, 256>}, {transform_indices = @transform_4, window_bounds = array<i64: 8, 256>}, {transform_indices = @transform_5, window_bounds = array<i64: 8, 256>}]} {
    %c0_i32 = arith.constant 0 : i32
    %0 = arith.cmpi eq, %arg2, %c0_i32 : i32
    %1 = arith.extui %0 : i1 to i32
    %c0_i32_0 = arith.constant 0 : i32
    %2 = arith.cmpi ne, %1, %c0_i32_0 : i32
    scf.if %2 {
      %cst_9 = arith.constant 0.000000e+00 : f32
      %12 = vector.broadcast %cst_9 : f32 to vector<8x256xf32>
      %c0_10 = arith.constant 0 : index
      %c0_11 = arith.constant 0 : index
      %13 = vector.load %arg9[%c0_10, %c0_11] : memref<8x256xf32, #tpu.memory_space<vmem>>, vector<8x256xf32>
      tpu.vector_store %arg9[%c0_10, %c0_11], %12 {strides = array<i32>} : memref<8x256xf32, #tpu.memory_space<vmem>>, vector<8x256xf32>,
    } else {
    }
    %c0 = arith.constant 0 : index
    %c0_1 = arith.constant 0 : index
    %3 = vector.load %arg9[%c0, %c0_1] : memref<8x256xf32, #tpu.memory_space<vmem>>, vector<8x256xf32>
    %c0_2 = arith.constant 0 : index
    %c0_3 = arith.constant 0 : index
    %4 = vector.load %arg3[%c0_2, %c0_3] : memref<8x512xbf16, #tpu.memory_space<vmem>>, vector<8x512xbf16>
    %c0_4 = arith.constant 0 : index
    %c0_5 = arith.constant 0 : index
    %5 = vector.load %arg4[%c0_4, %c0_5] : memref<512x256xbf16, #tpu.memory_space<vmem>>, vector<512x256xbf16>
    %cst = arith.constant dense<0.000000e+00> : vector<8x256xf32>
    %6 = tpu.matmul %4, %5, %cst {dimension_numbers = #tpu.dot_dimension_numbers<[1], [0], [0], [1], [0, 0, 1, 1], [], []>} : vector<8x512xbf16>, vector<512x256xbf16>, vector<8x256xf32> -> vector<8x256xf32>
    %7 = arith.addf %3, %6 : vector<8x256xf32>
    %c0_6 = arith.constant 0 : index
    %c0_7 = arith.constant 0 : index
    %8 = vector.load %arg9[%c0_6, %c0_7] : memref<8x256xf32, #tpu.memory_space<vmem>>, vector<8x256xf32>
    tpu.vector_store %arg9[%c0_6, %c0_7], %7 {strides = array<i32>} : memref<8x256xf32, #tpu.memory_space<vmem>>, vector<8x256xf32>,
    %c4_i32 = arith.constant 4 : i32
    %9 = arith.cmpi eq, %arg2, %c4_i32 : i32
    %10 = arith.extui %9 : i1 to i32
    %c0_i32_8 = arith.constant 0 : i32
    %11 = arith.cmpi ne, %10, %c0_i32_8 : i32
    scf.if %11 {
      %c0_9 = arith.constant 0 : index
      %c0_10 = arith.constant 0 : index
      %12 = vector.load %arg9[%c0_9, %c0_10] : memref<8x256xf32, #tpu.memory_space<vmem>>, vector<8x256xf32>
      %c0_11 = arith.constant 0 : index
      %c0_12 = arith.constant 0 : index
      %13 = vector.load %arg5[%c0_11, %c0_12] : memref<1x256xf32, #tpu.memory_space<vmem>>, vector<1x256xf32>
      %14 = vector.broadcast %13 : vector<1x256xf32> to vector<8x256xf32>
      %15 = arith.mulf %12, %14 : vector<8x256xf32>
      %c0_13 = arith.constant 0 : index
      %c0_14 = arith.constant 0 : index
      %16 = vector.load %arg6[%c0_13, %c0_14] : memref<1x256xf32, #tpu.memory_space<vmem>>, vector<1x256xf32>
      %17 = vector.broadcast %16 : vector<1x256xf32> to vector<8x256xf32>
      %18 = arith.addf %15, %17 : vector<8x256xf32>
      %c0_15 = arith.constant 0 : index
      %c0_16 = arith.constant 0 : index
      %19 = vector.load %arg7[%c0_15, %c0_16] : memref<8x256xbf16, #tpu.memory_space<vmem>>, vector<8x256xbf16>
      %20 = arith.extf %19 : vector<8x256xbf16> to vector<8x256xf32>
      %21 = arith.addf %18, %20 : vector<8x256xf32>
      %cst_17 = arith.constant 0.000000e+00 : f32
      %22 = vector.broadcast %cst_17 : f32 to vector<8x256xf32>
      %23 = arith.maximumf %21, %22 : vector<8x256xf32>
      %24 = arith.truncf %23 : vector<8x256xf32> to vector<8x256xbf16>
      %c0_18 = arith.constant 0 : index
      %c0_19 = arith.constant 0 : index
      %25 = vector.load %arg8[%c0_18, %c0_19] : memref<8x256xbf16, #tpu.memory_space<vmem>>, vector<8x256xbf16>
      tpu.vector_store %arg8[%c0_18, %c0_19], %24 {strides = array<i32>} : memref<8x256xbf16, #tpu.memory_space<vmem>>, vector<8x256xbf16>,
    } else {
    }
    return
  }
  func.func @transform_0(%arg0: i32, %arg1: i32, %arg2: i32) -> (i32, i32) {
    %c0_i32 = arith.constant 0 : i32
    return %arg0, %arg2 : i32, i32
  }
  func.func @transform_1(%arg0: i32, %arg1: i32, %arg2: i32) -> (i32, i32) {
    %c0_i32 = arith.constant 0 : i32
    return %arg2, %arg1 : i32, i32
  }
  func.func @transform_2(%arg0: i32, %arg1: i32, %arg2: i32) -> (i32, i32) {
    %c0_i32 = arith.constant 0 : i32
    %c0_i32_0 = arith.constant 0 : i32
    return %c0_i32, %arg1 : i32, i32
  }
  func.func @transform_3(%arg0: i32, %arg1: i32, %arg2: i32) -> (i32, i32) {
    %c0_i32 = arith.constant 0 : i32
    %c0_i32_0 = arith.constant 0 : i32
    return %c0_i32, %arg1 : i32, i32
  }
  func.func @transform_4(%arg0: i32, %arg1: i32, %arg2: i32) -> (i32, i32) {
    %c0_i32 = arith.constant 0 : i32
    return %arg0, %arg1 : i32, i32
  }
  func.func @transform_5(%arg0: i32, %arg1: i32, %arg2: i32) -> (i32, i32) {
    %c0_i32 = arith.constant 0 : i32
    return %arg0, %arg1 : i32, i32
  }
}

module attributes {stable_mosaic.version = 11 : i64} {
  func.func @_gemm_bn_kernel(%arg0: i32, %arg1: i32, %arg2: i32, %arg3: memref<8x512xbf16, #tpu.memory_space<vmem>>, %arg4: memref<512x256xbf16, #tpu.memory_space<vmem>>, %arg5: memref<1x256xf32, #tpu.memory_space<vmem>>, %arg6: memref<1x256xf32, #tpu.memory_space<vmem>>, %arg7: memref<8x256xbf16, #tpu.memory_space<vmem>>, %arg8: memref<8x256xf32, #tpu.memory_space<vmem>>) attributes {dimension_semantics = [#tpu.dimension_semantics<parallel>, #tpu.dimension_semantics<parallel>, #tpu.dimension_semantics<arbitrary>], iteration_bounds = array<i64: 1, 1, 5>, scalar_prefetch = 0 : i64, scratch_operands = 1 : i64, tpu.core_type = #tpu.core_type<tc>, window_params = [{transform_indices = @transform_0, window_bounds = array<i64: 8, 512>}, {transform_indices = @transform_1, window_bounds = array<i64: 512, 256>}, {transform_indices = @transform_2, window_bounds = array<i64: 1, 256>}, {transform_indices = @transform_3, window_bounds = array<i64: 1, 256>}, {transform_indices = @transform_4, window_bounds = array<i64: 8, 256>}]} {
    %c0_i32 = arith.constant 0 : i32
    %0 = arith.cmpi eq, %arg2, %c0_i32 : i32
    %1 = arith.extui %0 : i1 to i32
    %c0_i32_0 = arith.constant 0 : i32
    %2 = arith.cmpi ne, %1, %c0_i32_0 : i32
    scf.if %2 {
      %cst_9 = arith.constant 0.000000e+00 : f32
      %12 = vector.broadcast %cst_9 : f32 to vector<8x256xf32>
      %c0_10 = arith.constant 0 : index
      %c0_11 = arith.constant 0 : index
      %13 = vector.load %arg8[%c0_10, %c0_11] : memref<8x256xf32, #tpu.memory_space<vmem>>, vector<8x256xf32>
      tpu.vector_store %arg8[%c0_10, %c0_11], %12 {strides = array<i32>} : memref<8x256xf32, #tpu.memory_space<vmem>>, vector<8x256xf32>,
    } else {
    }
    %c0 = arith.constant 0 : index
    %c0_1 = arith.constant 0 : index
    %3 = vector.load %arg8[%c0, %c0_1] : memref<8x256xf32, #tpu.memory_space<vmem>>, vector<8x256xf32>
    %c0_2 = arith.constant 0 : index
    %c0_3 = arith.constant 0 : index
    %4 = vector.load %arg3[%c0_2, %c0_3] : memref<8x512xbf16, #tpu.memory_space<vmem>>, vector<8x512xbf16>
    %c0_4 = arith.constant 0 : index
    %c0_5 = arith.constant 0 : index
    %5 = vector.load %arg4[%c0_4, %c0_5] : memref<512x256xbf16, #tpu.memory_space<vmem>>, vector<512x256xbf16>
    %cst = arith.constant dense<0.000000e+00> : vector<8x256xf32>
    %6 = tpu.matmul %4, %5, %cst {dimension_numbers = #tpu.dot_dimension_numbers<[1], [0], [0], [1], [0, 0, 1, 1], [], []>} : vector<8x512xbf16>, vector<512x256xbf16>, vector<8x256xf32> -> vector<8x256xf32>
    %7 = arith.addf %3, %6 : vector<8x256xf32>
    %c0_6 = arith.constant 0 : index
    %c0_7 = arith.constant 0 : index
    %8 = vector.load %arg8[%c0_6, %c0_7] : memref<8x256xf32, #tpu.memory_space<vmem>>, vector<8x256xf32>
    tpu.vector_store %arg8[%c0_6, %c0_7], %7 {strides = array<i32>} : memref<8x256xf32, #tpu.memory_space<vmem>>, vector<8x256xf32>,
    %c4_i32 = arith.constant 4 : i32
    %9 = arith.cmpi eq, %arg2, %c4_i32 : i32
    %10 = arith.extui %9 : i1 to i32
    %c0_i32_8 = arith.constant 0 : i32
    %11 = arith.cmpi ne, %10, %c0_i32_8 : i32
    scf.if %11 {
      %c0_9 = arith.constant 0 : index
      %c0_10 = arith.constant 0 : index
      %12 = vector.load %arg8[%c0_9, %c0_10] : memref<8x256xf32, #tpu.memory_space<vmem>>, vector<8x256xf32>
      %c0_11 = arith.constant 0 : index
      %c0_12 = arith.constant 0 : index
      %13 = vector.load %arg5[%c0_11, %c0_12] : memref<1x256xf32, #tpu.memory_space<vmem>>, vector<1x256xf32>
      %14 = vector.broadcast %13 : vector<1x256xf32> to vector<8x256xf32>
      %15 = arith.mulf %12, %14 : vector<8x256xf32>
      %c0_13 = arith.constant 0 : index
      %c0_14 = arith.constant 0 : index
      %16 = vector.load %arg6[%c0_13, %c0_14] : memref<1x256xf32, #tpu.memory_space<vmem>>, vector<1x256xf32>
      %17 = vector.broadcast %16 : vector<1x256xf32> to vector<8x256xf32>
      %18 = arith.addf %15, %17 : vector<8x256xf32>
      %cst_15 = arith.constant 0.000000e+00 : f32
      %19 = vector.broadcast %cst_15 : f32 to vector<8x256xf32>
      %20 = arith.maximumf %18, %19 : vector<8x256xf32>
      %21 = arith.truncf %20 : vector<8x256xf32> to vector<8x256xbf16>
      %c0_16 = arith.constant 0 : index
      %c0_17 = arith.constant 0 : index
      %22 = vector.load %arg7[%c0_16, %c0_17] : memref<8x256xbf16, #tpu.memory_space<vmem>>, vector<8x256xbf16>
      tpu.vector_store %arg7[%c0_16, %c0_17], %21 {strides = array<i32>} : memref<8x256xbf16, #tpu.memory_space<vmem>>, vector<8x256xbf16>,
    } else {
    }
    return
  }
  func.func @transform_0(%arg0: i32, %arg1: i32, %arg2: i32) -> (i32, i32) {
    %c0_i32 = arith.constant 0 : i32
    return %arg0, %arg2 : i32, i32
  }
  func.func @transform_1(%arg0: i32, %arg1: i32, %arg2: i32) -> (i32, i32) {
    %c0_i32 = arith.constant 0 : i32
    return %arg2, %arg1 : i32, i32
  }
  func.func @transform_2(%arg0: i32, %arg1: i32, %arg2: i32) -> (i32, i32) {
    %c0_i32 = arith.constant 0 : i32
    %c0_i32_0 = arith.constant 0 : i32
    return %c0_i32, %arg1 : i32, i32
  }
  func.func @transform_3(%arg0: i32, %arg1: i32, %arg2: i32) -> (i32, i32) {
    %c0_i32 = arith.constant 0 : i32
    %c0_i32_0 = arith.constant 0 : i32
    return %c0_i32, %arg1 : i32, i32
  }
  func.func @transform_4(%arg0: i32, %arg1: i32, %arg2: i32) -> (i32, i32) {
    %c0_i32 = arith.constant 0 : i32
    return %arg0, %arg1 : i32, i32
  }
}

module attributes {stable_mosaic.version = 11 : i64} {
  func.func @_gemm_bn_kernel(%arg0: i32, %arg1: i32, %arg2: i32, %arg3: memref<8x512xbf16, #tpu.memory_space<vmem>>, %arg4: memref<512x256xbf16, #tpu.memory_space<vmem>>, %arg5: memref<1x256xf32, #tpu.memory_space<vmem>>, %arg6: memref<1x256xf32, #tpu.memory_space<vmem>>, %arg7: memref<8x256xbf16, #tpu.memory_space<vmem>>, %arg8: memref<8x256xf32, #tpu.memory_space<vmem>>) attributes {dimension_semantics = [#tpu.dimension_semantics<parallel>, #tpu.dimension_semantics<parallel>, #tpu.dimension_semantics<arbitrary>], iteration_bounds = array<i64: 1, 2, 5>, scalar_prefetch = 0 : i64, scratch_operands = 1 : i64, tpu.core_type = #tpu.core_type<tc>, window_params = [{transform_indices = @transform_0, window_bounds = array<i64: 8, 512>}, {transform_indices = @transform_1, window_bounds = array<i64: 512, 256>}, {transform_indices = @transform_2, window_bounds = array<i64: 1, 256>}, {transform_indices = @transform_3, window_bounds = array<i64: 1, 256>}, {transform_indices = @transform_4, window_bounds = array<i64: 8, 256>}]} {
    %c0_i32 = arith.constant 0 : i32
    %0 = arith.cmpi eq, %arg2, %c0_i32 : i32
    %1 = arith.extui %0 : i1 to i32
    %c0_i32_0 = arith.constant 0 : i32
    %2 = arith.cmpi ne, %1, %c0_i32_0 : i32
    scf.if %2 {
      %cst_9 = arith.constant 0.000000e+00 : f32
      %12 = vector.broadcast %cst_9 : f32 to vector<8x256xf32>
      %c0_10 = arith.constant 0 : index
      %c0_11 = arith.constant 0 : index
      %13 = vector.load %arg8[%c0_10, %c0_11] : memref<8x256xf32, #tpu.memory_space<vmem>>, vector<8x256xf32>
      tpu.vector_store %arg8[%c0_10, %c0_11], %12 {strides = array<i32>} : memref<8x256xf32, #tpu.memory_space<vmem>>, vector<8x256xf32>,
    } else {
    }
    %c0 = arith.constant 0 : index
    %c0_1 = arith.constant 0 : index
    %3 = vector.load %arg8[%c0, %c0_1] : memref<8x256xf32, #tpu.memory_space<vmem>>, vector<8x256xf32>
    %c0_2 = arith.constant 0 : index
    %c0_3 = arith.constant 0 : index
    %4 = vector.load %arg3[%c0_2, %c0_3] : memref<8x512xbf16, #tpu.memory_space<vmem>>, vector<8x512xbf16>
    %c0_4 = arith.constant 0 : index
    %c0_5 = arith.constant 0 : index
    %5 = vector.load %arg4[%c0_4, %c0_5] : memref<512x256xbf16, #tpu.memory_space<vmem>>, vector<512x256xbf16>
    %cst = arith.constant dense<0.000000e+00> : vector<8x256xf32>
    %6 = tpu.matmul %4, %5, %cst {dimension_numbers = #tpu.dot_dimension_numbers<[1], [0], [0], [1], [0, 0, 1, 1], [], []>} : vector<8x512xbf16>, vector<512x256xbf16>, vector<8x256xf32> -> vector<8x256xf32>
    %7 = arith.addf %3, %6 : vector<8x256xf32>
    %c0_6 = arith.constant 0 : index
    %c0_7 = arith.constant 0 : index
    %8 = vector.load %arg8[%c0_6, %c0_7] : memref<8x256xf32, #tpu.memory_space<vmem>>, vector<8x256xf32>
    tpu.vector_store %arg8[%c0_6, %c0_7], %7 {strides = array<i32>} : memref<8x256xf32, #tpu.memory_space<vmem>>, vector<8x256xf32>,
    %c4_i32 = arith.constant 4 : i32
    %9 = arith.cmpi eq, %arg2, %c4_i32 : i32
    %10 = arith.extui %9 : i1 to i32
    %c0_i32_8 = arith.constant 0 : i32
    %11 = arith.cmpi ne, %10, %c0_i32_8 : i32
    scf.if %11 {
      %c0_9 = arith.constant 0 : index
      %c0_10 = arith.constant 0 : index
      %12 = vector.load %arg8[%c0_9, %c0_10] : memref<8x256xf32, #tpu.memory_space<vmem>>, vector<8x256xf32>
      %c0_11 = arith.constant 0 : index
      %c0_12 = arith.constant 0 : index
      %13 = vector.load %arg5[%c0_11, %c0_12] : memref<1x256xf32, #tpu.memory_space<vmem>>, vector<1x256xf32>
      %14 = vector.broadcast %13 : vector<1x256xf32> to vector<8x256xf32>
      %15 = arith.mulf %12, %14 : vector<8x256xf32>
      %c0_13 = arith.constant 0 : index
      %c0_14 = arith.constant 0 : index
      %16 = vector.load %arg6[%c0_13, %c0_14] : memref<1x256xf32, #tpu.memory_space<vmem>>, vector<1x256xf32>
      %17 = vector.broadcast %16 : vector<1x256xf32> to vector<8x256xf32>
      %18 = arith.addf %15, %17 : vector<8x256xf32>
      %cst_15 = arith.constant 0.000000e+00 : f32
      %19 = vector.broadcast %cst_15 : f32 to vector<8x256xf32>
      %20 = arith.maximumf %18, %19 : vector<8x256xf32>
      %21 = arith.truncf %20 : vector<8x256xf32> to vector<8x256xbf16>
      %c0_16 = arith.constant 0 : index
      %c0_17 = arith.constant 0 : index
      %22 = vector.load %arg7[%c0_16, %c0_17] : memref<8x256xbf16, #tpu.memory_space<vmem>>, vector<8x256xbf16>
      tpu.vector_store %arg7[%c0_16, %c0_17], %21 {strides = array<i32>} : memref<8x256xbf16, #tpu.memory_space<vmem>>, vector<8x256xbf16>,
    } else {
    }
    return
  }
  func.func @transform_0(%arg0: i32, %arg1: i32, %arg2: i32) -> (i32, i32) {
    %c0_i32 = arith.constant 0 : i32
    return %arg0, %arg2 : i32, i32
  }
  func.func @transform_1(%arg0: i32, %arg1: i32, %arg2: i32) -> (i32, i32) {
    %c0_i32 = arith.constant 0 : i32
    return %arg2, %arg1 : i32, i32
  }
  func.func @transform_2(%arg0: i32, %arg1: i32, %arg2: i32) -> (i32, i32) {
    %c0_i32 = arith.constant 0 : i32
    %c0_i32_0 = arith.constant 0 : i32
    return %c0_i32, %arg1 : i32, i32
  }
  func.func @transform_3(%arg0: i32, %arg1: i32, %arg2: i32) -> (i32, i32) {
    %c0_i32 = arith.constant 0 : i32
    %c0_i32_0 = arith.constant 0 : i32
    return %c0_i32, %arg1 : i32, i32
  }
  func.func @transform_4(%arg0: i32, %arg1: i32, %arg2: i32) -> (i32, i32) {
    %c0_i32 = arith.constant 0 : i32
    return %arg0, %arg1 : i32, i32
  }
}

module attributes {stable_mosaic.version = 11 : i64} {
  func.func @_gemm_bn_res_kernel(%arg0: i32, %arg1: i32, %arg2: i32, %arg3: memref<8x512xbf16, #tpu.memory_space<vmem>>, %arg4: memref<512x256xbf16, #tpu.memory_space<vmem>>, %arg5: memref<1x256xf32, #tpu.memory_space<vmem>>, %arg6: memref<1x256xf32, #tpu.memory_space<vmem>>, %arg7: memref<8x256xbf16, #tpu.memory_space<vmem>>, %arg8: memref<8x256xbf16, #tpu.memory_space<vmem>>, %arg9: memref<8x256xf32, #tpu.memory_space<vmem>>) attributes {dimension_semantics = [#tpu.dimension_semantics<parallel>, #tpu.dimension_semantics<parallel>, #tpu.dimension_semantics<arbitrary>], iteration_bounds = array<i64: 1, 2, 9>, scalar_prefetch = 0 : i64, scratch_operands = 1 : i64, tpu.core_type = #tpu.core_type<tc>, window_params = [{transform_indices = @transform_0, window_bounds = array<i64: 8, 512>}, {transform_indices = @transform_1, window_bounds = array<i64: 512, 256>}, {transform_indices = @transform_2, window_bounds = array<i64: 1, 256>}, {transform_indices = @transform_3, window_bounds = array<i64: 1, 256>}, {transform_indices = @transform_4, window_bounds = array<i64: 8, 256>}, {transform_indices = @transform_5, window_bounds = array<i64: 8, 256>}]} {
    %c0_i32 = arith.constant 0 : i32
    %0 = arith.cmpi eq, %arg2, %c0_i32 : i32
    %1 = arith.extui %0 : i1 to i32
    %c0_i32_0 = arith.constant 0 : i32
    %2 = arith.cmpi ne, %1, %c0_i32_0 : i32
    scf.if %2 {
      %cst_9 = arith.constant 0.000000e+00 : f32
      %12 = vector.broadcast %cst_9 : f32 to vector<8x256xf32>
      %c0_10 = arith.constant 0 : index
      %c0_11 = arith.constant 0 : index
      %13 = vector.load %arg9[%c0_10, %c0_11] : memref<8x256xf32, #tpu.memory_space<vmem>>, vector<8x256xf32>
      tpu.vector_store %arg9[%c0_10, %c0_11], %12 {strides = array<i32>} : memref<8x256xf32, #tpu.memory_space<vmem>>, vector<8x256xf32>,
    } else {
    }
    %c0 = arith.constant 0 : index
    %c0_1 = arith.constant 0 : index
    %3 = vector.load %arg9[%c0, %c0_1] : memref<8x256xf32, #tpu.memory_space<vmem>>, vector<8x256xf32>
    %c0_2 = arith.constant 0 : index
    %c0_3 = arith.constant 0 : index
    %4 = vector.load %arg3[%c0_2, %c0_3] : memref<8x512xbf16, #tpu.memory_space<vmem>>, vector<8x512xbf16>
    %c0_4 = arith.constant 0 : index
    %c0_5 = arith.constant 0 : index
    %5 = vector.load %arg4[%c0_4, %c0_5] : memref<512x256xbf16, #tpu.memory_space<vmem>>, vector<512x256xbf16>
    %cst = arith.constant dense<0.000000e+00> : vector<8x256xf32>
    %6 = tpu.matmul %4, %5, %cst {dimension_numbers = #tpu.dot_dimension_numbers<[1], [0], [0], [1], [0, 0, 1, 1], [], []>} : vector<8x512xbf16>, vector<512x256xbf16>, vector<8x256xf32> -> vector<8x256xf32>
    %7 = arith.addf %3, %6 : vector<8x256xf32>
    %c0_6 = arith.constant 0 : index
    %c0_7 = arith.constant 0 : index
    %8 = vector.load %arg9[%c0_6, %c0_7] : memref<8x256xf32, #tpu.memory_space<vmem>>, vector<8x256xf32>
    tpu.vector_store %arg9[%c0_6, %c0_7], %7 {strides = array<i32>} : memref<8x256xf32, #tpu.memory_space<vmem>>, vector<8x256xf32>,
    %c8_i32 = arith.constant 8 : i32
    %9 = arith.cmpi eq, %arg2, %c8_i32 : i32
    %10 = arith.extui %9 : i1 to i32
    %c0_i32_8 = arith.constant 0 : i32
    %11 = arith.cmpi ne, %10, %c0_i32_8 : i32
    scf.if %11 {
      %c0_9 = arith.constant 0 : index
      %c0_10 = arith.constant 0 : index
      %12 = vector.load %arg9[%c0_9, %c0_10] : memref<8x256xf32, #tpu.memory_space<vmem>>, vector<8x256xf32>
      %c0_11 = arith.constant 0 : index
      %c0_12 = arith.constant 0 : index
      %13 = vector.load %arg5[%c0_11, %c0_12] : memref<1x256xf32, #tpu.memory_space<vmem>>, vector<1x256xf32>
      %14 = vector.broadcast %13 : vector<1x256xf32> to vector<8x256xf32>
      %15 = arith.mulf %12, %14 : vector<8x256xf32>
      %c0_13 = arith.constant 0 : index
      %c0_14 = arith.constant 0 : index
      %16 = vector.load %arg6[%c0_13, %c0_14] : memref<1x256xf32, #tpu.memory_space<vmem>>, vector<1x256xf32>
      %17 = vector.broadcast %16 : vector<1x256xf32> to vector<8x256xf32>
      %18 = arith.addf %15, %17 : vector<8x256xf32>
      %c0_15 = arith.constant 0 : index
      %c0_16 = arith.constant 0 : index
      %19 = vector.load %arg7[%c0_15, %c0_16] : memref<8x256xbf16, #tpu.memory_space<vmem>>, vector<8x256xbf16>
      %20 = arith.extf %19 : vector<8x256xbf16> to vector<8x256xf32>
      %21 = arith.addf %18, %20 : vector<8x256xf32>
      %cst_17 = arith.constant 0.000000e+00 : f32
      %22 = vector.broadcast %cst_17 : f32 to vector<8x256xf32>
      %23 = arith.maximumf %21, %22 : vector<8x256xf32>
      %24 = arith.truncf %23 : vector<8x256xf32> to vector<8x256xbf16>
      %c0_18 = arith.constant 0 : index
      %c0_19 = arith.constant 0 : index
      %25 = vector.load %arg8[%c0_18, %c0_19] : memref<8x256xbf16, #tpu.memory_space<vmem>>, vector<8x256xbf16>
      tpu.vector_store %arg8[%c0_18, %c0_19], %24 {strides = array<i32>} : memref<8x256xbf16, #tpu.memory_space<vmem>>, vector<8x256xbf16>,
    } else {
    }
    return
  }
  func.func @transform_0(%arg0: i32, %arg1: i32, %arg2: i32) -> (i32, i32) {
    %c0_i32 = arith.constant 0 : i32
    return %arg0, %arg2 : i32, i32
  }
  func.func @transform_1(%arg0: i32, %arg1: i32, %arg2: i32) -> (i32, i32) {
    %c0_i32 = arith.constant 0 : i32
    return %arg2, %arg1 : i32, i32
  }
  func.func @transform_2(%arg0: i32, %arg1: i32, %arg2: i32) -> (i32, i32) {
    %c0_i32 = arith.constant 0 : i32
    %c0_i32_0 = arith.constant 0 : i32
    return %c0_i32, %arg1 : i32, i32
  }
  func.func @transform_3(%arg0: i32, %arg1: i32, %arg2: i32) -> (i32, i32) {
    %c0_i32 = arith.constant 0 : i32
    %c0_i32_0 = arith.constant 0 : i32
    return %c0_i32, %arg1 : i32, i32
  }
  func.func @transform_4(%arg0: i32, %arg1: i32, %arg2: i32) -> (i32, i32) {
    %c0_i32 = arith.constant 0 : i32
    return %arg0, %arg1 : i32, i32
  }
  func.func @transform_5(%arg0: i32, %arg1: i32, %arg2: i32) -> (i32, i32) {
    %c0_i32 = arith.constant 0 : i32
    return %arg0, %arg1 : i32, i32
  }
}

module attributes {stable_mosaic.version = 11 : i64} {
  func.func @_gemm_bn_kernel(%arg0: i32, %arg1: i32, %arg2: i32, %arg3: memref<8x256xbf16, #tpu.memory_space<vmem>>, %arg4: memref<256x256xbf16, #tpu.memory_space<vmem>>, %arg5: memref<1x256xf32, #tpu.memory_space<vmem>>, %arg6: memref<1x256xf32, #tpu.memory_space<vmem>>, %arg7: memref<8x256xbf16, #tpu.memory_space<vmem>>, %arg8: memref<8x256xf32, #tpu.memory_space<vmem>>) attributes {dimension_semantics = [#tpu.dimension_semantics<parallel>, #tpu.dimension_semantics<parallel>, #tpu.dimension_semantics<arbitrary>], iteration_bounds = array<i64: 1, 2, 1>, scalar_prefetch = 0 : i64, scratch_operands = 1 : i64, tpu.core_type = #tpu.core_type<tc>, window_params = [{transform_indices = @transform_0, window_bounds = array<i64: 8, 256>}, {transform_indices = @transform_1, window_bounds = array<i64: 256, 256>}, {transform_indices = @transform_2, window_bounds = array<i64: 1, 256>}, {transform_indices = @transform_3, window_bounds = array<i64: 1, 256>}, {transform_indices = @transform_4, window_bounds = array<i64: 8, 256>}]} {
    %c0_i32 = arith.constant 0 : i32
    %0 = arith.cmpi eq, %arg2, %c0_i32 : i32
    %1 = arith.extui %0 : i1 to i32
    %c0_i32_0 = arith.constant 0 : i32
    %2 = arith.cmpi ne, %1, %c0_i32_0 : i32
    scf.if %2 {
      %cst_10 = arith.constant 0.000000e+00 : f32
      %12 = vector.broadcast %cst_10 : f32 to vector<8x256xf32>
      %c0_11 = arith.constant 0 : index
      %c0_12 = arith.constant 0 : index
      %13 = vector.load %arg8[%c0_11, %c0_12] : memref<8x256xf32, #tpu.memory_space<vmem>>, vector<8x256xf32>
      tpu.vector_store %arg8[%c0_11, %c0_12], %12 {strides = array<i32>} : memref<8x256xf32, #tpu.memory_space<vmem>>, vector<8x256xf32>,
    } else {
    }
    %c0 = arith.constant 0 : index
    %c0_1 = arith.constant 0 : index
    %3 = vector.load %arg8[%c0, %c0_1] : memref<8x256xf32, #tpu.memory_space<vmem>>, vector<8x256xf32>
    %c0_2 = arith.constant 0 : index
    %c0_3 = arith.constant 0 : index
    %4 = vector.load %arg3[%c0_2, %c0_3] : memref<8x256xbf16, #tpu.memory_space<vmem>>, vector<8x256xbf16>
    %c0_4 = arith.constant 0 : index
    %c0_5 = arith.constant 0 : index
    %5 = vector.load %arg4[%c0_4, %c0_5] : memref<256x256xbf16, #tpu.memory_space<vmem>>, vector<256x256xbf16>
    %cst = arith.constant dense<0.000000e+00> : vector<8x256xf32>
    %6 = tpu.matmul %4, %5, %cst {dimension_numbers = #tpu.dot_dimension_numbers<[1], [0], [0], [1], [0, 0, 1, 1], [], []>} : vector<8x256xbf16>, vector<256x256xbf16>, vector<8x256xf32> -> vector<8x256xf32>
    %7 = arith.addf %3, %6 : vector<8x256xf32>
    %c0_6 = arith.constant 0 : index
    %c0_7 = arith.constant 0 : index
    %8 = vector.load %arg8[%c0_6, %c0_7] : memref<8x256xf32, #tpu.memory_space<vmem>>, vector<8x256xf32>
    tpu.vector_store %arg8[%c0_6, %c0_7], %7 {strides = array<i32>} : memref<8x256xf32, #tpu.memory_space<vmem>>, vector<8x256xf32>,
    %c0_i32_8 = arith.constant 0 : i32
    %9 = arith.cmpi eq, %arg2, %c0_i32_8 : i32
    %10 = arith.extui %9 : i1 to i32
    %c0_i32_9 = arith.constant 0 : i32
    %11 = arith.cmpi ne, %10, %c0_i32_9 : i32
    scf.if %11 {
      %c0_10 = arith.constant 0 : index
      %c0_11 = arith.constant 0 : index
      %12 = vector.load %arg8[%c0_10, %c0_11] : memref<8x256xf32, #tpu.memory_space<vmem>>, vector<8x256xf32>
      %c0_12 = arith.constant 0 : index
      %c0_13 = arith.constant 0 : index
      %13 = vector.load %arg5[%c0_12, %c0_13] : memref<1x256xf32, #tpu.memory_space<vmem>>, vector<1x256xf32>
      %14 = vector.broadcast %13 : vector<1x256xf32> to vector<8x256xf32>
      %15 = arith.mulf %12, %14 : vector<8x256xf32>
      %c0_14 = arith.constant 0 : index
      %c0_15 = arith.constant 0 : index
      %16 = vector.load %arg6[%c0_14, %c0_15] : memref<1x256xf32, #tpu.memory_space<vmem>>, vector<1x256xf32>
      %17 = vector.broadcast %16 : vector<1x256xf32> to vector<8x256xf32>
      %18 = arith.addf %15, %17 : vector<8x256xf32>
      %19 = arith.truncf %18 : vector<8x256xf32> to vector<8x256xbf16>
      %c0_16 = arith.constant 0 : index
      %c0_17 = arith.constant 0 : index
      %20 = vector.load %arg7[%c0_16, %c0_17] : memref<8x256xbf16, #tpu.memory_space<vmem>>, vector<8x256xbf16>
      tpu.vector_store %arg7[%c0_16, %c0_17], %19 {strides = array<i32>} : memref<8x256xbf16, #tpu.memory_space<vmem>>, vector<8x256xbf16>,
    } else {
    }
    return
  }
  func.func @transform_0(%arg0: i32, %arg1: i32, %arg2: i32) -> (i32, i32) {
    %c0_i32 = arith.constant 0 : i32
    return %arg0, %arg2 : i32, i32
  }
  func.func @transform_1(%arg0: i32, %arg1: i32, %arg2: i32) -> (i32, i32) {
    %c0_i32 = arith.constant 0 : i32
    return %arg2, %arg1 : i32, i32
  }
  func.func @transform_2(%arg0: i32, %arg1: i32, %arg2: i32) -> (i32, i32) {
    %c0_i32 = arith.constant 0 : i32
    %c0_i32_0 = arith.constant 0 : i32
    return %c0_i32, %arg1 : i32, i32
  }
  func.func @transform_3(%arg0: i32, %arg1: i32, %arg2: i32) -> (i32, i32) {
    %c0_i32 = arith.constant 0 : i32
    %c0_i32_0 = arith.constant 0 : i32
    return %c0_i32, %arg1 : i32, i32
  }
  func.func @transform_4(%arg0: i32, %arg1: i32, %arg2: i32) -> (i32, i32) {
    %c0_i32 = arith.constant 0 : i32
    return %arg0, %arg1 : i32, i32
  }
}

module attributes {stable_mosaic.version = 11 : i64} {
  func.func @_gemm_bn_kernel(%arg0: i32, %arg1: i32, %arg2: i32, %arg3: memref<8x512xbf16, #tpu.memory_space<vmem>>, %arg4: memref<512x256xbf16, #tpu.memory_space<vmem>>, %arg5: memref<1x256xf32, #tpu.memory_space<vmem>>, %arg6: memref<1x256xf32, #tpu.memory_space<vmem>>, %arg7: memref<8x256xbf16, #tpu.memory_space<vmem>>, %arg8: memref<8x256xf32, #tpu.memory_space<vmem>>) attributes {dimension_semantics = [#tpu.dimension_semantics<parallel>, #tpu.dimension_semantics<parallel>, #tpu.dimension_semantics<arbitrary>], iteration_bounds = array<i64: 1, 2, 9>, scalar_prefetch = 0 : i64, scratch_operands = 1 : i64, tpu.core_type = #tpu.core_type<tc>, window_params = [{transform_indices = @transform_0, window_bounds = array<i64: 8, 512>}, {transform_indices = @transform_1, window_bounds = array<i64: 512, 256>}, {transform_indices = @transform_2, window_bounds = array<i64: 1, 256>}, {transform_indices = @transform_3, window_bounds = array<i64: 1, 256>}, {transform_indices = @transform_4, window_bounds = array<i64: 8, 256>}]} {
    %c0_i32 = arith.constant 0 : i32
    %0 = arith.cmpi eq, %arg2, %c0_i32 : i32
    %1 = arith.extui %0 : i1 to i32
    %c0_i32_0 = arith.constant 0 : i32
    %2 = arith.cmpi ne, %1, %c0_i32_0 : i32
    scf.if %2 {
      %cst_9 = arith.constant 0.000000e+00 : f32
      %12 = vector.broadcast %cst_9 : f32 to vector<8x256xf32>
      %c0_10 = arith.constant 0 : index
      %c0_11 = arith.constant 0 : index
      %13 = vector.load %arg8[%c0_10, %c0_11] : memref<8x256xf32, #tpu.memory_space<vmem>>, vector<8x256xf32>
      tpu.vector_store %arg8[%c0_10, %c0_11], %12 {strides = array<i32>} : memref<8x256xf32, #tpu.memory_space<vmem>>, vector<8x256xf32>,
    } else {
    }
    %c0 = arith.constant 0 : index
    %c0_1 = arith.constant 0 : index
    %3 = vector.load %arg8[%c0, %c0_1] : memref<8x256xf32, #tpu.memory_space<vmem>>, vector<8x256xf32>
    %c0_2 = arith.constant 0 : index
    %c0_3 = arith.constant 0 : index
    %4 = vector.load %arg3[%c0_2, %c0_3] : memref<8x512xbf16, #tpu.memory_space<vmem>>, vector<8x512xbf16>
    %c0_4 = arith.constant 0 : index
    %c0_5 = arith.constant 0 : index
    %5 = vector.load %arg4[%c0_4, %c0_5] : memref<512x256xbf16, #tpu.memory_space<vmem>>, vector<512x256xbf16>
    %cst = arith.constant dense<0.000000e+00> : vector<8x256xf32>
    %6 = tpu.matmul %4, %5, %cst {dimension_numbers = #tpu.dot_dimension_numbers<[1], [0], [0], [1], [0, 0, 1, 1], [], []>} : vector<8x512xbf16>, vector<512x256xbf16>, vector<8x256xf32> -> vector<8x256xf32>
    %7 = arith.addf %3, %6 : vector<8x256xf32>
    %c0_6 = arith.constant 0 : index
    %c0_7 = arith.constant 0 : index
    %8 = vector.load %arg8[%c0_6, %c0_7] : memref<8x256xf32, #tpu.memory_space<vmem>>, vector<8x256xf32>
    tpu.vector_store %arg8[%c0_6, %c0_7], %7 {strides = array<i32>} : memref<8x256xf32, #tpu.memory_space<vmem>>, vector<8x256xf32>,
    %c8_i32 = arith.constant 8 : i32
    %9 = arith.cmpi eq, %arg2, %c8_i32 : i32
    %10 = arith.extui %9 : i1 to i32
    %c0_i32_8 = arith.constant 0 : i32
    %11 = arith.cmpi ne, %10, %c0_i32_8 : i32
    scf.if %11 {
      %c0_9 = arith.constant 0 : index
      %c0_10 = arith.constant 0 : index
      %12 = vector.load %arg8[%c0_9, %c0_10] : memref<8x256xf32, #tpu.memory_space<vmem>>, vector<8x256xf32>
      %c0_11 = arith.constant 0 : index
      %c0_12 = arith.constant 0 : index
      %13 = vector.load %arg5[%c0_11, %c0_12] : memref<1x256xf32, #tpu.memory_space<vmem>>, vector<1x256xf32>
      %14 = vector.broadcast %13 : vector<1x256xf32> to vector<8x256xf32>
      %15 = arith.mulf %12, %14 : vector<8x256xf32>
      %c0_13 = arith.constant 0 : index
      %c0_14 = arith.constant 0 : index
      %16 = vector.load %arg6[%c0_13, %c0_14] : memref<1x256xf32, #tpu.memory_space<vmem>>, vector<1x256xf32>
      %17 = vector.broadcast %16 : vector<1x256xf32> to vector<8x256xf32>
      %18 = arith.addf %15, %17 : vector<8x256xf32>
      %cst_15 = arith.constant 0.000000e+00 : f32
      %19 = vector.broadcast %cst_15 : f32 to vector<8x256xf32>
      %20 = arith.maximumf %18, %19 : vector<8x256xf32>
      %21 = arith.truncf %20 : vector<8x256xf32> to vector<8x256xbf16>
      %c0_16 = arith.constant 0 : index
      %c0_17 = arith.constant 0 : index
      %22 = vector.load %arg7[%c0_16, %c0_17] : memref<8x256xbf16, #tpu.memory_space<vmem>>, vector<8x256xbf16>
      tpu.vector_store %arg7[%c0_16, %c0_17], %21 {strides = array<i32>} : memref<8x256xbf16, #tpu.memory_space<vmem>>, vector<8x256xbf16>,
    } else {
    }
    return
  }
  func.func @transform_0(%arg0: i32, %arg1: i32, %arg2: i32) -> (i32, i32) {
    %c0_i32 = arith.constant 0 : i32
    return %arg0, %arg2 : i32, i32
  }
  func.func @transform_1(%arg0: i32, %arg1: i32, %arg2: i32) -> (i32, i32) {
    %c0_i32 = arith.constant 0 : i32
    return %arg2, %arg1 : i32, i32
  }
  func.func @transform_2(%arg0: i32, %arg1: i32, %arg2: i32) -> (i32, i32) {
    %c0_i32 = arith.constant 0 : i32
    %c0_i32_0 = arith.constant 0 : i32
    return %c0_i32, %arg1 : i32, i32
  }
  func.func @transform_3(%arg0: i32, %arg1: i32, %arg2: i32) -> (i32, i32) {
    %c0_i32 = arith.constant 0 : i32
    %c0_i32_0 = arith.constant 0 : i32
    return %c0_i32, %arg1 : i32, i32
  }
  func.func @transform_4(%arg0: i32, %arg1: i32, %arg2: i32) -> (i32, i32) {
    %c0_i32 = arith.constant 0 : i32
    return %arg0, %arg1 : i32, i32
  }
}

module attributes {stable_mosaic.version = 11 : i64} {
  func.func @_avgpool_kernel(%arg0: memref<1x2x512xbf16, #tpu.memory_space<vmem>>, %arg1: memref<2x512xbf16, #tpu.memory_space<vmem>>) attributes {dimension_semantics = [], scalar_prefetch = 0 : i64, scratch_operands = 0 : i64, tpu.core_type = #tpu.core_type<tc>} {
    %c0 = arith.constant 0 : index
    %c0_0 = arith.constant 0 : index
    %c0_1 = arith.constant 0 : index
    %0 = vector.load %arg0[%c0, %c0_0, %c0_1] : memref<1x2x512xbf16, #tpu.memory_space<vmem>>, vector<1x2x512xbf16>
    %1 = vector.shape_cast %0 : vector<1x2x512xbf16> to vector<2x512xbf16>
    %2 = arith.extf %1 : vector<2x512xbf16> to vector<2x512xf32>
    %cst = arith.constant 1.000000e+00 : f32
    %3 = vector.broadcast %cst : f32 to vector<2x512xf32>
    %4 = arith.mulf %2, %3 : vector<2x512xf32>
    %5 = arith.truncf %4 : vector<2x512xf32> to vector<2x512xbf16>
    %c0_2 = arith.constant 0 : index
    %c0_3 = arith.constant 0 : index
    %6 = vector.load %arg1[%c0_2, %c0_3] : memref<2x512xbf16, #tpu.memory_space<vmem>>, vector<2x512xbf16>
    tpu.vector_store %arg1[%c0_2, %c0_3], %5 {strides = array<i32>} : memref<2x512xbf16, #tpu.memory_space<vmem>>, vector<2x512xbf16>,
    return
  }
}

module attributes {stable_mosaic.version = 11 : i64} {
  func.func @_gemm_bn_kernel(%arg0: i32, %arg1: i32, %arg2: i32, %arg3: memref<8x512xbf16, #tpu.memory_space<vmem>>, %arg4: memref<512x256xbf16, #tpu.memory_space<vmem>>, %arg5: memref<1x256xf32, #tpu.memory_space<vmem>>, %arg6: memref<1x256xf32, #tpu.memory_space<vmem>>, %arg7: memref<8x256xf32, #tpu.memory_space<vmem>>, %arg8: memref<8x256xf32, #tpu.memory_space<vmem>>) attributes {dimension_semantics = [#tpu.dimension_semantics<parallel>, #tpu.dimension_semantics<parallel>, #tpu.dimension_semantics<arbitrary>], iteration_bounds = array<i64: 1, 1, 1>, scalar_prefetch = 0 : i64, scratch_operands = 1 : i64, tpu.core_type = #tpu.core_type<tc>, window_params = [{transform_indices = @transform_0, window_bounds = array<i64: 8, 512>}, {transform_indices = @transform_1, window_bounds = array<i64: 512, 256>}, {transform_indices = @transform_2, window_bounds = array<i64: 1, 256>}, {transform_indices = @transform_3, window_bounds = array<i64: 1, 256>}, {transform_indices = @transform_4, window_bounds = array<i64: 8, 256>}]} {
    %c0_i32 = arith.constant 0 : i32
    %0 = arith.cmpi eq, %arg2, %c0_i32 : i32
    %1 = arith.extui %0 : i1 to i32
    %c0_i32_0 = arith.constant 0 : i32
    %2 = arith.cmpi ne, %1, %c0_i32_0 : i32
    scf.if %2 {
      %cst_10 = arith.constant 0.000000e+00 : f32
      %12 = vector.broadcast %cst_10 : f32 to vector<8x256xf32>
      %c0_11 = arith.constant 0 : index
      %c0_12 = arith.constant 0 : index
      %13 = vector.load %arg8[%c0_11, %c0_12] : memref<8x256xf32, #tpu.memory_space<vmem>>, vector<8x256xf32>
      tpu.vector_store %arg8[%c0_11, %c0_12], %12 {strides = array<i32>} : memref<8x256xf32, #tpu.memory_space<vmem>>, vector<8x256xf32>,
    } else {
    }
    %c0 = arith.constant 0 : index
    %c0_1 = arith.constant 0 : index
    %3 = vector.load %arg8[%c0, %c0_1] : memref<8x256xf32, #tpu.memory_space<vmem>>, vector<8x256xf32>
    %c0_2 = arith.constant 0 : index
    %c0_3 = arith.constant 0 : index
    %4 = vector.load %arg3[%c0_2, %c0_3] : memref<8x512xbf16, #tpu.memory_space<vmem>>, vector<8x512xbf16>
    %c0_4 = arith.constant 0 : index
    %c0_5 = arith.constant 0 : index
    %5 = vector.load %arg4[%c0_4, %c0_5] : memref<512x256xbf16, #tpu.memory_space<vmem>>, vector<512x256xbf16>
    %cst = arith.constant dense<0.000000e+00> : vector<8x256xf32>
    %6 = tpu.matmul %4, %5, %cst {dimension_numbers = #tpu.dot_dimension_numbers<[1], [0], [0], [1], [0, 0, 1, 1], [], []>} : vector<8x512xbf16>, vector<512x256xbf16>, vector<8x256xf32> -> vector<8x256xf32>
    %7 = arith.addf %3, %6 : vector<8x256xf32>
    %c0_6 = arith.constant 0 : index
    %c0_7 = arith.constant 0 : index
    %8 = vector.load %arg8[%c0_6, %c0_7] : memref<8x256xf32, #tpu.memory_space<vmem>>, vector<8x256xf32>
    tpu.vector_store %arg8[%c0_6, %c0_7], %7 {strides = array<i32>} : memref<8x256xf32, #tpu.memory_space<vmem>>, vector<8x256xf32>,
    %c0_i32_8 = arith.constant 0 : i32
    %9 = arith.cmpi eq, %arg2, %c0_i32_8 : i32
    %10 = arith.extui %9 : i1 to i32
    %c0_i32_9 = arith.constant 0 : i32
    %11 = arith.cmpi ne, %10, %c0_i32_9 : i32
    scf.if %11 {
      %c0_10 = arith.constant 0 : index
      %c0_11 = arith.constant 0 : index
      %12 = vector.load %arg8[%c0_10, %c0_11] : memref<8x256xf32, #tpu.memory_space<vmem>>, vector<8x256xf32>
      %c0_12 = arith.constant 0 : index
      %c0_13 = arith.constant 0 : index
      %13 = vector.load %arg5[%c0_12, %c0_13] : memref<1x256xf32, #tpu.memory_space<vmem>>, vector<1x256xf32>
      %14 = vector.broadcast %13 : vector<1x256xf32> to vector<8x256xf32>
      %15 = arith.mulf %12, %14 : vector<8x256xf32>
      %c0_14 = arith.constant 0 : index
      %c0_15 = arith.constant 0 : index
      %16 = vector.load %arg6[%c0_14, %c0_15] : memref<1x256xf32, #tpu.memory_space<vmem>>, vector<1x256xf32>
      %17 = vector.broadcast %16 : vector<1x256xf32> to vector<8x256xf32>
      %18 = arith.addf %15, %17 : vector<8x256xf32>
      %c0_16 = arith.constant 0 : index
      %c0_17 = arith.constant 0 : index
      %19 = vector.load %arg7[%c0_16, %c0_17] : memref<8x256xf32, #tpu.memory_space<vmem>>, vector<8x256xf32>
      tpu.vector_store %arg7[%c0_16, %c0_17], %18 {strides = array<i32>} : memref<8x256xf32, #tpu.memory_space<vmem>>, vector<8x256xf32>,
    } else {
    }
    return
  }
  func.func @transform_0(%arg0: i32, %arg1: i32, %arg2: i32) -> (i32, i32) {
    %c0_i32 = arith.constant 0 : i32
    return %arg0, %arg2 : i32, i32
  }
  func.func @transform_1(%arg0: i32, %arg1: i32, %arg2: i32) -> (i32, i32) {
    %c0_i32 = arith.constant 0 : i32
    return %arg2, %arg1 : i32, i32
  }
  func.func @transform_2(%arg0: i32, %arg1: i32, %arg2: i32) -> (i32, i32) {
    %c0_i32 = arith.constant 0 : i32
    %c0_i32_0 = arith.constant 0 : i32
    return %c0_i32, %arg1 : i32, i32
  }
  func.func @transform_3(%arg0: i32, %arg1: i32, %arg2: i32) -> (i32, i32) {
    %c0_i32 = arith.constant 0 : i32
    %c0_i32_0 = arith.constant 0 : i32
    return %c0_i32, %arg1 : i32, i32
  }
  func.func @transform_4(%arg0: i32, %arg1: i32, %arg2: i32) -> (i32, i32) {
    %c0_i32 = arith.constant 0 : i32
    return %arg0, %arg1 : i32, i32
  }
}

</mosaic_0001>

<bundles_post_ra>
// kernel: resnet_forward.23
= control target key start
LH: loop header
LB: loop body
LE: loop exit
PB: predicated region body
PF: predicated region fallthrough
CT: control target
= control target key end

     0   :  { %s1726_s15 = smov 0   ;;  %s1728_s16 = smov 0   ;;  %s1935_s0 = inlined_call_operand.vmem [shape: bf16[512,160], index: 0, kind: input, shape index: {}]   ;;  %s1936_s1 = inlined_call_operand.vmem [shape: bf16[160,128], index: 1, kind: input, shape index: {}]   ;;  %s1937_s2 = inlined_call_operand.vmem [shape: f32[1,128], index: 2, kind: input, shape index: {}]   ;;  %s1938_s3 = inlined_call_operand.vmem [shape: f32[1,128], index: 3, kind: input, shape index: {}]   ;;  %s1939_s4 = inlined_call_operand.vmem [shape: bf16[512,128], index: 4, kind: output, shape index: {}]  }
   0x1   :  { %s1730_s17 = smov 0  }
   0x2 LB: > { %s33_s18 = sadd.s32 1, %s1694_s16  ;;  %p1345_p0 = scmp.ge.s32.totalorder %s1698_s17, 1  ;;  %s1698_s17 = sphi %s1730_s17, %s14_s17   ;;  %s1694_s16 = sphi %s1728_s16, %s1941_s16   ;;  %s1690_s15 = sphi %s1726_s15, %s1940_s15  }
   0x3   : > { %p35_p1 = scmp.ge.s32.totalorder %s33_s18, 2  ;;  %p224_p2 = scmp.lt.s32.totalorder %s1698_s17, 3 }
   0x5   : > { %s1943_s18 = smov (%p35_p1, %s33_s18), 0  ;;  %p225_p3 = pnand %p1345_p0, %p224_p2 }
   0x6   : > { %v1618_v0 = vld [vmem:[%s1936_s1] sm:$0xff] (!%p225_p3)   ;;  %v1700_v1 = vmov (!%p225_p3), 0   ;;  %s1346_s21 = sshll.u32 (!%p225_p3), %s1690_s15, 5  ;;  %v1619_v2 = vld [vmem:[%s1936_s1 + $0x8] sm:$0xff] (!%p225_p3)   ;;  %v1620_v3 = vld [vmem:[%s1936_s1 + $0x10] sm:$0xff] (!%p225_p3)   ;;  %vm633_vm0 = vcmask (!%p225_p3), 261120  }
   0x7   : > { %228 = sbr.rel (%p225_p3) target bundleno = 327 (0x147), region = 36  ;;  %682 = vmatprep.subr.bf16.mxu0 (!%p225_p3), %v1700_v1  ;;  %1573 = vmatprep.subr.bf16.mxu1 (!%p225_p3), %v1700_v1  ;;  %p274_p4 = scmp.lt.s32.totalorder (!%p225_p3), %s1346_s21, 63  ;;  %v1621_v4 = vld [vmem:[%s1936_s1 + $0x18] sm:$0xff] (!%p225_p3)   ;;  %v1622_v7 = vld [vmem:[%s1936_s1 + $0x20] sm:$0xff] (!%p225_p3)   ;;  %v1623_v8 = vld [vmem:[%s1936_s1 + $0x28] sm:$0xff] (!%p225_p3)  }
   0x8   : > { %683 = vmatpush1.bf16.msra.mxu0 (!%p225_p3), %v1618_v0  ;;  %1583 = vmatpush1.bf16.msra.mxu1 (!%p225_p3), %v1618_v0  ;;  %v1624_v9 = vld [vmem:[%s1936_s1 + $0x30] sm:$0xff] (!%p225_p3)   ;;  %v1625_v10 = vld [vmem:[%s1936_s1 + $0x38] sm:$0xff] (!%p225_p3)   ;;  %v1626_v11 = vld [vmem:[%s1936_s1 + $0x40] sm:$0xff] (!%p225_p3)  }
   0x9   : > { %684 = vmatprep.subr.bf16.mxu0 (!%p225_p3), %v1700_v1  ;;  %1574 = vmatprep.subr.bf16.mxu1 (!%p225_p3), %v1700_v1  ;;  %v1627_v12 = vld [vmem:[%s1936_s1 + $0x48] sm:$0xff] (!%p225_p3)   ;;  %v1833_v43 = vld [vmem:[%s1937_s2] ss:$0 sm:$0xff] (!%p225_p3) }
   0xa   : > { %v1838_v45 = vld [vmem:[%s1938_s3] ss:$0 sm:$0xff] (!%p225_p3) }
   0xc   : > { %685 = vmatpush1.bf16.msra.mxu0 (!%p225_p3), %v1619_v2  ;;  %1584 = vmatpush1.bf16.msra.mxu1 (!%p225_p3), %v1619_v2 }
   0xd   : > { %686 = vmatprep.subr.bf16.mxu0 (!%p225_p3), %v1700_v1  ;;  %1575 = vmatprep.subr.bf16.mxu1 (!%p225_p3), %v1700_v1 }
   0xe   : > { %s1945_s21 = smov (!%p274_p4, %s1346_s21), 63 }
   0xf   : > { %s1445_s26 = sshll.u32 %s1945_s21, 3 }
  0x10   : > { %s1759_s29 = scalar_lea.vmem %s1935_s0, %s1445_s26  ;;  %687 = vmatpush1.bf16.msra.mxu0 %v1620_v3  ;;  %1585 = vmatpush1.bf16.msra.mxu1 %v1620_v3  ;;  %s1350_s26 = sshll.u32 %s1945_s21, 2 }
  0x11   : > { %688 = vmatprep.subr.bf16.mxu0 %v1700_v1  ;;  %1576 = vmatprep.subr.bf16.mxu1 %v1700_v1  ;;  %v1630_v5 = vld [vmem:[%s1759_s29 + $0x4] ss:$8 sps:$4 sm:$0xff]   ;;  %v1628_v13 = vld [vmem:[%s1759_s29] ss:$8 sps:$4 sm:$0xff]   ;;  %v1634_v15 = vld [vmem:[%s1759_s29 + $0x14] ss:$8 sps:$4 sm:$0xff]  }
  0x12   : > { %v1633_v6 = vld [vmem:[%s1759_s29 + $0x84] ss:$8 sps:$4 sm:$0xff]   ;;  %1393 = vmatprep.mubr.msk.bf16.mxu0 %vm633_vm0, %v1630_v5  ;;  %v1631_v14 = vld [vmem:[%s1759_s29 + $0x80] ss:$8 sps:$4 sm:$0xff]   ;;  %v1636_v16 = vld [vmem:[%s1759_s29 + $0x94] ss:$8 sps:$4 sm:$0xff]  }
  0x13   : > { %1401 = vmatprep.mubr.msk.bf16.mxu1 %vm633_vm0, %v1633_v6  ;;  %v1638_v17 = vld [vmem:[%s1759_s29 + $0x10] ss:$8 sps:$4 sm:$0xff]   ;;  %v1640_v19 = vld [vmem:[%s1759_s29 + $0x24] ss:$8 sps:$4 sm:$0xff]   ;;  %v1644_v21 = vld [vmem:[%s1759_s29 + $0x20] ss:$8 sps:$4 sm:$0xff]  }
  0x14   : > { %689 = vmatpush1.bf16.msra.mxu0 %v1621_v4  ;;  %1586 = vmatpush1.bf16.msra.mxu1 %v1621_v4  ;;  %v1639_v18 = vld [vmem:[%s1759_s29 + $0x90] ss:$8 sps:$4 sm:$0xff]   ;;  %v1642_v20 = vld [vmem:[%s1759_s29 + $0xa4] ss:$8 sps:$4 sm:$0xff]   ;;  %v1645_v22 = vld [vmem:[%s1759_s29 + $0xa0] ss:$8 sps:$4 sm:$0xff]  }
  0x15   : > { %690 = vmatprep.subr.bf16.mxu0 %v1700_v1  ;;  %1577 = vmatprep.subr.bf16.mxu1 %v1700_v1  ;;  %v1646_v23 = vld [vmem:[%s1759_s29 + $0x34] ss:$8 sps:$4 sm:$0xff]   ;;  %v1650_v25 = vld [vmem:[%s1759_s29 + $0x30] ss:$8 sps:$4 sm:$0xff]   ;;  %v1652_v27 = vld [vmem:[%s1759_s29 + $0x44] ss:$8 sps:$4 sm:$0xff]  }
  0x16   : > { %v1648_v24 = vld [vmem:[%s1759_s29 + $0xb4] ss:$8 sps:$4 sm:$0xff]   ;;  %v1651_v26 = vld [vmem:[%s1759_s29 + $0xb0] ss:$8 sps:$4 sm:$0xff]   ;;  %v1654_v28 = vld [vmem:[%s1759_s29 + $0xc4] ss:$8 sps:$4 sm:$0xff]  }
  0x17   : > { %v1656_v29 = vld [vmem:[%s1759_s29 + $0x40] ss:$8 sps:$4 sm:$0xff]   ;;  %v1658_v31 = vld [vmem:[%s1759_s29 + $0x54] ss:$8 sps:$4 sm:$0xff]   ;;  %v1662_v33 = vld [vmem:[%s1759_s29 + $0x50] ss:$8 sps:$4 sm:$0xff]  }
  0x18   : > { %691 = vmatpush1.bf16.msra.mxu0 %v1622_v7  ;;  %1587 = vmatpush1.bf16.msra.mxu1 %v1622_v7  ;;  %v1657_v30 = vld [vmem:[%s1759_s29 + $0xc0] ss:$8 sps:$4 sm:$0xff]   ;;  %v1660_v32 = vld [vmem:[%s1759_s29 + $0xd4] ss:$8 sps:$4 sm:$0xff]   ;;  %v1663_v34 = vld [vmem:[%s1759_s29 + $0xd0] ss:$8 sps:$4 sm:$0xff]  }
  0x19   : > { %692 = vmatprep.subr.bf16.mxu0 %v1700_v1  ;;  %1578 = vmatprep.subr.bf16.mxu1 %v1700_v1  ;;  %v1664_v35 = vld [vmem:[%s1759_s29 + $0x64] ss:$8 sps:$4 sm:$0xff]   ;;  %v1668_v37 = vld [vmem:[%s1759_s29 + $0x60] ss:$8 sps:$4 sm:$0xff]   ;;  %v1670_v39 = vld [vmem:[%s1759_s29 + $0x74] ss:$8 sps:$4 sm:$0xff]  }
  0x1a   : > { %v1666_v36 = vld [vmem:[%s1759_s29 + $0xe4] ss:$8 sps:$4 sm:$0xff]   ;;  %v1669_v38 = vld [vmem:[%s1759_s29 + $0xe0] ss:$8 sps:$4 sm:$0xff]   ;;  %v1672_v40 = vld [vmem:[%s1759_s29 + $0xf4] ss:$8 sps:$4 sm:$0xff]  }
  0x1b   : > { %v1674_v41 = vld [vmem:[%s1759_s29 + $0x70] ss:$8 sps:$4 sm:$0xff]  }
  0x1c   : > { %693 = vmatpush1.bf16.msra.mxu0 %v1623_v8  ;;  %1588 = vmatpush1.bf16.msra.mxu1 %v1623_v8  ;;  %v1675_v42 = vld [vmem:[%s1759_s29 + $0xf0] ss:$8 sps:$4 sm:$0xff]   ;;  %s1852_s29 = scalar_lea.vmem %s1939_s4, %s1350_s26 }
  0x1d   : > { %694 = vmatprep.subr.bf16.mxu0 %v1700_v1  ;;  %1579 = vmatprep.subr.bf16.mxu1 %v1700_v1 }
  0x20   : > { %695 = vmatpush1.bf16.msra.mxu0 %v1624_v9  ;;  %1589 = vmatpush1.bf16.msra.mxu1 %v1624_v9 }
  0x21   : > { %696 = vmatprep.subr.bf16.mxu0 %v1700_v1  ;;  %1580 = vmatprep.subr.bf16.mxu1 %v1700_v1 }
  0x24   : > { %697 = vmatpush1.bf16.msra.mxu0 %v1625_v10  ;;  %1590 = vmatpush1.bf16.msra.mxu1 %v1625_v10 }
  0x25   : > { %698 = vmatprep.subr.bf16.mxu0 %v1700_v1  ;;  %1581 = vmatprep.subr.bf16.mxu1 %v1700_v1 }
  0x28   : > { %699 = vmatpush1.bf16.msra.mxu0 %v1626_v11  ;;  %1591 = vmatpush1.bf16.msra.mxu1 %v1626_v11 }
  0x29   : > { %700 = vmatprep.subr.bf16.mxu0 %v1700_v1  ;;  %1582 = vmatprep.subr.bf16.mxu1 %v1700_v1 }
  0x2c   : > { %701 = vmatpush1.bf16.msra.mxu0 %v1627_v12  ;;  %1592 = vmatpush1.bf16.msra.mxu1 %v1627_v12 }
  0x2f   : > { %715 = vmatmul.mubr.bf16.vlgmr.msra.gmra.mrb[0].mxu0 %v1628_v13  ;;  %779 = vmatmul.mubr.bf16.vlgmr.msra.gmra.mrb[0].mxu1 %v1631_v14 }
  0x30   : > { %1394 = vmatprep.mubr.msk.bf16.mxu0 %vm633_vm0, %v1634_v15  ;;  %1402 = vmatprep.mubr.msk.bf16.mxu1 %vm633_vm0, %v1636_v16 }
  0x37   : > { %723 = vmatmul.mubr.bf16.gmra.mrb[4].mxu0 %v1638_v17  ;;  %787 = vmatmul.mubr.bf16.gmra.mrb[4].mxu1 %v1639_v18 }
  0x38   : > { %1395 = vmatprep.mubr.msk.bf16.mxu0 %vm633_vm0, %v1640_v19  ;;  %1403 = vmatprep.mubr.msk.bf16.mxu1 %vm633_vm0, %v1642_v20 }
  0x3f   : > { %731 = vmatmul.mubr.bf16.gmra.mrb[8].mxu0 %v1644_v21  ;;  %795 = vmatmul.mubr.bf16.gmra.mrb[8].mxu1 %v1645_v22 }
  0x40   : > { %1396 = vmatprep.mubr.msk.bf16.mxu0 %vm633_vm0, %v1646_v23  ;;  %1404 = vmatprep.mubr.msk.bf16.mxu1 %vm633_vm0, %v1648_v24 }
  0x47   : > { %739 = vmatmul.mubr.bf16.gmra.mrb[12].mxu0 %v1650_v25  ;;  %803 = vmatmul.mubr.bf16.gmra.mrb[12].mxu1 %v1651_v26 }
  0x48   : > { %1397 = vmatprep.mubr.msk.bf16.mxu0 %vm633_vm0, %v1652_v27  ;;  %1405 = vmatprep.mubr.msk.bf16.mxu1 %vm633_vm0, %v1654_v28 }
  0x4f   : > { %747 = vmatmul.mubr.bf16.gmra.mrb[16].mxu0 %v1656_v29  ;;  %811 = vmatmul.mubr.bf16.gmra.mrb[16].mxu1 %v1657_v30 }
  0x50   : > { %1398 = vmatprep.mubr.msk.bf16.mxu0 %vm633_vm0, %v1658_v31  ;;  %1406 = vmatprep.mubr.msk.bf16.mxu1 %vm633_vm0, %v1660_v32 }
  0x57   : > { %755 = vmatmul.mubr.bf16.gmra.mrb[20].mxu0 %v1662_v33  ;;  %819 = vmatmul.mubr.bf16.gmra.mrb[20].mxu1 %v1663_v34 }
  0x58   : > { %1399 = vmatprep.mubr.msk.bf16.mxu0 %vm633_vm0, %v1664_v35  ;;  %1407 = vmatprep.mubr.msk.bf16.mxu1 %vm633_vm0, %v1666_v36 }
  0x5f   : > { %763 = vmatmul.mubr.bf16.gmra.mrb[24].mxu0 %v1668_v37  ;;  %827 = vmatmul.mubr.bf16.gmra.mrb[24].mxu1 %v1669_v38 }
  0x60   : > { %1400 = vmatprep.mubr.msk.bf16.mxu0 %vm633_vm0, %v1670_v39  ;;  %1408 = vmatprep.mubr.msk.bf16.mxu1 %vm633_vm0, %v1672_v40 }
  0x67   : > { %771 = vmatmul.mubr.bf16.gmra.mrb[28].mxu0 %v1674_v41  ;;  %835 = vmatmul.mubr.bf16.gmra.mrb[28].mxu1 %v1675_v42 }
 0x102   : > { %v716_v44 = vpop.f32.mrb[0].mxu0  ;;  %v780_v46 = vpop.f32.mrb[0].mxu1 }
 0x103   : > { %v949_v47 = vmul.f32 %v1833_v43, %v716_v44  ;;  %v965_v48 = vmul.f32 %v1833_v43, %v780_v46  ;;  %v718_v49 = vpop.f32.mrb[1].mxu0  ;;  %v782_v50 = vpop.f32.mrb[1].mxu1 }
 0x104   : > { %v719_v51 = vpop.f32.mrb[2].mxu0  ;;  %v783_v52 = vpop.f32.mrb[2].mxu1 }
 0x105   : > { %v988_v53 = vadd.f32 %v1838_v45, %v949_v47  ;;  %v1004_v54 = vadd.f32 %v1838_v45, %v965_v48  ;;  %v950_v55 = vmul.f32 %v1833_v43, %v719_v51  ;;  %v966_v56 = vmul.f32 %v1833_v43, %v783_v52  ;;  %v721_v57 = vpop.f32.mrb[3].mxu0  ;;  %v785_v58 = vpop.f32.mrb[3].mxu1 }
 0x107   : > { %v989_v59 = vadd.f32 %v1838_v45, %v950_v55  ;;  %v1005_v60 = vadd.f32 %v1838_v45, %v966_v56  ;;  %v1020_v61 = vmax.f32 %v988_v53, 0.0  ;;  %v1036_v62 = vmax.f32 %v1004_v54, 0.0 }
 0x109   : > { %v1021_v63 = vmax.f32 %v989_v59, 0.0  ;;  %v1037_v0 = vmax.f32 %v1005_v60, 0.0 }
 0x10a   : > { %v724_v1 = vpop.f32.mrb[4].mxu0  ;;  %v788_v2 = vpop.f32.mrb[4].mxu1 }
 0x10b   : > { %v1481_v3 = vpack.c.bf16 %v1021_v63, %v1020_v61  ;;  %v1521_v4 = vpack.c.bf16 %v1037_v0, %v1036_v62  ;;  %v951_v5 = vmul.f32 %v1833_v43, %v724_v1  ;;  %v967_v6 = vmul.f32 %v1833_v43, %v788_v2  ;;  %v726_v7 = vpop.f32.mrb[5].mxu0  ;;  %v790_v8 = vpop.f32.mrb[5].mxu1 }
 0x10c   : > { %v727_v9 = vpop.f32.mrb[6].mxu0  ;;  %v791_v10 = vpop.f32.mrb[6].mxu1 }
 0x10d   : > { %1482 = vst [vmem:[%s1852_s29] sm:$0xff] %v1481_v3   ;;  %1565 = vst [vmem:[%s1852_s29 + $0x40] sm:$0xff] %v1521_v4   ;;  %v990_v11 = vadd.f32 %v1838_v45, %v951_v5  ;;  %v1006_v12 = vadd.f32 %v1838_v45, %v967_v6  ;;  %v952_v13 = vmul.f32 %v1833_v43, %v727_v9  ;;  %v729_v15 = vpop.f32.mrb[7].mxu0  ;;  %v793_v16 = vpop.f32.mrb[7].mxu1 }
 0x10e   : > { %v968_v14 = vmul.f32 %v1833_v43, %v791_v10 }
 0x10f   : > { %v991_v17 = vadd.f32 %v1838_v45, %v952_v13  ;;  %v1022_v19 = vmax.f32 %v990_v11, 0.0  ;;  %v1038_v20 = vmax.f32 %v1006_v12, 0.0 }
 0x110   : > { %v1007_v18 = vadd.f32 %v1838_v45, %v968_v14 }
 0x111   : > { %v1023_v21 = vmax.f32 %v991_v17, 0.0 }
 0x112   : > { %v1039_v22 = vmax.f32 %v1007_v18, 0.0  ;;  %v732_v23 = vpop.f32.mrb[8].mxu0  ;;  %v796_v24 = vpop.f32.mrb[8].mxu1 }
 0x113   : > { %v1486_v25 = vpack.c.bf16 %v1023_v21, %v1022_v19  ;;  %v953_v27 = vmul.f32 %v1833_v43, %v732_v23  ;;  %v969_v28 = vmul.f32 %v1833_v43, %v796_v24  ;;  %v734_v29 = vpop.f32.mrb[9].mxu0  ;;  %v798_v30 = vpop.f32.mrb[9].mxu1 }
 0x114   : > { %v1526_v26 = vpack.c.bf16 %v1039_v22, %v1038_v20  ;;  %v735_v31 = vpop.f32.mrb[10].mxu0  ;;  %v799_v32 = vpop.f32.mrb[10].mxu1 }
 0x115   : > { %1558 = vst [vmem:[%s1852_s29 + $0x8] sm:$0xff] %v1486_v25   ;;  %v992_v33 = vadd.f32 %v1838_v45, %v953_v27  ;;  %v1008_v34 = vadd.f32 %v1838_v45, %v969_v28  ;;  %v954_v35 = vmul.f32 %v1833_v43, %v735_v31  ;;  %v970_v36 = vmul.f32 %v1833_v43, %v799_v32  ;;  %v737_v37 = vpop.f32.mrb[11].mxu0  ;;  %v801_v38 = vpop.f32.mrb[11].mxu1 }
 0x116   : > { %1566 = vst [vmem:[%s1852_s29 + $0x48] sm:$0xff] %v1526_v26  }
 0x117   : > { %v993_v39 = vadd.f32 %v1838_v45, %v954_v35  ;;  %v1009_v40 = vadd.f32 %v1838_v45, %v970_v36  ;;  %v1024_v41 = vmax.f32 %v992_v33, 0.0  ;;  %v1040_v42 = vmax.f32 %v1008_v34, 0.0 }
 0x119   : > { %v1025_v44 = vmax.f32 %v993_v39, 0.0  ;;  %v1041_v46 = vmax.f32 %v1009_v40, 0.0 }
 0x11a   : > { %v740_v47 = vpop.f32.mrb[12].mxu0  ;;  %v804_v48 = vpop.f32.mrb[12].mxu1 }
 0x11b   : > { %v1491_v49 = vpack.c.bf16 %v1025_v44, %v1024_v41  ;;  %v1531_v50 = vpack.c.bf16 %v1041_v46, %v1040_v42  ;;  %v955_v51 = vmul.f32 %v1833_v43, %v740_v47  ;;  %v971_v52 = vmul.f32 %v1833_v43, %v804_v48  ;;  %v742_v53 = vpop.f32.mrb[13].mxu0  ;;  %v806_v54 = vpop.f32.mrb[13].mxu1 }
 0x11c   : > { %v743_v55 = vpop.f32.mrb[14].mxu0  ;;  %v807_v56 = vpop.f32.mrb[14].mxu1 }
 0x11d   : > { %1559 = vst [vmem:[%s1852_s29 + $0x10] sm:$0xff] %v1491_v49   ;;  %1567 = vst [vmem:[%s1852_s29 + $0x50] sm:$0xff] %v1531_v50   ;;  %v994_v57 = vadd.f32 %v1838_v45, %v955_v51  ;;  %v1010_v58 = vadd.f32 %v1838_v45, %v971_v52  ;;  %v956_v59 = vmul.f32 %v1833_v43, %v743_v55  ;;  %v745_v61 = vpop.f32.mrb[15].mxu0  ;;  %v809_v62 = vpop.f32.mrb[15].mxu1 }
 0x11e   : > { %v972_v60 = vmul.f32 %v1833_v43, %v807_v56 }
 0x11f   : > { %v995_v63 = vadd.f32 %v1838_v45, %v956_v59  ;;  %v1026_v1 = vmax.f32 %v994_v57, 0.0  ;;  %v1042_v2 = vmax.f32 %v1010_v58, 0.0 }
 0x120   : > { %v1011_v0 = vadd.f32 %v1838_v45, %v972_v60 }
 0x121   : > { %v1027_v3 = vmax.f32 %v995_v63, 0.0 }
 0x122   : > { %v1043_v4 = vmax.f32 %v1011_v0, 0.0  ;;  %v748_v5 = vpop.f32.mrb[16].mxu0  ;;  %v812_v6 = vpop.f32.mrb[16].mxu1 }
 0x123   : > { %v1496_v7 = vpack.c.bf16 %v1027_v3, %v1026_v1  ;;  %v957_v9 = vmul.f32 %v1833_v43, %v748_v5  ;;  %v973_v10 = vmul.f32 %v1833_v43, %v812_v6  ;;  %v750_v11 = vpop.f32.mrb[17].mxu0  ;;  %v814_v12 = vpop.f32.mrb[17].mxu1 }
 0x124   : > { %v1536_v8 = vpack.c.bf16 %v1043_v4, %v1042_v2  ;;  %v751_v13 = vpop.f32.mrb[18].mxu0  ;;  %v815_v14 = vpop.f32.mrb[18].mxu1 }
 0x125   : > { %1560 = vst [vmem:[%s1852_s29 + $0x18] sm:$0xff] %v1496_v7   ;;  %v996_v15 = vadd.f32 %v1838_v45, %v957_v9  ;;  %v1012_v16 = vadd.f32 %v1838_v45, %v973_v10  ;;  %v958_v17 = vmul.f32 %v1833_v43, %v751_v13  ;;  %v974_v18 = vmul.f32 %v1833_v43, %v815_v14  ;;  %v753_v19 = vpop.f32.mrb[19].mxu0  ;;  %v817_v20 = vpop.f32.mrb[19].mxu1 }
 0x126   : > { %1568 = vst [vmem:[%s1852_s29 + $0x58] sm:$0xff] %v1536_v8  }
 0x127   : > { %v997_v21 = vadd.f32 %v1838_v45, %v958_v17  ;;  %v1013_v22 = vadd.f32 %v1838_v45, %v974_v18  ;;  %v1028_v23 = vmax.f32 %v996_v15, 0.0  ;;  %v1044_v24 = vmax.f32 %v1012_v16, 0.0 }
 0x129   : > { %v1029_v25 = vmax.f32 %v997_v21, 0.0  ;;  %v1045_v26 = vmax.f32 %v1013_v22, 0.0 }
 0x12a   : > { %v756_v27 = vpop.f32.mrb[20].mxu0  ;;  %v820_v28 = vpop.f32.mrb[20].mxu1 }
 0x12b   : > { %v1501_v29 = vpack.c.bf16 %v1029_v25, %v1028_v23  ;;  %v1541_v30 = vpack.c.bf16 %v1045_v26, %v1044_v24  ;;  %v959_v31 = vmul.f32 %v1833_v43, %v756_v27  ;;  %v975_v32 = vmul.f32 %v1833_v43, %v820_v28  ;;  %v758_v33 = vpop.f32.mrb[21].mxu0  ;;  %v822_v34 = vpop.f32.mrb[21].mxu1 }
 0x12c   : > { %v759_v35 = vpop.f32.mrb[22].mxu0  ;;  %v823_v36 = vpop.f32.mrb[22].mxu1 }
 0x12d   : > { %1561 = vst [vmem:[%s1852_s29 + $0x20] sm:$0xff] %v1501_v29   ;;  %1569 = vst [vmem:[%s1852_s29 + $0x60] sm:$0xff] %v1541_v30   ;;  %v998_v37 = vadd.f32 %v1838_v45, %v959_v31  ;;  %v1014_v38 = vadd.f32 %v1838_v45, %v975_v32  ;;  %v960_v39 = vmul.f32 %v1833_v43, %v759_v35  ;;  %v761_v41 = vpop.f32.mrb[23].mxu0  ;;  %v825_v42 = vpop.f32.mrb[23].mxu1 }
 0x12e   : > { %v976_v40 = vmul.f32 %v1833_v43, %v823_v36 }
 0x12f   : > { %v999_v44 = vadd.f32 %v1838_v45, %v960_v39  ;;  %v1030_v47 = vmax.f32 %v998_v37, 0.0  ;;  %v1046_v48 = vmax.f32 %v1014_v38, 0.0 }
 0x130   : > { %v1015_v46 = vadd.f32 %v1838_v45, %v976_v40 }
 0x131   : > { %v1031_v49 = vmax.f32 %v999_v44, 0.0 }
 0x132   : > { %v1047_v50 = vmax.f32 %v1015_v46, 0.0  ;;  %v764_v51 = vpop.f32.mrb[24].mxu0  ;;  %v828_v52 = vpop.f32.mrb[24].mxu1 }
 0x133   : > { %v1506_v53 = vpack.c.bf16 %v1031_v49, %v1030_v47  ;;  %v961_v55 = vmul.f32 %v1833_v43, %v764_v51  ;;  %v977_v56 = vmul.f32 %v1833_v43, %v828_v52  ;;  %v766_v57 = vpop.f32.mrb[25].mxu0  ;;  %v830_v58 = vpop.f32.mrb[25].mxu1 }
 0x134   : > { %v1546_v54 = vpack.c.bf16 %v1047_v50, %v1046_v48  ;;  %v767_v59 = vpop.f32.mrb[26].mxu0  ;;  %v831_v60 = vpop.f32.mrb[26].mxu1 }
 0x135   : > { %1562 = vst [vmem:[%s1852_s29 + $0x28] sm:$0xff] %v1506_v53   ;;  %v1000_v61 = vadd.f32 %v1838_v45, %v961_v55  ;;  %v1016_v62 = vadd.f32 %v1838_v45, %v977_v56  ;;  %v962_v63 = vmul.f32 %v1833_v43, %v767_v59  ;;  %v978_v0 = vmul.f32 %v1833_v43, %v831_v60  ;;  %v769_v1 = vpop.f32.mrb[27].mxu0  ;;  %v833_v2 = vpop.f32.mrb[27].mxu1 }
 0x136   : > { %1570 = vst [vmem:[%s1852_s29 + $0x68] sm:$0xff] %v1546_v54  }
 0x137   : > { %v1001_v3 = vadd.f32 %v1838_v45, %v962_v63  ;;  %v1017_v4 = vadd.f32 %v1838_v45, %v978_v0  ;;  %v1032_v5 = vmax.f32 %v1000_v61, 0.0  ;;  %v1048_v6 = vmax.f32 %v1016_v62, 0.0 }
 0x139   : > { %v1033_v7 = vmax.f32 %v1001_v3, 0.0  ;;  %v1049_v8 = vmax.f32 %v1017_v4, 0.0 }
 0x13a   : > { %v772_v9 = vpop.f32.mrb[28].mxu0  ;;  %v836_v10 = vpop.f32.mrb[28].mxu1 }
 0x13b   : > { %v1511_v11 = vpack.c.bf16 %v1033_v7, %v1032_v5  ;;  %v1551_v12 = vpack.c.bf16 %v1049_v8, %v1048_v6  ;;  %v963_v13 = vmul.f32 %v1833_v43, %v772_v9  ;;  %v979_v14 = vmul.f32 %v1833_v43, %v836_v10  ;;  %v774_v15 = vpop.f32.mrb[29].mxu0  ;;  %v838_v16 = vpop.f32.mrb[29].mxu1 }
 0x13c   : > { %v775_v17 = vpop.f32.mrb[30].mxu0  ;;  %v839_v18 = vpop.f32.mrb[30].mxu1 }
 0x13d   : > { %1563 = vst [vmem:[%s1852_s29 + $0x30] sm:$0xff] %v1511_v11   ;;  %1571 = vst [vmem:[%s1852_s29 + $0x70] sm:$0xff] %v1551_v12   ;;  %v1002_v19 = vadd.f32 %v1838_v45, %v963_v13  ;;  %v1018_v20 = vadd.f32 %v1838_v45, %v979_v14  ;;  %v964_v21 = vmul.f32 %v1833_v43, %v775_v17  ;;  %v777_v23 = vpop.f32.mrb[31].mxu0  ;;  %v841_v24 = vpop.f32.mrb[31].mxu1 }
 0x13e   : > { %v980_v22 = vmul.f32 %v1833_v43, %v839_v18 }
 0x13f   : > { %v1003_v25 = vadd.f32 %v1838_v45, %v964_v21  ;;  %v1034_v27 = vmax.f32 %v1002_v19, 0.0  ;;  %v1050_v28 = vmax.f32 %v1018_v20, 0.0 }
 0x140   : > { %v1019_v26 = vadd.f32 %v1838_v45, %v980_v22 }
 0x141   : > { %v1035_v29 = vmax.f32 %v1003_v25, 0.0 }
 0x142   : > { %v1051_v30 = vmax.f32 %v1019_v26, 0.0 }
 0x143   : > { %v1516_v31 = vpack.c.bf16 %v1035_v29, %v1034_v27 }
 0x144   : > { %v1556_v32 = vpack.c.bf16 %v1051_v30, %v1050_v28 }
 0x145   : > { %1564 = vst [vmem:[%s1852_s29 + $0x38] sm:$0xff] %v1516_v31  }
 0x146   : > { %1572 = vst [vmem:[%s1852_s29 + $0x78] sm:$0xff] %v1556_v32  }
 0x147 PF: > { %s14_s17 = sadd.s32 1, %s1698_s17   ;;  %s1940_s15 = smov %s1694_s16 }
 0x148   : > { %p11_p5 = scmp.ge.s32.totalorder %s14_s17, 4   ;;  %s1941_s16 = smov %s1943_s18 }
 0x14a   :  { %13 = sbr.rel (!%p11_p5) target bundleno = 2 (0x2), region = 83 }

// kernel: resnet_forward.24
= control target key start
LH: loop header
LB: loop body
LE: loop exit
PB: predicated region body
PF: predicated region fallthrough
CT: control target
= control target key end

     0   :  { %vm288_vm0 = vcmask 519168   ;;  %s943_s0 = inlined_call_operand.vmem [shape: bf16[9,128,64], index: 0, kind: input, shape index: {}]   ;;  %s944_s1 = inlined_call_operand.vmem [shape: bf16[128,64], index: 1, kind: output, shape index: {}]  }
   0x1   :  { %v8_v0 = vld [vmem:[%s943_s0] sm:$0xf]  ;;  %v9_v6 = vld [vmem:[%s943_s0 + $0x4] sm:$0xf]  ;;  %v10_v15 = vld [vmem:[%s943_s0 + $0x8] sm:$0xf] }
   0x2   :  { %v309_v1 = vld [vmem:[%s943_s0 + $0x40] sm:$0xf]  ;;  %v310_v7 = vld [vmem:[%s943_s0 + $0x44] sm:$0xf]  ;;  %v311_v16 = vld [vmem:[%s943_s0 + $0x48] sm:$0xf] }
   0x3   :  { %v325_v2 = vld [vmem:[%s943_s0 + $0x80] sm:$0xf]  ;;  %v41_v3 = vmax.bf16 %v309_v1, %v8_v0  ;;  %v326_v8 = vld [vmem:[%s943_s0 + $0x84] sm:$0xf]  ;;  %v42_v10 = vmax.bf16 %v310_v7, %v9_v6  ;;  %v327_v17 = vld [vmem:[%s943_s0 + $0x88] sm:$0xf]  ;;  %v43_v20 = vmax.bf16 %v311_v16, %v10_v15 }
   0x4   :  { %v341_v4 = vld [vmem:[%s943_s0 + $0xc0] sm:$0xf]  ;;  %v342_v13 = vld [vmem:[%s943_s0 + $0xc4] sm:$0xf]  ;;  %v343_v24 = vld [vmem:[%s943_s0 + $0xc8] sm:$0xf] }
   0x5   :  { %v74_v5 = vmax.bf16 %v325_v2, %v41_v3  ;;  %v357_v9 = vld [vmem:[%s943_s0 + $0x100] sm:$0xf]  ;;  %v75_v14 = vmax.bf16 %v326_v8, %v42_v10  ;;  %v358_v19 = vld [vmem:[%s943_s0 + $0x104] sm:$0xf]  ;;  %v76_v26 = vmax.bf16 %v327_v17, %v43_v20  ;;  %v11_v27 = vld [vmem:[%s943_s0 + $0xc] sm:$0xf] }
   0x6   :  { %v373_v12 = vld [vmem:[%s943_s0 + $0x140] sm:$0xf]  ;;  %v374_v23 = vld [vmem:[%s943_s0 + $0x144] sm:$0xf]  ;;  %v312_v28 = vld [vmem:[%s943_s0 + $0x4c] sm:$0xf] }
   0x7   :  { %v107_v11 = vmax.bf16 %v341_v4, %v74_v5  ;;  %v389_v21 = vld [vmem:[%s943_s0 + $0x180] sm:$0xf]  ;;  %v108_v22 = vmax.bf16 %v342_v13, %v75_v14  ;;  %v328_v29 = vld [vmem:[%s943_s0 + $0x8c] sm:$0xf]  ;;  %v359_v33 = vld [vmem:[%s943_s0 + $0x108] sm:$0xf]  ;;  %v44_v34 = vmax.bf16 %v312_v28, %v11_v27  ;;  %v109_v37 = vmax.bf16 %v343_v24, %v76_v26 }
   0x8   :  { %v405_v30 = vld [vmem:[%s943_s0 + $0x1c0] sm:$0xf]  ;;  %v390_v36 = vld [vmem:[%s943_s0 + $0x184] sm:$0xf]  ;;  %v375_v38 = vld [vmem:[%s943_s0 + $0x148] sm:$0xf] }
   0x9   :  { %v140_v18 = vmax.bf16 %v357_v9, %v107_v11  ;;  %v421_v31 = vld [vmem:[%s943_s0 + $0x200] sm:$0xf]  ;;  %v141_v32 = vmax.bf16 %v358_v19, %v108_v22  ;;  %v344_v39 = vld [vmem:[%s943_s0 + $0xcc] sm:$0xf]  ;;  %v77_v41 = vmax.bf16 %v328_v29, %v44_v34  ;;  %v12_v42 = vld [vmem:[%s943_s0 + $0x10] sm:$0xf]  ;;  %v142_v48 = vmax.bf16 %v359_v33, %v109_v37 }
   0xa   :  { %v313_v43 = vld [vmem:[%s943_s0 + $0x50] sm:$0xf]  ;;  %v406_v46 = vld [vmem:[%s943_s0 + $0x1c4] sm:$0xf]  ;;  %v360_v49 = vld [vmem:[%s943_s0 + $0x10c] sm:$0xf] }
   0xb   :  { %v173_v25 = vmax.bf16 %v373_v12, %v140_v18  ;;  %v174_v40 = vmax.bf16 %v374_v23, %v141_v32  ;;  %v329_v44 = vld [vmem:[%s943_s0 + $0x90] sm:$0xf]  ;;  %v422_v47 = vld [vmem:[%s943_s0 + $0x204] sm:$0xf]  ;;  %v45_v50 = vmax.bf16 %v313_v43, %v12_v42  ;;  %v391_v52 = vld [vmem:[%s943_s0 + $0x188] sm:$0xf]  ;;  %v110_v53 = vmax.bf16 %v344_v39, %v77_v41 }
   0xc   :  { %v376_v54 = vld [vmem:[%s943_s0 + $0x14c] sm:$0xf]  ;;  %v345_v55 = vld [vmem:[%s943_s0 + $0xd0] sm:$0xf]  ;;  %v175_v57 = vmax.bf16 %v375_v38, %v142_v48  ;;  %v13_v59 = vld [vmem:[%s943_s0 + $0x14] sm:$0xf] }
   0xd   :  { %v206_v35 = vmax.bf16 %v389_v21, %v173_v25  ;;  %v207_v51 = vmax.bf16 %v390_v36, %v174_v40  ;;  %v78_v58 = vmax.bf16 %v329_v44, %v45_v50  ;;  %v314_v60 = vld [vmem:[%s943_s0 + $0x54] sm:$0xf]  ;;  %v407_v63 = vld [vmem:[%s943_s0 + $0x1c8] sm:$0xf]  ;;  %v143_v1 = vmax.bf16 %v360_v49, %v110_v53  ;;  %v361_v2 = vld [vmem:[%s943_s0 + $0x110] sm:$0xf] }
   0xe   :  { %v330_v61 = vld [vmem:[%s943_s0 + $0x94] sm:$0xf]  ;;  %v423_v0 = vld [vmem:[%s943_s0 + $0x208] sm:$0xf]  ;;  %v46_v3 = vmax.bf16 %v314_v60, %v13_v59  ;;  %v208_v4 = vmax.bf16 %v391_v52, %v175_v57  ;;  %v392_v5 = vld [vmem:[%s943_s0 + $0x18c] sm:$0xf] }
   0xf   :  { %v239_v45 = vmax.bf16 %v405_v30, %v206_v35  ;;  %v240_v62 = vmax.bf16 %v406_v46, %v207_v51  ;;  %v111_v6 = vmax.bf16 %v345_v55, %v78_v58  ;;  %v377_v7 = vld [vmem:[%s943_s0 + $0x150] sm:$0xf]  ;;  %v346_v8 = vld [vmem:[%s943_s0 + $0xd4] sm:$0xf]  ;;  %v176_v10 = vmax.bf16 %v376_v54, %v143_v1  ;;  %v14_v12 = vld [vmem:[%s943_s0 + $0x18] sm:$0xf] }
  0x10   :  { %v79_v11 = vmax.bf16 %v330_v61, %v46_v3  ;;  %v315_v13 = vld [vmem:[%s943_s0 + $0x58] sm:$0xf]  ;;  %v241_v15 = vmax.bf16 %v407_v63, %v208_v4  ;;  %v408_v16 = vld [vmem:[%s943_s0 + $0x1cc] sm:$0xf]  ;;  %v362_v19 = vld [vmem:[%s943_s0 + $0x114] sm:$0xf] }
  0x11   :  { %v272_v56 = vmax.bf16 %v421_v31, %v239_v45  ;;  %v273_v9 = vmax.bf16 %v422_v47, %v240_v62  ;;  %v331_v14 = vld [vmem:[%s943_s0 + $0x98] sm:$0xf]  ;;  %v424_v17 = vld [vmem:[%s943_s0 + $0x20c] sm:$0xf]  ;;  %v144_v18 = vmax.bf16 %v361_v2, %v111_v6  ;;  %v47_v20 = vmax.bf16 %v315_v13, %v14_v12  ;;  %v393_v22 = vld [vmem:[%s943_s0 + $0x190] sm:$0xf] }
  0x12   :  { %v209_v21 = vmax.bf16 %v392_v5, %v176_v10  ;;  %v112_v23 = vmax.bf16 %v346_v8, %v79_v11  ;;  %v378_v24 = vld [vmem:[%s943_s0 + $0x154] sm:$0xf]  ;;  %v347_v25 = vld [vmem:[%s943_s0 + $0xd8] sm:$0xf]  ;;  %v274_v26 = vmax.bf16 %v423_v0, %v241_v15  ;;  %v15_v29 = vld [vmem:[%s943_s0 + $0x1c] sm:$0xf] }
  0x13   :  { %289 = vst.msk [vmem:[%s944_s1] sm:$0xf] %vm288_vm0, %v272_v56  ;;  %290 = vst.msk [vmem:[%s944_s1 + $0x4] sm:$0xf] %vm288_vm0, %v273_v9  ;;  %v177_v27 = vmax.bf16 %v377_v7, %v144_v18  ;;  %v80_v28 = vmax.bf16 %v331_v14, %v47_v20  ;;  %v316_v30 = vld [vmem:[%s943_s0 + $0x5c] sm:$0xf] }
  0x14   :  { %v332_v31 = vld [vmem:[%s943_s0 + $0x9c] sm:$0xf]  ;;  %v242_v32 = vmax.bf16 %v408_v16, %v209_v21  ;;  %v409_v33 = vld [vmem:[%s943_s0 + $0x1d0] sm:$0xf]  ;;  %v145_v35 = vmax.bf16 %v362_v19, %v112_v23  ;;  %v363_v36 = vld [vmem:[%s943_s0 + $0x118] sm:$0xf]  ;;  %v48_v37 = vmax.bf16 %v316_v30, %v15_v29 }
  0x15   :  { %v425_v34 = vld [vmem:[%s943_s0 + $0x210] sm:$0xf]  ;;  %291 = vst.msk [vmem:[%s944_s1 + $0x8] sm:$0xf] %vm288_vm0, %v274_v26  ;;  %v210_v38 = vmax.bf16 %v393_v22, %v177_v27  ;;  %v394_v39 = vld [vmem:[%s943_s0 + $0x194] sm:$0xf]  ;;  %v113_v40 = vmax.bf16 %v347_v25, %v80_v28 }
  0x16   :  { %v379_v41 = vld [vmem:[%s943_s0 + $0x158] sm:$0xf]  ;;  %v348_v42 = vld [vmem:[%s943_s0 + $0xdc] sm:$0xf]  ;;  %v275_v43 = vmax.bf16 %v424_v17, %v242_v32  ;;  %v178_v44 = vmax.bf16 %v378_v24, %v145_v35  ;;  %v81_v45 = vmax.bf16 %v332_v31, %v48_v37  ;;  %v16_v46 = vld [vmem:[%s943_s0 + $0x20] sm:$0xf] }
  0x17   :  { %v317_v47 = vld [vmem:[%s943_s0 + $0x60] sm:$0xf]  ;;  %v243_v49 = vmax.bf16 %v409_v33, %v210_v38  ;;  %v410_v50 = vld [vmem:[%s943_s0 + $0x1d4] sm:$0xf]  ;;  %v146_v52 = vmax.bf16 %v363_v36, %v113_v40  ;;  %v364_v53 = vld [vmem:[%s943_s0 + $0x11c] sm:$0xf] }
  0x18   :  { %v333_v48 = vld [vmem:[%s943_s0 + $0xa0] sm:$0xf]  ;;  %v426_v51 = vld [vmem:[%s943_s0 + $0x214] sm:$0xf]  ;;  %v49_v54 = vmax.bf16 %v317_v47, %v16_v46  ;;  %292 = vst.msk [vmem:[%s944_s1 + $0xc] sm:$0xf] %vm288_vm0, %v275_v43  ;;  %v211_v55 = vmax.bf16 %v394_v39, %v178_v44  ;;  %v114_v57 = vmax.bf16 %v348_v42, %v81_v45 }
  0x19   :  { %v395_v56 = vld [vmem:[%s943_s0 + $0x198] sm:$0xf]  ;;  %v380_v58 = vld [vmem:[%s943_s0 + $0x15c] sm:$0xf]  ;;  %v349_v59 = vld [vmem:[%s943_s0 + $0xe0] sm:$0xf]  ;;  %v276_v60 = vmax.bf16 %v425_v34, %v243_v49  ;;  %v179_v61 = vmax.bf16 %v379_v41, %v146_v52 }
  0x1a   :  { %v82_v62 = vmax.bf16 %v333_v48, %v49_v54  ;;  %v17_v63 = vld [vmem:[%s943_s0 + $0x24] sm:$0xf]  ;;  %v244_v2 = vmax.bf16 %v410_v50, %v211_v55  ;;  %v411_v3 = vld [vmem:[%s943_s0 + $0x1d8] sm:$0xf]  ;;  %v147_v5 = vmax.bf16 %v364_v53, %v114_v57  ;;  %v365_v6 = vld [vmem:[%s943_s0 + $0x120] sm:$0xf] }
  0x1b   :  { %v318_v0 = vld [vmem:[%s943_s0 + $0x64] sm:$0xf]  ;;  %v427_v4 = vld [vmem:[%s943_s0 + $0x218] sm:$0xf]  ;;  %293 = vst.msk [vmem:[%s944_s1 + $0x10] sm:$0xf] %vm288_vm0, %v276_v60  ;;  %v212_v8 = vmax.bf16 %v395_v56, %v179_v61 }
  0x1c   :  { %v334_v1 = vld [vmem:[%s943_s0 + $0xa4] sm:$0xf]  ;;  %v50_v7 = vmax.bf16 %v318_v0, %v17_v63  ;;  %v396_v9 = vld [vmem:[%s943_s0 + $0x19c] sm:$0xf]  ;;  %v115_v10 = vmax.bf16 %v349_v59, %v82_v62  ;;  %v381_v11 = vld [vmem:[%s943_s0 + $0x160] sm:$0xf]  ;;  %v277_v13 = vmax.bf16 %v426_v51, %v244_v2  ;;  %v180_v14 = vmax.bf16 %v380_v58, %v147_v5 }
  0x1d   :  { %v350_v12 = vld [vmem:[%s943_s0 + $0xe4] sm:$0xf]  ;;  %v18_v16 = vld [vmem:[%s943_s0 + $0x28] sm:$0xf]  ;;  %v245_v19 = vmax.bf16 %v411_v3, %v212_v8  ;;  %v412_v20 = vld [vmem:[%s943_s0 + $0x1dc] sm:$0xf] }
  0x1e   :  { %v83_v15 = vmax.bf16 %v334_v1, %v50_v7  ;;  %v319_v17 = vld [vmem:[%s943_s0 + $0x68] sm:$0xf]  ;;  %v428_v21 = vld [vmem:[%s943_s0 + $0x21c] sm:$0xf]  ;;  %v148_v22 = vmax.bf16 %v365_v6, %v115_v10  ;;  %v366_v23 = vld [vmem:[%s943_s0 + $0x124] sm:$0xf]  ;;  %v213_v25 = vmax.bf16 %v396_v9, %v180_v14 }
  0x1f   :  { %v335_v18 = vld [vmem:[%s943_s0 + $0xa8] sm:$0xf]  ;;  %v51_v24 = vmax.bf16 %v319_v17, %v18_v16  ;;  %294 = vst.msk [vmem:[%s944_s1 + $0x14] sm:$0xf] %vm288_vm0, %v277_v13  ;;  %v397_v26 = vld [vmem:[%s943_s0 + $0x1a0] sm:$0xf]  ;;  %v278_v30 = vmax.bf16 %v427_v4, %v245_v19 }
  0x20   :  { %v116_v27 = vmax.bf16 %v350_v12, %v83_v15  ;;  %v382_v28 = vld [vmem:[%s943_s0 + $0x164] sm:$0xf]  ;;  %v351_v29 = vld [vmem:[%s943_s0 + $0xe8] sm:$0xf]  ;;  %v181_v31 = vmax.bf16 %v381_v11, %v148_v22  ;;  %v19_v33 = vld [vmem:[%s943_s0 + $0x2c] sm:$0xf]  ;;  %v246_v36 = vmax.bf16 %v412_v20, %v213_v25 }
  0x21   :  { %v84_v32 = vmax.bf16 %v335_v18, %v51_v24  ;;  %v320_v34 = vld [vmem:[%s943_s0 + $0x6c] sm:$0xf]  ;;  %v413_v37 = vld [vmem:[%s943_s0 + $0x1e0] sm:$0xf]  ;;  %v367_v40 = vld [vmem:[%s943_s0 + $0x128] sm:$0xf] }
  0x22   :  { %v336_v35 = vld [vmem:[%s943_s0 + $0xac] sm:$0xf]  ;;  %v429_v38 = vld [vmem:[%s943_s0 + $0x220] sm:$0xf]  ;;  %v149_v39 = vmax.bf16 %v366_v23, %v116_v27  ;;  %v52_v41 = vmax.bf16 %v320_v34, %v19_v33  ;;  %295 = vst.msk [vmem:[%s944_s1 + $0x18] sm:$0xf] %vm288_vm0, %v278_v30  ;;  %v214_v42 = vmax.bf16 %v397_v26, %v181_v31  ;;  %v279_v47 = vmax.bf16 %v428_v21, %v246_v36 }
  0x23   :  { %v398_v43 = vld [vmem:[%s943_s0 + $0x1a4] sm:$0xf]  ;;  %v117_v44 = vmax.bf16 %v351_v29, %v84_v32  ;;  %v383_v45 = vld [vmem:[%s943_s0 + $0x168] sm:$0xf]  ;;  %v352_v46 = vld [vmem:[%s943_s0 + $0xec] sm:$0xf] }
  0x24   :  { %v182_v48 = vmax.bf16 %v382_v28, %v149_v39  ;;  %v85_v49 = vmax.bf16 %v336_v35, %v52_v41  ;;  %v20_v50 = vld [vmem:[%s943_s0 + $0x30] sm:$0xf]  ;;  %v247_v53 = vmax.bf16 %v413_v37, %v214_v42  ;;  %v414_v54 = vld [vmem:[%s943_s0 + $0x1e4] sm:$0xf]  ;;  %v368_v57 = vld [vmem:[%s943_s0 + $0x12c] sm:$0xf] }
  0x25   :  { %v321_v51 = vld [vmem:[%s943_s0 + $0x70] sm:$0xf]  ;;  %v430_v55 = vld [vmem:[%s943_s0 + $0x224] sm:$0xf]  ;;  %v150_v56 = vmax.bf16 %v367_v40, %v117_v44  ;;  %296 = vst.msk [vmem:[%s944_s1 + $0x1c] sm:$0xf] %vm288_vm0, %v279_v47 }
  0x26   :  { %v337_v52 = vld [vmem:[%s943_s0 + $0xb0] sm:$0xf]  ;;  %v53_v58 = vmax.bf16 %v321_v51, %v20_v50  ;;  %v215_v59 = vmax.bf16 %v398_v43, %v182_v48  ;;  %v399_v60 = vld [vmem:[%s943_s0 + $0x1a8] sm:$0xf]  ;;  %v118_v61 = vmax.bf16 %v352_v46, %v85_v49  ;;  %v384_v62 = vld [vmem:[%s943_s0 + $0x16c] sm:$0xf]  ;;  %v280_v0 = vmax.bf16 %v429_v38, %v247_v53 }
  0x27   :  { %v353_v63 = vld [vmem:[%s943_s0 + $0xf0] sm:$0xf]  ;;  %v183_v1 = vmax.bf16 %v383_v45, %v150_v56  ;;  %v21_v3 = vld [vmem:[%s943_s0 + $0x34] sm:$0xf]  ;;  %v415_v7 = vld [vmem:[%s943_s0 + $0x1e8] sm:$0xf] }
  0x28   :  { %v86_v2 = vmax.bf16 %v337_v52, %v53_v58  ;;  %v322_v4 = vld [vmem:[%s943_s0 + $0x74] sm:$0xf]  ;;  %v248_v6 = vmax.bf16 %v414_v54, %v215_v59  ;;  %v431_v8 = vld [vmem:[%s943_s0 + $0x228] sm:$0xf]  ;;  %v151_v9 = vmax.bf16 %v368_v57, %v118_v61  ;;  %v369_v10 = vld [vmem:[%s943_s0 + $0x130] sm:$0xf] }
  0x29   :  { %v338_v5 = vld [vmem:[%s943_s0 + $0xb4] sm:$0xf]  ;;  %v54_v11 = vmax.bf16 %v322_v4, %v21_v3  ;;  %297 = vst.msk [vmem:[%s944_s1 + $0x20] sm:$0xf] %vm288_vm0, %v280_v0  ;;  %v216_v12 = vmax.bf16 %v399_v60, %v183_v1  ;;  %v400_v13 = vld [vmem:[%s943_s0 + $0x1ac] sm:$0xf] }
  0x2a   :  { %v119_v14 = vmax.bf16 %v353_v63, %v86_v2  ;;  %v385_v15 = vld [vmem:[%s943_s0 + $0x170] sm:$0xf]  ;;  %v354_v16 = vld [vmem:[%s943_s0 + $0xf4] sm:$0xf]  ;;  %v281_v17 = vmax.bf16 %v430_v55, %v248_v6  ;;  %v184_v18 = vmax.bf16 %v384_v62, %v151_v9  ;;  %v22_v20 = vld [vmem:[%s943_s0 + $0x38] sm:$0xf] }
  0x2b   :  { %v87_v19 = vmax.bf16 %v338_v5, %v54_v11  ;;  %v323_v21 = vld [vmem:[%s943_s0 + $0x78] sm:$0xf]  ;;  %v249_v23 = vmax.bf16 %v415_v7, %v216_v12  ;;  %v416_v24 = vld [vmem:[%s943_s0 + $0x1ec] sm:$0xf]  ;;  %v370_v27 = vld [vmem:[%s943_s0 + $0x134] sm:$0xf] }
  0x2c   :  { %v339_v22 = vld [vmem:[%s943_s0 + $0xb8] sm:$0xf]  ;;  %v432_v25 = vld [vmem:[%s943_s0 + $0x22c] sm:$0xf]  ;;  %v152_v26 = vmax.bf16 %v369_v10, %v119_v14  ;;  %v55_v28 = vmax.bf16 %v323_v21, %v22_v20  ;;  %298 = vst.msk [vmem:[%s944_s1 + $0x24] sm:$0xf] %vm288_vm0, %v281_v17  ;;  %v217_v29 = vmax.bf16 %v400_v13, %v184_v18 }
  0x2d   :  { %v401_v30 = vld [vmem:[%s943_s0 + $0x1b0] sm:$0xf]  ;;  %v120_v31 = vmax.bf16 %v354_v16, %v87_v19  ;;  %v386_v32 = vld [vmem:[%s943_s0 + $0x174] sm:$0xf]  ;;  %v355_v33 = vld [vmem:[%s943_s0 + $0xf8] sm:$0xf]  ;;  %v282_v34 = vmax.bf16 %v431_v8, %v249_v23 }
  0x2e   :  { %v185_v35 = vmax.bf16 %v385_v15, %v152_v26  ;;  %v88_v36 = vmax.bf16 %v339_v22, %v55_v28  ;;  %v23_v37 = vld [vmem:[%s943_s0 + $0x3c] sm:$0xf]  ;;  %v250_v40 = vmax.bf16 %v416_v24, %v217_v29  ;;  %v417_v41 = vld [vmem:[%s943_s0 + $0x1f0] sm:$0xf]  ;;  %v371_v43 = vld [vmem:[%s943_s0 + $0x138] sm:$0xf] }
  0x2f   :  { %v324_v38 = vld [vmem:[%s943_s0 + $0x7c] sm:$0xf]  ;;  %v153_v42 = vmax.bf16 %v370_v27, %v120_v31  ;;  %299 = vst.msk [vmem:[%s944_s1 + $0x28] sm:$0xf] %vm288_vm0, %v282_v34  ;;  %v402_v46 = vld [vmem:[%s943_s0 + $0x1b4] sm:$0xf] }
  0x30   :  { %v340_v39 = vld [vmem:[%s943_s0 + $0xbc] sm:$0xf]  ;;  %v56_v44 = vmax.bf16 %v324_v38, %v23_v37  ;;  %v218_v45 = vmax.bf16 %v401_v30, %v185_v35  ;;  %v121_v47 = vmax.bf16 %v355_v33, %v88_v36  ;;  %v283_v49 = vmax.bf16 %v432_v25, %v250_v40  ;;  %v433_v50 = vld [vmem:[%s943_s0 + $0x230] sm:$0xf]  ;;  %v387_v52 = vld [vmem:[%s943_s0 + $0x178] sm:$0xf] }
  0x31   :  { %v356_v48 = vld [vmem:[%s943_s0 + $0xfc] sm:$0xf]  ;;  %v186_v51 = vmax.bf16 %v386_v32, %v153_v42  ;;  %v418_v55 = vld [vmem:[%s943_s0 + $0x1f4] sm:$0xf]  ;;  %v403_v59 = vld [vmem:[%s943_s0 + $0x1b8] sm:$0xf] }
  0x32   :  { %v89_v53 = vmax.bf16 %v340_v39, %v56_v44  ;;  %v251_v54 = vmax.bf16 %v417_v41, %v218_v45  ;;  %v154_v56 = vmax.bf16 %v371_v43, %v121_v47  ;;  %v372_v57 = vld [vmem:[%s943_s0 + $0x13c] sm:$0xf]  ;;  %300 = vst.msk [vmem:[%s944_s1 + $0x2c] sm:$0xf] %vm288_vm0, %v283_v49  ;;  %v434_v62 = vld [vmem:[%s943_s0 + $0x234] sm:$0xf] }
  0x33   :  { %v219_v58 = vmax.bf16 %v402_v46, %v186_v51  ;;  %v388_v0 = vld [vmem:[%s943_s0 + $0x17c] sm:$0xf]  ;;  %v419_v2 = vld [vmem:[%s943_s0 + $0x1f8] sm:$0xf] }
  0x34   :  { %v122_v60 = vmax.bf16 %v356_v48, %v89_v53  ;;  %v284_v61 = vmax.bf16 %v433_v50, %v251_v54  ;;  %v187_v63 = vmax.bf16 %v387_v52, %v154_v56  ;;  %v404_v5 = vld [vmem:[%s943_s0 + $0x1bc] sm:$0xf]  ;;  %v435_v7 = vld [vmem:[%s943_s0 + $0x238] sm:$0xf] }
  0x35   :  { %v252_v1 = vmax.bf16 %v418_v55, %v219_v58  ;;  %v420_v10 = vld [vmem:[%s943_s0 + $0x1fc] sm:$0xf] }
  0x36   :  { %v155_v3 = vmax.bf16 %v372_v57, %v122_v60  ;;  %301 = vst.msk [vmem:[%s944_s1 + $0x30] sm:$0xf] %vm288_vm0, %v284_v61  ;;  %v220_v4 = vmax.bf16 %v403_v59, %v187_v63  ;;  %v436_v13 = vld [vmem:[%s943_s0 + $0x23c] sm:$0xf] }
  0x37   :  { %v285_v6 = vmax.bf16 %v434_v62, %v252_v1 }
  0x38   :  { %v188_v8 = vmax.bf16 %v388_v0, %v155_v3  ;;  %v253_v9 = vmax.bf16 %v419_v2, %v220_v4 }
  0x39   :  { %302 = vst.msk [vmem:[%s944_s1 + $0x34] sm:$0xf] %vm288_vm0, %v285_v6 }
  0x3a   :  { %v221_v11 = vmax.bf16 %v404_v5, %v188_v8  ;;  %v286_v12 = vmax.bf16 %v435_v7, %v253_v9 }
  0x3c   :  { %v254_v14 = vmax.bf16 %v420_v10, %v221_v11  ;;  %303 = vst.msk [vmem:[%s944_s1 + $0x38] sm:$0xf] %vm288_vm0, %v286_v12 }
  0x3e   :  { %v287_v15 = vmax.bf16 %v436_v13, %v254_v14 }
  0x40   :  { %304 = vst.msk [vmem:[%s944_s1 + $0x3c] sm:$0xf] %vm288_vm0, %v287_v15 }

// kernel: resnet_forward.25
= control target key start
LH: loop header
LB: loop body
LE: loop exit
PB: predicated region body
PF: predicated region fallthrough
CT: control target
= control target key end

     0   :  { %vm590_vm0 = vcmask 523264   ;;  %s1895_s1 = inlined_call_operand.vmem [shape: bf16[576,128], index: 1, kind: input, shape index: {}]   ;;  %s1896_s0 = inlined_call_operand.vmem [shape: bf16[128,576], index: 0, kind: input, shape index: {}]   ;;  %s1897_s2 = inlined_call_operand.vmem [shape: f32[1,128], index: 2, kind: input, shape index: {}]   ;;  %s1898_s3 = inlined_call_operand.vmem [shape: f32[1,128], index: 3, kind: input, shape index: {}]   ;;  %s1899_s4 = inlined_call_operand.vmem [shape: bf16[128,128], index: 4, kind: output, shape index: {}]  }
   0x1   :  { %v1440_v0 = vld [vmem:[%s1895_s1 + $0x40] sm:$0xff]   ;;  %v1444_v4 = vld [vmem:[%s1895_s1 + $0x48] sm:$0xff]   ;;  %v1448_v8 = vld [vmem:[%s1895_s1 + $0x50] sm:$0xff]  }
   0x2   :  { %v1441_v1 = vld [vmem:[%s1895_s1 + $0xc0] sm:$0xff]   ;;  %1268 = vmatprep.subr.bf16.mxu0 %v1440_v0  ;;  %v1445_v5 = vld [vmem:[%s1895_s1 + $0xc8] sm:$0xff]   ;;  %v1449_v9 = vld [vmem:[%s1895_s1 + $0xd0] sm:$0xff]  }
   0x3   :  { %v1442_v2 = vld [vmem:[%s1895_s1] sm:$0xff]   ;;  %1332 = vmatprep.subr.bf16.mxu1 %v1441_v1  ;;  %v1446_v6 = vld [vmem:[%s1895_s1 + $0x8] sm:$0xff]   ;;  %v1450_v10 = vld [vmem:[%s1895_s1 + $0x10] sm:$0xff]  }
   0x4   :  { %v1443_v3 = vld [vmem:[%s1895_s1 + $0x80] sm:$0xff]   ;;  %1269 = vmatpush3.bf16.msra.mxu0 %v1442_v2  ;;  %v1447_v7 = vld [vmem:[%s1895_s1 + $0x88] sm:$0xff]   ;;  %v1451_v11 = vld [vmem:[%s1895_s1 + $0x90] sm:$0xff]  }
   0x5   :  { %1333 = vmatpush3.bf16.msra.mxu1 %v1443_v3  ;;  %1270 = vmatprep.subr.bf16.mxu0 %v1444_v4  ;;  %v1452_v12 = vld [vmem:[%s1895_s1 + $0x58] sm:$0xff]   ;;  %v1456_v16 = vld [vmem:[%s1895_s1 + $0x60] sm:$0xff]   ;;  %v1460_v20 = vld [vmem:[%s1895_s1 + $0x68] sm:$0xff]  }
   0x6   :  { %1334 = vmatprep.subr.bf16.mxu1 %v1445_v5  ;;  %v1453_v13 = vld [vmem:[%s1895_s1 + $0xd8] sm:$0xff]   ;;  %v1457_v17 = vld [vmem:[%s1895_s1 + $0xe0] sm:$0xff]   ;;  %v1461_v21 = vld [vmem:[%s1895_s1 + $0xe8] sm:$0xff]  }
   0x7   :  { %v1454_v14 = vld [vmem:[%s1895_s1 + $0x18] sm:$0xff]   ;;  %v1458_v18 = vld [vmem:[%s1895_s1 + $0x20] sm:$0xff]   ;;  %v1462_v22 = vld [vmem:[%s1895_s1 + $0x28] sm:$0xff]  }
   0x8   :  { %1271 = vmatpush3.bf16.msra.mxu0 %v1446_v6  ;;  %v1455_v15 = vld [vmem:[%s1895_s1 + $0x98] sm:$0xff]   ;;  %v1459_v19 = vld [vmem:[%s1895_s1 + $0xa0] sm:$0xff]   ;;  %v1463_v23 = vld [vmem:[%s1895_s1 + $0xa8] sm:$0xff]  }
   0x9   :  { %1335 = vmatpush3.bf16.msra.mxu1 %v1447_v7  ;;  %1272 = vmatprep.subr.bf16.mxu0 %v1448_v8  ;;  %v1464_v24 = vld [vmem:[%s1895_s1 + $0x70] sm:$0xff]   ;;  %v1468_v28 = vld [vmem:[%s1895_s1 + $0x78] sm:$0xff]   ;;  %v1477_v35 = vld [vmem:[%s1896_s0 + $0xc] ss:$20 sps:$4 sm:$0xff]  }
   0xa   :  { %1336 = vmatprep.subr.bf16.mxu1 %v1449_v9  ;;  %v1465_v25 = vld [vmem:[%s1895_s1 + $0xf0] sm:$0xff]   ;;  %v1469_v29 = vld [vmem:[%s1895_s1 + $0xf8] sm:$0xff]   ;;  %v1478_v36 = vld [vmem:[%s1895_s1 + $0x100] sm:$0xff]   ;;  %744 = vmatprep.mubr.bf16.mxu1 %v1477_v35 }
   0xb   :  { %v1466_v26 = vld [vmem:[%s1895_s1 + $0x30] sm:$0xff]   ;;  %v1470_v30 = vld [vmem:[%s1895_s1 + $0x38] sm:$0xff]   ;;  %v1479_v37 = vld [vmem:[%s1896_s0 + $0x2c] ss:$20 sps:$4 sm:$0xff]  }
   0xc   :  { %1273 = vmatpush3.bf16.msra.mxu0 %v1450_v10  ;;  %v1467_v27 = vld [vmem:[%s1895_s1 + $0xb0] sm:$0xff]   ;;  %v1471_v31 = vld [vmem:[%s1895_s1 + $0xb8] sm:$0xff]   ;;  %v1491_v42 = vld [vmem:[%s1895_s1 + $0x108] sm:$0xff]  }
   0xd   :  { %1337 = vmatpush3.bf16.msra.mxu1 %v1451_v11  ;;  %1274 = vmatprep.subr.bf16.mxu0 %v1452_v12  ;;  %v1472_v32 = vld [vmem:[%s1896_s0] ss:$20 sps:$4 sm:$0xff]   ;;  %v1474_v33 = vld [vmem:[%s1896_s0 + $0x4] ss:$20 sps:$4 sm:$0xff]   ;;  %v1475_v34 = vld [vmem:[%s1896_s0 + $0x8] ss:$20 sps:$4 sm:$0xff]  }
   0xe   :  { %1338 = vmatprep.subr.bf16.mxu1 %v1453_v13  ;;  %647 = vmatprep.mubr.bf16.mxu0 %v1474_v33  ;;  %v1481_v38 = vld [vmem:[%s1896_s0 + $0x34] ss:$20 sps:$4 sm:$0xff]   ;;  %v1484_v40 = vld [vmem:[%s1896_s0 + $0x30] ss:$20 sps:$4 sm:$0xff]   ;;  %v1490_v45 = vld [vmem:[%s1896_s0 + $0x58] ss:$20 sps:$4 sm:$0xff]  }
   0xf   :  { %v1483_v39 = vld [vmem:[%s1896_s0 + $0x28] ss:$20 sps:$4 sm:$0xff]   ;;  %v1489_v44 = vld [vmem:[%s1896_s0 + $0x50] ss:$20 sps:$4 sm:$0xff]   ;;  %v1496_v50 = vld [vmem:[%s1896_s0 + $0x78] ss:$20 sps:$4 sm:$0xff]  }
  0x10   :  { %1275 = vmatpush3.bf16.msra.mxu0 %v1454_v14  ;;  %v1485_v41 = vld [vmem:[%s1896_s0 + $0x54] ss:$20 sps:$4 sm:$0xff]   ;;  %v1487_v43 = vld [vmem:[%s1896_s0 + $0x5c] ss:$20 sps:$4 sm:$0xff]   ;;  %v1494_v48 = vld [vmem:[%s1896_s0 + $0x84] ss:$20 sps:$4 sm:$0xff]  }
  0x11   :  { %1339 = vmatpush3.bf16.msra.mxu1 %v1455_v15  ;;  %1276 = vmatprep.subr.bf16.mxu0 %v1456_v16  ;;  %v1504_v46 = vld [vmem:[%s1895_s1 + $0x110] sm:$0xff]   ;;  %v1517_v49 = vld [vmem:[%s1895_s1 + $0x118] sm:$0xff]   ;;  %v1500_v53 = vld [vmem:[%s1896_s0 + $0xac] ss:$20 sps:$4 sm:$0xff]  }
  0x12   :  { %1340 = vmatprep.subr.bf16.mxu1 %v1457_v17  ;;  %v1492_v47 = vld [vmem:[%s1896_s0 + $0x7c] ss:$20 sps:$4 sm:$0xff]   ;;  %v1497_v51 = vld [vmem:[%s1896_s0 + $0x80] ss:$20 sps:$4 sm:$0xff]   ;;  %v1498_v52 = vld [vmem:[%s1896_s0 + $0xa4] ss:$20 sps:$4 sm:$0xff]  }
  0x13   :  { %v1502_v54 = vld [vmem:[%s1896_s0 + $0xa0] ss:$20 sps:$4 sm:$0xff]   ;;  %v1503_v55 = vld [vmem:[%s1896_s0 + $0xa8] ss:$20 sps:$4 sm:$0xff]   ;;  %v1510_v59 = vld [vmem:[%s1896_s0 + $0xd0] ss:$20 sps:$4 sm:$0xff]  }
  0x14   :  { %1277 = vmatpush3.bf16.msra.mxu0 %v1458_v18  ;;  %v1505_v56 = vld [vmem:[%s1896_s0 + $0xcc] ss:$20 sps:$4 sm:$0xff]   ;;  %v1507_v57 = vld [vmem:[%s1896_s0 + $0xd4] ss:$20 sps:$4 sm:$0xff]   ;;  %v1513_v61 = vld [vmem:[%s1896_s0 + $0xfc] ss:$20 sps:$4 sm:$0xff]  }
  0x15   :  { %1341 = vmatpush3.bf16.msra.mxu1 %v1459_v19  ;;  %1278 = vmatprep.subr.bf16.mxu0 %v1460_v20  ;;  %v1509_v58 = vld [vmem:[%s1896_s0 + $0xc8] ss:$20 sps:$4 sm:$0xff]   ;;  %v1515_v62 = vld [vmem:[%s1896_s0 + $0xf0] ss:$20 sps:$4 sm:$0xff]   ;;  %v1516_v63 = vld [vmem:[%s1896_s0 + $0xf8] ss:$20 sps:$4 sm:$0xff]  }
  0x16   :  { %1342 = vmatprep.subr.bf16.mxu1 %v1461_v21  ;;  %v1511_v60 = vld [vmem:[%s1896_s0 + $0xf4] ss:$20 sps:$4 sm:$0xff]   ;;  %v1518_v0 = vld [vmem:[%s1896_s0 + $0x11c] ss:$20 sps:$4 sm:$0xff]   ;;  %v1520_v1 = vld [vmem:[%s1896_s0 + $0x124] ss:$20 sps:$4 sm:$0xff]  }
  0x17   :  { %v1522_v2 = vld [vmem:[%s1896_s0 + $0x118] ss:$20 sps:$4 sm:$0xff]   ;;  %v1523_v3 = vld [vmem:[%s1896_s0 + $0x120] ss:$20 sps:$4 sm:$0xff]   ;;  %v1524_v4 = vld [vmem:[%s1896_s0 + $0x10] ss:$20 sps:$4 sm:$0xff]  }
  0x18   :  { %1279 = vmatpush3.bf16.msra.mxu0 %v1462_v22  ;;  %v1525_v5 = vld [vmem:[%s1896_s0 + $0xb0] ss:$20 sps:$4 sm:$0xff]   ;;  %v1526_v6 = vld [vmem:[%s1896_s0 + $0x38] ss:$20 sps:$4 sm:$0xff]   ;;  %v1528_v8 = vld [vmem:[%s1896_s0 + $0x60] ss:$20 sps:$4 sm:$0xff]  }
  0x19   :  { %1343 = vmatpush3.bf16.msra.mxu1 %v1463_v23  ;;  %1280 = vmatprep.subr.bf16.mxu0 %v1464_v24  ;;  %v1527_v7 = vld [vmem:[%s1896_s0 + $0xd8] ss:$20 sps:$4 sm:$0xff]   ;;  %v1529_v9 = vld [vmem:[%s1896_s0 + $0x100] ss:$20 sps:$4 sm:$0xff]   ;;  %v1530_v10 = vld [vmem:[%s1896_s0 + $0x88] ss:$20 sps:$4 sm:$0xff]  }
  0x1a   :  { %1344 = vmatprep.subr.bf16.mxu1 %v1465_v25  ;;  %v1531_v11 = vld [vmem:[%s1896_s0 + $0x128] ss:$20 sps:$4 sm:$0xff]  }
  0x1c   :  { %1281 = vmatpush3.bf16.msra.mxu0 %v1466_v26 }
  0x1d   :  { %1345 = vmatpush3.bf16.msra.mxu1 %v1467_v27  ;;  %1282 = vmatprep.subr.bf16.mxu0 %v1468_v28 }
  0x1e   :  { %1346 = vmatprep.subr.bf16.mxu1 %v1469_v29 }
  0x20   :  { %1283 = vmatpush3.bf16.msra.mxu0 %v1470_v30 }
  0x21   :  { %1347 = vmatpush3.bf16.msra.mxu1 %v1471_v31  ;;  %1408 = vmatprep.subr.bf16.mxu0 %v1478_v36 }
  0x22   :  { %1432 = vmatprep.subr.bf16.mxu1 %v1478_v36 }
  0x23   :  { %648 = vmatmul.mubr.bf16.vlgmr.msra.gmra.mrb[0].mxu0 %v1472_v32 }
  0x24   :  { %745 = vmatmul.mubr.bf16.vlgmr.msra.gmra.mrb[0].mxu1 %v1475_v34  ;;  %1409 = vmatpush3.bf16.msra.mxu0 %v1478_v36 }
  0x25   :  { %1436 = vmatpush3.bf16.msra.mxu1 %v1478_v36  ;;  %655 = vmatprep.mubr.bf16.mxu0 %v1479_v37 }
  0x26   :  { %752 = vmatprep.mubr.bf16.mxu1 %v1481_v38  ;;  %1410 = vmatprep.subr.bf16.mxu0 %v1491_v42 }
  0x27   :  { %1433 = vmatprep.subr.bf16.mxu1 %v1491_v42 }
  0x28   :  { %1411 = vmatpush3.bf16.msra.mxu0 %v1491_v42 }
  0x29   :  { %1437 = vmatpush3.bf16.msra.mxu1 %v1491_v42  ;;  %1412 = vmatprep.subr.bf16.mxu0 %v1504_v46 }
  0x2a   :  { %1434 = vmatprep.subr.bf16.mxu1 %v1504_v46 }
  0x2b   :  { %656 = vmatmul.mubr.bf16.gmra.mrb[4].mxu0 %v1483_v39 }
  0x2c   :  { %753 = vmatmul.mubr.bf16.gmra.mrb[4].mxu1 %v1484_v40  ;;  %663 = vmatprep.mubr.bf16.mxu0 %v1485_v41 }
  0x2d   :  { %760 = vmatprep.mubr.bf16.mxu1 %v1487_v43  ;;  %1413 = vmatpush3.bf16.msra.mxu0 %v1504_v46 }
  0x2e   :  { %1438 = vmatpush3.bf16.msra.mxu1 %v1504_v46  ;;  %1414 = vmatprep.subr.bf16.mxu0 %v1517_v49 }
  0x2f   :  { %1435 = vmatprep.subr.bf16.mxu1 %v1517_v49 }
  0x31   :  { %1415 = vmatpush3.bf16.msra.mxu0 %v1517_v49 }
  0x32   :  { %1439 = vmatpush3.bf16.msra.mxu1 %v1517_v49 }
  0x33   :  { %664 = vmatmul.mubr.bf16.gmra.mrb[8].mxu0 %v1489_v44 }
  0x34   :  { %761 = vmatmul.mubr.bf16.gmra.mrb[8].mxu1 %v1490_v45  ;;  %671 = vmatprep.mubr.bf16.mxu0 %v1492_v47 }
  0x35   :  { %768 = vmatprep.mubr.bf16.mxu1 %v1494_v48 }
  0x3b   :  { %672 = vmatmul.mubr.bf16.gmra.mrb[12].mxu0 %v1496_v50 }
  0x3c   :  { %769 = vmatmul.mubr.bf16.gmra.mrb[12].mxu1 %v1497_v51  ;;  %679 = vmatprep.mubr.bf16.mxu0 %v1498_v52 }
  0x3d   :  { %776 = vmatprep.mubr.bf16.mxu1 %v1500_v53 }
  0x43   :  { %680 = vmatmul.mubr.bf16.gmra.mrb[16].mxu0 %v1502_v54 }
  0x44   :  { %777 = vmatmul.mubr.bf16.gmra.mrb[16].mxu1 %v1503_v55  ;;  %687 = vmatprep.mubr.bf16.mxu0 %v1505_v56 }
  0x45   :  { %784 = vmatprep.mubr.bf16.mxu1 %v1507_v57 }
  0x4b   :  { %688 = vmatmul.mubr.bf16.gmra.mrb[20].mxu0 %v1509_v58 }
  0x4c   :  { %785 = vmatmul.mubr.bf16.gmra.mrb[20].mxu1 %v1510_v59  ;;  %695 = vmatprep.mubr.bf16.mxu0 %v1511_v60 }
  0x4d   :  { %792 = vmatprep.mubr.bf16.mxu1 %v1513_v61 }
  0x53   :  { %696 = vmatmul.mubr.bf16.gmra.mrb[24].mxu0 %v1515_v62 }
  0x54   :  { %793 = vmatmul.mubr.bf16.gmra.mrb[24].mxu1 %v1516_v63  ;;  %703 = vmatprep.mubr.bf16.mxu0 %v1518_v0 }
  0x55   :  { %800 = vmatprep.mubr.bf16.mxu1 %v1520_v1 }
  0x5b   :  { %704 = vmatmul.mubr.bf16.gmra.mrb[28].mxu0 %v1522_v2 }
  0x5c   :  { %801 = vmatmul.mubr.bf16.gmra.mrb[28].mxu1 %v1523_v3  ;;  %1416 = vmatprep.mubr.msk.bf16.mxu0 %vm590_vm0, %v1524_v4 }
  0x5d   :  { %1424 = vmatprep.mubr.msk.bf16.mxu1 %vm590_vm0, %v1525_v5 }
  0x63   :  { %1417 = vmatmul.mubr.msk.bf16.vlgmr.msra.gmra.mrb[32].mxu0 %vm590_vm0, %v1526_v6 }
  0x64   :  { %1425 = vmatmul.mubr.msk.bf16.vlgmr.msra.gmra.mrb[32].mxu1 %vm590_vm0, %v1527_v7  ;;  %1420 = vmatprep.mubr.msk.bf16.mxu0 %vm590_vm0, %v1528_v8 }
  0x65   :  { %1428 = vmatprep.mubr.msk.bf16.mxu1 %vm590_vm0, %v1529_v9 }
  0x6b   :  { %1421 = vmatmul.mubr.msk.bf16.gmra.mrb[36].mxu0 %vm590_vm0, %v1530_v10 }
  0x6c   :  { %1429 = vmatmul.mubr.msk.bf16.gmra.mrb[36].mxu1 %vm590_vm0, %v1531_v11 }
  0xf6   :  { %v1284_v12 = vpop.f32.mrb[0].mxu0 }
  0xf7   :  { %v1348_v13 = vpop.f32.mrb[0].mxu1  ;;  %v1285_v14 = vpop.f32.mrb[1].mxu0 }
  0xf8   :  { %v1286_v15 = vadd.f32 %v1285_v14, %v1284_v12  ;;  %v1349_v16 = vpop.f32.mrb[1].mxu1  ;;  %v1287_v17 = vpop.f32.mrb[2].mxu0 }
  0xf9   :  { %v1350_v18 = vadd.f32 %v1349_v16, %v1348_v13  ;;  %v1351_v19 = vpop.f32.mrb[2].mxu1  ;;  %v1288_v20 = vpop.f32.mrb[3].mxu0 }
  0xfa   :  { %v1289_v21 = vadd.f32 %v1288_v20, %v1287_v17  ;;  %v1352_v22 = vpop.f32.mrb[3].mxu1 }
  0xfb   :  { %v1353_v23 = vadd.f32 %v1352_v22, %v1351_v19  ;;  %v1793_v24 = vadd.f32 %v1350_v18, %v1286_v15 }
  0xfd   :  { %v1795_v25 = vadd.f32 %v1353_v23, %v1289_v21 }
  0xfe   :  { %v1290_v26 = vpop.f32.mrb[4].mxu0 }
  0xff   :  { %v1354_v27 = vpop.f32.mrb[4].mxu1  ;;  %v1291_v28 = vpop.f32.mrb[5].mxu0 }
 0x100   :  { %v1292_v29 = vadd.f32 %v1291_v28, %v1290_v26  ;;  %v1355_v30 = vpop.f32.mrb[5].mxu1  ;;  %v1293_v31 = vpop.f32.mrb[6].mxu0 }
 0x101   :  { %v1356_v32 = vadd.f32 %v1355_v30, %v1354_v27  ;;  %v1357_v33 = vpop.f32.mrb[6].mxu1  ;;  %v1294_v34 = vpop.f32.mrb[7].mxu0 }
 0x102   :  { %v1295_v35 = vadd.f32 %v1294_v34, %v1293_v31  ;;  %v1358_v36 = vpop.f32.mrb[7].mxu1 }
 0x103   :  { %v1359_v37 = vadd.f32 %v1358_v36, %v1357_v33  ;;  %v1797_v38 = vadd.f32 %v1356_v32, %v1292_v29 }
 0x105   :  { %v1799_v39 = vadd.f32 %v1359_v37, %v1295_v35 }
 0x106   :  { %v1296_v40 = vpop.f32.mrb[8].mxu0 }
 0x107   :  { %v1360_v41 = vpop.f32.mrb[8].mxu1  ;;  %v1297_v42 = vpop.f32.mrb[9].mxu0 }
 0x108   :  { %v1298_v43 = vadd.f32 %v1297_v42, %v1296_v40  ;;  %v1361_v44 = vpop.f32.mrb[9].mxu1  ;;  %v1299_v45 = vpop.f32.mrb[10].mxu0 }
 0x109   :  { %v1362_v46 = vadd.f32 %v1361_v44, %v1360_v41  ;;  %v1363_v47 = vpop.f32.mrb[10].mxu1  ;;  %v1300_v48 = vpop.f32.mrb[11].mxu0 }
 0x10a   :  { %v1301_v49 = vadd.f32 %v1300_v48, %v1299_v45  ;;  %v1364_v50 = vpop.f32.mrb[11].mxu1 }
 0x10b   :  { %v1365_v51 = vadd.f32 %v1364_v50, %v1363_v47  ;;  %v1801_v52 = vadd.f32 %v1362_v46, %v1298_v43 }
 0x10d   :  { %v1803_v53 = vadd.f32 %v1365_v51, %v1301_v49 }
 0x10e   :  { %v1302_v54 = vpop.f32.mrb[12].mxu0 }
 0x10f   :  { %v1366_v55 = vpop.f32.mrb[12].mxu1  ;;  %v1303_v56 = vpop.f32.mrb[13].mxu0 }
 0x110   :  { %v1304_v57 = vadd.f32 %v1303_v56, %v1302_v54  ;;  %v1367_v58 = vpop.f32.mrb[13].mxu1  ;;  %v1305_v59 = vpop.f32.mrb[14].mxu0 }
 0x111   :  { %v1368_v60 = vadd.f32 %v1367_v58, %v1366_v55  ;;  %v1369_v61 = vpop.f32.mrb[14].mxu1  ;;  %v1306_v62 = vpop.f32.mrb[15].mxu0 }
 0x112   :  { %v1307_v63 = vadd.f32 %v1306_v62, %v1305_v59  ;;  %v1370_v0 = vpop.f32.mrb[15].mxu1 }
 0x113   :  { %v1371_v1 = vadd.f32 %v1370_v0, %v1369_v61  ;;  %v1805_v2 = vadd.f32 %v1368_v60, %v1304_v57 }
 0x115   :  { %v1807_v3 = vadd.f32 %v1371_v1, %v1307_v63 }
 0x116   :  { %v1308_v4 = vpop.f32.mrb[16].mxu0 }
 0x117   :  { %v1372_v5 = vpop.f32.mrb[16].mxu1  ;;  %v1309_v6 = vpop.f32.mrb[17].mxu0 }
 0x118   :  { %v1310_v7 = vadd.f32 %v1309_v6, %v1308_v4  ;;  %v1373_v8 = vpop.f32.mrb[17].mxu1  ;;  %v1311_v9 = vpop.f32.mrb[18].mxu0 }
 0x119   :  { %v1374_v10 = vadd.f32 %v1373_v8, %v1372_v5  ;;  %v1375_v11 = vpop.f32.mrb[18].mxu1  ;;  %v1312_v12 = vpop.f32.mrb[19].mxu0  ;;  %v1820_v5 = vld [vmem:[%s1897_s2] ss:$0 sm:$0xff] }
 0x11a   :  { %v1313_v13 = vadd.f32 %v1312_v12, %v1311_v9  ;;  %v1376_v14 = vpop.f32.mrb[19].mxu1  ;;  %v1826_v9 = vld [vmem:[%s1898_s3] ss:$0 sm:$0xff] }
 0x11b   :  { %v1377_v15 = vadd.f32 %v1376_v14, %v1375_v11  ;;  %v779_v16 = vadd.f32 %v1374_v10, %v1310_v7 }
 0x11d   :  { %v1809_v17 = vadd.f32 %v1377_v15, %v1313_v13 }
 0x11e   :  { %v1314_v18 = vpop.f32.mrb[20].mxu0 }
 0x11f   :  { %v1378_v19 = vpop.f32.mrb[20].mxu1  ;;  %v1315_v20 = vpop.f32.mrb[21].mxu0 }
 0x120   :  { %v1316_v21 = vadd.f32 %v1315_v20, %v1314_v18  ;;  %v1379_v22 = vpop.f32.mrb[21].mxu1  ;;  %v1317_v23 = vpop.f32.mrb[22].mxu0 }
 0x121   :  { %v1380_v26 = vadd.f32 %v1379_v22, %v1378_v19  ;;  %v1381_v27 = vpop.f32.mrb[22].mxu1  ;;  %v1318_v28 = vpop.f32.mrb[23].mxu0 }
 0x122   :  { %v1319_v29 = vadd.f32 %v1318_v28, %v1317_v23  ;;  %v1382_v30 = vpop.f32.mrb[23].mxu1 }
 0x123   :  { %v1383_v31 = vadd.f32 %v1382_v30, %v1381_v27  ;;  %v787_v32 = vadd.f32 %v1380_v26, %v1316_v21 }
 0x125   :  { %v790_v33 = vadd.f32 %v1383_v31, %v1319_v29 }
 0x126   :  { %v1320_v34 = vpop.f32.mrb[24].mxu0 }
 0x127   :  { %v1384_v35 = vpop.f32.mrb[24].mxu1  ;;  %v1321_v36 = vpop.f32.mrb[25].mxu0 }
 0x128   :  { %v1322_v37 = vadd.f32 %v1321_v36, %v1320_v34  ;;  %v1385_v40 = vpop.f32.mrb[25].mxu1  ;;  %v1323_v41 = vpop.f32.mrb[26].mxu0 }
 0x129   :  { %v1386_v42 = vadd.f32 %v1385_v40, %v1384_v35  ;;  %v1387_v43 = vpop.f32.mrb[26].mxu1  ;;  %v1324_v44 = vpop.f32.mrb[27].mxu0 }
 0x12a   :  { %v1325_v45 = vadd.f32 %v1324_v44, %v1323_v41  ;;  %v1388_v46 = vpop.f32.mrb[27].mxu1 }
 0x12b   :  { %v1389_v47 = vadd.f32 %v1388_v46, %v1387_v43  ;;  %v1811_v48 = vadd.f32 %v1386_v42, %v1322_v37 }
 0x12d   :  { %v1813_v49 = vadd.f32 %v1389_v47, %v1325_v45 }
 0x12e   :  { %v1326_v50 = vpop.f32.mrb[28].mxu0 }
 0x12f   :  { %v1390_v51 = vpop.f32.mrb[28].mxu1  ;;  %v1327_v54 = vpop.f32.mrb[29].mxu0 }
 0x130   :  { %v1328_v55 = vadd.f32 %v1327_v54, %v1326_v50  ;;  %v1391_v56 = vpop.f32.mrb[29].mxu1  ;;  %v1329_v57 = vpop.f32.mrb[30].mxu0 }
 0x131   :  { %v1392_v58 = vadd.f32 %v1391_v56, %v1390_v51  ;;  %v1393_v59 = vpop.f32.mrb[30].mxu1  ;;  %v1330_v60 = vpop.f32.mrb[31].mxu0 }
 0x132   :  { %v1331_v61 = vadd.f32 %v1330_v60, %v1329_v57  ;;  %v1394_v62 = vpop.f32.mrb[31].mxu1 }
 0x133   :  { %v1395_v63 = vadd.f32 %v1394_v62, %v1393_v59  ;;  %v803_v0 = vadd.f32 %v1392_v58, %v1328_v55 }
 0x135   :  { %v1815_v1 = vadd.f32 %v1395_v63, %v1331_v61 }
 0x136   :  { %v1418_v4 = vpop.f32.mrb[32].mxu0 }
 0x137   :  { %v852_v6 = vadd.f32 %v1418_v4, %v1797_v38  ;;  %v1426_v7 = vpop.f32.mrb[32].mxu1  ;;  %v843_v8 = vpop.f32.mrb[33].mxu0 }
 0x138   :  { %v884_v10 = vadd.f32 %v1426_v7, %v787_v32  ;;  %v844_v11 = vadd.f32 %v843_v8, %v1793_v24  ;;  %v875_v12 = vpop.f32.mrb[33].mxu1  ;;  %v1419_v13 = vpop.f32.mrb[34].mxu0 }
 0x139   :  { %v966_v14 = vmul.f32 %v1820_v5, %v852_v6  ;;  %v876_v15 = vadd.f32 %v875_v12, %v779_v16  ;;  %v855_v18 = vadd.f32 %v1419_v13, %v1799_v39  ;;  %v1427_v19 = vpop.f32.mrb[34].mxu1  ;;  %v846_v20 = vpop.f32.mrb[35].mxu0 }
 0x13a   :  { %v974_v38 = vmul.f32 %v1820_v5, %v884_v10  ;;  %v964_v21 = vmul.f32 %v1820_v5, %v844_v11  ;;  %v887_v22 = vadd.f32 %v1427_v19, %v790_v33  ;;  %v847_v23 = vadd.f32 %v846_v20, %v1795_v25  ;;  %v878_v26 = vpop.f32.mrb[35].mxu1 }
 0x13b   :  { %v989_v27 = vadd.f32 %v1826_v9, %v966_v14  ;;  %v972_v24 = vmul.f32 %v1820_v5, %v876_v15  ;;  %v967_v28 = vmul.f32 %v1820_v5, %v855_v18  ;;  %v879_v16 = vadd.f32 %v878_v26, %v1809_v17 }
 0x13c   :  { %v997_v39 = vadd.f32 %v1826_v9, %v974_v38  ;;  %v987_v29 = vadd.f32 %v1826_v9, %v964_v21  ;;  %v975_v30 = vmul.f32 %v1820_v5, %v887_v22  ;;  %v965_v31 = vmul.f32 %v1820_v5, %v847_v23 }
 0x13d   :  { %v1005_v32 = vmax.f32 %v989_v27, 0.0  ;;  %v995_v25 = vadd.f32 %v1826_v9, %v972_v24  ;;  %v990_v33 = vadd.f32 %v1826_v9, %v967_v28  ;;  %v973_v34 = vmul.f32 %v1820_v5, %v879_v16 }
 0x13e   :  { %v1013_v35 = vmax.f32 %v997_v39, 0.0  ;;  %v1003_v36 = vmax.f32 %v987_v29, 0.0  ;;  %v998_v37 = vadd.f32 %v1826_v9, %v975_v30  ;;  %v988_v17 = vadd.f32 %v1826_v9, %v965_v31  ;;  %v1422_v40 = vpop.f32.mrb[36].mxu0 }
 0x13f   :  { %v1011_v41 = vmax.f32 %v995_v25, 0.0  ;;  %v1006_v42 = vmax.f32 %v990_v33, 0.0  ;;  %v996_v43 = vadd.f32 %v1826_v9, %v973_v34  ;;  %v868_v44 = vadd.f32 %v1422_v40, %v1805_v2  ;;  %v1430_v45 = vpop.f32.mrb[36].mxu1  ;;  %v859_v46 = vpop.f32.mrb[37].mxu0 }
 0x140   :  { %v1014_v47 = vmax.f32 %v998_v37, 0.0  ;;  %v1004_v50 = vmax.f32 %v988_v17, 0.0  ;;  %v900_v51 = vadd.f32 %v1430_v45, %v803_v0  ;;  %v860_v54 = vadd.f32 %v859_v46, %v1801_v52  ;;  %v891_v55 = vpop.f32.mrb[37].mxu1  ;;  %v1423_v56 = vpop.f32.mrb[38].mxu0 }
 0x141   :  { %v1229_v57 = vpack.c.bf16 %v1006_v42, %v1005_v32  ;;  %v1012_v58 = vmax.f32 %v996_v43, 0.0  ;;  %v970_v59 = vmul.f32 %v1820_v5, %v868_v44  ;;  %v892_v60 = vadd.f32 %v891_v55, %v1811_v48  ;;  %v1431_v61 = vpop.f32.mrb[38].mxu1  ;;  %v862_v62 = vpop.f32.mrb[39].mxu0 }
 0x142   :  { %v1249_v63 = vpack.c.bf16 %v1014_v47, %v1013_v35  ;;  %v1224_v4 = vpack.c.bf16 %v1004_v50, %v1003_v36  ;;  %v978_v2 = vmul.f32 %v1820_v5, %v900_v51  ;;  %v968_v6 = vmul.f32 %v1820_v5, %v860_v54  ;;  %v894_v7 = vpop.f32.mrb[39].mxu1 }
 0x143   :  { %1261 = vst [vmem:[%s1899_s4 + $0x8] sm:$0xff] %v1229_v57   ;;  %v1244_v52 = vpack.c.bf16 %v1012_v58, %v1011_v41  ;;  %v976_v0 = vmul.f32 %v1820_v5, %v892_v60  ;;  %v871_v8 = vadd.f32 %v1423_v56, %v1807_v3  ;;  %v903_v48 = vadd.f32 %v1431_v61, %v1815_v1 }
 0x144   :  { %1265 = vst [vmem:[%s1899_s4 + $0x28] sm:$0xff] %v1249_v63   ;;  %1225 = vst [vmem:[%s1899_s4] sm:$0xff] %v1224_v4   ;;  %v863_v10 = vadd.f32 %v862_v62, %v1803_v53  ;;  %v993_v11 = vadd.f32 %v1826_v9, %v970_v59  ;;  %v895_v12 = vadd.f32 %v894_v7, %v1813_v49 }
 0x145   :  { %1264 = vst [vmem:[%s1899_s4 + $0x20] sm:$0xff] %v1244_v52   ;;  %v971_v3 = vmul.f32 %v1820_v5, %v871_v8  ;;  %v1001_v13 = vadd.f32 %v1826_v9, %v978_v2  ;;  %v991_v14 = vadd.f32 %v1826_v9, %v968_v6  ;;  %v979_v15 = vmul.f32 %v1820_v5, %v903_v48 }
 0x146   :  { %v969_v1 = vmul.f32 %v1820_v5, %v863_v10  ;;  %v999_v53 = vadd.f32 %v1826_v9, %v976_v0  ;;  %v977_v19 = vmul.f32 %v1820_v5, %v895_v12  ;;  %v1009_v21 = vmax.f32 %v993_v11, 0.0 }
 0x147   :  { %v994_v18 = vadd.f32 %v1826_v9, %v971_v3  ;;  %v1002_v20 = vadd.f32 %v1826_v9, %v979_v15  ;;  %v1017_v23 = vmax.f32 %v1001_v13, 0.0  ;;  %v1007_v26 = vmax.f32 %v991_v14, 0.0 }
 0x148   :  { %v992_v38 = vadd.f32 %v1826_v9, %v969_v1  ;;  %v1000_v22 = vadd.f32 %v1826_v9, %v977_v19  ;;  %v1015_v28 = vmax.f32 %v999_v53, 0.0 }
 0x149   :  { %v1010_v49 = vmax.f32 %v994_v18, 0.0  ;;  %v1018_v27 = vmax.f32 %v1002_v20, 0.0 }
 0x14a   :  { %v1008_v24 = vmax.f32 %v992_v38, 0.0  ;;  %v1016_v39 = vmax.f32 %v1000_v22, 0.0 }
 0x14b   :  { %v1239_v16 = vpack.c.bf16 %v1010_v49, %v1009_v21  ;;  %v1259_v29 = vpack.c.bf16 %v1018_v27, %v1017_v23 }
 0x14c   :  { %v1234_v30 = vpack.c.bf16 %v1008_v24, %v1007_v26  ;;  %v1254_v5 = vpack.c.bf16 %v1016_v39, %v1015_v28 }
 0x14d   :  { %1263 = vst [vmem:[%s1899_s4 + $0x18] sm:$0xff] %v1239_v16   ;;  %1267 = vst [vmem:[%s1899_s4 + $0x38] sm:$0xff] %v1259_v29  }
 0x14e   :  { %1262 = vst [vmem:[%s1899_s4 + $0x10] sm:$0xff] %v1234_v30   ;;  %1266 = vst [vmem:[%s1899_s4 + $0x30] sm:$0xff] %v1254_v5  }

// kernel: resnet_forward.26
= control target key start
LH: loop header
LB: loop body
LE: loop exit
PB: predicated region body
PF: predicated region fallthrough
CT: control target
= control target key end

     0   :  { %vm593_vm0 = vcmask 523264   ;;  %s2063_s1 = inlined_call_operand.vmem [shape: bf16[576,128], index: 1, kind: input, shape index: {}]   ;;  %s2064_s0 = inlined_call_operand.vmem [shape: bf16[128,576], index: 0, kind: input, shape index: {}]   ;;  %s2065_s4 = inlined_call_operand.vmem [shape: bf16[128,128], index: 4, kind: input, shape index: {}]   ;;  %s2066_s2 = inlined_call_operand.vmem [shape: f32[1,128], index: 2, kind: input, shape index: {}]   ;;  %s2067_s3 = inlined_call_operand.vmem [shape: f32[1,128], index: 3, kind: input, shape index: {}]   ;;  %s2068_s5 = inlined_call_operand.vmem [shape: bf16[128,128], index: 5, kind: output, shape index: {}]  }
   0x1   :  { %v1530_v0 = vld [vmem:[%s2063_s1 + $0x40] sm:$0xff]   ;;  %v1534_v4 = vld [vmem:[%s2063_s1 + $0x48] sm:$0xff]   ;;  %v1538_v8 = vld [vmem:[%s2063_s1 + $0x50] sm:$0xff]  }
   0x2   :  { %v1531_v1 = vld [vmem:[%s2063_s1 + $0xc0] sm:$0xff]   ;;  %1358 = vmatprep.subr.bf16.mxu0 %v1530_v0  ;;  %v1535_v5 = vld [vmem:[%s2063_s1 + $0xc8] sm:$0xff]   ;;  %v1539_v9 = vld [vmem:[%s2063_s1 + $0xd0] sm:$0xff]  }
   0x3   :  { %v1532_v2 = vld [vmem:[%s2063_s1] sm:$0xff]   ;;  %1422 = vmatprep.subr.bf16.mxu1 %v1531_v1  ;;  %v1536_v6 = vld [vmem:[%s2063_s1 + $0x8] sm:$0xff]   ;;  %v1540_v10 = vld [vmem:[%s2063_s1 + $0x10] sm:$0xff]  }
   0x4   :  { %v1533_v3 = vld [vmem:[%s2063_s1 + $0x80] sm:$0xff]   ;;  %1359 = vmatpush3.bf16.msra.mxu0 %v1532_v2  ;;  %v1537_v7 = vld [vmem:[%s2063_s1 + $0x88] sm:$0xff]   ;;  %v1541_v11 = vld [vmem:[%s2063_s1 + $0x90] sm:$0xff]  }
   0x5   :  { %1423 = vmatpush3.bf16.msra.mxu1 %v1533_v3  ;;  %1360 = vmatprep.subr.bf16.mxu0 %v1534_v4  ;;  %v1542_v12 = vld [vmem:[%s2063_s1 + $0x58] sm:$0xff]   ;;  %v1546_v16 = vld [vmem:[%s2063_s1 + $0x60] sm:$0xff]   ;;  %v1550_v20 = vld [vmem:[%s2063_s1 + $0x68] sm:$0xff]  }
   0x6   :  { %1424 = vmatprep.subr.bf16.mxu1 %v1535_v5  ;;  %v1543_v13 = vld [vmem:[%s2063_s1 + $0xd8] sm:$0xff]   ;;  %v1547_v17 = vld [vmem:[%s2063_s1 + $0xe0] sm:$0xff]   ;;  %v1551_v21 = vld [vmem:[%s2063_s1 + $0xe8] sm:$0xff]  }
   0x7   :  { %v1544_v14 = vld [vmem:[%s2063_s1 + $0x18] sm:$0xff]   ;;  %v1548_v18 = vld [vmem:[%s2063_s1 + $0x20] sm:$0xff]   ;;  %v1552_v22 = vld [vmem:[%s2063_s1 + $0x28] sm:$0xff]  }
   0x8   :  { %1361 = vmatpush3.bf16.msra.mxu0 %v1536_v6  ;;  %v1545_v15 = vld [vmem:[%s2063_s1 + $0x98] sm:$0xff]   ;;  %v1549_v19 = vld [vmem:[%s2063_s1 + $0xa0] sm:$0xff]   ;;  %v1553_v23 = vld [vmem:[%s2063_s1 + $0xa8] sm:$0xff]  }
   0x9   :  { %1425 = vmatpush3.bf16.msra.mxu1 %v1537_v7  ;;  %1362 = vmatprep.subr.bf16.mxu0 %v1538_v8  ;;  %v1554_v24 = vld [vmem:[%s2063_s1 + $0x70] sm:$0xff]   ;;  %v1558_v28 = vld [vmem:[%s2063_s1 + $0x78] sm:$0xff]   ;;  %v1567_v35 = vld [vmem:[%s2064_s0 + $0xc] ss:$20 sps:$4 sm:$0xff]  }
   0xa   :  { %1426 = vmatprep.subr.bf16.mxu1 %v1539_v9  ;;  %v1555_v25 = vld [vmem:[%s2063_s1 + $0xf0] sm:$0xff]   ;;  %v1559_v29 = vld [vmem:[%s2063_s1 + $0xf8] sm:$0xff]   ;;  %v1568_v36 = vld [vmem:[%s2063_s1 + $0x100] sm:$0xff]   ;;  %747 = vmatprep.mubr.bf16.mxu1 %v1567_v35 }
   0xb   :  { %v1556_v26 = vld [vmem:[%s2063_s1 + $0x30] sm:$0xff]   ;;  %v1560_v30 = vld [vmem:[%s2063_s1 + $0x38] sm:$0xff]   ;;  %v1569_v37 = vld [vmem:[%s2064_s0 + $0x2c] ss:$20 sps:$4 sm:$0xff]  }
   0xc   :  { %1363 = vmatpush3.bf16.msra.mxu0 %v1540_v10  ;;  %v1557_v27 = vld [vmem:[%s2063_s1 + $0xb0] sm:$0xff]   ;;  %v1561_v31 = vld [vmem:[%s2063_s1 + $0xb8] sm:$0xff]   ;;  %v1581_v42 = vld [vmem:[%s2063_s1 + $0x108] sm:$0xff]  }
   0xd   :  { %1427 = vmatpush3.bf16.msra.mxu1 %v1541_v11  ;;  %1364 = vmatprep.subr.bf16.mxu0 %v1542_v12  ;;  %v1562_v32 = vld [vmem:[%s2064_s0] ss:$20 sps:$4 sm:$0xff]   ;;  %v1564_v33 = vld [vmem:[%s2064_s0 + $0x4] ss:$20 sps:$4 sm:$0xff]   ;;  %v1565_v34 = vld [vmem:[%s2064_s0 + $0x8] ss:$20 sps:$4 sm:$0xff]  }
   0xe   :  { %1428 = vmatprep.subr.bf16.mxu1 %v1543_v13  ;;  %650 = vmatprep.mubr.bf16.mxu0 %v1564_v33  ;;  %v1571_v38 = vld [vmem:[%s2064_s0 + $0x34] ss:$20 sps:$4 sm:$0xff]   ;;  %v1574_v40 = vld [vmem:[%s2064_s0 + $0x30] ss:$20 sps:$4 sm:$0xff]   ;;  %v1580_v45 = vld [vmem:[%s2064_s0 + $0x58] ss:$20 sps:$4 sm:$0xff]  }
   0xf   :  { %v1573_v39 = vld [vmem:[%s2064_s0 + $0x28] ss:$20 sps:$4 sm:$0xff]   ;;  %v1579_v44 = vld [vmem:[%s2064_s0 + $0x50] ss:$20 sps:$4 sm:$0xff]   ;;  %v1586_v50 = vld [vmem:[%s2064_s0 + $0x78] ss:$20 sps:$4 sm:$0xff]  }
  0x10   :  { %1365 = vmatpush3.bf16.msra.mxu0 %v1544_v14  ;;  %v1575_v41 = vld [vmem:[%s2064_s0 + $0x54] ss:$20 sps:$4 sm:$0xff]   ;;  %v1577_v43 = vld [vmem:[%s2064_s0 + $0x5c] ss:$20 sps:$4 sm:$0xff]   ;;  %v1584_v48 = vld [vmem:[%s2064_s0 + $0x84] ss:$20 sps:$4 sm:$0xff]  }
  0x11   :  { %1429 = vmatpush3.bf16.msra.mxu1 %v1545_v15  ;;  %1366 = vmatprep.subr.bf16.mxu0 %v1546_v16  ;;  %v1594_v46 = vld [vmem:[%s2063_s1 + $0x110] sm:$0xff]   ;;  %v1607_v49 = vld [vmem:[%s2063_s1 + $0x118] sm:$0xff]   ;;  %v1590_v53 = vld [vmem:[%s2064_s0 + $0xac] ss:$20 sps:$4 sm:$0xff]  }
  0x12   :  { %1430 = vmatprep.subr.bf16.mxu1 %v1547_v17  ;;  %v1582_v47 = vld [vmem:[%s2064_s0 + $0x7c] ss:$20 sps:$4 sm:$0xff]   ;;  %v1587_v51 = vld [vmem:[%s2064_s0 + $0x80] ss:$20 sps:$4 sm:$0xff]   ;;  %v1588_v52 = vld [vmem:[%s2064_s0 + $0xa4] ss:$20 sps:$4 sm:$0xff]  }
  0x13   :  { %v1592_v54 = vld [vmem:[%s2064_s0 + $0xa0] ss:$20 sps:$4 sm:$0xff]   ;;  %v1593_v55 = vld [vmem:[%s2064_s0 + $0xa8] ss:$20 sps:$4 sm:$0xff]   ;;  %v1600_v59 = vld [vmem:[%s2064_s0 + $0xd0] ss:$20 sps:$4 sm:$0xff]  }
  0x14   :  { %1367 = vmatpush3.bf16.msra.mxu0 %v1548_v18  ;;  %v1595_v56 = vld [vmem:[%s2064_s0 + $0xcc] ss:$20 sps:$4 sm:$0xff]   ;;  %v1597_v57 = vld [vmem:[%s2064_s0 + $0xd4] ss:$20 sps:$4 sm:$0xff]   ;;  %v1603_v61 = vld [vmem:[%s2064_s0 + $0xfc] ss:$20 sps:$4 sm:$0xff]  }
  0x15   :  { %1431 = vmatpush3.bf16.msra.mxu1 %v1549_v19  ;;  %1368 = vmatprep.subr.bf16.mxu0 %v1550_v20  ;;  %v1599_v58 = vld [vmem:[%s2064_s0 + $0xc8] ss:$20 sps:$4 sm:$0xff]   ;;  %v1605_v62 = vld [vmem:[%s2064_s0 + $0xf0] ss:$20 sps:$4 sm:$0xff]   ;;  %v1606_v63 = vld [vmem:[%s2064_s0 + $0xf8] ss:$20 sps:$4 sm:$0xff]  }
  0x16   :  { %1432 = vmatprep.subr.bf16.mxu1 %v1551_v21  ;;  %v1601_v60 = vld [vmem:[%s2064_s0 + $0xf4] ss:$20 sps:$4 sm:$0xff]   ;;  %v1608_v0 = vld [vmem:[%s2064_s0 + $0x11c] ss:$20 sps:$4 sm:$0xff]   ;;  %v1610_v1 = vld [vmem:[%s2064_s0 + $0x124] ss:$20 sps:$4 sm:$0xff]  }
  0x17   :  { %v1612_v2 = vld [vmem:[%s2064_s0 + $0x118] ss:$20 sps:$4 sm:$0xff]   ;;  %v1613_v3 = vld [vmem:[%s2064_s0 + $0x120] ss:$20 sps:$4 sm:$0xff]   ;;  %v1614_v4 = vld [vmem:[%s2064_s0 + $0x10] ss:$20 sps:$4 sm:$0xff]  }
  0x18   :  { %1369 = vmatpush3.bf16.msra.mxu0 %v1552_v22  ;;  %v1615_v5 = vld [vmem:[%s2064_s0 + $0xb0] ss:$20 sps:$4 sm:$0xff]   ;;  %v1616_v6 = vld [vmem:[%s2064_s0 + $0x38] ss:$20 sps:$4 sm:$0xff]   ;;  %v1618_v8 = vld [vmem:[%s2064_s0 + $0x60] ss:$20 sps:$4 sm:$0xff]  }
  0x19   :  { %1433 = vmatpush3.bf16.msra.mxu1 %v1553_v23  ;;  %1370 = vmatprep.subr.bf16.mxu0 %v1554_v24  ;;  %v1617_v7 = vld [vmem:[%s2064_s0 + $0xd8] ss:$20 sps:$4 sm:$0xff]   ;;  %v1619_v9 = vld [vmem:[%s2064_s0 + $0x100] ss:$20 sps:$4 sm:$0xff]   ;;  %v1620_v10 = vld [vmem:[%s2064_s0 + $0x88] ss:$20 sps:$4 sm:$0xff]  }
  0x1a   :  { %1434 = vmatprep.subr.bf16.mxu1 %v1555_v25  ;;  %v1621_v11 = vld [vmem:[%s2064_s0 + $0x128] ss:$20 sps:$4 sm:$0xff]  }
  0x1c   :  { %1371 = vmatpush3.bf16.msra.mxu0 %v1556_v26 }
  0x1d   :  { %1435 = vmatpush3.bf16.msra.mxu1 %v1557_v27  ;;  %1372 = vmatprep.subr.bf16.mxu0 %v1558_v28 }
  0x1e   :  { %1436 = vmatprep.subr.bf16.mxu1 %v1559_v29 }
  0x20   :  { %1373 = vmatpush3.bf16.msra.mxu0 %v1560_v30 }
  0x21   :  { %1437 = vmatpush3.bf16.msra.mxu1 %v1561_v31  ;;  %1498 = vmatprep.subr.bf16.mxu0 %v1568_v36 }
  0x22   :  { %1522 = vmatprep.subr.bf16.mxu1 %v1568_v36 }
  0x23   :  { %651 = vmatmul.mubr.bf16.vlgmr.msra.gmra.mrb[0].mxu0 %v1562_v32 }
  0x24   :  { %748 = vmatmul.mubr.bf16.vlgmr.msra.gmra.mrb[0].mxu1 %v1565_v34  ;;  %1499 = vmatpush3.bf16.msra.mxu0 %v1568_v36 }
  0x25   :  { %1526 = vmatpush3.bf16.msra.mxu1 %v1568_v36  ;;  %658 = vmatprep.mubr.bf16.mxu0 %v1569_v37 }
  0x26   :  { %755 = vmatprep.mubr.bf16.mxu1 %v1571_v38  ;;  %1500 = vmatprep.subr.bf16.mxu0 %v1581_v42 }
  0x27   :  { %1523 = vmatprep.subr.bf16.mxu1 %v1581_v42 }
  0x28   :  { %1501 = vmatpush3.bf16.msra.mxu0 %v1581_v42 }
  0x29   :  { %1527 = vmatpush3.bf16.msra.mxu1 %v1581_v42  ;;  %1502 = vmatprep.subr.bf16.mxu0 %v1594_v46 }
  0x2a   :  { %1524 = vmatprep.subr.bf16.mxu1 %v1594_v46 }
  0x2b   :  { %659 = vmatmul.mubr.bf16.gmra.mrb[4].mxu0 %v1573_v39 }
  0x2c   :  { %756 = vmatmul.mubr.bf16.gmra.mrb[4].mxu1 %v1574_v40  ;;  %666 = vmatprep.mubr.bf16.mxu0 %v1575_v41 }
  0x2d   :  { %763 = vmatprep.mubr.bf16.mxu1 %v1577_v43  ;;  %1503 = vmatpush3.bf16.msra.mxu0 %v1594_v46 }
  0x2e   :  { %1528 = vmatpush3.bf16.msra.mxu1 %v1594_v46  ;;  %1504 = vmatprep.subr.bf16.mxu0 %v1607_v49 }
  0x2f   :  { %1525 = vmatprep.subr.bf16.mxu1 %v1607_v49 }
  0x31   :  { %1505 = vmatpush3.bf16.msra.mxu0 %v1607_v49 }
  0x32   :  { %1529 = vmatpush3.bf16.msra.mxu1 %v1607_v49 }
  0x33   :  { %667 = vmatmul.mubr.bf16.gmra.mrb[8].mxu0 %v1579_v44 }
  0x34   :  { %764 = vmatmul.mubr.bf16.gmra.mrb[8].mxu1 %v1580_v45  ;;  %674 = vmatprep.mubr.bf16.mxu0 %v1582_v47 }
  0x35   :  { %771 = vmatprep.mubr.bf16.mxu1 %v1584_v48 }
  0x3b   :  { %675 = vmatmul.mubr.bf16.gmra.mrb[12].mxu0 %v1586_v50 }
  0x3c   :  { %772 = vmatmul.mubr.bf16.gmra.mrb[12].mxu1 %v1587_v51  ;;  %682 = vmatprep.mubr.bf16.mxu0 %v1588_v52 }
  0x3d   :  { %779 = vmatprep.mubr.bf16.mxu1 %v1590_v53 }
  0x43   :  { %683 = vmatmul.mubr.bf16.gmra.mrb[16].mxu0 %v1592_v54 }
  0x44   :  { %780 = vmatmul.mubr.bf16.gmra.mrb[16].mxu1 %v1593_v55  ;;  %690 = vmatprep.mubr.bf16.mxu0 %v1595_v56 }
  0x45   :  { %787 = vmatprep.mubr.bf16.mxu1 %v1597_v57 }
  0x4b   :  { %691 = vmatmul.mubr.bf16.gmra.mrb[20].mxu0 %v1599_v58 }
  0x4c   :  { %788 = vmatmul.mubr.bf16.gmra.mrb[20].mxu1 %v1600_v59  ;;  %698 = vmatprep.mubr.bf16.mxu0 %v1601_v60 }
  0x4d   :  { %795 = vmatprep.mubr.bf16.mxu1 %v1603_v61 }
  0x53   :  { %699 = vmatmul.mubr.bf16.gmra.mrb[24].mxu0 %v1605_v62 }
  0x54   :  { %796 = vmatmul.mubr.bf16.gmra.mrb[24].mxu1 %v1606_v63  ;;  %706 = vmatprep.mubr.bf16.mxu0 %v1608_v0 }
  0x55   :  { %803 = vmatprep.mubr.bf16.mxu1 %v1610_v1 }
  0x5b   :  { %707 = vmatmul.mubr.bf16.gmra.mrb[28].mxu0 %v1612_v2 }
  0x5c   :  { %804 = vmatmul.mubr.bf16.gmra.mrb[28].mxu1 %v1613_v3  ;;  %1506 = vmatprep.mubr.msk.bf16.mxu0 %vm593_vm0, %v1614_v4 }
  0x5d   :  { %1514 = vmatprep.mubr.msk.bf16.mxu1 %vm593_vm0, %v1615_v5 }
  0x63   :  { %1507 = vmatmul.mubr.msk.bf16.vlgmr.msra.gmra.mrb[32].mxu0 %vm593_vm0, %v1616_v6 }
  0x64   :  { %1515 = vmatmul.mubr.msk.bf16.vlgmr.msra.gmra.mrb[32].mxu1 %vm593_vm0, %v1617_v7  ;;  %1510 = vmatprep.mubr.msk.bf16.mxu0 %vm593_vm0, %v1618_v8 }
  0x65   :  { %1518 = vmatprep.mubr.msk.bf16.mxu1 %vm593_vm0, %v1619_v9 }
  0x6b   :  { %1511 = vmatmul.mubr.msk.bf16.gmra.mrb[36].mxu0 %vm593_vm0, %v1620_v10 }
  0x6c   :  { %1519 = vmatmul.mubr.msk.bf16.gmra.mrb[36].mxu1 %vm593_vm0, %v1621_v11 }
  0xf6   :  { %v1374_v12 = vpop.f32.mrb[0].mxu0 }
  0xf7   :  { %v1438_v13 = vpop.f32.mrb[0].mxu1  ;;  %v1375_v14 = vpop.f32.mrb[1].mxu0 }
  0xf8   :  { %v1376_v15 = vadd.f32 %v1375_v14, %v1374_v12  ;;  %v1439_v16 = vpop.f32.mrb[1].mxu1  ;;  %v1377_v17 = vpop.f32.mrb[2].mxu0 }
  0xf9   :  { %v1440_v18 = vadd.f32 %v1439_v16, %v1438_v13  ;;  %v1441_v19 = vpop.f32.mrb[2].mxu1  ;;  %v1378_v20 = vpop.f32.mrb[3].mxu0 }
  0xfa   :  { %v1379_v21 = vadd.f32 %v1378_v20, %v1377_v17  ;;  %v1442_v22 = vpop.f32.mrb[3].mxu1 }
  0xfb   :  { %v1443_v23 = vadd.f32 %v1442_v22, %v1441_v19  ;;  %v1888_v24 = vadd.f32 %v1440_v18, %v1376_v15 }
  0xfd   :  { %v1890_v25 = vadd.f32 %v1443_v23, %v1379_v21 }
  0xfe   :  { %v1380_v26 = vpop.f32.mrb[4].mxu0 }
  0xff   :  { %v1444_v27 = vpop.f32.mrb[4].mxu1  ;;  %v1381_v28 = vpop.f32.mrb[5].mxu0 }
 0x100   :  { %v1382_v29 = vadd.f32 %v1381_v28, %v1380_v26  ;;  %v1445_v30 = vpop.f32.mrb[5].mxu1  ;;  %v1383_v31 = vpop.f32.mrb[6].mxu0 }
 0x101   :  { %v1446_v32 = vadd.f32 %v1445_v30, %v1444_v27  ;;  %v1447_v33 = vpop.f32.mrb[6].mxu1  ;;  %v1384_v34 = vpop.f32.mrb[7].mxu0 }
 0x102   :  { %v1385_v35 = vadd.f32 %v1384_v34, %v1383_v31  ;;  %v1448_v36 = vpop.f32.mrb[7].mxu1 }
 0x103   :  { %v1449_v37 = vadd.f32 %v1448_v36, %v1447_v33  ;;  %v1892_v38 = vadd.f32 %v1446_v32, %v1382_v29 }
 0x105   :  { %v1894_v39 = vadd.f32 %v1449_v37, %v1385_v35 }
 0x106   :  { %v1386_v40 = vpop.f32.mrb[8].mxu0 }
 0x107   :  { %v1450_v41 = vpop.f32.mrb[8].mxu1  ;;  %v1387_v42 = vpop.f32.mrb[9].mxu0 }
 0x108   :  { %v1388_v43 = vadd.f32 %v1387_v42, %v1386_v40  ;;  %v1451_v44 = vpop.f32.mrb[9].mxu1  ;;  %v1389_v45 = vpop.f32.mrb[10].mxu0 }
 0x109   :  { %v1452_v46 = vadd.f32 %v1451_v44, %v1450_v41  ;;  %v1453_v47 = vpop.f32.mrb[10].mxu1  ;;  %v1390_v48 = vpop.f32.mrb[11].mxu0 }
 0x10a   :  { %v1391_v49 = vadd.f32 %v1390_v48, %v1389_v45  ;;  %v1454_v50 = vpop.f32.mrb[11].mxu1 }
 0x10b   :  { %v1455_v51 = vadd.f32 %v1454_v50, %v1453_v47  ;;  %v1896_v52 = vadd.f32 %v1452_v46, %v1388_v43 }
 0x10d   :  { %v1898_v53 = vadd.f32 %v1455_v51, %v1391_v49 }
 0x10e   :  { %v1392_v54 = vpop.f32.mrb[12].mxu0 }
 0x10f   :  { %v1456_v55 = vpop.f32.mrb[12].mxu1  ;;  %v1393_v56 = vpop.f32.mrb[13].mxu0 }
 0x110   :  { %v1394_v57 = vadd.f32 %v1393_v56, %v1392_v54  ;;  %v1457_v58 = vpop.f32.mrb[13].mxu1  ;;  %v1395_v59 = vpop.f32.mrb[14].mxu0 }
 0x111   :  { %v1458_v60 = vadd.f32 %v1457_v58, %v1456_v55  ;;  %v1459_v61 = vpop.f32.mrb[14].mxu1  ;;  %v1396_v62 = vpop.f32.mrb[15].mxu0 }
 0x112   :  { %v1397_v63 = vadd.f32 %v1396_v62, %v1395_v59  ;;  %v1460_v0 = vpop.f32.mrb[15].mxu1 }
 0x113   :  { %v1461_v1 = vadd.f32 %v1460_v0, %v1459_v61  ;;  %v1900_v2 = vadd.f32 %v1458_v60, %v1394_v57  ;;  %v1922_v0 = vld [vmem:[%s2065_s4 + $0x28] sm:$0xff]  }
 0x115   :  { %v1902_v3 = vadd.f32 %v1461_v1, %v1397_v63  ;;  %v1917_v63 = vld [vmem:[%s2065_s4 + $0x8] sm:$0xff]  }
 0x116   :  { %v1398_v4 = vpop.f32.mrb[16].mxu0 }
 0x117   :  { %v1462_v5 = vpop.f32.mrb[16].mxu1  ;;  %v1399_v6 = vpop.f32.mrb[17].mxu0 }
 0x118   :  { %v1400_v7 = vadd.f32 %v1399_v6, %v1398_v4  ;;  %v1463_v8 = vpop.f32.mrb[17].mxu1  ;;  %v1401_v9 = vpop.f32.mrb[18].mxu0  ;;  %v1927_v4 = vld [vmem:[%s2065_s4] sm:$0xff]  }
 0x119   :  { %v1464_v10 = vadd.f32 %v1463_v8, %v1462_v5  ;;  %v1465_v11 = vpop.f32.mrb[18].mxu1  ;;  %v1402_v12 = vpop.f32.mrb[19].mxu0  ;;  %v1932_v5 = vld [vmem:[%s2065_s4 + $0x20] sm:$0xff]   ;;  %v1278_v8 = vunpack.c.l.bf16 %v1917_v63 }
 0x11a   :  { %v1403_v13 = vadd.f32 %v1402_v12, %v1401_v9  ;;  %v1466_v14 = vpop.f32.mrb[19].mxu1  ;;  %v1294_v9 = vunpack.c.l.bf16 %v1922_v0 }
 0x11b   :  { %v1467_v15 = vadd.f32 %v1466_v14, %v1465_v11  ;;  %v1904_v16 = vadd.f32 %v1464_v10, %v1400_v7  ;;  %v1939_v7 = vld [vmem:[%s2065_s4 + $0x18] sm:$0xff]   ;;  %v1951_v11 = vld [vmem:[%s2065_s4 + $0x10] sm:$0xff]   ;;  %v1958_v14 = vld [vmem:[%s2066_s2] ss:$0 sm:$0xff] }
 0x11c   :  { %v1946_v10 = vld [vmem:[%s2065_s4 + $0x38] sm:$0xff]  }
 0x11d   :  { %v1906_v17 = vadd.f32 %v1467_v15, %v1403_v13  ;;  %v1274_v15 = vunpack.c.l.bf16 %v1927_v4 }
 0x11e   :  { %v1404_v18 = vpop.f32.mrb[20].mxu0 }
 0x11f   :  { %v1468_v19 = vpop.f32.mrb[20].mxu1  ;;  %v1405_v20 = vpop.f32.mrb[21].mxu0 }
 0x120   :  { %v1406_v21 = vadd.f32 %v1405_v20, %v1404_v18  ;;  %v1469_v22 = vpop.f32.mrb[21].mxu1  ;;  %v1407_v23 = vpop.f32.mrb[22].mxu0  ;;  %v1290_v18 = vunpack.c.l.bf16 %v1932_v5  ;;  %v1295_v20 = vunpack.c.h.bf16 %v1922_v0 }
 0x121   :  { %v1470_v26 = vadd.f32 %v1469_v22, %v1468_v19  ;;  %v1471_v27 = vpop.f32.mrb[22].mxu1  ;;  %v1408_v28 = vpop.f32.mrb[23].mxu0  ;;  %v1279_v19 = vunpack.c.h.bf16 %v1917_v63 }
 0x122   :  { %v1409_v29 = vadd.f32 %v1408_v28, %v1407_v23  ;;  %v1472_v30 = vpop.f32.mrb[23].mxu1  ;;  %v1291_v28 = vunpack.c.h.bf16 %v1932_v5 }
 0x123   :  { %v1473_v31 = vadd.f32 %v1472_v30, %v1471_v27  ;;  %v790_v32 = vadd.f32 %v1470_v26, %v1406_v21  ;;  %v1967_v21 = vld [vmem:[%s2065_s4 + $0x30] sm:$0xff]   ;;  %v1275_v27 = vunpack.c.h.bf16 %v1927_v4  ;;  %v1976_v30 = vld [vmem:[%s2067_s3] ss:$0 sm:$0xff] }
 0x125   :  { %v1908_v33 = vadd.f32 %v1473_v31, %v1409_v29  ;;  %v1286_v29 = vunpack.c.l.bf16 %v1939_v7 }
 0x126   :  { %v1410_v34 = vpop.f32.mrb[24].mxu0 }
 0x127   :  { %v1474_v35 = vpop.f32.mrb[24].mxu1  ;;  %v1411_v36 = vpop.f32.mrb[25].mxu0 }
 0x128   :  { %v1412_v37 = vadd.f32 %v1411_v36, %v1410_v34  ;;  %v1475_v40 = vpop.f32.mrb[25].mxu1  ;;  %v1413_v41 = vpop.f32.mrb[26].mxu0 }
 0x129   :  { %v1476_v42 = vadd.f32 %v1475_v40, %v1474_v35  ;;  %v1477_v43 = vpop.f32.mrb[26].mxu1  ;;  %v1414_v44 = vpop.f32.mrb[27].mxu0 }
 0x12a   :  { %v1415_v45 = vadd.f32 %v1414_v44, %v1413_v41  ;;  %v1478_v46 = vpop.f32.mrb[27].mxu1 }
 0x12b   :  { %v1479_v47 = vadd.f32 %v1478_v46, %v1477_v43  ;;  %v1910_v48 = vadd.f32 %v1476_v42, %v1412_v37  ;;  %v1282_v37 = vunpack.c.l.bf16 %v1951_v11 }
 0x12d   :  { %v1912_v49 = vadd.f32 %v1479_v47, %v1415_v45  ;;  %v1298_v45 = vunpack.c.l.bf16 %v1967_v21 }
 0x12e   :  { %v1416_v50 = vpop.f32.mrb[28].mxu0 }
 0x12f   :  { %v1480_v51 = vpop.f32.mrb[28].mxu1  ;;  %v1417_v54 = vpop.f32.mrb[29].mxu0 }
 0x130   :  { %v1418_v55 = vadd.f32 %v1417_v54, %v1416_v50  ;;  %v1481_v56 = vpop.f32.mrb[29].mxu1  ;;  %v1419_v57 = vpop.f32.mrb[30].mxu0 }
 0x131   :  { %v1482_v58 = vadd.f32 %v1481_v56, %v1480_v51  ;;  %v1483_v59 = vpop.f32.mrb[30].mxu1  ;;  %v1420_v60 = vpop.f32.mrb[31].mxu0 }
 0x132   :  { %v1421_v61 = vadd.f32 %v1420_v60, %v1419_v57  ;;  %v1484_v62 = vpop.f32.mrb[31].mxu1 }
 0x133   :  { %v1485_v1 = vadd.f32 %v1484_v62, %v1483_v59  ;;  %v1934_v6 = vadd.f32 %v1482_v58, %v1418_v55 }
 0x135   :  { %v1953_v12 = vadd.f32 %v1485_v1, %v1421_v61 }
 0x136   :  { %v1508_v13 = vpop.f32.mrb[32].mxu0 }
 0x137   :  { %v855_v22 = vadd.f32 %v1508_v13, %v1892_v38  ;;  %v1516_v23 = vpop.f32.mrb[32].mxu1  ;;  %v846_v26 = vpop.f32.mrb[33].mxu0  ;;  %v1302_v38 = vunpack.c.l.bf16 %v1946_v10 }
 0x138   :  { %v887_v31 = vadd.f32 %v1516_v23, %v790_v32  ;;  %v847_v34 = vadd.f32 %v846_v26, %v1888_v24  ;;  %v878_v35 = vpop.f32.mrb[33].mxu1  ;;  %v1509_v36 = vpop.f32.mrb[34].mxu0 }
 0x139   :  { %v969_v40 = vmul.f32 %v1958_v14, %v855_v22  ;;  %v879_v41 = vadd.f32 %v878_v35, %v1904_v16  ;;  %v858_v42 = vadd.f32 %v1509_v36, %v1894_v39  ;;  %v1517_v43 = vpop.f32.mrb[34].mxu1  ;;  %v849_v44 = vpop.f32.mrb[35].mxu0 }
 0x13a   :  { %v977_v32 = vmul.f32 %v1958_v14, %v887_v31  ;;  %v967_v24 = vmul.f32 %v1958_v14, %v847_v34  ;;  %v890_v46 = vadd.f32 %v1517_v43, %v1908_v33  ;;  %v850_v47 = vadd.f32 %v849_v44, %v1890_v25  ;;  %v881_v50 = vpop.f32.mrb[35].mxu1 }
 0x13b   :  { %v992_v51 = vadd.f32 %v1976_v30, %v969_v40  ;;  %v975_v54 = vmul.f32 %v1958_v14, %v879_v41  ;;  %v970_v16 = vmul.f32 %v1958_v14, %v858_v42  ;;  %v882_v39 = vadd.f32 %v881_v50, %v1906_v17 }
 0x13c   :  { %v1000_v55 = vadd.f32 %v1976_v30, %v977_v32  ;;  %v990_v56 = vadd.f32 %v1976_v30, %v967_v24  ;;  %v978_v57 = vmul.f32 %v1958_v14, %v890_v46  ;;  %v968_v58 = vmul.f32 %v1958_v14, %v850_v47 }
 0x13d   :  { %v1040_v33 = vadd.f32 %v1278_v8, %v992_v51  ;;  %v998_v25 = vadd.f32 %v1976_v30, %v975_v54  ;;  %v993_v59 = vadd.f32 %v1976_v30, %v970_v16  ;;  %v976_v60 = vmul.f32 %v1958_v14, %v882_v39 }
 0x13e   :  { %v1048_v61 = vadd.f32 %v1294_v9, %v1000_v55  ;;  %v1038_v62 = vadd.f32 %v1274_v15, %v990_v56  ;;  %v1001_v63 = vadd.f32 %v1976_v30, %v978_v57  ;;  %v991_v17 = vadd.f32 %v1976_v30, %v968_v58  ;;  %v1512_v0 = vpop.f32.mrb[36].mxu0 }
 0x13f   :  { %v1056_v1 = vmax.f32 %v1040_v33, 0.0  ;;  %v1046_v4 = vadd.f32 %v1290_v18, %v998_v25  ;;  %v1041_v5 = vadd.f32 %v1279_v19, %v993_v59  ;;  %v999_v13 = vadd.f32 %v1976_v30, %v976_v60  ;;  %v1520_v22 = vpop.f32.mrb[36].mxu1  ;;  %v862_v8 = vpop.f32.mrb[37].mxu0 }
 0x140   :  { %v1064_v23 = vmax.f32 %v1048_v61, 0.0  ;;  %v1054_v26 = vmax.f32 %v1038_v62, 0.0  ;;  %v1049_v31 = vadd.f32 %v1295_v20, %v1001_v63  ;;  %v1039_v34 = vadd.f32 %v1275_v27, %v991_v17  ;;  %v894_v35 = vpop.f32.mrb[37].mxu1  ;;  %v1513_v36 = vpop.f32.mrb[38].mxu0 }
 0x141   :  { %v1062_v9 = vmax.f32 %v1046_v4, 0.0  ;;  %v1057_v15 = vmax.f32 %v1041_v5, 0.0  ;;  %v1047_v40 = vadd.f32 %v1291_v28, %v999_v13  ;;  %v871_v41 = vadd.f32 %v1512_v0, %v1900_v2  ;;  %v1521_v42 = vpop.f32.mrb[38].mxu1  ;;  %v865_v43 = vpop.f32.mrb[39].mxu0 }
 0x142   :  { %v1065_v44 = vmax.f32 %v1049_v31, 0.0  ;;  %v1055_v18 = vmax.f32 %v1039_v34, 0.0  ;;  %v903_v19 = vadd.f32 %v1520_v22, %v1934_v6  ;;  %v863_v32 = vadd.f32 %v862_v8, %v1896_v52  ;;  %v897_v24 = vpop.f32.mrb[39].mxu1 }
 0x143   :  { %v1312_v46 = vpack.c.bf16 %v1057_v15, %v1056_v1  ;;  %v1063_v47 = vmax.f32 %v1047_v40, 0.0  ;;  %v973_v20 = vmul.f32 %v1958_v14, %v871_v41  ;;  %v895_v27 = vadd.f32 %v894_v35, %v1910_v48 }
 0x144   :  { %v1332_v50 = vpack.c.bf16 %v1065_v44, %v1064_v23  ;;  %v1307_v51 = vpack.c.bf16 %v1055_v18, %v1054_v26  ;;  %v981_v28 = vmul.f32 %v1958_v14, %v903_v19  ;;  %v971_v2 = vmul.f32 %v1958_v14, %v863_v32 }
 0x145   :  { %1351 = vst [vmem:[%s2068_s5 + $0x8] sm:$0xff] %v1312_v46   ;;  %v1327_v6 = vpack.c.bf16 %v1063_v47, %v1062_v9  ;;  %v996_v52 = vadd.f32 %v1976_v30, %v973_v20  ;;  %v979_v54 = vmul.f32 %v1958_v14, %v895_v27  ;;  %v874_v16 = vadd.f32 %v1513_v36, %v1902_v3 }
 0x146   :  { %1355 = vst [vmem:[%s2068_s5 + $0x28] sm:$0xff] %v1332_v50   ;;  %1308 = vst [vmem:[%s2068_s5] sm:$0xff] %v1307_v51   ;;  %v1004_v48 = vadd.f32 %v1976_v30, %v981_v28  ;;  %v994_v39 = vadd.f32 %v1976_v30, %v971_v2  ;;  %v906_v55 = vadd.f32 %v1521_v42, %v1953_v12  ;;  %v1287_v58 = vunpack.c.h.bf16 %v1939_v7 }
 0x147   :  { %v866_v56 = vadd.f32 %v865_v43, %v1898_v53  ;;  %1354 = vst [vmem:[%s2068_s5 + $0x20] sm:$0xff] %v1327_v6   ;;  %v1002_v3 = vadd.f32 %v1976_v30, %v979_v54  ;;  %v974_v57 = vmul.f32 %v1958_v14, %v874_v16  ;;  %v898_v33 = vadd.f32 %v897_v24, %v1912_v49 }
 0x148   :  { %v982_v25 = vmul.f32 %v1958_v14, %v906_v55  ;;  %v1303_v59 = vunpack.c.h.bf16 %v1946_v10  ;;  %v1283_v53 = vunpack.c.h.bf16 %v1951_v11  ;;  %v1044_v60 = vadd.f32 %v1286_v29, %v996_v52 }
 0x149   :  { %v972_v12 = vmul.f32 %v1958_v14, %v866_v56  ;;  %v997_v61 = vadd.f32 %v1976_v30, %v974_v57  ;;  %v980_v62 = vmul.f32 %v1958_v14, %v898_v33  ;;  %v1299_v63 = vunpack.c.h.bf16 %v1967_v21 }
 0x14a   :  { %v1052_v49 = vadd.f32 %v1302_v38, %v1004_v48  ;;  %v1042_v17 = vadd.f32 %v1282_v37, %v994_v39  ;;  %v1005_v0 = vadd.f32 %v1976_v30, %v982_v25  ;;  %v1050_v7 = vadd.f32 %v1298_v45, %v1002_v3 }
 0x14b   :  { %v995_v1 = vadd.f32 %v1976_v30, %v972_v12  ;;  %v1045_v29 = vadd.f32 %v1287_v58, %v997_v61  ;;  %v1003_v4 = vadd.f32 %v1976_v30, %v980_v62  ;;  %v1060_v13 = vmax.f32 %v1044_v60, 0.0 }
 0x14c   :  { %v1053_v5 = vadd.f32 %v1303_v59, %v1005_v0  ;;  %v1068_v10 = vmax.f32 %v1052_v49, 0.0  ;;  %v1058_v38 = vmax.f32 %v1042_v17, 0.0  ;;  %v1066_v37 = vmax.f32 %v1050_v7, 0.0 }
 0x14d   :  { %v1043_v14 = vadd.f32 %v1283_v53, %v995_v1  ;;  %v1061_v22 = vmax.f32 %v1045_v29, 0.0  ;;  %v1051_v8 = vadd.f32 %v1299_v63, %v1003_v4 }
 0x14e   :  { %v1069_v23 = vmax.f32 %v1053_v5, 0.0 }
 0x14f   :  { %v1059_v11 = vmax.f32 %v1043_v14, 0.0  ;;  %v1322_v26 = vpack.c.bf16 %v1061_v22, %v1060_v13  ;;  %v1067_v31 = vmax.f32 %v1051_v8, 0.0 }
 0x150   :  { %v1342_v34 = vpack.c.bf16 %v1069_v23, %v1068_v10 }
 0x151   :  { %v1317_v35 = vpack.c.bf16 %v1059_v11, %v1058_v38  ;;  %1353 = vst [vmem:[%s2068_s5 + $0x18] sm:$0xff] %v1322_v26   ;;  %v1337_v21 = vpack.c.bf16 %v1067_v31, %v1066_v37 }
 0x152   :  { %1357 = vst [vmem:[%s2068_s5 + $0x38] sm:$0xff] %v1342_v34  }
 0x153   :  { %1352 = vst [vmem:[%s2068_s5 + $0x10] sm:$0xff] %v1317_v35   ;;  %1356 = vst [vmem:[%s2068_s5 + $0x30] sm:$0xff] %v1337_v21  }

// kernel: resnet_forward.30
= control target key start
LH: loop header
LB: loop body
LE: loop exit
PB: predicated region body
PF: predicated region fallthrough
CT: control target
= control target key end

     0   :  { %vm76_vm0 = vcmask 523264   ;;  %s301_s1 = inlined_call_operand.vmem [shape: bf16[64,128], index: 1, kind: input, shape index: {}]   ;;  %s302_s0 = inlined_call_operand.vmem [shape: bf16[32,64], index: 0, kind: input, shape index: {}]   ;;  %s303_s2 = inlined_call_operand.vmem [shape: f32[1,128], index: 2, kind: input, shape index: {}]   ;;  %s304_s3 = inlined_call_operand.vmem [shape: f32[1,128], index: 3, kind: input, shape index: {}]   ;;  %s305_s4 = inlined_call_operand.vmem [shape: bf16[32,128], index: 4, kind: output, shape index: {}]  }
   0x1   :  { %v240_v0 = vld [vmem:[%s301_s1] sm:$0xff]   ;;  %v241_v1 = vld [vmem:[%s301_s1 + $0x8] sm:$0xff]   ;;  %v242_v2 = vld [vmem:[%s301_s1 + $0x10] sm:$0xff]  }
   0x2   :  { %228 = vmatprep.subr.bf16.mxu0 %v240_v0  ;;  %v244_v3 = vld [vmem:[%s302_s0] sm:$0xff]   ;;  %v243_v4 = vld [vmem:[%s301_s1 + $0x18] sm:$0xff]   ;;  %v245_v5 = vld [vmem:[%s302_s0 + $0x8] sm:$0xff]  }
   0x3   :  { %229 = vmatpush3.bf16.msra.mxu0 %v240_v0  ;;  %236 = vmatprep.mubr.msk.bf16.mxu0 %vm76_vm0, %v244_v3  ;;  %v201_v6 = vld [vmem:[%s303_s2] ss:$0 sm:$0xff] }
   0x4   :  { %230 = vmatprep.subr.bf16.mxu0 %v241_v1  ;;  %v202_v10 = vld [vmem:[%s304_s3] ss:$0 sm:$0xff] }
   0x7   :  { %231 = vmatpush3.bf16.msra.mxu0 %v241_v1 }
   0x8   :  { %232 = vmatprep.subr.bf16.mxu0 %v242_v2 }
   0xb   :  { %233 = vmatpush3.bf16.msra.mxu0 %v242_v2 }
   0xc   :  { %234 = vmatprep.subr.bf16.mxu0 %v243_v4 }
   0xf   :  { %235 = vmatpush3.bf16.msra.mxu0 %v243_v4 }
  0x12   :  { %237 = vmatmul.mubr.msk.bf16.vlgmr.msra.gmra.mrb[0].mxu0 %vm76_vm0, %v245_v5 }
  0xe5   :  { %v238_v7 = vpop.f32.mrb[0].mxu0 }
  0xe6   :  { %v156_v8 = vmul.f32 %v238_v7, %v201_v6  ;;  %v117_v9 = vpop.f32.mrb[1].mxu0 }
  0xe7   :  { %v154_v11 = vmul.f32 %v201_v6, %v117_v9  ;;  %v239_v12 = vpop.f32.mrb[2].mxu0 }
  0xe8   :  { %v157_v13 = vmul.f32 %v239_v12, %v201_v6  ;;  %v120_v14 = vpop.f32.mrb[3].mxu0  ;;  %v167_v16 = vadd.f32 %v202_v10, %v156_v8 }
  0xe9   :  { %v155_v15 = vmul.f32 %v201_v6, %v120_v14  ;;  %v165_v18 = vadd.f32 %v202_v10, %v154_v11 }
  0xea   :  { %v168_v17 = vadd.f32 %v202_v10, %v157_v13 }
  0xeb   :  { %v166_v19 = vadd.f32 %v202_v10, %v155_v15 }
  0xec   :  { %v219_v20 = vpack.c.bf16 %v168_v17, %v167_v16 }
  0xed   :  { %v214_v21 = vpack.c.bf16 %v166_v19, %v165_v18 }
  0xee   :  { %221 = vst [vmem:[%s305_s4 + $0x8] sm:$0xff] %v219_v20  }
  0xef   :  { %215 = vst [vmem:[%s305_s4] sm:$0xff] %v214_v21  }

// kernel: resnet_forward.29
= control target key start
LH: loop header
LB: loop body
LE: loop exit
PB: predicated region body
PF: predicated region fallthrough
CT: control target
= control target key end

     0   :  { %vm380_vm0 = vcmask 523264   ;;  %s967_s1 = inlined_call_operand.vmem [shape: bf16[576,128], index: 1, kind: input, shape index: {}]   ;;  %s968_s0 = inlined_call_operand.vmem [shape: bf16[32,576], index: 0, kind: input, shape index: {}]   ;;  %s969_s2 = inlined_call_operand.vmem [shape: f32[1,128], index: 2, kind: input, shape index: {}]   ;;  %s970_s3 = inlined_call_operand.vmem [shape: f32[1,128], index: 3, kind: input, shape index: {}]   ;;  %s971_s4 = inlined_call_operand.vmem [shape: bf16[32,128], index: 4, kind: output, shape index: {}]  }
   0x1   :  { %v742_v0 = vld [vmem:[%s967_s1 + $0x40] sm:$0xff]   ;;  %v746_v4 = vld [vmem:[%s967_s1 + $0x48] sm:$0xff]   ;;  %v750_v8 = vld [vmem:[%s967_s1 + $0x50] sm:$0xff]  }
   0x2   :  { %v743_v1 = vld [vmem:[%s967_s1 + $0xc0] sm:$0xff]   ;;  %668 = vmatprep.subr.bf16.mxu0 %v742_v0  ;;  %v747_v5 = vld [vmem:[%s967_s1 + $0xc8] sm:$0xff]   ;;  %v751_v9 = vld [vmem:[%s967_s1 + $0xd0] sm:$0xff]  }
   0x3   :  { %v744_v2 = vld [vmem:[%s967_s1] sm:$0xff]   ;;  %696 = vmatprep.subr.bf16.mxu1 %v743_v1  ;;  %v748_v6 = vld [vmem:[%s967_s1 + $0x8] sm:$0xff]   ;;  %v752_v10 = vld [vmem:[%s967_s1 + $0x10] sm:$0xff]  }
   0x4   :  { %v745_v3 = vld [vmem:[%s967_s1 + $0x80] sm:$0xff]   ;;  %669 = vmatpush3.bf16.msra.mxu0 %v744_v2  ;;  %v749_v7 = vld [vmem:[%s967_s1 + $0x88] sm:$0xff]   ;;  %v753_v11 = vld [vmem:[%s967_s1 + $0x90] sm:$0xff]  }
   0x5   :  { %697 = vmatpush3.bf16.msra.mxu1 %v745_v3  ;;  %670 = vmatprep.subr.bf16.mxu0 %v746_v4  ;;  %v754_v12 = vld [vmem:[%s967_s1 + $0x58] sm:$0xff]   ;;  %v758_v16 = vld [vmem:[%s967_s1 + $0x60] sm:$0xff]   ;;  %v762_v20 = vld [vmem:[%s967_s1 + $0x68] sm:$0xff]  }
   0x6   :  { %698 = vmatprep.subr.bf16.mxu1 %v747_v5  ;;  %v755_v13 = vld [vmem:[%s967_s1 + $0xd8] sm:$0xff]   ;;  %v759_v17 = vld [vmem:[%s967_s1 + $0xe0] sm:$0xff]   ;;  %v763_v21 = vld [vmem:[%s967_s1 + $0xe8] sm:$0xff]  }
   0x7   :  { %v756_v14 = vld [vmem:[%s967_s1 + $0x18] sm:$0xff]   ;;  %v760_v18 = vld [vmem:[%s967_s1 + $0x20] sm:$0xff]   ;;  %v764_v22 = vld [vmem:[%s967_s1 + $0x28] sm:$0xff]  }
   0x8   :  { %671 = vmatpush3.bf16.msra.mxu0 %v748_v6  ;;  %v757_v15 = vld [vmem:[%s967_s1 + $0x98] sm:$0xff]   ;;  %v761_v19 = vld [vmem:[%s967_s1 + $0xa0] sm:$0xff]   ;;  %v765_v23 = vld [vmem:[%s967_s1 + $0xa8] sm:$0xff]  }
   0x9   :  { %699 = vmatpush3.bf16.msra.mxu1 %v749_v7  ;;  %672 = vmatprep.subr.bf16.mxu0 %v750_v8  ;;  %v766_v24 = vld [vmem:[%s967_s1 + $0x70] sm:$0xff]   ;;  %v770_v28 = vld [vmem:[%s967_s1 + $0x78] sm:$0xff]   ;;  %v779_v35 = vld [vmem:[%s968_s0 + $0xc] ss:$20 sps:$4 sm:$0xff]  }
   0xa   :  { %700 = vmatprep.subr.bf16.mxu1 %v751_v9  ;;  %v767_v25 = vld [vmem:[%s967_s1 + $0xf0] sm:$0xff]   ;;  %v771_v29 = vld [vmem:[%s967_s1 + $0xf8] sm:$0xff]   ;;  %v780_v36 = vld [vmem:[%s967_s1 + $0x100] sm:$0xff]   ;;  %468 = vmatprep.mubr.bf16.mxu1 %v779_v35 }
   0xb   :  { %v768_v26 = vld [vmem:[%s967_s1 + $0x30] sm:$0xff]   ;;  %v772_v30 = vld [vmem:[%s967_s1 + $0x38] sm:$0xff]   ;;  %v781_v37 = vld [vmem:[%s967_s1 + $0x108] sm:$0xff]  }
   0xc   :  { %673 = vmatpush3.bf16.msra.mxu0 %v752_v10  ;;  %v769_v27 = vld [vmem:[%s967_s1 + $0xb0] sm:$0xff]   ;;  %v773_v31 = vld [vmem:[%s967_s1 + $0xb8] sm:$0xff]   ;;  %v782_v38 = vld [vmem:[%s968_s0 + $0x2c] ss:$20 sps:$4 sm:$0xff]  }
   0xd   :  { %701 = vmatpush3.bf16.msra.mxu1 %v753_v11  ;;  %674 = vmatprep.subr.bf16.mxu0 %v754_v12  ;;  %v774_v32 = vld [vmem:[%s968_s0] ss:$20 sps:$4 sm:$0xff]   ;;  %v776_v33 = vld [vmem:[%s968_s0 + $0x4] ss:$20 sps:$4 sm:$0xff]   ;;  %v777_v34 = vld [vmem:[%s968_s0 + $0x8] ss:$20 sps:$4 sm:$0xff]  }
   0xe   :  { %702 = vmatprep.subr.bf16.mxu1 %v755_v13  ;;  %419 = vmatprep.mubr.bf16.mxu0 %v776_v33  ;;  %v784_v39 = vld [vmem:[%s968_s0 + $0x34] ss:$20 sps:$4 sm:$0xff]   ;;  %v787_v42 = vld [vmem:[%s968_s0 + $0x30] ss:$20 sps:$4 sm:$0xff]   ;;  %v789_v44 = vld [vmem:[%s967_s1 + $0x118] sm:$0xff]  }
   0xf   :  { %v786_v40 = vld [vmem:[%s968_s0 + $0x28] ss:$20 sps:$4 sm:$0xff]   ;;  %v788_v41 = vld [vmem:[%s967_s1 + $0x110] sm:$0xff]   ;;  %v791_v45 = vld [vmem:[%s968_s0 + $0x38] ss:$20 sps:$4 sm:$0xff]  }
  0x10   :  { %675 = vmatpush3.bf16.msra.mxu0 %v756_v14  ;;  %v790_v43 = vld [vmem:[%s968_s0 + $0x10] ss:$20 sps:$4 sm:$0xff]   ;;  %v647_v11 = vld [vmem:[%s969_s2] ss:$0 sm:$0xff] }
  0x11   :  { %703 = vmatpush3.bf16.msra.mxu1 %v757_v15  ;;  %676 = vmatprep.subr.bf16.mxu0 %v758_v16  ;;  %v648_v14 = vld [vmem:[%s970_s3] ss:$0 sm:$0xff] }
  0x12   :  { %704 = vmatprep.subr.bf16.mxu1 %v759_v17 }
  0x14   :  { %677 = vmatpush3.bf16.msra.mxu0 %v760_v18 }
  0x15   :  { %705 = vmatpush3.bf16.msra.mxu1 %v761_v19  ;;  %678 = vmatprep.subr.bf16.mxu0 %v762_v20 }
  0x16   :  { %706 = vmatprep.subr.bf16.mxu1 %v763_v21 }
  0x18   :  { %679 = vmatpush3.bf16.msra.mxu0 %v764_v22 }
  0x19   :  { %707 = vmatpush3.bf16.msra.mxu1 %v765_v23  ;;  %680 = vmatprep.subr.bf16.mxu0 %v766_v24 }
  0x1a   :  { %708 = vmatprep.subr.bf16.mxu1 %v767_v25 }
  0x1c   :  { %681 = vmatpush3.bf16.msra.mxu0 %v768_v26 }
  0x1d   :  { %709 = vmatpush3.bf16.msra.mxu1 %v769_v27  ;;  %682 = vmatprep.subr.bf16.mxu0 %v770_v28 }
  0x1e   :  { %710 = vmatprep.subr.bf16.mxu1 %v771_v29 }
  0x20   :  { %683 = vmatpush3.bf16.msra.mxu0 %v772_v30 }
  0x21   :  { %711 = vmatpush3.bf16.msra.mxu1 %v773_v31  ;;  %730 = vmatprep.subr.bf16.mxu0 %v780_v36 }
  0x23   :  { %420 = vmatmul.mubr.bf16.vlgmr.msra.gmra.mrb[0].mxu0 %v774_v32 }
  0x24   :  { %469 = vmatmul.mubr.bf16.vlgmr.msra.gmra.mrb[0].mxu1 %v777_v34  ;;  %731 = vmatpush3.bf16.msra.mxu0 %v780_v36 }
  0x25   :  { %732 = vmatprep.subr.bf16.mxu0 %v781_v37  ;;  %427 = vmatprep.mubr.bf16.mxu0 %v782_v38 }
  0x26   :  { %476 = vmatprep.mubr.bf16.mxu1 %v784_v39 }
  0x28   :  { %733 = vmatpush3.bf16.msra.mxu0 %v781_v37 }
  0x29   :  { %734 = vmatprep.subr.bf16.mxu0 %v788_v41 }
  0x2b   :  { %428 = vmatmul.mubr.bf16.gmra.mrb[4].mxu0 %v786_v40 }
  0x2c   :  { %477 = vmatmul.mubr.bf16.gmra.mrb[4].mxu1 %v787_v42  ;;  %738 = vmatprep.mubr.msk.bf16.mxu0 %vm380_vm0, %v790_v43 }
  0x2d   :  { %735 = vmatpush3.bf16.msra.mxu0 %v788_v41 }
  0x2e   :  { %736 = vmatprep.subr.bf16.mxu0 %v789_v44 }
  0x31   :  { %737 = vmatpush3.bf16.msra.mxu0 %v789_v44 }
  0x34   :  { %739 = vmatmul.mubr.msk.bf16.vlgmr.msra.gmra.mrb[8].mxu0 %vm380_vm0, %v791_v45 }
  0xf6   :  { %v684_v46 = vpop.f32.mrb[0].mxu0 }
  0xf7   :  { %v712_v47 = vpop.f32.mrb[0].mxu1  ;;  %v685_v48 = vpop.f32.mrb[1].mxu0 }
  0xf8   :  { %v686_v49 = vadd.f32 %v685_v48, %v684_v46  ;;  %v713_v50 = vpop.f32.mrb[1].mxu1  ;;  %v687_v51 = vpop.f32.mrb[2].mxu0 }
  0xf9   :  { %v714_v52 = vadd.f32 %v713_v50, %v712_v47  ;;  %v715_v53 = vpop.f32.mrb[2].mxu1  ;;  %v688_v54 = vpop.f32.mrb[3].mxu0 }
  0xfa   :  { %v689_v55 = vadd.f32 %v688_v54, %v687_v51  ;;  %v716_v56 = vpop.f32.mrb[3].mxu1 }
  0xfb   :  { %v717_v57 = vadd.f32 %v716_v56, %v715_v53  ;;  %v471_v58 = vadd.f32 %v714_v52, %v686_v49 }
  0xfd   :  { %v474_v59 = vadd.f32 %v717_v57, %v689_v55 }
  0xfe   :  { %v690_v60 = vpop.f32.mrb[4].mxu0 }
  0xff   :  { %v718_v61 = vpop.f32.mrb[4].mxu1  ;;  %v691_v62 = vpop.f32.mrb[5].mxu0 }
 0x100   :  { %v692_v63 = vadd.f32 %v691_v62, %v690_v60  ;;  %v719_v0 = vpop.f32.mrb[5].mxu1  ;;  %v693_v1 = vpop.f32.mrb[6].mxu0 }
 0x101   :  { %v720_v2 = vadd.f32 %v719_v0, %v718_v61  ;;  %v721_v3 = vpop.f32.mrb[6].mxu1  ;;  %v694_v4 = vpop.f32.mrb[7].mxu0 }
 0x102   :  { %v695_v5 = vadd.f32 %v694_v4, %v693_v1  ;;  %v722_v6 = vpop.f32.mrb[7].mxu1 }
 0x103   :  { %v723_v7 = vadd.f32 %v722_v6, %v721_v3  ;;  %v479_v8 = vadd.f32 %v720_v2, %v692_v63 }
 0x105   :  { %v482_v9 = vadd.f32 %v723_v7, %v695_v5 }
 0x107   :  { %v740_v10 = vpop.f32.mrb[8].mxu0 }
 0x108   :  { %v528_v12 = vadd.f32 %v740_v10, %v479_v8  ;;  %v519_v13 = vpop.f32.mrb[9].mxu0 }
 0x109   :  { %v520_v15 = vadd.f32 %v519_v13, %v471_v58  ;;  %v741_v16 = vpop.f32.mrb[10].mxu0 }
 0x10a   :  { %v558_v17 = vmul.f32 %v647_v11, %v528_v12  ;;  %v531_v18 = vadd.f32 %v741_v16, %v482_v9  ;;  %v522_v19 = vpop.f32.mrb[11].mxu0 }
 0x10b   :  { %v556_v20 = vmul.f32 %v647_v11, %v520_v15  ;;  %v523_v21 = vadd.f32 %v522_v19, %v474_v59 }
 0x10c   :  { %v569_v22 = vadd.f32 %v648_v14, %v558_v17  ;;  %v559_v23 = vmul.f32 %v647_v11, %v531_v18 }
 0x10d   :  { %v567_v24 = vadd.f32 %v648_v14, %v556_v20  ;;  %v557_v25 = vmul.f32 %v647_v11, %v523_v21 }
 0x10e   :  { %v570_v26 = vadd.f32 %v648_v14, %v559_v23  ;;  %v573_v28 = vmax.f32 %v569_v22, 0.0 }
 0x10f   :  { %v568_v27 = vadd.f32 %v648_v14, %v557_v25  ;;  %v571_v30 = vmax.f32 %v567_v24, 0.0 }
 0x110   :  { %v574_v29 = vmax.f32 %v570_v26, 0.0 }
 0x111   :  { %v572_v31 = vmax.f32 %v568_v27, 0.0 }
 0x112   :  { %v665_v32 = vpack.c.bf16 %v574_v29, %v573_v28 }
 0x113   :  { %v660_v33 = vpack.c.bf16 %v572_v31, %v571_v30 }
 0x114   :  { %667 = vst [vmem:[%s971_s4 + $0x8] sm:$0xff] %v665_v32  }
 0x115   :  { %661 = vst [vmem:[%s971_s4] sm:$0xff] %v660_v33  }

// kernel: resnet_forward.32
= control target key start
LH: loop header
LB: loop body
LE: loop exit
PB: predicated region body
PF: predicated region fallthrough
CT: control target
= control target key end

     0   :  { %s1686_s1 = inlined_call_operand.vmem [shape: bf16[1152,128], index: 1, kind: input, shape index: {}]   ;;  %s1687_s0 = inlined_call_operand.vmem [shape: bf16[32,1152], index: 0, kind: input, shape index: {}]   ;;  %s1688_s2 = inlined_call_operand.vmem [shape: f32[1,128], index: 2, kind: input, shape index: {}]   ;;  %s1689_s3 = inlined_call_operand.vmem [shape: f32[1,128], index: 3, kind: input, shape index: {}]   ;;  %s1690_s4 = inlined_call_operand.vmem [shape: bf16[32,128], index: 4, kind: output, shape index: {}]  }
   0x1   :  { %v1281_v0 = vld [vmem:[%s1686_s1 + $0x40] sm:$0xff]   ;;  %v1285_v4 = vld [vmem:[%s1686_s1 + $0x48] sm:$0xff]   ;;  %v1289_v8 = vld [vmem:[%s1686_s1 + $0x50] sm:$0xff]  }
   0x2   :  { %v1282_v1 = vld [vmem:[%s1686_s1 + $0xc0] sm:$0xff]   ;;  %1139 = vmatprep.subr.bf16.mxu0 %v1281_v0  ;;  %v1286_v5 = vld [vmem:[%s1686_s1 + $0xc8] sm:$0xff]   ;;  %v1290_v9 = vld [vmem:[%s1686_s1 + $0xd0] sm:$0xff]  }
   0x3   :  { %v1283_v2 = vld [vmem:[%s1686_s1] sm:$0xff]   ;;  %1167 = vmatprep.subr.bf16.mxu1 %v1282_v1  ;;  %v1287_v6 = vld [vmem:[%s1686_s1 + $0x8] sm:$0xff]   ;;  %v1291_v10 = vld [vmem:[%s1686_s1 + $0x10] sm:$0xff]  }
   0x4   :  { %v1284_v3 = vld [vmem:[%s1686_s1 + $0x80] sm:$0xff]   ;;  %1140 = vmatpush3.bf16.msra.mxu0 %v1283_v2  ;;  %v1288_v7 = vld [vmem:[%s1686_s1 + $0x88] sm:$0xff]   ;;  %v1292_v11 = vld [vmem:[%s1686_s1 + $0x90] sm:$0xff]  }
   0x5   :  { %1168 = vmatpush3.bf16.msra.mxu1 %v1284_v3  ;;  %1141 = vmatprep.subr.bf16.mxu0 %v1285_v4  ;;  %v1293_v12 = vld [vmem:[%s1686_s1 + $0x58] sm:$0xff]   ;;  %v1297_v16 = vld [vmem:[%s1686_s1 + $0x60] sm:$0xff]   ;;  %v1301_v20 = vld [vmem:[%s1686_s1 + $0x68] sm:$0xff]  }
   0x6   :  { %1169 = vmatprep.subr.bf16.mxu1 %v1286_v5  ;;  %v1294_v13 = vld [vmem:[%s1686_s1 + $0xd8] sm:$0xff]   ;;  %v1298_v17 = vld [vmem:[%s1686_s1 + $0xe0] sm:$0xff]   ;;  %v1302_v21 = vld [vmem:[%s1686_s1 + $0xe8] sm:$0xff]  }
   0x7   :  { %v1295_v14 = vld [vmem:[%s1686_s1 + $0x18] sm:$0xff]   ;;  %v1299_v18 = vld [vmem:[%s1686_s1 + $0x20] sm:$0xff]   ;;  %v1303_v22 = vld [vmem:[%s1686_s1 + $0x28] sm:$0xff]  }
   0x8   :  { %1142 = vmatpush3.bf16.msra.mxu0 %v1287_v6  ;;  %v1296_v15 = vld [vmem:[%s1686_s1 + $0x98] sm:$0xff]   ;;  %v1300_v19 = vld [vmem:[%s1686_s1 + $0xa0] sm:$0xff]   ;;  %v1304_v23 = vld [vmem:[%s1686_s1 + $0xa8] sm:$0xff]  }
   0x9   :  { %1170 = vmatpush3.bf16.msra.mxu1 %v1288_v7  ;;  %1143 = vmatprep.subr.bf16.mxu0 %v1289_v8  ;;  %v1305_v24 = vld [vmem:[%s1686_s1 + $0x70] sm:$0xff]   ;;  %v1309_v28 = vld [vmem:[%s1686_s1 + $0x78] sm:$0xff]   ;;  %v1313_v32 = vld [vmem:[%s1687_s0] ss:$36 sps:$4 sm:$0xff]  }
   0xa   :  { %1171 = vmatprep.subr.bf16.mxu1 %v1290_v9  ;;  %v1306_v25 = vld [vmem:[%s1686_s1 + $0xf0] sm:$0xff]   ;;  %v1310_v29 = vld [vmem:[%s1686_s1 + $0xf8] sm:$0xff]   ;;  %v1315_v33 = vld [vmem:[%s1687_s0 + $0x4] ss:$36 sps:$4 sm:$0xff]  }
   0xb   :  { %v1307_v26 = vld [vmem:[%s1686_s1 + $0x30] sm:$0xff]   ;;  %v1311_v30 = vld [vmem:[%s1686_s1 + $0x38] sm:$0xff]   ;;  %v1316_v34 = vld [vmem:[%s1687_s0 + $0x8] ss:$36 sps:$4 sm:$0xff]   ;;  %750 = vmatprep.mubr.bf16.mxu0 %v1315_v33 }
   0xc   :  { %1144 = vmatpush3.bf16.msra.mxu0 %v1291_v10  ;;  %v1308_v27 = vld [vmem:[%s1686_s1 + $0xb0] sm:$0xff]   ;;  %v1312_v31 = vld [vmem:[%s1686_s1 + $0xb8] sm:$0xff]   ;;  %v1319_v36 = vld [vmem:[%s1686_s1 + $0x140] sm:$0xff]  }
   0xd   :  { %1172 = vmatpush3.bf16.msra.mxu1 %v1292_v11  ;;  %1145 = vmatprep.subr.bf16.mxu0 %v1293_v12  ;;  %v1318_v35 = vld [vmem:[%s1687_s0 + $0xc] ss:$36 sps:$4 sm:$0xff]   ;;  %v1320_v37 = vld [vmem:[%s1686_s1 + $0x100] sm:$0xff]   ;;  %v1331_v48 = vld [vmem:[%s1686_s1 + $0x158] sm:$0xff]  }
   0xe   :  { %1173 = vmatprep.subr.bf16.mxu1 %v1294_v13  ;;  %799 = vmatprep.mubr.bf16.mxu1 %v1318_v35  ;;  %v1321_v38 = vld [vmem:[%s1686_s1 + $0x1c0] sm:$0xff]   ;;  %v1323_v40 = vld [vmem:[%s1686_s1 + $0x148] sm:$0xff]   ;;  %v1327_v44 = vld [vmem:[%s1686_s1 + $0x150] sm:$0xff]  }
   0xf   :  { %v1322_v39 = vld [vmem:[%s1686_s1 + $0x180] sm:$0xff]   ;;  %v1324_v41 = vld [vmem:[%s1686_s1 + $0x108] sm:$0xff]   ;;  %v1328_v45 = vld [vmem:[%s1686_s1 + $0x110] sm:$0xff]  }
  0x10   :  { %1146 = vmatpush3.bf16.msra.mxu0 %v1295_v14  ;;  %v1325_v42 = vld [vmem:[%s1686_s1 + $0x1c8] sm:$0xff]   ;;  %v1329_v46 = vld [vmem:[%s1686_s1 + $0x1d0] sm:$0xff]   ;;  %v1332_v49 = vld [vmem:[%s1686_s1 + $0x118] sm:$0xff]  }
  0x11   :  { %1174 = vmatpush3.bf16.msra.mxu1 %v1296_v15  ;;  %1147 = vmatprep.subr.bf16.mxu0 %v1297_v16  ;;  %v1326_v43 = vld [vmem:[%s1686_s1 + $0x188] sm:$0xff]   ;;  %v1330_v47 = vld [vmem:[%s1686_s1 + $0x190] sm:$0xff]   ;;  %v1333_v50 = vld [vmem:[%s1686_s1 + $0x1d8] sm:$0xff]  }
  0x12   :  { %1175 = vmatprep.subr.bf16.mxu1 %v1298_v17  ;;  %v1334_v51 = vld [vmem:[%s1686_s1 + $0x198] sm:$0xff]   ;;  %v1335_v52 = vld [vmem:[%s1686_s1 + $0x160] sm:$0xff]   ;;  %v1339_v56 = vld [vmem:[%s1686_s1 + $0x168] sm:$0xff]  }
  0x13   :  { %v1336_v53 = vld [vmem:[%s1686_s1 + $0x120] sm:$0xff]   ;;  %v1340_v57 = vld [vmem:[%s1687_s0 + $0x4c] ss:$36 sps:$4 sm:$0xff]   ;;  %v1342_v58 = vld [vmem:[%s1687_s0 + $0x54] ss:$36 sps:$4 sm:$0xff]  }
  0x14   :  { %1148 = vmatpush3.bf16.msra.mxu0 %v1299_v18  ;;  %v1337_v54 = vld [vmem:[%s1686_s1 + $0x1e0] sm:$0xff]   ;;  %v1344_v59 = vld [vmem:[%s1686_s1 + $0x128] sm:$0xff]   ;;  %v1346_v61 = vld [vmem:[%s1687_s0 + $0x50] ss:$36 sps:$4 sm:$0xff]  }
  0x15   :  { %1176 = vmatpush3.bf16.msra.mxu1 %v1300_v19  ;;  %1149 = vmatprep.subr.bf16.mxu0 %v1301_v20  ;;  %v1338_v55 = vld [vmem:[%s1686_s1 + $0x1a0] sm:$0xff]   ;;  %v1345_v60 = vld [vmem:[%s1687_s0 + $0x48] ss:$36 sps:$4 sm:$0xff]   ;;  %v1349_v0 = vld [vmem:[%s1686_s1 + $0x170] sm:$0xff]  }
  0x16   :  { %1177 = vmatprep.subr.bf16.mxu1 %v1302_v21  ;;  %v1347_v62 = vld [vmem:[%s1686_s1 + $0x1e8] sm:$0xff]   ;;  %v1350_v1 = vld [vmem:[%s1686_s1 + $0x130] sm:$0xff]   ;;  %v1353_v4 = vld [vmem:[%s1686_s1 + $0x178] sm:$0xff]  }
  0x17   :  { %v1348_v63 = vld [vmem:[%s1686_s1 + $0x1a8] sm:$0xff]   ;;  %v1351_v2 = vld [vmem:[%s1686_s1 + $0x1f0] sm:$0xff]   ;;  %v1354_v5 = vld [vmem:[%s1686_s1 + $0x138] sm:$0xff]  }
  0x18   :  { %1150 = vmatpush3.bf16.msra.mxu0 %v1303_v22  ;;  %v1352_v3 = vld [vmem:[%s1686_s1 + $0x1b0] sm:$0xff]   ;;  %v1355_v6 = vld [vmem:[%s1686_s1 + $0x1f8] sm:$0xff]   ;;  %v1360_v10 = vld [vmem:[%s1686_s1 + $0x200] sm:$0xff]  }
  0x19   :  { %1178 = vmatpush3.bf16.msra.mxu1 %v1304_v23  ;;  %1151 = vmatprep.subr.bf16.mxu0 %v1305_v24  ;;  %v1356_v7 = vld [vmem:[%s1687_s0 + $0x10] ss:$36 sps:$4 sm:$0xff]   ;;  %v1359_v9 = vld [vmem:[%s1686_s1 + $0x1b8] sm:$0xff]   ;;  %v1364_v13 = vld [vmem:[%s1686_s1 + $0x208] sm:$0xff]  }
  0x1a   :  { %1179 = vmatprep.subr.bf16.mxu1 %v1306_v25  ;;  %v1358_v8 = vld [vmem:[%s1687_s0 + $0x14] ss:$36 sps:$4 sm:$0xff]   ;;  %v1363_v12 = vld [vmem:[%s1687_s0 + $0x1c] ss:$36 sps:$4 sm:$0xff]   ;;  %v1369_v17 = vld [vmem:[%s1687_s0 + $0x64] ss:$36 sps:$4 sm:$0xff]  }
  0x1b   :  { %v1361_v11 = vld [vmem:[%s1687_s0 + $0x18] ss:$36 sps:$4 sm:$0xff]   ;;  %v1368_v16 = vld [vmem:[%s1686_s1 + $0x210] sm:$0xff]   ;;  %v1371_v18 = vld [vmem:[%s1687_s0 + $0x60] ss:$36 sps:$4 sm:$0xff]  }
  0x1c   :  { %1152 = vmatpush3.bf16.msra.mxu0 %v1307_v26  ;;  %v1365_v14 = vld [vmem:[%s1687_s0 + $0x5c] ss:$36 sps:$4 sm:$0xff]   ;;  %v1374_v22 = vld [vmem:[%s1686_s1 + $0x228] sm:$0xff]   ;;  %v1375_v23 = vld [vmem:[%s1686_s1 + $0x230] sm:$0xff]  }
  0x1d   :  { %1180 = vmatpush3.bf16.msra.mxu1 %v1308_v27  ;;  %1153 = vmatprep.subr.bf16.mxu0 %v1309_v28  ;;  %v1367_v15 = vld [vmem:[%s1687_s0 + $0x58] ss:$36 sps:$4 sm:$0xff]   ;;  %v1373_v20 = vld [vmem:[%s1686_s1 + $0x220] sm:$0xff]   ;;  %v1378_v25 = vld [vmem:[%s1687_s0 + $0x68] ss:$36 sps:$4 sm:$0xff]  }
  0x1e   :  { %1181 = vmatprep.subr.bf16.mxu1 %v1310_v29  ;;  %v1372_v19 = vld [vmem:[%s1686_s1 + $0x218] sm:$0xff]   ;;  %v1377_v21 = vld [vmem:[%s1687_s0 + $0x20] ss:$36 sps:$4 sm:$0xff]  }
  0x1f   :  { %v1376_v24 = vld [vmem:[%s1686_s1 + $0x238] sm:$0xff]  }
  0x20   :  { %1154 = vmatpush3.bf16.msra.mxu0 %v1311_v30 }
  0x21   :  { %1182 = vmatpush3.bf16.msra.mxu1 %v1312_v31  ;;  %1195 = vmatprep.subr.bf16.mxu0 %v1319_v36 }
  0x22   :  { %1223 = vmatprep.subr.bf16.mxu1 %v1321_v38 }
  0x23   :  { %751 = vmatmul.mubr.bf16.vlgmr.msra.gmra.mrb[0].mxu0 %v1313_v32 }
  0x24   :  { %800 = vmatmul.mubr.bf16.vlgmr.msra.gmra.mrb[0].mxu1 %v1316_v34  ;;  %1196 = vmatpush3.bf16.msra.mxu0 %v1320_v37 }
  0x25   :  { %1224 = vmatpush3.bf16.msra.mxu1 %v1322_v39  ;;  %1197 = vmatprep.subr.bf16.mxu0 %v1323_v40 }
  0x26   :  { %1225 = vmatprep.subr.bf16.mxu1 %v1325_v42  ;;  %758 = vmatprep.mubr.bf16.mxu0 %v1340_v57 }
  0x27   :  { %807 = vmatprep.mubr.bf16.mxu1 %v1342_v58 }
  0x28   :  { %1198 = vmatpush3.bf16.msra.mxu0 %v1324_v41 }
  0x29   :  { %1226 = vmatpush3.bf16.msra.mxu1 %v1326_v43  ;;  %1199 = vmatprep.subr.bf16.mxu0 %v1327_v44 }
  0x2a   :  { %1227 = vmatprep.subr.bf16.mxu1 %v1329_v46 }
  0x2b   :  { %759 = vmatmul.mubr.bf16.gmra.mrb[4].mxu0 %v1345_v60 }
  0x2c   :  { %1200 = vmatpush3.bf16.msra.mxu0 %v1328_v45  ;;  %808 = vmatmul.mubr.bf16.gmra.mrb[4].mxu1 %v1346_v61 }
  0x2d   :  { %1228 = vmatpush3.bf16.msra.mxu1 %v1330_v47  ;;  %1201 = vmatprep.subr.bf16.mxu0 %v1331_v48 }
  0x2e   :  { %1229 = vmatprep.subr.bf16.mxu1 %v1333_v50  ;;  %848 = vmatprep.mubr.bf16.mxu0 %v1358_v8 }
  0x2f   :  { %897 = vmatprep.mubr.bf16.mxu1 %v1363_v12 }
  0x30   :  { %1202 = vmatpush3.bf16.msra.mxu0 %v1332_v49 }
  0x31   :  { %1230 = vmatpush3.bf16.msra.mxu1 %v1334_v51  ;;  %1203 = vmatprep.subr.bf16.mxu0 %v1335_v52 }
  0x32   :  { %1231 = vmatprep.subr.bf16.mxu1 %v1337_v54 }
  0x34   :  { %1204 = vmatpush3.bf16.msra.mxu0 %v1336_v53 }
  0x35   :  { %1232 = vmatpush3.bf16.msra.mxu1 %v1338_v55  ;;  %1205 = vmatprep.subr.bf16.mxu0 %v1339_v56 }
  0x36   :  { %1233 = vmatprep.subr.bf16.mxu1 %v1347_v62 }
  0x38   :  { %1206 = vmatpush3.bf16.msra.mxu0 %v1344_v59 }
  0x39   :  { %1234 = vmatpush3.bf16.msra.mxu1 %v1348_v63  ;;  %1207 = vmatprep.subr.bf16.mxu0 %v1349_v0 }
  0x3a   :  { %1235 = vmatprep.subr.bf16.mxu1 %v1351_v2 }
  0x3c   :  { %1208 = vmatpush3.bf16.msra.mxu0 %v1350_v1 }
  0x3d   :  { %1236 = vmatpush3.bf16.msra.mxu1 %v1352_v3  ;;  %1209 = vmatprep.subr.bf16.mxu0 %v1353_v4 }
  0x3e   :  { %1237 = vmatprep.subr.bf16.mxu1 %v1355_v6 }
  0x40   :  { %1210 = vmatpush3.bf16.msra.mxu0 %v1354_v5 }
  0x41   :  { %1238 = vmatpush3.bf16.msra.mxu1 %v1359_v9  ;;  %1261 = vmatprep.subr.bf16.mxu0 %v1360_v10 }
  0x43   :  { %849 = vmatmul.mubr.bf16.vlgmr.msra.gmra.mrb[8].mxu0 %v1356_v7 }
  0x44   :  { %1262 = vmatpush3.bf16.msra.mxu0 %v1360_v10  ;;  %898 = vmatmul.mubr.bf16.vlgmr.msra.gmra.mrb[8].mxu1 %v1361_v11 }
  0x45   :  { %1263 = vmatprep.subr.bf16.mxu0 %v1364_v13  ;;  %856 = vmatprep.mubr.bf16.mxu0 %v1365_v14 }
  0x46   :  { %905 = vmatprep.mubr.bf16.mxu1 %v1369_v17 }
  0x48   :  { %1264 = vmatpush3.bf16.msra.mxu0 %v1364_v13 }
  0x49   :  { %1265 = vmatprep.subr.bf16.mxu0 %v1368_v16 }
  0x4b   :  { %857 = vmatmul.mubr.bf16.gmra.mrb[12].mxu0 %v1367_v15 }
  0x4c   :  { %1266 = vmatpush3.bf16.msra.mxu0 %v1368_v16  ;;  %906 = vmatmul.mubr.bf16.gmra.mrb[12].mxu1 %v1371_v18 }
  0x4d   :  { %1267 = vmatprep.subr.bf16.mxu0 %v1372_v19  ;;  %1277 = vmatprep.mubr.bf16.mxu0 %v1377_v21 }
  0x50   :  { %1268 = vmatpush3.bf16.msra.mxu0 %v1372_v19 }
  0x51   :  { %1269 = vmatprep.subr.bf16.mxu0 %v1373_v20 }
  0x54   :  { %1270 = vmatpush3.bf16.msra.mxu0 %v1373_v20 }
  0x55   :  { %1271 = vmatprep.subr.bf16.mxu0 %v1374_v22 }
  0x58   :  { %1272 = vmatpush3.bf16.msra.mxu0 %v1374_v22 }
  0x59   :  { %1273 = vmatprep.subr.bf16.mxu0 %v1375_v23 }
  0x5c   :  { %1274 = vmatpush3.bf16.msra.mxu0 %v1375_v23  ;;  %v1118_v23 = vld [vmem:[%s1688_s2] ss:$0 sm:$0xff] }
  0x5d   :  { %1275 = vmatprep.subr.bf16.mxu0 %v1376_v24 }
  0x60   :  { %1276 = vmatpush3.bf16.msra.mxu0 %v1376_v24 }
  0x63   :  { %1278 = vmatmul.mubr.bf16.vlgmr.msra.gmra.mrb[16].mxu0 %v1378_v25 }
  0xf6   :  { %v1155_v26 = vpop.f32.mrb[0].mxu0 }
  0xf7   :  { %v1183_v27 = vpop.f32.mrb[0].mxu1  ;;  %v1156_v28 = vpop.f32.mrb[1].mxu0 }
  0xf8   :  { %v1157_v29 = vadd.f32 %v1156_v28, %v1155_v26  ;;  %v1184_v30 = vpop.f32.mrb[1].mxu1  ;;  %v1158_v31 = vpop.f32.mrb[2].mxu0  ;;  %v1119_v26 = vld [vmem:[%s1689_s3] ss:$0 sm:$0xff] }
  0xf9   :  { %v1185_v32 = vadd.f32 %v1184_v30, %v1183_v27  ;;  %v1186_v33 = vpop.f32.mrb[2].mxu1  ;;  %v1159_v34 = vpop.f32.mrb[3].mxu0 }
  0xfa   :  { %v1160_v35 = vadd.f32 %v1159_v34, %v1158_v31  ;;  %v1187_v36 = vpop.f32.mrb[3].mxu1 }
  0xfb   :  { %v802_v37 = vadd.f32 %v1185_v32, %v1157_v29  ;;  %v1188_v38 = vadd.f32 %v1187_v36, %v1186_v33 }
  0xfd   :  { %v805_v39 = vadd.f32 %v1188_v38, %v1160_v35 }
  0xfe   :  { %v1161_v40 = vpop.f32.mrb[4].mxu0 }
  0xff   :  { %v1189_v41 = vpop.f32.mrb[4].mxu1  ;;  %v1162_v42 = vpop.f32.mrb[5].mxu0 }
 0x100   :  { %v1190_v43 = vpop.f32.mrb[5].mxu1  ;;  %v1163_v44 = vadd.f32 %v1162_v42, %v1161_v40  ;;  %v1164_v46 = vpop.f32.mrb[6].mxu0 }
 0x101   :  { %v1191_v45 = vadd.f32 %v1190_v43, %v1189_v41  ;;  %v1192_v47 = vpop.f32.mrb[6].mxu1  ;;  %v1165_v48 = vpop.f32.mrb[7].mxu0 }
 0x102   :  { %v1193_v49 = vpop.f32.mrb[7].mxu1  ;;  %v1166_v51 = vadd.f32 %v1165_v48, %v1164_v46 }
 0x103   :  { %v810_v50 = vadd.f32 %v1191_v45, %v1163_v44  ;;  %v1194_v52 = vadd.f32 %v1193_v49, %v1192_v47 }
 0x105   :  { %v813_v53 = vadd.f32 %v1194_v52, %v1166_v51 }
 0x116   :  { %v1211_v54 = vpop.f32.mrb[8].mxu0 }
 0x117   :  { %v1212_v55 = vpop.f32.mrb[9].mxu0  ;;  %v1239_v58 = vpop.f32.mrb[8].mxu1 }
 0x118   :  { %v1213_v56 = vadd.f32 %v1212_v55, %v1211_v54  ;;  %v1214_v57 = vpop.f32.mrb[10].mxu0  ;;  %v1240_v62 = vpop.f32.mrb[9].mxu1 }
 0x119   :  { %v1215_v59 = vpop.f32.mrb[11].mxu0  ;;  %v1241_v63 = vadd.f32 %v1240_v62, %v1239_v58  ;;  %v1242_v0 = vpop.f32.mrb[10].mxu1 }
 0x11a   :  { %v851_v60 = vadd.f32 %v1213_v56, %v802_v37  ;;  %v1216_v61 = vadd.f32 %v1215_v59, %v1214_v57  ;;  %v1243_v2 = vpop.f32.mrb[11].mxu1 }
 0x11b   :  { %v1244_v3 = vadd.f32 %v1243_v2, %v1242_v0 }
 0x11c   :  { %v854_v1 = vadd.f32 %v1216_v61, %v805_v39  ;;  %v900_v4 = vadd.f32 %v1241_v63, %v851_v60 }
 0x11e   :  { %v1217_v5 = vpop.f32.mrb[12].mxu0  ;;  %v903_v7 = vadd.f32 %v1244_v3, %v854_v1 }
 0x11f   :  { %v1218_v6 = vpop.f32.mrb[13].mxu0  ;;  %v1245_v10 = vpop.f32.mrb[12].mxu1 }
 0x120   :  { %v1219_v8 = vadd.f32 %v1218_v6, %v1217_v5  ;;  %v1220_v9 = vpop.f32.mrb[14].mxu0  ;;  %v1246_v14 = vpop.f32.mrb[13].mxu1 }
 0x121   :  { %v1221_v11 = vpop.f32.mrb[15].mxu0  ;;  %v1247_v15 = vadd.f32 %v1246_v14, %v1245_v10  ;;  %v1248_v16 = vpop.f32.mrb[14].mxu1 }
 0x122   :  { %v859_v12 = vadd.f32 %v1219_v8, %v810_v50  ;;  %v1222_v13 = vadd.f32 %v1221_v11, %v1220_v9  ;;  %v1249_v18 = vpop.f32.mrb[15].mxu1 }
 0x123   :  { %v1250_v19 = vadd.f32 %v1249_v18, %v1248_v16 }
 0x124   :  { %v862_v17 = vadd.f32 %v1222_v13, %v813_v53  ;;  %v908_v20 = vadd.f32 %v1247_v15, %v859_v12 }
 0x126   :  { %v911_v21 = vadd.f32 %v1250_v19, %v862_v17 }
 0x136   :  { %v1279_v22 = vpop.f32.mrb[16].mxu0 }
 0x137   :  { %v957_v24 = vadd.f32 %v1279_v22, %v908_v20  ;;  %v948_v25 = vpop.f32.mrb[17].mxu0 }
 0x138   :  { %v949_v27 = vadd.f32 %v948_v25, %v900_v4  ;;  %v1280_v28 = vpop.f32.mrb[18].mxu0 }
 0x139   :  { %v987_v29 = vmul.f32 %v1118_v23, %v957_v24  ;;  %v960_v30 = vadd.f32 %v1280_v28, %v911_v21  ;;  %v951_v31 = vpop.f32.mrb[19].mxu0 }
 0x13a   :  { %v985_v32 = vmul.f32 %v1118_v23, %v949_v27  ;;  %v952_v33 = vadd.f32 %v951_v31, %v903_v7 }
 0x13b   :  { %v998_v34 = vadd.f32 %v1119_v26, %v987_v29  ;;  %v988_v35 = vmul.f32 %v1118_v23, %v960_v30 }
 0x13c   :  { %v996_v36 = vadd.f32 %v1119_v26, %v985_v32  ;;  %v986_v37 = vmul.f32 %v1118_v23, %v952_v33 }
 0x13d   :  { %v999_v38 = vadd.f32 %v1119_v26, %v988_v35  ;;  %v1002_v40 = vmax.f32 %v998_v34, 0.0 }
 0x13e   :  { %v997_v39 = vadd.f32 %v1119_v26, %v986_v37  ;;  %v1000_v42 = vmax.f32 %v996_v36, 0.0 }
 0x13f   :  { %v1003_v41 = vmax.f32 %v999_v38, 0.0 }
 0x140   :  { %v1001_v43 = vmax.f32 %v997_v39, 0.0 }
 0x141   :  { %v1136_v44 = vpack.c.bf16 %v1003_v41, %v1002_v40 }
 0x142   :  { %v1131_v45 = vpack.c.bf16 %v1001_v43, %v1000_v42 }
 0x143   :  { %1138 = vst [vmem:[%s1690_s4 + $0x8] sm:$0xff] %v1136_v44  }
 0x144   :  { %1132 = vst [vmem:[%s1690_s4] sm:$0xff] %v1131_v45  }

// kernel: resnet_forward.31
= control target key start
LH: loop header
LB: loop body
LE: loop exit
PB: predicated region body
PF: predicated region fallthrough
CT: control target
= control target key end

     0   :  { %s1721_s1 = inlined_call_operand.vmem [shape: bf16[1152,128], index: 1, kind: input, shape index: {}]   ;;  %s1722_s0 = inlined_call_operand.vmem [shape: bf16[32,1152], index: 0, kind: input, shape index: {}]   ;;  %s1723_s2 = inlined_call_operand.vmem [shape: f32[1,128], index: 2, kind: input, shape index: {}]   ;;  %s1724_s4 = inlined_call_operand.vmem [shape: bf16[32,128], index: 4, kind: input, shape index: {}]   ;;  %s1725_s3 = inlined_call_operand.vmem [shape: f32[1,128], index: 3, kind: input, shape index: {}]   ;;  %s1726_s5 = inlined_call_operand.vmem [shape: bf16[32,128], index: 5, kind: output, shape index: {}]  }
   0x1   :  { %v1305_v0 = vld [vmem:[%s1721_s1 + $0x40] sm:$0xff]   ;;  %v1309_v4 = vld [vmem:[%s1721_s1 + $0x48] sm:$0xff]   ;;  %v1313_v8 = vld [vmem:[%s1721_s1 + $0x50] sm:$0xff]  }
   0x2   :  { %v1306_v1 = vld [vmem:[%s1721_s1 + $0xc0] sm:$0xff]   ;;  %1163 = vmatprep.subr.bf16.mxu0 %v1305_v0  ;;  %v1310_v5 = vld [vmem:[%s1721_s1 + $0xc8] sm:$0xff]   ;;  %v1314_v9 = vld [vmem:[%s1721_s1 + $0xd0] sm:$0xff]  }
   0x3   :  { %v1307_v2 = vld [vmem:[%s1721_s1] sm:$0xff]   ;;  %1191 = vmatprep.subr.bf16.mxu1 %v1306_v1  ;;  %v1311_v6 = vld [vmem:[%s1721_s1 + $0x8] sm:$0xff]   ;;  %v1315_v10 = vld [vmem:[%s1721_s1 + $0x10] sm:$0xff]  }
   0x4   :  { %v1308_v3 = vld [vmem:[%s1721_s1 + $0x80] sm:$0xff]   ;;  %1164 = vmatpush3.bf16.msra.mxu0 %v1307_v2  ;;  %v1312_v7 = vld [vmem:[%s1721_s1 + $0x88] sm:$0xff]   ;;  %v1316_v11 = vld [vmem:[%s1721_s1 + $0x90] sm:$0xff]  }
   0x5   :  { %1192 = vmatpush3.bf16.msra.mxu1 %v1308_v3  ;;  %1165 = vmatprep.subr.bf16.mxu0 %v1309_v4  ;;  %v1317_v12 = vld [vmem:[%s1721_s1 + $0x58] sm:$0xff]   ;;  %v1321_v16 = vld [vmem:[%s1721_s1 + $0x60] sm:$0xff]   ;;  %v1325_v20 = vld [vmem:[%s1721_s1 + $0x68] sm:$0xff]  }
   0x6   :  { %1193 = vmatprep.subr.bf16.mxu1 %v1310_v5  ;;  %v1318_v13 = vld [vmem:[%s1721_s1 + $0xd8] sm:$0xff]   ;;  %v1322_v17 = vld [vmem:[%s1721_s1 + $0xe0] sm:$0xff]   ;;  %v1326_v21 = vld [vmem:[%s1721_s1 + $0xe8] sm:$0xff]  }
   0x7   :  { %v1319_v14 = vld [vmem:[%s1721_s1 + $0x18] sm:$0xff]   ;;  %v1323_v18 = vld [vmem:[%s1721_s1 + $0x20] sm:$0xff]   ;;  %v1327_v22 = vld [vmem:[%s1721_s1 + $0x28] sm:$0xff]  }
   0x8   :  { %1166 = vmatpush3.bf16.msra.mxu0 %v1311_v6  ;;  %v1320_v15 = vld [vmem:[%s1721_s1 + $0x98] sm:$0xff]   ;;  %v1324_v19 = vld [vmem:[%s1721_s1 + $0xa0] sm:$0xff]   ;;  %v1328_v23 = vld [vmem:[%s1721_s1 + $0xa8] sm:$0xff]  }
   0x9   :  { %1194 = vmatpush3.bf16.msra.mxu1 %v1312_v7  ;;  %1167 = vmatprep.subr.bf16.mxu0 %v1313_v8  ;;  %v1329_v24 = vld [vmem:[%s1721_s1 + $0x70] sm:$0xff]   ;;  %v1333_v28 = vld [vmem:[%s1721_s1 + $0x78] sm:$0xff]   ;;  %v1337_v32 = vld [vmem:[%s1722_s0] ss:$36 sps:$4 sm:$0xff]  }
   0xa   :  { %1195 = vmatprep.subr.bf16.mxu1 %v1314_v9  ;;  %v1330_v25 = vld [vmem:[%s1721_s1 + $0xf0] sm:$0xff]   ;;  %v1334_v29 = vld [vmem:[%s1721_s1 + $0xf8] sm:$0xff]   ;;  %v1339_v33 = vld [vmem:[%s1722_s0 + $0x4] ss:$36 sps:$4 sm:$0xff]  }
   0xb   :  { %v1331_v26 = vld [vmem:[%s1721_s1 + $0x30] sm:$0xff]   ;;  %v1335_v30 = vld [vmem:[%s1721_s1 + $0x38] sm:$0xff]   ;;  %v1340_v34 = vld [vmem:[%s1722_s0 + $0x8] ss:$36 sps:$4 sm:$0xff]   ;;  %753 = vmatprep.mubr.bf16.mxu0 %v1339_v33 }
   0xc   :  { %1168 = vmatpush3.bf16.msra.mxu0 %v1315_v10  ;;  %v1332_v27 = vld [vmem:[%s1721_s1 + $0xb0] sm:$0xff]   ;;  %v1336_v31 = vld [vmem:[%s1721_s1 + $0xb8] sm:$0xff]   ;;  %v1343_v36 = vld [vmem:[%s1721_s1 + $0x140] sm:$0xff]  }
   0xd   :  { %1196 = vmatpush3.bf16.msra.mxu1 %v1316_v11  ;;  %1169 = vmatprep.subr.bf16.mxu0 %v1317_v12  ;;  %v1342_v35 = vld [vmem:[%s1722_s0 + $0xc] ss:$36 sps:$4 sm:$0xff]   ;;  %v1344_v37 = vld [vmem:[%s1721_s1 + $0x100] sm:$0xff]   ;;  %v1355_v48 = vld [vmem:[%s1721_s1 + $0x158] sm:$0xff]  }
   0xe   :  { %1197 = vmatprep.subr.bf16.mxu1 %v1318_v13  ;;  %802 = vmatprep.mubr.bf16.mxu1 %v1342_v35  ;;  %v1345_v38 = vld [vmem:[%s1721_s1 + $0x1c0] sm:$0xff]   ;;  %v1347_v40 = vld [vmem:[%s1721_s1 + $0x148] sm:$0xff]   ;;  %v1351_v44 = vld [vmem:[%s1721_s1 + $0x150] sm:$0xff]  }
   0xf   :  { %v1346_v39 = vld [vmem:[%s1721_s1 + $0x180] sm:$0xff]   ;;  %v1348_v41 = vld [vmem:[%s1721_s1 + $0x108] sm:$0xff]   ;;  %v1352_v45 = vld [vmem:[%s1721_s1 + $0x110] sm:$0xff]  }
  0x10   :  { %1170 = vmatpush3.bf16.msra.mxu0 %v1319_v14  ;;  %v1349_v42 = vld [vmem:[%s1721_s1 + $0x1c8] sm:$0xff]   ;;  %v1353_v46 = vld [vmem:[%s1721_s1 + $0x1d0] sm:$0xff]   ;;  %v1356_v49 = vld [vmem:[%s1721_s1 + $0x118] sm:$0xff]  }
  0x11   :  { %1198 = vmatpush3.bf16.msra.mxu1 %v1320_v15  ;;  %1171 = vmatprep.subr.bf16.mxu0 %v1321_v16  ;;  %v1350_v43 = vld [vmem:[%s1721_s1 + $0x188] sm:$0xff]   ;;  %v1354_v47 = vld [vmem:[%s1721_s1 + $0x190] sm:$0xff]   ;;  %v1357_v50 = vld [vmem:[%s1721_s1 + $0x1d8] sm:$0xff]  }
  0x12   :  { %1199 = vmatprep.subr.bf16.mxu1 %v1322_v17  ;;  %v1358_v51 = vld [vmem:[%s1721_s1 + $0x198] sm:$0xff]   ;;  %v1359_v52 = vld [vmem:[%s1721_s1 + $0x160] sm:$0xff]   ;;  %v1363_v56 = vld [vmem:[%s1721_s1 + $0x168] sm:$0xff]  }
  0x13   :  { %v1360_v53 = vld [vmem:[%s1721_s1 + $0x120] sm:$0xff]   ;;  %v1364_v57 = vld [vmem:[%s1722_s0 + $0x4c] ss:$36 sps:$4 sm:$0xff]   ;;  %v1366_v58 = vld [vmem:[%s1722_s0 + $0x54] ss:$36 sps:$4 sm:$0xff]  }
  0x14   :  { %1172 = vmatpush3.bf16.msra.mxu0 %v1323_v18  ;;  %v1361_v54 = vld [vmem:[%s1721_s1 + $0x1e0] sm:$0xff]   ;;  %v1368_v59 = vld [vmem:[%s1721_s1 + $0x128] sm:$0xff]   ;;  %v1370_v61 = vld [vmem:[%s1722_s0 + $0x50] ss:$36 sps:$4 sm:$0xff]  }
  0x15   :  { %1200 = vmatpush3.bf16.msra.mxu1 %v1324_v19  ;;  %1173 = vmatprep.subr.bf16.mxu0 %v1325_v20  ;;  %v1362_v55 = vld [vmem:[%s1721_s1 + $0x1a0] sm:$0xff]   ;;  %v1369_v60 = vld [vmem:[%s1722_s0 + $0x48] ss:$36 sps:$4 sm:$0xff]   ;;  %v1373_v0 = vld [vmem:[%s1721_s1 + $0x170] sm:$0xff]  }
  0x16   :  { %1201 = vmatprep.subr.bf16.mxu1 %v1326_v21  ;;  %v1371_v62 = vld [vmem:[%s1721_s1 + $0x1e8] sm:$0xff]   ;;  %v1374_v1 = vld [vmem:[%s1721_s1 + $0x130] sm:$0xff]   ;;  %v1377_v4 = vld [vmem:[%s1721_s1 + $0x178] sm:$0xff]  }
  0x17   :  { %v1372_v63 = vld [vmem:[%s1721_s1 + $0x1a8] sm:$0xff]   ;;  %v1375_v2 = vld [vmem:[%s1721_s1 + $0x1f0] sm:$0xff]   ;;  %v1378_v5 = vld [vmem:[%s1721_s1 + $0x138] sm:$0xff]  }
  0x18   :  { %1174 = vmatpush3.bf16.msra.mxu0 %v1327_v22  ;;  %v1376_v3 = vld [vmem:[%s1721_s1 + $0x1b0] sm:$0xff]   ;;  %v1379_v6 = vld [vmem:[%s1721_s1 + $0x1f8] sm:$0xff]   ;;  %v1384_v10 = vld [vmem:[%s1721_s1 + $0x200] sm:$0xff]  }
  0x19   :  { %1202 = vmatpush3.bf16.msra.mxu1 %v1328_v23  ;;  %1175 = vmatprep.subr.bf16.mxu0 %v1329_v24  ;;  %v1380_v7 = vld [vmem:[%s1722_s0 + $0x10] ss:$36 sps:$4 sm:$0xff]   ;;  %v1383_v9 = vld [vmem:[%s1721_s1 + $0x1b8] sm:$0xff]   ;;  %v1388_v13 = vld [vmem:[%s1721_s1 + $0x208] sm:$0xff]  }
  0x1a   :  { %1203 = vmatprep.subr.bf16.mxu1 %v1330_v25  ;;  %v1382_v8 = vld [vmem:[%s1722_s0 + $0x14] ss:$36 sps:$4 sm:$0xff]   ;;  %v1387_v12 = vld [vmem:[%s1722_s0 + $0x1c] ss:$36 sps:$4 sm:$0xff]   ;;  %v1393_v17 = vld [vmem:[%s1722_s0 + $0x64] ss:$36 sps:$4 sm:$0xff]  }
  0x1b   :  { %v1385_v11 = vld [vmem:[%s1722_s0 + $0x18] ss:$36 sps:$4 sm:$0xff]   ;;  %v1392_v16 = vld [vmem:[%s1721_s1 + $0x210] sm:$0xff]   ;;  %v1395_v18 = vld [vmem:[%s1722_s0 + $0x60] ss:$36 sps:$4 sm:$0xff]  }
  0x1c   :  { %1176 = vmatpush3.bf16.msra.mxu0 %v1331_v26  ;;  %v1389_v14 = vld [vmem:[%s1722_s0 + $0x5c] ss:$36 sps:$4 sm:$0xff]   ;;  %v1398_v22 = vld [vmem:[%s1721_s1 + $0x228] sm:$0xff]   ;;  %v1399_v23 = vld [vmem:[%s1721_s1 + $0x230] sm:$0xff]  }
  0x1d   :  { %1204 = vmatpush3.bf16.msra.mxu1 %v1332_v27  ;;  %1177 = vmatprep.subr.bf16.mxu0 %v1333_v28  ;;  %v1391_v15 = vld [vmem:[%s1722_s0 + $0x58] ss:$36 sps:$4 sm:$0xff]   ;;  %v1397_v20 = vld [vmem:[%s1721_s1 + $0x220] sm:$0xff]   ;;  %v1402_v25 = vld [vmem:[%s1722_s0 + $0x68] ss:$36 sps:$4 sm:$0xff]  }
  0x1e   :  { %1205 = vmatprep.subr.bf16.mxu1 %v1334_v29  ;;  %v1396_v19 = vld [vmem:[%s1721_s1 + $0x218] sm:$0xff]   ;;  %v1401_v21 = vld [vmem:[%s1722_s0 + $0x20] ss:$36 sps:$4 sm:$0xff]  }
  0x1f   :  { %v1400_v24 = vld [vmem:[%s1721_s1 + $0x238] sm:$0xff]  }
  0x20   :  { %1178 = vmatpush3.bf16.msra.mxu0 %v1335_v30 }
  0x21   :  { %1206 = vmatpush3.bf16.msra.mxu1 %v1336_v31  ;;  %1219 = vmatprep.subr.bf16.mxu0 %v1343_v36 }
  0x22   :  { %1247 = vmatprep.subr.bf16.mxu1 %v1345_v38 }
  0x23   :  { %754 = vmatmul.mubr.bf16.vlgmr.msra.gmra.mrb[0].mxu0 %v1337_v32 }
  0x24   :  { %803 = vmatmul.mubr.bf16.vlgmr.msra.gmra.mrb[0].mxu1 %v1340_v34  ;;  %1220 = vmatpush3.bf16.msra.mxu0 %v1344_v37 }
  0x25   :  { %1248 = vmatpush3.bf16.msra.mxu1 %v1346_v39  ;;  %1221 = vmatprep.subr.bf16.mxu0 %v1347_v40 }
  0x26   :  { %1249 = vmatprep.subr.bf16.mxu1 %v1349_v42  ;;  %761 = vmatprep.mubr.bf16.mxu0 %v1364_v57 }
  0x27   :  { %810 = vmatprep.mubr.bf16.mxu1 %v1366_v58 }
  0x28   :  { %1222 = vmatpush3.bf16.msra.mxu0 %v1348_v41 }
  0x29   :  { %1250 = vmatpush3.bf16.msra.mxu1 %v1350_v43  ;;  %1223 = vmatprep.subr.bf16.mxu0 %v1351_v44 }
  0x2a   :  { %1251 = vmatprep.subr.bf16.mxu1 %v1353_v46 }
  0x2b   :  { %762 = vmatmul.mubr.bf16.gmra.mrb[4].mxu0 %v1369_v60 }
  0x2c   :  { %1224 = vmatpush3.bf16.msra.mxu0 %v1352_v45  ;;  %811 = vmatmul.mubr.bf16.gmra.mrb[4].mxu1 %v1370_v61 }
  0x2d   :  { %1252 = vmatpush3.bf16.msra.mxu1 %v1354_v47  ;;  %1225 = vmatprep.subr.bf16.mxu0 %v1355_v48 }
  0x2e   :  { %1253 = vmatprep.subr.bf16.mxu1 %v1357_v50  ;;  %851 = vmatprep.mubr.bf16.mxu0 %v1382_v8 }
  0x2f   :  { %900 = vmatprep.mubr.bf16.mxu1 %v1387_v12 }
  0x30   :  { %1226 = vmatpush3.bf16.msra.mxu0 %v1356_v49 }
  0x31   :  { %1254 = vmatpush3.bf16.msra.mxu1 %v1358_v51  ;;  %1227 = vmatprep.subr.bf16.mxu0 %v1359_v52 }
  0x32   :  { %1255 = vmatprep.subr.bf16.mxu1 %v1361_v54 }
  0x34   :  { %1228 = vmatpush3.bf16.msra.mxu0 %v1360_v53 }
  0x35   :  { %1256 = vmatpush3.bf16.msra.mxu1 %v1362_v55  ;;  %1229 = vmatprep.subr.bf16.mxu0 %v1363_v56 }
  0x36   :  { %1257 = vmatprep.subr.bf16.mxu1 %v1371_v62 }
  0x38   :  { %1230 = vmatpush3.bf16.msra.mxu0 %v1368_v59 }
  0x39   :  { %1258 = vmatpush3.bf16.msra.mxu1 %v1372_v63  ;;  %1231 = vmatprep.subr.bf16.mxu0 %v1373_v0 }
  0x3a   :  { %1259 = vmatprep.subr.bf16.mxu1 %v1375_v2 }
  0x3c   :  { %1232 = vmatpush3.bf16.msra.mxu0 %v1374_v1 }
  0x3d   :  { %1260 = vmatpush3.bf16.msra.mxu1 %v1376_v3  ;;  %1233 = vmatprep.subr.bf16.mxu0 %v1377_v4 }
  0x3e   :  { %1261 = vmatprep.subr.bf16.mxu1 %v1379_v6 }
  0x40   :  { %1234 = vmatpush3.bf16.msra.mxu0 %v1378_v5 }
  0x41   :  { %1262 = vmatpush3.bf16.msra.mxu1 %v1383_v9  ;;  %1285 = vmatprep.subr.bf16.mxu0 %v1384_v10 }
  0x43   :  { %852 = vmatmul.mubr.bf16.vlgmr.msra.gmra.mrb[8].mxu0 %v1380_v7 }
  0x44   :  { %1286 = vmatpush3.bf16.msra.mxu0 %v1384_v10  ;;  %901 = vmatmul.mubr.bf16.vlgmr.msra.gmra.mrb[8].mxu1 %v1385_v11 }
  0x45   :  { %1287 = vmatprep.subr.bf16.mxu0 %v1388_v13  ;;  %859 = vmatprep.mubr.bf16.mxu0 %v1389_v14 }
  0x46   :  { %908 = vmatprep.mubr.bf16.mxu1 %v1393_v17 }
  0x48   :  { %1288 = vmatpush3.bf16.msra.mxu0 %v1388_v13 }
  0x49   :  { %1289 = vmatprep.subr.bf16.mxu0 %v1392_v16 }
  0x4b   :  { %860 = vmatmul.mubr.bf16.gmra.mrb[12].mxu0 %v1391_v15 }
  0x4c   :  { %1290 = vmatpush3.bf16.msra.mxu0 %v1392_v16  ;;  %909 = vmatmul.mubr.bf16.gmra.mrb[12].mxu1 %v1395_v18 }
  0x4d   :  { %1291 = vmatprep.subr.bf16.mxu0 %v1396_v19  ;;  %1301 = vmatprep.mubr.bf16.mxu0 %v1401_v21 }
  0x50   :  { %1292 = vmatpush3.bf16.msra.mxu0 %v1396_v19 }
  0x51   :  { %1293 = vmatprep.subr.bf16.mxu0 %v1397_v20 }
  0x54   :  { %1294 = vmatpush3.bf16.msra.mxu0 %v1397_v20 }
  0x55   :  { %1295 = vmatprep.subr.bf16.mxu0 %v1398_v22 }
  0x58   :  { %1296 = vmatpush3.bf16.msra.mxu0 %v1398_v22 }
  0x59   :  { %1297 = vmatprep.subr.bf16.mxu0 %v1399_v23 }
  0x5c   :  { %1298 = vmatpush3.bf16.msra.mxu0 %v1399_v23  ;;  %v1133_v23 = vld [vmem:[%s1723_s2] ss:$0 sm:$0xff] }
  0x5d   :  { %1299 = vmatprep.subr.bf16.mxu0 %v1400_v24 }
  0x60   :  { %1300 = vmatpush3.bf16.msra.mxu0 %v1400_v24  ;;  %v1161_v24 = vld [vmem:[%s1724_s4 + $0x8] sm:$0xff]  }
  0x63   :  { %1302 = vmatmul.mubr.bf16.vlgmr.msra.gmra.mrb[16].mxu0 %v1402_v25 }
  0xf6   :  { %v1179_v26 = vpop.f32.mrb[0].mxu0 }
  0xf7   :  { %v1207_v27 = vpop.f32.mrb[0].mxu1  ;;  %v1180_v28 = vpop.f32.mrb[1].mxu0 }
  0xf8   :  { %v1181_v29 = vadd.f32 %v1180_v28, %v1179_v26  ;;  %v1208_v30 = vpop.f32.mrb[1].mxu1  ;;  %v1182_v31 = vpop.f32.mrb[2].mxu0  ;;  %v1134_v28 = vld [vmem:[%s1725_s3] ss:$0 sm:$0xff] }
  0xf9   :  { %v1209_v32 = vadd.f32 %v1208_v30, %v1207_v27  ;;  %v1210_v33 = vpop.f32.mrb[2].mxu1  ;;  %v1183_v34 = vpop.f32.mrb[3].mxu0  ;;  %v1144_v27 = vld [vmem:[%s1724_s4] sm:$0xff]  }
  0xfa   :  { %v1184_v35 = vadd.f32 %v1183_v34, %v1182_v31  ;;  %v1211_v36 = vpop.f32.mrb[3].mxu1 }
  0xfb   :  { %v805_v37 = vadd.f32 %v1209_v32, %v1181_v29  ;;  %v1212_v38 = vadd.f32 %v1211_v36, %v1210_v33  ;;  %v1149_v32 = vunpack.c.l.bf16 %v1161_v24  ;;  %v1145_v36 = vunpack.c.l.bf16 %v1144_v27 }
  0xfd   :  { %v808_v39 = vadd.f32 %v1212_v38, %v1184_v35 }
  0xfe   :  { %v1185_v40 = vpop.f32.mrb[4].mxu0 }
  0xff   :  { %v1213_v41 = vpop.f32.mrb[4].mxu1  ;;  %v1186_v42 = vpop.f32.mrb[5].mxu0 }
 0x100   :  { %v1214_v43 = vpop.f32.mrb[5].mxu1  ;;  %v1187_v44 = vadd.f32 %v1186_v42, %v1185_v40  ;;  %v1188_v46 = vpop.f32.mrb[6].mxu0  ;;  %v1150_v40 = vunpack.c.h.bf16 %v1161_v24 }
 0x101   :  { %v1215_v45 = vadd.f32 %v1214_v43, %v1213_v41  ;;  %v1216_v47 = vpop.f32.mrb[6].mxu1  ;;  %v1189_v48 = vpop.f32.mrb[7].mxu0  ;;  %v1146_v43 = vunpack.c.h.bf16 %v1144_v27 }
 0x102   :  { %v1217_v49 = vpop.f32.mrb[7].mxu1  ;;  %v1190_v51 = vadd.f32 %v1189_v48, %v1188_v46 }
 0x103   :  { %v813_v50 = vadd.f32 %v1215_v45, %v1187_v44  ;;  %v1218_v52 = vadd.f32 %v1217_v49, %v1216_v47 }
 0x105   :  { %v816_v53 = vadd.f32 %v1218_v52, %v1190_v51 }
 0x116   :  { %v1235_v54 = vpop.f32.mrb[8].mxu0 }
 0x117   :  { %v1236_v55 = vpop.f32.mrb[9].mxu0  ;;  %v1263_v58 = vpop.f32.mrb[8].mxu1 }
 0x118   :  { %v1237_v56 = vadd.f32 %v1236_v55, %v1235_v54  ;;  %v1238_v57 = vpop.f32.mrb[10].mxu0  ;;  %v1264_v62 = vpop.f32.mrb[9].mxu1 }
 0x119   :  { %v1239_v59 = vpop.f32.mrb[11].mxu0  ;;  %v1265_v63 = vadd.f32 %v1264_v62, %v1263_v58  ;;  %v1266_v0 = vpop.f32.mrb[10].mxu1 }
 0x11a   :  { %v854_v60 = vadd.f32 %v1237_v56, %v805_v37  ;;  %v1240_v61 = vadd.f32 %v1239_v59, %v1238_v57  ;;  %v1267_v2 = vpop.f32.mrb[11].mxu1 }
 0x11b   :  { %v1268_v3 = vadd.f32 %v1267_v2, %v1266_v0 }
 0x11c   :  { %v857_v1 = vadd.f32 %v1240_v61, %v808_v39  ;;  %v903_v4 = vadd.f32 %v1265_v63, %v854_v60 }
 0x11e   :  { %v1241_v5 = vpop.f32.mrb[12].mxu0  ;;  %v906_v7 = vadd.f32 %v1268_v3, %v857_v1 }
 0x11f   :  { %v1242_v6 = vpop.f32.mrb[13].mxu0  ;;  %v1269_v10 = vpop.f32.mrb[12].mxu1 }
 0x120   :  { %v1243_v8 = vadd.f32 %v1242_v6, %v1241_v5  ;;  %v1244_v9 = vpop.f32.mrb[14].mxu0  ;;  %v1270_v14 = vpop.f32.mrb[13].mxu1 }
 0x121   :  { %v1245_v11 = vpop.f32.mrb[15].mxu0  ;;  %v1271_v15 = vadd.f32 %v1270_v14, %v1269_v10  ;;  %v1272_v16 = vpop.f32.mrb[14].mxu1 }
 0x122   :  { %v862_v12 = vadd.f32 %v1243_v8, %v813_v50  ;;  %v1246_v13 = vadd.f32 %v1245_v11, %v1244_v9  ;;  %v1273_v18 = vpop.f32.mrb[15].mxu1 }
 0x123   :  { %v1274_v19 = vadd.f32 %v1273_v18, %v1272_v16 }
 0x124   :  { %v865_v17 = vadd.f32 %v1246_v13, %v816_v53  ;;  %v911_v20 = vadd.f32 %v1271_v15, %v862_v12 }
 0x126   :  { %v914_v21 = vadd.f32 %v1274_v19, %v865_v17 }
 0x136   :  { %v1303_v22 = vpop.f32.mrb[16].mxu0 }
 0x137   :  { %v960_v25 = vadd.f32 %v1303_v22, %v911_v20  ;;  %v951_v26 = vpop.f32.mrb[17].mxu0 }
 0x138   :  { %v952_v29 = vadd.f32 %v951_v26, %v903_v4  ;;  %v1304_v30 = vpop.f32.mrb[18].mxu0 }
 0x139   :  { %v990_v31 = vmul.f32 %v1133_v23, %v960_v25  ;;  %v963_v33 = vadd.f32 %v1304_v30, %v914_v21  ;;  %v954_v34 = vpop.f32.mrb[19].mxu0 }
 0x13a   :  { %v988_v35 = vmul.f32 %v1133_v23, %v952_v29  ;;  %v955_v37 = vadd.f32 %v954_v34, %v906_v7 }
 0x13b   :  { %v1001_v38 = vadd.f32 %v1134_v28, %v990_v31  ;;  %v991_v39 = vmul.f32 %v1133_v23, %v963_v33 }
 0x13c   :  { %v999_v41 = vadd.f32 %v1134_v28, %v988_v35  ;;  %v989_v42 = vmul.f32 %v1133_v23, %v955_v37 }
 0x13d   :  { %v1013_v44 = vadd.f32 %v1149_v32, %v1001_v38  ;;  %v1002_v45 = vadd.f32 %v1134_v28, %v991_v39 }
 0x13e   :  { %v1011_v46 = vadd.f32 %v1145_v36, %v999_v41  ;;  %v1000_v47 = vadd.f32 %v1134_v28, %v989_v42 }
 0x13f   :  { %v1014_v48 = vadd.f32 %v1150_v40, %v1002_v45  ;;  %v1017_v50 = vmax.f32 %v1013_v44, 0.0 }
 0x140   :  { %v1012_v49 = vadd.f32 %v1146_v43, %v1000_v47  ;;  %v1015_v52 = vmax.f32 %v1011_v46, 0.0 }
 0x141   :  { %v1018_v51 = vmax.f32 %v1014_v48, 0.0 }
 0x142   :  { %v1016_v53 = vmax.f32 %v1012_v49, 0.0 }
 0x143   :  { %v1159_v54 = vpack.c.bf16 %v1018_v51, %v1017_v50 }
 0x144   :  { %v1154_v55 = vpack.c.bf16 %v1016_v53, %v1015_v52 }
 0x145   :  { %1162 = vst [vmem:[%s1726_s5 + $0x8] sm:$0xff] %v1159_v54  }
 0x146   :  { %1155 = vst [vmem:[%s1726_s5] sm:$0xff] %v1154_v55  }

// kernel: resnet_forward.35
= control target key start
LH: loop header
LB: loop body
LE: loop exit
PB: predicated region body
PF: predicated region fallthrough
CT: control target
= control target key end

     0   :  { %v257_v1 = vmov 0   ;;  %v175_v18 = vlaneseq  ;;  %s343_s1 = inlined_call_operand.vmem [shape: bf16[128,256], index: 1, kind: input, shape index: {}]   ;;  %s344_s0 = inlined_call_operand.vmem [shape: bf16[8,128], index: 0, kind: input, shape index: {}]   ;;  %s345_s2 = inlined_call_operand.vmem [shape: f32[1,256], index: 2, kind: input, shape index: {}]   ;;  %s346_s3 = inlined_call_operand.vmem [shape: f32[1,256], index: 3, kind: input, shape index: {}]   ;;  %s347_s4 = inlined_call_operand.vmem [shape: bf16[8,256], index: 4, kind: output, shape index: {}]  }
   0x1   :  { %v233_v0 = vld [vmem:[%s343_s1 + $0x4] ss:$8 sps:$4 sm:$0xff]   ;;  %155 = vmatprep.mubr.bf16.mxu0 %v257_v1  ;;  %v235_v2 = vld [vmem:[%s343_s1] ss:$8 sps:$4 sm:$0xff]   ;;  %v236_v3 = vld [vmem:[%s343_s1 + $0x14] ss:$8 sps:$4 sm:$0xff]  }
   0x2   :  { %123 = vmatprep.subr.bf16.mxu0 %v233_v0  ;;  %v238_v4 = vld [vmem:[%s343_s1 + $0x10] ss:$8 sps:$4 sm:$0xff]   ;;  %v239_v5 = vld [vmem:[%s343_s1 + $0x24] ss:$8 sps:$4 sm:$0xff]   ;;  %v241_v6 = vld [vmem:[%s343_s1 + $0x20] ss:$8 sps:$4 sm:$0xff]  }
   0x3   :  { %124 = vmatpush1.bf16.msra.mxu0 %v235_v2  ;;  %v242_v7 = vld [vmem:[%s343_s1 + $0x34] ss:$8 sps:$4 sm:$0xff]   ;;  %v244_v8 = vld [vmem:[%s343_s1 + $0x30] ss:$8 sps:$4 sm:$0xff]   ;;  %v245_v9 = vld [vmem:[%s343_s1 + $0x44] ss:$8 sps:$4 sm:$0xff]  }
   0x4   :  { %125 = vmatprep.subr.bf16.mxu0 %v236_v3  ;;  %v247_v10 = vld [vmem:[%s343_s1 + $0x40] ss:$8 sps:$4 sm:$0xff]   ;;  %v248_v11 = vld [vmem:[%s343_s1 + $0x54] ss:$8 sps:$4 sm:$0xff]   ;;  %v250_v12 = vld [vmem:[%s343_s1 + $0x50] ss:$8 sps:$4 sm:$0xff]  }
   0x5   :  { %v251_v13 = vld [vmem:[%s343_s1 + $0x64] ss:$8 sps:$4 sm:$0xff]   ;;  %v253_v14 = vld [vmem:[%s343_s1 + $0x60] ss:$8 sps:$4 sm:$0xff]   ;;  %v254_v15 = vld [vmem:[%s343_s1 + $0x74] ss:$8 sps:$4 sm:$0xff]  }
   0x6   :  { %v256_v16 = vld [vmem:[%s343_s1 + $0x70] ss:$8 sps:$4 sm:$0xff]   ;;  %v26_v17 = vld [vmem:[%s344_s0] sm:$0xf]  ;;  %v176_v19 = vshrl.u32 %v175_v18, 7 }
   0x7   :  { %126 = vmatpush1.bf16.msra.mxu0 %v238_v4  ;;  %v173_v21 = vld [vmem:[%s345_s2] sm:$0x3] }
   0x8   :  { %127 = vmatprep.subr.bf16.mxu0 %v239_v5  ;;  %v177_v20 = vsub.s32 0, %v176_v19  ;;  %v181_v22 = vsub.s32 1, %v176_v19  ;;  %v187_v23 = vld [vmem:[%s346_s3] sm:$0x3] }
   0xa   :  { %v178_v24 = vrot.slane %v173_v21, %v177_v20  ;;  %v182_v25 = vrot.slane %v173_v21, %v181_v22  ;;  %v192_v26 = vrot.slane %v187_v23, %v177_v20  ;;  %v196_v28 = vrot.slane %v187_v23, %v181_v22 }
   0xb   :  { %128 = vmatpush1.bf16.msra.mxu0 %v241_v6 }
   0xc   :  { %129 = vmatprep.subr.bf16.mxu0 %v242_v7 }
   0xf   :  { %130 = vmatpush1.bf16.msra.mxu0 %v244_v8 }
  0x10   :  { %131 = vmatprep.subr.bf16.mxu0 %v245_v9 }
  0x13   :  { %132 = vmatpush1.bf16.msra.mxu0 %v247_v10 }
  0x14   :  { %133 = vmatprep.subr.bf16.mxu0 %v248_v11 }
  0x17   :  { %134 = vmatpush1.bf16.msra.mxu0 %v250_v12 }
  0x18   :  { %135 = vmatprep.subr.bf16.mxu0 %v251_v13 }
  0x1b   :  { %136 = vmatpush1.bf16.msra.mxu0 %v253_v14 }
  0x1c   :  { %137 = vmatprep.subr.bf16.mxu0 %v254_v15 }
  0x1f   :  { %138 = vmatpush1.bf16.msra.mxu0 %v256_v16 }
  0x22   :  { %156 = vmatmul.mubr.bf16.vlgmr.msra.gmra.mrb[0].mxu0 %v26_v17 }
  0xf5   :  { %v157_v27 = vpop.f32.mrb[0].mxu0 }
  0xf6   :  { %v185_v29 = vmul.f32 %v178_v24, %v157_v27  ;;  %v159_v30 = vpop.f32.mrb[1].mxu0 }
  0xf7   :  { %v186_v31 = vmul.f32 %v182_v25, %v159_v30  ;;  %v161_v32 = vpop.f32.mrb[2].mxu0 }
  0xf8   :  { %v199_v33 = vadd.f32 %v192_v26, %v185_v29  ;;  %v162_v34 = vpop.f32.mrb[3].mxu0 }
  0xf9   :  { %v200_v35 = vadd.f32 %v196_v28, %v186_v31 }
  0xfb   :  { %v231_v36 = vpack.c.bf16 %v200_v35, %v199_v33 }
  0xfd   :  { %209 = vst [vmem:[%s347_s4] sm:$0xff] %v231_v36 }

// kernel: resnet_forward.36
= control target key start
LH: loop header
LB: loop body
LE: loop exit
PB: predicated region body
PF: predicated region fallthrough
CT: control target
= control target key end

     0   :  { %s1349_s18 = smov 0   ;;  %s1351_s19 = smov 0   ;;  %s1470_s0 = inlined_call_operand.vmem [shape: bf16[8,2560], index: 0, kind: input, shape index: {}]   ;;  %s1471_s1 = inlined_call_operand.vmem [shape: bf16[2560,256], index: 1, kind: input, shape index: {}]   ;;  %s1472_s2 = inlined_call_operand.vmem [shape: f32[1,256], index: 2, kind: input, shape index: {}]   ;;  %s1473_s3 = inlined_call_operand.vmem [shape: f32[1,256], index: 3, kind: input, shape index: {}]   ;;  %s1474_s4 = inlined_call_operand.vmem [shape: bf16[8,256], index: 4, kind: input, shape index: {}]   ;;  %s1475_s5 = inlined_call_operand.vmem [shape: bf16[8,256], index: 5, kind: output, shape index: {}]  }
   0x1   :  { %s1353_s20 = smov 0  }
   0x2 LB: > { %s27_s21 = sadd.s32 1, %s1312_s19  ;;  %p1086_p0 = scmp.ge.s32.totalorder %s1316_s20, 1  ;;  %s1316_s20 = sphi %s1353_s20, %s15_s20   ;;  %s1312_s19 = sphi %s1351_s19, %s1477_s19   ;;  %s1308_s18 = sphi %s1349_s18, %s1476_s18  }
   0x3   : > { %p28_p1 = scmp.ge.s32.totalorder %s27_s21, 5  ;;  %p271_p2 = scmp.lt.s32.totalorder %s1316_s20, 6 }
   0x5   : > { %s1479_s21 = smov (%p28_p1, %s27_s21), 0  ;;  %p272_p3 = pnand %p1086_p0, %p271_p2 }
   0x6   : > { %s1087_s22 = sshll.u32 (!%p272_p3), %s1308_s18, 2  ;;  %s1089_s23 = sshll.u32 (!%p272_p3), %s1308_s18, 6 }
   0x7   : > { %275 = sbr.rel (%p272_p3) target bundleno = 326 (0x146), region = 40  ;;  %p337_p4 = scmp.lt.s32.totalorder (!%p272_p3), %s1087_s22, 19 }
   0x8   : > { %p346_p5 = scmp.lt.s32.totalorder (!%p272_p3), %s1089_s23, 319  ;;  %p1092_p6 = scmp.ne.s32.totalorder (!%p272_p3), %s1308_s18, 0 }
   0xe   : > { %s1481_s22 = smov (!%p337_p4, %s1087_s22), 19  ;;  %s1483_s23 = smov (!%p346_p5, %s1089_s23), 319 }
   0xf   : > { %s1088_s24 = sshll.u32 %s1481_s22, 2  ;;  %s1167_s28 = sshll.u32 %s1483_s23, 3  ;;  %v1318_v0 = vmov (!%p1092_p6), 0.0  }
  0x10   : > { %s1374_s27 = scalar_lea.vmem %s1470_s0, %s1088_s24  ;;  %s1379_s6 = scalar_lea.vmem %s1471_s1, %s1167_s28  ;;  %390 = vst [vmem:[#allocation2] sm:$0xff] (!%p1092_p6), %v1318_v0  ;;  %391 = vst [vmem:[#allocation2 + $0x8] sm:$0xff] (!%p1092_p6), %v1318_v0 }
  0x11   : > { %389 = sbr.rel (%p1092_p6) target bundleno = 24 (0x18), region = 44 }
  0x18 PF: > { %v1194_v1 = vld [vmem:[%s1379_s6 + $0x4] ss:$8 sps:$4 sm:$0xff]   ;;  %v1198_v3 = vld [vmem:[%s1379_s6] ss:$8 sps:$4 sm:$0xff]   ;;  %v1200_v5 = vld [vmem:[%s1379_s6 + $0x14] ss:$8 sps:$4 sm:$0xff]  }
  0x19   : > { %v1196_v2 = vld [vmem:[%s1379_s6 + $0x104] ss:$8 sps:$4 sm:$0xff]   ;;  %794 = vmatprep.subr.bf16.mxu0 %v1194_v1  ;;  %v1199_v4 = vld [vmem:[%s1379_s6 + $0x100] ss:$8 sps:$4 sm:$0xff]   ;;  %v1202_v6 = vld [vmem:[%s1379_s6 + $0x114] ss:$8 sps:$4 sm:$0xff]  }
  0x1a   : > { %835 = vmatprep.subr.bf16.mxu1 %v1196_v2  ;;  %795 = vmatpush1.bf16.msra.mxu0 %v1198_v3  ;;  %v1204_v7 = vld [vmem:[%s1379_s6 + $0x10] ss:$8 sps:$4 sm:$0xff]   ;;  %v1206_v9 = vld [vmem:[%s1379_s6 + $0x24] ss:$8 sps:$4 sm:$0xff]   ;;  %v1210_v11 = vld [vmem:[%s1379_s6 + $0x20] ss:$8 sps:$4 sm:$0xff]  }
  0x1b   : > { %836 = vmatpush1.bf16.msra.mxu1 %v1199_v4  ;;  %796 = vmatprep.subr.bf16.mxu0 %v1200_v5  ;;  %v1205_v8 = vld [vmem:[%s1379_s6 + $0x110] ss:$8 sps:$4 sm:$0xff]   ;;  %v1208_v10 = vld [vmem:[%s1379_s6 + $0x124] ss:$8 sps:$4 sm:$0xff]   ;;  %v1211_v12 = vld [vmem:[%s1379_s6 + $0x120] ss:$8 sps:$4 sm:$0xff]  }
  0x1c   : > { %837 = vmatprep.subr.bf16.mxu1 %v1202_v6  ;;  %v1212_v13 = vld [vmem:[%s1379_s6 + $0x34] ss:$8 sps:$4 sm:$0xff]   ;;  %v1216_v15 = vld [vmem:[%s1379_s6 + $0x30] ss:$8 sps:$4 sm:$0xff]   ;;  %v1218_v17 = vld [vmem:[%s1379_s6 + $0x44] ss:$8 sps:$4 sm:$0xff]  }
  0x1d   : > { %v1214_v14 = vld [vmem:[%s1379_s6 + $0x134] ss:$8 sps:$4 sm:$0xff]   ;;  %v1217_v16 = vld [vmem:[%s1379_s6 + $0x130] ss:$8 sps:$4 sm:$0xff]   ;;  %v1220_v18 = vld [vmem:[%s1379_s6 + $0x144] ss:$8 sps:$4 sm:$0xff]  }
  0x1e   : > { %797 = vmatpush1.bf16.msra.mxu0 %v1204_v7  ;;  %v1222_v19 = vld [vmem:[%s1379_s6 + $0x40] ss:$8 sps:$4 sm:$0xff]   ;;  %v1224_v21 = vld [vmem:[%s1379_s6 + $0x54] ss:$8 sps:$4 sm:$0xff]   ;;  %v1228_v23 = vld [vmem:[%s1379_s6 + $0x50] ss:$8 sps:$4 sm:$0xff]  }
  0x1f   : > { %838 = vmatpush1.bf16.msra.mxu1 %v1205_v8  ;;  %798 = vmatprep.subr.bf16.mxu0 %v1206_v9  ;;  %v1223_v20 = vld [vmem:[%s1379_s6 + $0x140] ss:$8 sps:$4 sm:$0xff]   ;;  %v1226_v22 = vld [vmem:[%s1379_s6 + $0x154] ss:$8 sps:$4 sm:$0xff]   ;;  %v1229_v24 = vld [vmem:[%s1379_s6 + $0x150] ss:$8 sps:$4 sm:$0xff]  }
  0x20   : > { %839 = vmatprep.subr.bf16.mxu1 %v1208_v10  ;;  %v1230_v25 = vld [vmem:[%s1379_s6 + $0x64] ss:$8 sps:$4 sm:$0xff]   ;;  %v1234_v27 = vld [vmem:[%s1379_s6 + $0x60] ss:$8 sps:$4 sm:$0xff]   ;;  %v1236_v29 = vld [vmem:[%s1379_s6 + $0x74] ss:$8 sps:$4 sm:$0xff]  }
  0x21   : > { %v1232_v26 = vld [vmem:[%s1379_s6 + $0x164] ss:$8 sps:$4 sm:$0xff]   ;;  %v1235_v28 = vld [vmem:[%s1379_s6 + $0x160] ss:$8 sps:$4 sm:$0xff]   ;;  %v1238_v30 = vld [vmem:[%s1379_s6 + $0x174] ss:$8 sps:$4 sm:$0xff]  }
  0x22   : > { %799 = vmatpush1.bf16.msra.mxu0 %v1210_v11  ;;  %v1240_v31 = vld [vmem:[%s1379_s6 + $0x70] ss:$8 sps:$4 sm:$0xff]   ;;  %v1242_v33 = vld [vmem:[%s1379_s6 + $0x84] ss:$8 sps:$4 sm:$0xff]   ;;  %v1246_v35 = vld [vmem:[%s1379_s6 + $0x80] ss:$8 sps:$4 sm:$0xff]  }
  0x23   : > { %840 = vmatpush1.bf16.msra.mxu1 %v1211_v12  ;;  %800 = vmatprep.subr.bf16.mxu0 %v1212_v13  ;;  %v1241_v32 = vld [vmem:[%s1379_s6 + $0x170] ss:$8 sps:$4 sm:$0xff]   ;;  %v1244_v34 = vld [vmem:[%s1379_s6 + $0x184] ss:$8 sps:$4 sm:$0xff]   ;;  %v1247_v36 = vld [vmem:[%s1379_s6 + $0x180] ss:$8 sps:$4 sm:$0xff]  }
  0x24   : > { %841 = vmatprep.subr.bf16.mxu1 %v1214_v14  ;;  %v1248_v37 = vld [vmem:[%s1379_s6 + $0x94] ss:$8 sps:$4 sm:$0xff]   ;;  %v1252_v39 = vld [vmem:[%s1379_s6 + $0x90] ss:$8 sps:$4 sm:$0xff]   ;;  %v1254_v41 = vld [vmem:[%s1379_s6 + $0xa4] ss:$8 sps:$4 sm:$0xff]  }
  0x25   : > { %v1250_v38 = vld [vmem:[%s1379_s6 + $0x194] ss:$8 sps:$4 sm:$0xff]   ;;  %v1253_v40 = vld [vmem:[%s1379_s6 + $0x190] ss:$8 sps:$4 sm:$0xff]   ;;  %v1256_v42 = vld [vmem:[%s1379_s6 + $0x1a4] ss:$8 sps:$4 sm:$0xff]  }
  0x26   : > { %801 = vmatpush1.bf16.msra.mxu0 %v1216_v15  ;;  %v1258_v43 = vld [vmem:[%s1379_s6 + $0xa0] ss:$8 sps:$4 sm:$0xff]   ;;  %v1260_v45 = vld [vmem:[%s1379_s6 + $0xb4] ss:$8 sps:$4 sm:$0xff]   ;;  %v1264_v50 = vld [vmem:[%s1379_s6 + $0xb0] ss:$8 sps:$4 sm:$0xff]  }
  0x27   : > { %842 = vmatpush1.bf16.msra.mxu1 %v1217_v16  ;;  %802 = vmatprep.subr.bf16.mxu0 %v1218_v17  ;;  %v1259_v44 = vld [vmem:[%s1379_s6 + $0x1a0] ss:$8 sps:$4 sm:$0xff]   ;;  %v1262_v46 = vld [vmem:[%s1379_s6 + $0x1b4] ss:$8 sps:$4 sm:$0xff]   ;;  %v1265_v51 = vld [vmem:[%s1379_s6 + $0x1b0] ss:$8 sps:$4 sm:$0xff]  }
  0x28   : > { %843 = vmatprep.subr.bf16.mxu1 %v1220_v18  ;;  %v394_v47 = vld [vmem:[%s1374_s27] sm:$0xff]  ;;  %v395_v49 = vld [vmem:[%s1374_s27 + $0x8] sm:$0xff]  ;;  %v1272_v57 = vld [vmem:[%s1379_s6 + $0xd4] ss:$8 sps:$4 sm:$0xff]   ;;  %p1161_p7 = scmp.ne.s32.totalorder %s1308_s18, 4 }
  0x29   : > { %v1094_v48 = vcombine.high %v394_v47, %v394_v47  ;;  %v1096_v52 = vcombine.high %v395_v49, %v395_v49  ;;  %v1266_v53 = vld [vmem:[%s1379_s6 + $0xc4] ss:$8 sps:$4 sm:$0xff]   ;;  %v1270_v55 = vld [vmem:[%s1379_s6 + $0xc0] ss:$8 sps:$4 sm:$0xff]   ;;  %v1274_v58 = vld [vmem:[%s1379_s6 + $0x1d4] ss:$8 sps:$4 sm:$0xff]   ;;  %v1093_v5 = vcombine.low %v394_v47, %v394_v47  ;;  %v1095_v6 = vcombine.low %v395_v49, %v395_v49 }
  0x2a   : > { %803 = vmatpush1.bf16.msra.mxu0 %v1222_v19  ;;  %v1268_v54 = vld [vmem:[%s1379_s6 + $0x1c4] ss:$8 sps:$4 sm:$0xff]   ;;  %v1271_v56 = vld [vmem:[%s1379_s6 + $0x1c0] ss:$8 sps:$4 sm:$0xff]   ;;  %v1276_v59 = vld [vmem:[%s1379_s6 + $0xd0] ss:$8 sps:$4 sm:$0xff]  }
  0x2b   : > { %844 = vmatpush1.bf16.msra.mxu1 %v1223_v20  ;;  %804 = vmatprep.subr.bf16.mxu0 %v1224_v21  ;;  %v1277_v60 = vld [vmem:[%s1379_s6 + $0x1d0] ss:$8 sps:$4 sm:$0xff]   ;;  %v1278_v61 = vld [vmem:[%s1379_s6 + $0xe4] ss:$8 sps:$4 sm:$0xff]   ;;  %v1282_v63 = vld [vmem:[%s1379_s6 + $0xe0] ss:$8 sps:$4 sm:$0xff]   ;;  %v888_v21 = vlaneseq (!%p1161_p7) }
  0x2c   : > { %845 = vmatprep.subr.bf16.mxu1 %v1226_v22  ;;  %826 = vmatprep.mubr.bf16.mxu0 %v1094_v48  ;;  %v1280_v62 = vld [vmem:[%s1379_s6 + $0x1e4] ss:$8 sps:$4 sm:$0xff]   ;;  %v1283_v0 = vld [vmem:[%s1379_s6 + $0x1e0] ss:$8 sps:$4 sm:$0xff]   ;;  %v1284_v1 = vld [vmem:[%s1379_s6 + $0xf4] ss:$8 sps:$4 sm:$0xff]  }
  0x2d   : > { %867 = vmatprep.mubr.bf16.mxu1 %v1096_v52  ;;  %v1286_v2 = vld [vmem:[%s1379_s6 + $0x1f4] ss:$8 sps:$4 sm:$0xff]   ;;  %v1288_v3 = vld [vmem:[%s1379_s6 + $0xf0] ss:$8 sps:$4 sm:$0xff]   ;;  %v392_v8 = vld [vmem:[#allocation2] sm:$0xff]  ;;  %v889_v22 = vshrl.u32 (!%p1161_p7), %v888_v21, 7 }
  0x2e   : > { %805 = vmatpush1.bf16.msra.mxu0 %v1228_v23  ;;  %v1289_v4 = vld [vmem:[%s1379_s6 + $0x1f0] ss:$8 sps:$4 sm:$0xff]   ;;  %v393_v12 = vld [vmem:[#allocation2 + $0x8] sm:$0xff]  ;;  %v886_v23 = vld [vmem:[%s1472_s2] sm:$0x3] (!%p1161_p7) }
  0x2f   : > { %846 = vmatpush1.bf16.msra.mxu1 %v1229_v24  ;;  %806 = vmatprep.subr.bf16.mxu0 %v1230_v25  ;;  %v900_v24 = vld [vmem:[%s1473_s3] sm:$0x3] (!%p1161_p7)  ;;  %v890_v25 = vsub.s32 (!%p1161_p7), 0, %v889_v22 }
  0x30   : > { %847 = vmatprep.subr.bf16.mxu1 %v1232_v26  ;;  %v894_v26 = vsub.s32 (!%p1161_p7), 1, %v889_v22 }
  0x32   : > { %807 = vmatpush1.bf16.msra.mxu0 %v1234_v27 }
  0x33   : > { %848 = vmatpush1.bf16.msra.mxu1 %v1235_v28  ;;  %808 = vmatprep.subr.bf16.mxu0 %v1236_v29  ;;  %v914_v29 = vld [vmem:[%s1474_s4] sm:$0xff] (!%p1161_p7) }
  0x34   : > { %849 = vmatprep.subr.bf16.mxu1 %v1238_v30  ;;  %v891_v30 = vrot.slane (!%p1161_p7), %v886_v23, %v890_v25 }
  0x36   : > { %809 = vmatpush1.bf16.msra.mxu0 %v1240_v31  ;;  %v895_v31 = vrot.slane (!%p1161_p7), %v886_v23, %v894_v26 }
  0x37   : > { %850 = vmatpush1.bf16.msra.mxu1 %v1241_v32  ;;  %810 = vmatprep.subr.bf16.mxu0 %v1242_v33  ;;  %v905_v32 = vrot.slane (!%p1161_p7), %v900_v24, %v890_v25  ;;  %v909_v33 = vrot.slane (!%p1161_p7), %v900_v24, %v894_v26 }
  0x38   : > { %851 = vmatprep.subr.bf16.mxu1 %v1244_v34 }
  0x3a   : > { %811 = vmatpush1.bf16.msra.mxu0 %v1246_v35 }
  0x3b   : > { %852 = vmatpush1.bf16.msra.mxu1 %v1247_v36  ;;  %812 = vmatprep.subr.bf16.mxu0 %v1248_v37  ;;  %v915_v36 = vunpack.c.l.bf16 (!%p1161_p7), %v914_v29  ;;  %v916_v37 = vunpack.c.h.bf16 (!%p1161_p7), %v914_v29 }
  0x3c   : > { %853 = vmatprep.subr.bf16.mxu1 %v1250_v38 }
  0x3e   : > { %813 = vmatpush1.bf16.msra.mxu0 %v1252_v39 }
  0x3f   : > { %854 = vmatpush1.bf16.msra.mxu1 %v1253_v40  ;;  %814 = vmatprep.subr.bf16.mxu0 %v1254_v41 }
  0x40   : > { %855 = vmatprep.subr.bf16.mxu1 %v1256_v42 }
  0x42   : > { %815 = vmatpush1.bf16.msra.mxu0 %v1258_v43 }
  0x43   : > { %856 = vmatpush1.bf16.msra.mxu1 %v1259_v44  ;;  %816 = vmatprep.subr.bf16.mxu0 %v1260_v45 }
  0x44   : > { %857 = vmatprep.subr.bf16.mxu1 %v1262_v46 }
  0x46   : > { %817 = vmatpush1.bf16.msra.mxu0 %v1264_v50 }
  0x47   : > { %858 = vmatpush1.bf16.msra.mxu1 %v1265_v51  ;;  %818 = vmatprep.subr.bf16.mxu0 %v1266_v53 }
  0x48   : > { %859 = vmatprep.subr.bf16.mxu1 %v1268_v54 }
  0x4a   : > { %819 = vmatpush1.bf16.msra.mxu0 %v1270_v55 }
  0x4b   : > { %860 = vmatpush1.bf16.msra.mxu1 %v1271_v56  ;;  %820 = vmatprep.subr.bf16.mxu0 %v1272_v57 }
  0x4c   : > { %861 = vmatprep.subr.bf16.mxu1 %v1274_v58 }
  0x4e   : > { %821 = vmatpush1.bf16.msra.mxu0 %v1276_v59 }
  0x4f   : > { %862 = vmatpush1.bf16.msra.mxu1 %v1277_v60  ;;  %822 = vmatprep.subr.bf16.mxu0 %v1278_v61 }
  0x50   : > { %863 = vmatprep.subr.bf16.mxu1 %v1280_v62 }
  0x52   : > { %823 = vmatpush1.bf16.msra.mxu0 %v1282_v63 }
  0x53   : > { %864 = vmatpush1.bf16.msra.mxu1 %v1283_v0  ;;  %824 = vmatprep.subr.bf16.mxu0 %v1284_v1 }
  0x54   : > { %865 = vmatprep.subr.bf16.mxu1 %v1286_v2 }
  0x56   : > { %825 = vmatpush1.bf16.msra.mxu0 %v1288_v3 }
  0x57   : > { %866 = vmatpush1.bf16.msra.mxu1 %v1289_v4 }
  0x59   : > { %827 = vmatmul.mubr.bf16.vlgmr.msra.gmra.mrb[0].mxu0 %v1093_v5 }
  0x5a   : > { %868 = vmatmul.mubr.bf16.vlgmr.msra.gmra.mrb[0].mxu1 %v1095_v6 }
 0x12c   : > { %v828_v7 = vpop.f32.mrb[0].mxu0 }
 0x12d   : > { %v869_v9 = vpop.f32.mrb[0].mxu1  ;;  %v830_v11 = vpop.f32.mrb[1].mxu0  ;;  %883 = sbr.rel (%p1161_p7) target bundleno = 326 (0x146), region = 48 }
 0x12e   : > { %v870_v10 = vadd.f32 %v869_v9, %v828_v7  ;;  %v871_v13 = vpop.f32.mrb[1].mxu1  ;;  %v832_v15 = vpop.f32.mrb[2].mxu0 }
 0x12f   : > { %v872_v14 = vadd.f32 %v871_v13, %v830_v11  ;;  %v873_v16 = vpop.f32.mrb[2].mxu1  ;;  %v833_v18 = vpop.f32.mrb[3].mxu0 }
 0x130   : > { %v876_v17 = vadd.f32 %v870_v10, %v392_v8  ;;  %v874_v19 = vpop.f32.mrb[3].mxu1 }
 0x131   : > { %v877_v20 = vadd.f32 %v872_v14, %v393_v12 }
 0x132   : > { %878 = vst [vmem:[#allocation2] sm:$0xff] %v876_v17 }
 0x133   : > { %879 = vst [vmem:[#allocation2 + $0x8] sm:$0xff] %v877_v20 }
 0x139   : > { %v884_v27 = vld [vmem:[#allocation2] sm:$0xff] }
 0x13a   : > { %v885_v28 = vld [vmem:[#allocation2 + $0x8] sm:$0xff]  ;;  %v898_v34 = vmul.f32 %v891_v30, %v884_v27 }
 0x13b   : > { %v899_v35 = vmul.f32 %v895_v31, %v885_v28 }
 0x13c   : > { %v912_v38 = vadd.f32 %v905_v32, %v898_v34 }
 0x13d   : > { %v913_v39 = vadd.f32 %v909_v33, %v899_v35 }
 0x13e   : > { %v917_v40 = vadd.f32 %v915_v36, %v912_v38 }
 0x13f   : > { %v918_v41 = vadd.f32 %v916_v37, %v913_v39 }
 0x140   : > { %v919_v42 = vmax.f32 %v917_v40, 0.0 }
 0x141   : > { %v920_v43 = vmax.f32 %v918_v41, 0.0 }
 0x143   : > { %v1168_v44 = vpack.c.bf16 %v920_v43, %v919_v42 }
 0x145   : > { %929 = vst [vmem:[%s1475_s5] sm:$0xff] %v1168_v44 }
 0x146 PF: > { %s15_s20 = sadd.s32 1, %s1316_s20   ;;  %s1476_s18 = smov %s1312_s19 }
 0x147   : > { %p12_p8 = scmp.ge.s32.totalorder %s15_s20, 7   ;;  %s1477_s19 = smov %s1479_s21 }
 0x149   :  { %14 = sbr.rel (!%p12_p8) target bundleno = 2 (0x2), region = 90 }

// kernel: resnet_forward.37
= control target key start
LH: loop header
LB: loop body
LE: loop exit
PB: predicated region body
PF: predicated region fallthrough
CT: control target
= control target key end

     0   :  { %s1254_s15 = smov 0   ;;  %s1256_s16 = smov 0   ;;  %s1372_s0 = inlined_call_operand.vmem [shape: bf16[8,2560], index: 0, kind: input, shape index: {}]   ;;  %s1373_s1 = inlined_call_operand.vmem [shape: bf16[2560,256], index: 1, kind: input, shape index: {}]   ;;  %s1374_s2 = inlined_call_operand.vmem [shape: f32[1,256], index: 2, kind: input, shape index: {}]   ;;  %s1375_s3 = inlined_call_operand.vmem [shape: f32[1,256], index: 3, kind: input, shape index: {}]   ;;  %s1376_s4 = inlined_call_operand.vmem [shape: bf16[8,256], index: 4, kind: output, shape index: {}]  }
   0x1   :  { %s1258_s17 = smov 0  }
   0x2 LB: > { %s26_s18 = sadd.s32 1, %s1222_s16  ;;  %p996_p0 = scmp.ge.s32.totalorder %s1226_s17, 1  ;;  %s1226_s17 = sphi %s1258_s17, %s14_s17   ;;  %s1222_s16 = sphi %s1256_s16, %s1378_s16   ;;  %s1218_s15 = sphi %s1254_s15, %s1377_s15  }
   0x3   : > { %p27_p1 = scmp.ge.s32.totalorder %s26_s18, 5  ;;  %p229_p2 = scmp.lt.s32.totalorder %s1226_s17, 6 }
   0x5   : > { %s1380_s18 = smov (%p27_p1, %s26_s18), 0  ;;  %p230_p3 = pnand %p996_p0, %p229_p2 }
   0x6   : > { %s997_s19 = sshll.u32 (!%p230_p3), %s1218_s15, 2  ;;  %s999_s20 = sshll.u32 (!%p230_p3), %s1218_s15, 6 }
   0x7   : > { %233 = sbr.rel (%p230_p3) target bundleno = 324 (0x144), region = 36  ;;  %p284_p4 = scmp.lt.s32.totalorder (!%p230_p3), %s997_s19, 19 }
   0x8   : > { %p293_p5 = scmp.lt.s32.totalorder (!%p230_p3), %s999_s20, 319  ;;  %p1002_p6 = scmp.ne.s32.totalorder (!%p230_p3), %s1218_s15, 0 }
   0xe   : > { %s1382_s19 = smov (!%p284_p4, %s997_s19), 19  ;;  %s1384_s20 = smov (!%p293_p5, %s999_s20), 319 }
   0xf   : > { %s998_s21 = sshll.u32 %s1382_s19, 2  ;;  %s1077_s25 = sshll.u32 %s1384_s20, 3  ;;  %v1228_v0 = vmov (!%p1002_p6), 0.0  }
  0x10   : > { %s1279_s24 = scalar_lea.vmem %s1372_s0, %s998_s21  ;;  %s1284_s28 = scalar_lea.vmem %s1373_s1, %s1077_s25  ;;  %327 = vst [vmem:[#allocation2] sm:$0xff] (!%p1002_p6), %v1228_v0  ;;  %328 = vst [vmem:[#allocation2 + $0x8] sm:$0xff] (!%p1002_p6), %v1228_v0 }
  0x11   : > { %326 = sbr.rel (%p1002_p6) target bundleno = 24 (0x18), region = 40 }
  0x18 PF: > { %v1104_v1 = vld [vmem:[%s1284_s28 + $0x4] ss:$8 sps:$4 sm:$0xff]   ;;  %v1108_v3 = vld [vmem:[%s1284_s28] ss:$8 sps:$4 sm:$0xff]   ;;  %v1110_v5 = vld [vmem:[%s1284_s28 + $0x14] ss:$8 sps:$4 sm:$0xff]  }
  0x19   : > { %v1106_v2 = vld [vmem:[%s1284_s28 + $0x104] ss:$8 sps:$4 sm:$0xff]   ;;  %731 = vmatprep.subr.bf16.mxu0 %v1104_v1  ;;  %v1109_v4 = vld [vmem:[%s1284_s28 + $0x100] ss:$8 sps:$4 sm:$0xff]   ;;  %v1112_v6 = vld [vmem:[%s1284_s28 + $0x114] ss:$8 sps:$4 sm:$0xff]  }
  0x1a   : > { %772 = vmatprep.subr.bf16.mxu1 %v1106_v2  ;;  %732 = vmatpush1.bf16.msra.mxu0 %v1108_v3  ;;  %v1114_v7 = vld [vmem:[%s1284_s28 + $0x10] ss:$8 sps:$4 sm:$0xff]   ;;  %v1116_v9 = vld [vmem:[%s1284_s28 + $0x24] ss:$8 sps:$4 sm:$0xff]   ;;  %v1120_v11 = vld [vmem:[%s1284_s28 + $0x20] ss:$8 sps:$4 sm:$0xff]  }
  0x1b   : > { %773 = vmatpush1.bf16.msra.mxu1 %v1109_v4  ;;  %733 = vmatprep.subr.bf16.mxu0 %v1110_v5  ;;  %v1115_v8 = vld [vmem:[%s1284_s28 + $0x110] ss:$8 sps:$4 sm:$0xff]   ;;  %v1118_v10 = vld [vmem:[%s1284_s28 + $0x124] ss:$8 sps:$4 sm:$0xff]   ;;  %v1121_v12 = vld [vmem:[%s1284_s28 + $0x120] ss:$8 sps:$4 sm:$0xff]  }
  0x1c   : > { %774 = vmatprep.subr.bf16.mxu1 %v1112_v6  ;;  %v1122_v13 = vld [vmem:[%s1284_s28 + $0x34] ss:$8 sps:$4 sm:$0xff]   ;;  %v1126_v15 = vld [vmem:[%s1284_s28 + $0x30] ss:$8 sps:$4 sm:$0xff]   ;;  %v1128_v17 = vld [vmem:[%s1284_s28 + $0x44] ss:$8 sps:$4 sm:$0xff]  }
  0x1d   : > { %v1124_v14 = vld [vmem:[%s1284_s28 + $0x134] ss:$8 sps:$4 sm:$0xff]   ;;  %v1127_v16 = vld [vmem:[%s1284_s28 + $0x130] ss:$8 sps:$4 sm:$0xff]   ;;  %v1130_v18 = vld [vmem:[%s1284_s28 + $0x144] ss:$8 sps:$4 sm:$0xff]  }
  0x1e   : > { %734 = vmatpush1.bf16.msra.mxu0 %v1114_v7  ;;  %v1132_v19 = vld [vmem:[%s1284_s28 + $0x40] ss:$8 sps:$4 sm:$0xff]   ;;  %v1134_v21 = vld [vmem:[%s1284_s28 + $0x54] ss:$8 sps:$4 sm:$0xff]   ;;  %v1138_v23 = vld [vmem:[%s1284_s28 + $0x50] ss:$8 sps:$4 sm:$0xff]  }
  0x1f   : > { %775 = vmatpush1.bf16.msra.mxu1 %v1115_v8  ;;  %735 = vmatprep.subr.bf16.mxu0 %v1116_v9  ;;  %v1133_v20 = vld [vmem:[%s1284_s28 + $0x140] ss:$8 sps:$4 sm:$0xff]   ;;  %v1136_v22 = vld [vmem:[%s1284_s28 + $0x154] ss:$8 sps:$4 sm:$0xff]   ;;  %v1139_v24 = vld [vmem:[%s1284_s28 + $0x150] ss:$8 sps:$4 sm:$0xff]  }
  0x20   : > { %776 = vmatprep.subr.bf16.mxu1 %v1118_v10  ;;  %v1140_v25 = vld [vmem:[%s1284_s28 + $0x64] ss:$8 sps:$4 sm:$0xff]   ;;  %v1144_v27 = vld [vmem:[%s1284_s28 + $0x60] ss:$8 sps:$4 sm:$0xff]   ;;  %v1146_v29 = vld [vmem:[%s1284_s28 + $0x74] ss:$8 sps:$4 sm:$0xff]  }
  0x21   : > { %v1142_v26 = vld [vmem:[%s1284_s28 + $0x164] ss:$8 sps:$4 sm:$0xff]   ;;  %v1145_v28 = vld [vmem:[%s1284_s28 + $0x160] ss:$8 sps:$4 sm:$0xff]   ;;  %v1148_v30 = vld [vmem:[%s1284_s28 + $0x174] ss:$8 sps:$4 sm:$0xff]  }
  0x22   : > { %736 = vmatpush1.bf16.msra.mxu0 %v1120_v11  ;;  %v1150_v31 = vld [vmem:[%s1284_s28 + $0x70] ss:$8 sps:$4 sm:$0xff]   ;;  %v1152_v33 = vld [vmem:[%s1284_s28 + $0x84] ss:$8 sps:$4 sm:$0xff]   ;;  %v1156_v35 = vld [vmem:[%s1284_s28 + $0x80] ss:$8 sps:$4 sm:$0xff]  }
  0x23   : > { %777 = vmatpush1.bf16.msra.mxu1 %v1121_v12  ;;  %737 = vmatprep.subr.bf16.mxu0 %v1122_v13  ;;  %v1151_v32 = vld [vmem:[%s1284_s28 + $0x170] ss:$8 sps:$4 sm:$0xff]   ;;  %v1154_v34 = vld [vmem:[%s1284_s28 + $0x184] ss:$8 sps:$4 sm:$0xff]   ;;  %v1157_v36 = vld [vmem:[%s1284_s28 + $0x180] ss:$8 sps:$4 sm:$0xff]  }
  0x24   : > { %778 = vmatprep.subr.bf16.mxu1 %v1124_v14  ;;  %v1158_v37 = vld [vmem:[%s1284_s28 + $0x94] ss:$8 sps:$4 sm:$0xff]   ;;  %v1162_v39 = vld [vmem:[%s1284_s28 + $0x90] ss:$8 sps:$4 sm:$0xff]   ;;  %v1164_v41 = vld [vmem:[%s1284_s28 + $0xa4] ss:$8 sps:$4 sm:$0xff]  }
  0x25   : > { %v1160_v38 = vld [vmem:[%s1284_s28 + $0x194] ss:$8 sps:$4 sm:$0xff]   ;;  %v1163_v40 = vld [vmem:[%s1284_s28 + $0x190] ss:$8 sps:$4 sm:$0xff]   ;;  %v1166_v42 = vld [vmem:[%s1284_s28 + $0x1a4] ss:$8 sps:$4 sm:$0xff]  }
  0x26   : > { %738 = vmatpush1.bf16.msra.mxu0 %v1126_v15  ;;  %v1168_v43 = vld [vmem:[%s1284_s28 + $0xa0] ss:$8 sps:$4 sm:$0xff]   ;;  %v1170_v45 = vld [vmem:[%s1284_s28 + $0xb4] ss:$8 sps:$4 sm:$0xff]   ;;  %v1174_v50 = vld [vmem:[%s1284_s28 + $0xb0] ss:$8 sps:$4 sm:$0xff]  }
  0x27   : > { %779 = vmatpush1.bf16.msra.mxu1 %v1127_v16  ;;  %739 = vmatprep.subr.bf16.mxu0 %v1128_v17  ;;  %v1169_v44 = vld [vmem:[%s1284_s28 + $0x1a0] ss:$8 sps:$4 sm:$0xff]   ;;  %v1172_v46 = vld [vmem:[%s1284_s28 + $0x1b4] ss:$8 sps:$4 sm:$0xff]   ;;  %v1175_v51 = vld [vmem:[%s1284_s28 + $0x1b0] ss:$8 sps:$4 sm:$0xff]  }
  0x28   : > { %780 = vmatprep.subr.bf16.mxu1 %v1130_v18  ;;  %v331_v47 = vld [vmem:[%s1279_s24] sm:$0xff]  ;;  %v332_v49 = vld [vmem:[%s1279_s24 + $0x8] sm:$0xff]  ;;  %v1182_v57 = vld [vmem:[%s1284_s28 + $0xd4] ss:$8 sps:$4 sm:$0xff]   ;;  %p1071_p7 = scmp.ne.s32.totalorder %s1218_s15, 4 }
  0x29   : > { %v1004_v48 = vcombine.high %v331_v47, %v331_v47  ;;  %v1006_v52 = vcombine.high %v332_v49, %v332_v49  ;;  %v1176_v53 = vld [vmem:[%s1284_s28 + $0xc4] ss:$8 sps:$4 sm:$0xff]   ;;  %v1180_v55 = vld [vmem:[%s1284_s28 + $0xc0] ss:$8 sps:$4 sm:$0xff]   ;;  %v1184_v58 = vld [vmem:[%s1284_s28 + $0x1d4] ss:$8 sps:$4 sm:$0xff]   ;;  %v1003_v5 = vcombine.low %v331_v47, %v331_v47  ;;  %v1005_v6 = vcombine.low %v332_v49, %v332_v49 }
  0x2a   : > { %740 = vmatpush1.bf16.msra.mxu0 %v1132_v19  ;;  %v1178_v54 = vld [vmem:[%s1284_s28 + $0x1c4] ss:$8 sps:$4 sm:$0xff]   ;;  %v1181_v56 = vld [vmem:[%s1284_s28 + $0x1c0] ss:$8 sps:$4 sm:$0xff]   ;;  %v1186_v59 = vld [vmem:[%s1284_s28 + $0xd0] ss:$8 sps:$4 sm:$0xff]  }
  0x2b   : > { %781 = vmatpush1.bf16.msra.mxu1 %v1133_v20  ;;  %741 = vmatprep.subr.bf16.mxu0 %v1134_v21  ;;  %v1187_v60 = vld [vmem:[%s1284_s28 + $0x1d0] ss:$8 sps:$4 sm:$0xff]   ;;  %v1188_v61 = vld [vmem:[%s1284_s28 + $0xe4] ss:$8 sps:$4 sm:$0xff]   ;;  %v1192_v63 = vld [vmem:[%s1284_s28 + $0xe0] ss:$8 sps:$4 sm:$0xff]   ;;  %v825_v21 = vlaneseq (!%p1071_p7) }
  0x2c   : > { %782 = vmatprep.subr.bf16.mxu1 %v1136_v22  ;;  %763 = vmatprep.mubr.bf16.mxu0 %v1004_v48  ;;  %v1190_v62 = vld [vmem:[%s1284_s28 + $0x1e4] ss:$8 sps:$4 sm:$0xff]   ;;  %v1193_v0 = vld [vmem:[%s1284_s28 + $0x1e0] ss:$8 sps:$4 sm:$0xff]   ;;  %v1194_v1 = vld [vmem:[%s1284_s28 + $0xf4] ss:$8 sps:$4 sm:$0xff]  }
  0x2d   : > { %804 = vmatprep.mubr.bf16.mxu1 %v1006_v52  ;;  %v1196_v2 = vld [vmem:[%s1284_s28 + $0x1f4] ss:$8 sps:$4 sm:$0xff]   ;;  %v1198_v3 = vld [vmem:[%s1284_s28 + $0xf0] ss:$8 sps:$4 sm:$0xff]   ;;  %v329_v8 = vld [vmem:[#allocation2] sm:$0xff]  ;;  %v826_v22 = vshrl.u32 (!%p1071_p7), %v825_v21, 7 }
  0x2e   : > { %742 = vmatpush1.bf16.msra.mxu0 %v1138_v23  ;;  %v1199_v4 = vld [vmem:[%s1284_s28 + $0x1f0] ss:$8 sps:$4 sm:$0xff]   ;;  %v330_v12 = vld [vmem:[#allocation2 + $0x8] sm:$0xff]  ;;  %v823_v23 = vld [vmem:[%s1374_s2] sm:$0x3] (!%p1071_p7) }
  0x2f   : > { %783 = vmatpush1.bf16.msra.mxu1 %v1139_v24  ;;  %743 = vmatprep.subr.bf16.mxu0 %v1140_v25  ;;  %v837_v24 = vld [vmem:[%s1375_s3] sm:$0x3] (!%p1071_p7)  ;;  %v827_v25 = vsub.s32 (!%p1071_p7), 0, %v826_v22 }
  0x30   : > { %784 = vmatprep.subr.bf16.mxu1 %v1142_v26  ;;  %v831_v26 = vsub.s32 (!%p1071_p7), 1, %v826_v22 }
  0x32   : > { %744 = vmatpush1.bf16.msra.mxu0 %v1144_v27 }
  0x33   : > { %785 = vmatpush1.bf16.msra.mxu1 %v1145_v28  ;;  %745 = vmatprep.subr.bf16.mxu0 %v1146_v29  ;;  %v828_v29 = vrot.slane (!%p1071_p7), %v823_v23, %v827_v25 }
  0x34   : > { %786 = vmatprep.subr.bf16.mxu1 %v1148_v30  ;;  %v832_v30 = vrot.slane (!%p1071_p7), %v823_v23, %v831_v26 }
  0x36   : > { %746 = vmatpush1.bf16.msra.mxu0 %v1150_v31  ;;  %v842_v31 = vrot.slane (!%p1071_p7), %v837_v24, %v827_v25 }
  0x37   : > { %787 = vmatpush1.bf16.msra.mxu1 %v1151_v32  ;;  %747 = vmatprep.subr.bf16.mxu0 %v1152_v33  ;;  %v846_v32 = vrot.slane (!%p1071_p7), %v837_v24, %v831_v26 }
  0x38   : > { %788 = vmatprep.subr.bf16.mxu1 %v1154_v34 }
  0x3a   : > { %748 = vmatpush1.bf16.msra.mxu0 %v1156_v35 }
  0x3b   : > { %789 = vmatpush1.bf16.msra.mxu1 %v1157_v36  ;;  %749 = vmatprep.subr.bf16.mxu0 %v1158_v37 }
  0x3c   : > { %790 = vmatprep.subr.bf16.mxu1 %v1160_v38 }
  0x3e   : > { %750 = vmatpush1.bf16.msra.mxu0 %v1162_v39 }
  0x3f   : > { %791 = vmatpush1.bf16.msra.mxu1 %v1163_v40  ;;  %751 = vmatprep.subr.bf16.mxu0 %v1164_v41 }
  0x40   : > { %792 = vmatprep.subr.bf16.mxu1 %v1166_v42 }
  0x42   : > { %752 = vmatpush1.bf16.msra.mxu0 %v1168_v43 }
  0x43   : > { %793 = vmatpush1.bf16.msra.mxu1 %v1169_v44  ;;  %753 = vmatprep.subr.bf16.mxu0 %v1170_v45 }
  0x44   : > { %794 = vmatprep.subr.bf16.mxu1 %v1172_v46 }
  0x46   : > { %754 = vmatpush1.bf16.msra.mxu0 %v1174_v50 }
  0x47   : > { %795 = vmatpush1.bf16.msra.mxu1 %v1175_v51  ;;  %755 = vmatprep.subr.bf16.mxu0 %v1176_v53 }
  0x48   : > { %796 = vmatprep.subr.bf16.mxu1 %v1178_v54 }
  0x4a   : > { %756 = vmatpush1.bf16.msra.mxu0 %v1180_v55 }
  0x4b   : > { %797 = vmatpush1.bf16.msra.mxu1 %v1181_v56  ;;  %757 = vmatprep.subr.bf16.mxu0 %v1182_v57 }
  0x4c   : > { %798 = vmatprep.subr.bf16.mxu1 %v1184_v58 }
  0x4e   : > { %758 = vmatpush1.bf16.msra.mxu0 %v1186_v59 }
  0x4f   : > { %799 = vmatpush1.bf16.msra.mxu1 %v1187_v60  ;;  %759 = vmatprep.subr.bf16.mxu0 %v1188_v61 }
  0x50   : > { %800 = vmatprep.subr.bf16.mxu1 %v1190_v62 }
  0x52   : > { %760 = vmatpush1.bf16.msra.mxu0 %v1192_v63 }
  0x53   : > { %801 = vmatpush1.bf16.msra.mxu1 %v1193_v0  ;;  %761 = vmatprep.subr.bf16.mxu0 %v1194_v1 }
  0x54   : > { %802 = vmatprep.subr.bf16.mxu1 %v1196_v2 }
  0x56   : > { %762 = vmatpush1.bf16.msra.mxu0 %v1198_v3 }
  0x57   : > { %803 = vmatpush1.bf16.msra.mxu1 %v1199_v4 }
  0x59   : > { %764 = vmatmul.mubr.bf16.vlgmr.msra.gmra.mrb[0].mxu0 %v1003_v5 }
  0x5a   : > { %805 = vmatmul.mubr.bf16.vlgmr.msra.gmra.mrb[0].mxu1 %v1005_v6 }
 0x12c   : > { %v765_v7 = vpop.f32.mrb[0].mxu0 }
 0x12d   : > { %v806_v9 = vpop.f32.mrb[0].mxu1  ;;  %v767_v11 = vpop.f32.mrb[1].mxu0  ;;  %820 = sbr.rel (%p1071_p7) target bundleno = 324 (0x144), region = 44 }
 0x12e   : > { %v807_v10 = vadd.f32 %v806_v9, %v765_v7  ;;  %v808_v13 = vpop.f32.mrb[1].mxu1  ;;  %v769_v15 = vpop.f32.mrb[2].mxu0 }
 0x12f   : > { %v809_v14 = vadd.f32 %v808_v13, %v767_v11  ;;  %v810_v16 = vpop.f32.mrb[2].mxu1  ;;  %v770_v18 = vpop.f32.mrb[3].mxu0 }
 0x130   : > { %v813_v17 = vadd.f32 %v807_v10, %v329_v8  ;;  %v811_v19 = vpop.f32.mrb[3].mxu1 }
 0x131   : > { %v814_v20 = vadd.f32 %v809_v14, %v330_v12 }
 0x132   : > { %815 = vst [vmem:[#allocation2] sm:$0xff] %v813_v17 }
 0x133   : > { %816 = vst [vmem:[#allocation2 + $0x8] sm:$0xff] %v814_v20 }
 0x139   : > { %v821_v27 = vld [vmem:[#allocation2] sm:$0xff] }
 0x13a   : > { %v822_v28 = vld [vmem:[#allocation2 + $0x8] sm:$0xff]  ;;  %v835_v33 = vmul.f32 %v828_v29, %v821_v27 }
 0x13b   : > { %v836_v34 = vmul.f32 %v832_v30, %v822_v28 }
 0x13c   : > { %v849_v35 = vadd.f32 %v842_v31, %v835_v33 }
 0x13d   : > { %v850_v36 = vadd.f32 %v846_v32, %v836_v34 }
 0x13e   : > { %v851_v37 = vmax.f32 %v849_v35, 0.0 }
 0x13f   : > { %v852_v38 = vmax.f32 %v850_v36, 0.0 }
 0x141   : > { %v1078_v39 = vpack.c.bf16 %v852_v38, %v851_v37 }
 0x143   : > { %861 = vst [vmem:[%s1376_s4] sm:$0xff] %v1078_v39 }
 0x144 PF: > { %s14_s17 = sadd.s32 1, %s1226_s17   ;;  %s1377_s15 = smov %s1222_s16 }
 0x145   : > { %p11_p8 = scmp.ge.s32.totalorder %s14_s17, 7   ;;  %s1378_s16 = smov %s1380_s18 }
 0x147   :  { %13 = sbr.rel (!%p11_p8) target bundleno = 2 (0x2), region = 83 }

// kernel: resnet_forward.34
= control target key start
LH: loop header
LB: loop body
LE: loop exit
PB: predicated region body
PF: predicated region fallthrough
CT: control target
= control target key end

     0   :  { %s2073_s1 = inlined_call_operand.vmem [shape: bf16[1152,256], index: 1, kind: input, shape index: {}]   ;;  %s2074_s0 = inlined_call_operand.vmem [shape: bf16[8,1152], index: 0, kind: input, shape index: {}]   ;;  %s2075_s2 = inlined_call_operand.vmem [shape: f32[1,256], index: 2, kind: input, shape index: {}]   ;;  %s2076_s3 = inlined_call_operand.vmem [shape: f32[1,256], index: 3, kind: input, shape index: {}]   ;;  %s2077_s4 = inlined_call_operand.vmem [shape: bf16[8,256], index: 4, kind: output, shape index: {}]  }
   0x1   :  { %v1354_v0 = vld [vmem:[%s2073_s1 + $0x4] ss:$8 sps:$4 sm:$0xff]   ;;  %v1358_v2 = vld [vmem:[%s2073_s1] ss:$8 sps:$4 sm:$0xff]   ;;  %v1360_v4 = vld [vmem:[%s2073_s1 + $0x14] ss:$8 sps:$4 sm:$0xff]  }
   0x2   :  { %v1356_v1 = vld [vmem:[%s2073_s1 + $0x204] ss:$8 sps:$4 sm:$0xff]   ;;  %927 = vmatprep.subr.bf16.mxu1 %v1354_v0  ;;  %v1359_v3 = vld [vmem:[%s2073_s1 + $0x200] ss:$8 sps:$4 sm:$0xff]   ;;  %v1362_v5 = vld [vmem:[%s2073_s1 + $0x214] ss:$8 sps:$4 sm:$0xff]  }
   0x3   :  { %1009 = vmatprep.subr.bf16.mxu0 %v1356_v1  ;;  %928 = vmatpush1.bf16.msra.mxu1 %v1358_v2  ;;  %v1364_v6 = vld [vmem:[%s2073_s1 + $0x10] ss:$8 sps:$4 sm:$0xff]   ;;  %v1366_v8 = vld [vmem:[%s2073_s1 + $0x24] ss:$8 sps:$4 sm:$0xff]   ;;  %v1370_v10 = vld [vmem:[%s2073_s1 + $0x20] ss:$8 sps:$4 sm:$0xff]  }
   0x4   :  { %1010 = vmatpush1.bf16.msra.mxu0 %v1359_v3  ;;  %929 = vmatprep.subr.bf16.mxu1 %v1360_v4  ;;  %v1365_v7 = vld [vmem:[%s2073_s1 + $0x210] ss:$8 sps:$4 sm:$0xff]   ;;  %v1368_v9 = vld [vmem:[%s2073_s1 + $0x224] ss:$8 sps:$4 sm:$0xff]   ;;  %v1371_v11 = vld [vmem:[%s2073_s1 + $0x220] ss:$8 sps:$4 sm:$0xff]  }
   0x5   :  { %1011 = vmatprep.subr.bf16.mxu0 %v1362_v5  ;;  %v1372_v12 = vld [vmem:[%s2073_s1 + $0x34] ss:$8 sps:$4 sm:$0xff]   ;;  %v1376_v14 = vld [vmem:[%s2073_s1 + $0x30] ss:$8 sps:$4 sm:$0xff]   ;;  %v1378_v16 = vld [vmem:[%s2073_s1 + $0x44] ss:$8 sps:$4 sm:$0xff]  }
   0x6   :  { %v1374_v13 = vld [vmem:[%s2073_s1 + $0x234] ss:$8 sps:$4 sm:$0xff]   ;;  %v1377_v15 = vld [vmem:[%s2073_s1 + $0x230] ss:$8 sps:$4 sm:$0xff]   ;;  %v1380_v17 = vld [vmem:[%s2073_s1 + $0x244] ss:$8 sps:$4 sm:$0xff]  }
   0x7   :  { %930 = vmatpush1.bf16.msra.mxu1 %v1364_v6  ;;  %v1382_v18 = vld [vmem:[%s2073_s1 + $0x40] ss:$8 sps:$4 sm:$0xff]   ;;  %v1384_v20 = vld [vmem:[%s2073_s1 + $0x54] ss:$8 sps:$4 sm:$0xff]   ;;  %v1388_v22 = vld [vmem:[%s2073_s1 + $0x50] ss:$8 sps:$4 sm:$0xff]  }
   0x8   :  { %1012 = vmatpush1.bf16.msra.mxu0 %v1365_v7  ;;  %931 = vmatprep.subr.bf16.mxu1 %v1366_v8  ;;  %v1383_v19 = vld [vmem:[%s2073_s1 + $0x240] ss:$8 sps:$4 sm:$0xff]   ;;  %v1386_v21 = vld [vmem:[%s2073_s1 + $0x254] ss:$8 sps:$4 sm:$0xff]   ;;  %v1389_v23 = vld [vmem:[%s2073_s1 + $0x250] ss:$8 sps:$4 sm:$0xff]  }
   0x9   :  { %1013 = vmatprep.subr.bf16.mxu0 %v1368_v9  ;;  %v1390_v24 = vld [vmem:[%s2073_s1 + $0x64] ss:$8 sps:$4 sm:$0xff]   ;;  %v1394_v26 = vld [vmem:[%s2073_s1 + $0x60] ss:$8 sps:$4 sm:$0xff]   ;;  %v1396_v28 = vld [vmem:[%s2073_s1 + $0x74] ss:$8 sps:$4 sm:$0xff]  }
   0xa   :  { %v1392_v25 = vld [vmem:[%s2073_s1 + $0x264] ss:$8 sps:$4 sm:$0xff]   ;;  %v1395_v27 = vld [vmem:[%s2073_s1 + $0x260] ss:$8 sps:$4 sm:$0xff]   ;;  %v1398_v29 = vld [vmem:[%s2073_s1 + $0x274] ss:$8 sps:$4 sm:$0xff]  }
   0xb   :  { %932 = vmatpush1.bf16.msra.mxu1 %v1370_v10  ;;  %v1400_v30 = vld [vmem:[%s2073_s1 + $0x70] ss:$8 sps:$4 sm:$0xff]   ;;  %v1402_v32 = vld [vmem:[%s2073_s1 + $0x84] ss:$8 sps:$4 sm:$0xff]   ;;  %v1406_v34 = vld [vmem:[%s2073_s1 + $0x80] ss:$8 sps:$4 sm:$0xff]  }
   0xc   :  { %1014 = vmatpush1.bf16.msra.mxu0 %v1371_v11  ;;  %933 = vmatprep.subr.bf16.mxu1 %v1372_v12  ;;  %v1401_v31 = vld [vmem:[%s2073_s1 + $0x270] ss:$8 sps:$4 sm:$0xff]   ;;  %v1404_v33 = vld [vmem:[%s2073_s1 + $0x284] ss:$8 sps:$4 sm:$0xff]   ;;  %v1407_v35 = vld [vmem:[%s2073_s1 + $0x280] ss:$8 sps:$4 sm:$0xff]  }
   0xd   :  { %1015 = vmatprep.subr.bf16.mxu0 %v1374_v13  ;;  %v1408_v36 = vld [vmem:[%s2073_s1 + $0x94] ss:$8 sps:$4 sm:$0xff]   ;;  %v1412_v38 = vld [vmem:[%s2073_s1 + $0x90] ss:$8 sps:$4 sm:$0xff]   ;;  %v1414_v40 = vld [vmem:[%s2073_s1 + $0xa4] ss:$8 sps:$4 sm:$0xff]  }
   0xe   :  { %v1410_v37 = vld [vmem:[%s2073_s1 + $0x294] ss:$8 sps:$4 sm:$0xff]   ;;  %v1413_v39 = vld [vmem:[%s2073_s1 + $0x290] ss:$8 sps:$4 sm:$0xff]   ;;  %v1416_v41 = vld [vmem:[%s2073_s1 + $0x2a4] ss:$8 sps:$4 sm:$0xff]  }
   0xf   :  { %934 = vmatpush1.bf16.msra.mxu1 %v1376_v14  ;;  %v1418_v42 = vld [vmem:[%s2073_s1 + $0xa0] ss:$8 sps:$4 sm:$0xff]   ;;  %v1420_v44 = vld [vmem:[%s2073_s1 + $0xb4] ss:$8 sps:$4 sm:$0xff]   ;;  %v1424_v47 = vld [vmem:[%s2073_s1 + $0xb0] ss:$8 sps:$4 sm:$0xff]  }
  0x10   :  { %1016 = vmatpush1.bf16.msra.mxu0 %v1377_v15  ;;  %935 = vmatprep.subr.bf16.mxu1 %v1378_v16  ;;  %v1419_v43 = vld [vmem:[%s2073_s1 + $0x2a0] ss:$8 sps:$4 sm:$0xff]   ;;  %v1422_v45 = vld [vmem:[%s2073_s1 + $0x2b4] ss:$8 sps:$4 sm:$0xff]   ;;  %v1425_v49 = vld [vmem:[%s2073_s1 + $0x2b0] ss:$8 sps:$4 sm:$0xff]  }
  0x11   :  { %1017 = vmatprep.subr.bf16.mxu0 %v1380_v17  ;;  %v26_v46 = vld [vmem:[%s2074_s0] sm:$0xff]  ;;  %v28_v50 = vld [vmem:[%s2074_s0 + $0x10] sm:$0xff] }
  0x12   :  { %v1185_v48 = vcombine.high %v26_v46, %v26_v46  ;;  %v1426_v51 = vld [vmem:[%s2073_s1 + $0xc4] ss:$8 sps:$4 sm:$0xff]   ;;  %v1189_v53 = vcombine.high %v28_v50, %v28_v50  ;;  %v1430_v54 = vld [vmem:[%s2073_s1 + $0xc0] ss:$8 sps:$4 sm:$0xff]   ;;  %v1432_v56 = vld [vmem:[%s2073_s1 + $0xd4] ss:$8 sps:$4 sm:$0xff]   ;;  %v1184_v6 = vcombine.low %v26_v46, %v26_v46  ;;  %v1188_v7 = vcombine.low %v28_v50, %v28_v50 }
  0x13   :  { %936 = vmatpush1.bf16.msra.mxu1 %v1382_v18  ;;  %v1428_v52 = vld [vmem:[%s2073_s1 + $0x2c4] ss:$8 sps:$4 sm:$0xff]   ;;  %v1431_v55 = vld [vmem:[%s2073_s1 + $0x2c0] ss:$8 sps:$4 sm:$0xff]   ;;  %v1434_v57 = vld [vmem:[%s2073_s1 + $0x2d4] ss:$8 sps:$4 sm:$0xff]  }
  0x14   :  { %1018 = vmatpush1.bf16.msra.mxu0 %v1383_v19  ;;  %937 = vmatprep.subr.bf16.mxu1 %v1384_v20  ;;  %v1436_v58 = vld [vmem:[%s2073_s1 + $0xd0] ss:$8 sps:$4 sm:$0xff]   ;;  %v1438_v60 = vld [vmem:[%s2073_s1 + $0xe4] ss:$8 sps:$4 sm:$0xff]   ;;  %v1442_v62 = vld [vmem:[%s2073_s1 + $0xe0] ss:$8 sps:$4 sm:$0xff]  }
  0x15   :  { %1019 = vmatprep.subr.bf16.mxu0 %v1386_v21  ;;  %959 = vmatprep.mubr.bf16.mxu1 %v1185_v48  ;;  %v1437_v59 = vld [vmem:[%s2073_s1 + $0x2d0] ss:$8 sps:$4 sm:$0xff]   ;;  %v1440_v61 = vld [vmem:[%s2073_s1 + $0x2e4] ss:$8 sps:$4 sm:$0xff]   ;;  %v1443_v63 = vld [vmem:[%s2073_s1 + $0x2e0] ss:$8 sps:$4 sm:$0xff]  }
  0x16   :  { %1041 = vmatprep.mubr.bf16.mxu0 %v1189_v53  ;;  %v1444_v0 = vld [vmem:[%s2073_s1 + $0xf4] ss:$8 sps:$4 sm:$0xff]   ;;  %v1448_v2 = vld [vmem:[%s2073_s1 + $0xf0] ss:$8 sps:$4 sm:$0xff]   ;;  %v1454_v4 = vld [vmem:[%s2073_s1 + $0x104] ss:$8 sps:$4 sm:$0xff]  }
  0x17   :  { %938 = vmatpush1.bf16.msra.mxu1 %v1388_v22  ;;  %v1446_v1 = vld [vmem:[%s2073_s1 + $0x2f4] ss:$8 sps:$4 sm:$0xff]   ;;  %v1449_v3 = vld [vmem:[%s2073_s1 + $0x2f0] ss:$8 sps:$4 sm:$0xff]   ;;  %v1459_v5 = vld [vmem:[%s2073_s1 + $0x304] ss:$8 sps:$4 sm:$0xff]  }
  0x18   :  { %1020 = vmatpush1.bf16.msra.mxu0 %v1389_v23  ;;  %939 = vmatprep.subr.bf16.mxu1 %v1390_v24  ;;  %v1452_v8 = vld [vmem:[%s2073_s1 + $0x100] ss:$8 sps:$4 sm:$0xff]   ;;  %v1462_v10 = vld [vmem:[%s2073_s1 + $0x114] ss:$8 sps:$4 sm:$0xff]   ;;  %v1460_v12 = vld [vmem:[%s2073_s1 + $0x110] ss:$8 sps:$4 sm:$0xff]  }
  0x19   :  { %1021 = vmatprep.subr.bf16.mxu0 %v1392_v25  ;;  %v1457_v9 = vld [vmem:[%s2073_s1 + $0x300] ss:$8 sps:$4 sm:$0xff]   ;;  %v1465_v11 = vld [vmem:[%s2073_s1 + $0x314] ss:$8 sps:$4 sm:$0xff]   ;;  %v1463_v13 = vld [vmem:[%s2073_s1 + $0x310] ss:$8 sps:$4 sm:$0xff]  }
  0x1a   :  { %v1468_v14 = vld [vmem:[%s2073_s1 + $0x124] ss:$8 sps:$4 sm:$0xff]   ;;  %v1466_v16 = vld [vmem:[%s2073_s1 + $0x120] ss:$8 sps:$4 sm:$0xff]   ;;  %v1474_v18 = vld [vmem:[%s2073_s1 + $0x134] ss:$8 sps:$4 sm:$0xff]  }
  0x1b   :  { %940 = vmatpush1.bf16.msra.mxu1 %v1394_v26  ;;  %v1471_v15 = vld [vmem:[%s2073_s1 + $0x324] ss:$8 sps:$4 sm:$0xff]   ;;  %v1469_v17 = vld [vmem:[%s2073_s1 + $0x320] ss:$8 sps:$4 sm:$0xff]   ;;  %v1477_v19 = vld [vmem:[%s2073_s1 + $0x334] ss:$8 sps:$4 sm:$0xff]  }
  0x1c   :  { %1022 = vmatpush1.bf16.msra.mxu0 %v1395_v27  ;;  %941 = vmatprep.subr.bf16.mxu1 %v1396_v28  ;;  %v1472_v20 = vld [vmem:[%s2073_s1 + $0x130] ss:$8 sps:$4 sm:$0xff]   ;;  %v1480_v22 = vld [vmem:[%s2073_s1 + $0x144] ss:$8 sps:$4 sm:$0xff]   ;;  %v1478_v24 = vld [vmem:[%s2073_s1 + $0x140] ss:$8 sps:$4 sm:$0xff]  }
  0x1d   :  { %1023 = vmatprep.subr.bf16.mxu0 %v1398_v29  ;;  %v1475_v21 = vld [vmem:[%s2073_s1 + $0x330] ss:$8 sps:$4 sm:$0xff]   ;;  %v1483_v23 = vld [vmem:[%s2073_s1 + $0x344] ss:$8 sps:$4 sm:$0xff]   ;;  %v1481_v25 = vld [vmem:[%s2073_s1 + $0x340] ss:$8 sps:$4 sm:$0xff]  }
  0x1e   :  { %v1486_v26 = vld [vmem:[%s2073_s1 + $0x154] ss:$8 sps:$4 sm:$0xff]   ;;  %v1484_v28 = vld [vmem:[%s2073_s1 + $0x150] ss:$8 sps:$4 sm:$0xff]   ;;  %v1516_v50 = vld [vmem:[%s2073_s1 + $0x1a4] ss:$8 sps:$4 sm:$0xff]  }
  0x1f   :  { %942 = vmatpush1.bf16.msra.mxu1 %v1400_v30  ;;  %v1489_v27 = vld [vmem:[%s2073_s1 + $0x354] ss:$8 sps:$4 sm:$0xff]   ;;  %v1487_v29 = vld [vmem:[%s2073_s1 + $0x350] ss:$8 sps:$4 sm:$0xff]   ;;  %v1492_v30 = vld [vmem:[%s2073_s1 + $0x164] ss:$8 sps:$4 sm:$0xff]  }
  0x20   :  { %1024 = vmatpush1.bf16.msra.mxu0 %v1401_v31  ;;  %943 = vmatprep.subr.bf16.mxu1 %v1402_v32  ;;  %v1495_v31 = vld [vmem:[%s2073_s1 + $0x364] ss:$8 sps:$4 sm:$0xff]   ;;  %v1510_v46 = vld [vmem:[%s2073_s1 + $0x194] ss:$8 sps:$4 sm:$0xff]   ;;  %v1508_v48 = vld [vmem:[%s2073_s1 + $0x190] ss:$8 sps:$4 sm:$0xff]  }
  0x21   :  { %1025 = vmatprep.subr.bf16.mxu0 %v1404_v33  ;;  %v1884_v32 = vld [vmem:[%s2074_s0 + $0x8] sm:$0xff]  ;;  %v1889_v33 = vld [vmem:[%s2074_s0 + $0x18] sm:$0xff] }
  0x22   :  { %v1517_v53 = vld [vmem:[%s2073_s1 + $0x3a0] ss:$8 sps:$4 sm:$0xff]  }
  0x23   :  { %944 = vmatpush1.bf16.msra.mxu1 %v1406_v34  ;;  %v1490_v34 = vld [vmem:[%s2073_s1 + $0x160] ss:$8 sps:$4 sm:$0xff]  }
  0x24   :  { %1026 = vmatpush1.bf16.msra.mxu0 %v1407_v35  ;;  %945 = vmatprep.subr.bf16.mxu1 %v1408_v36  ;;  %v1493_v35 = vld [vmem:[%s2073_s1 + $0x360] ss:$8 sps:$4 sm:$0xff]   ;;  %v1187_v36 = vcombine.high %v1884_v32, %v1884_v32 }
  0x25   :  { %1027 = vmatprep.subr.bf16.mxu0 %v1410_v37  ;;  %v1191_v37 = vcombine.high %v1889_v33, %v1889_v33 }
  0x27   :  { %946 = vmatpush1.bf16.msra.mxu1 %v1412_v38  ;;  %v1498_v38 = vld [vmem:[%s2073_s1 + $0x174] ss:$8 sps:$4 sm:$0xff]  }
  0x28   :  { %1028 = vmatpush1.bf16.msra.mxu0 %v1413_v39  ;;  %947 = vmatprep.subr.bf16.mxu1 %v1414_v40  ;;  %v1501_v39 = vld [vmem:[%s2073_s1 + $0x374] ss:$8 sps:$4 sm:$0xff]   ;;  %v1496_v40 = vld [vmem:[%s2073_s1 + $0x170] ss:$8 sps:$4 sm:$0xff]  }
  0x29   :  { %1029 = vmatprep.subr.bf16.mxu0 %v1416_v41  ;;  %v1499_v41 = vld [vmem:[%s2073_s1 + $0x370] ss:$8 sps:$4 sm:$0xff]  }
  0x2b   :  { %948 = vmatpush1.bf16.msra.mxu1 %v1418_v42  ;;  %v1504_v42 = vld [vmem:[%s2073_s1 + $0x184] ss:$8 sps:$4 sm:$0xff]  }
  0x2c   :  { %1030 = vmatpush1.bf16.msra.mxu0 %v1419_v43  ;;  %949 = vmatprep.subr.bf16.mxu1 %v1420_v44  ;;  %v1507_v43 = vld [vmem:[%s2073_s1 + $0x384] ss:$8 sps:$4 sm:$0xff]   ;;  %v1502_v44 = vld [vmem:[%s2073_s1 + $0x180] ss:$8 sps:$4 sm:$0xff]  }
  0x2d   :  { %1031 = vmatprep.subr.bf16.mxu0 %v1422_v45  ;;  %v1505_v45 = vld [vmem:[%s2073_s1 + $0x380] ss:$8 sps:$4 sm:$0xff]  }
  0x2f   :  { %950 = vmatpush1.bf16.msra.mxu1 %v1424_v47  ;;  %v1513_v47 = vld [vmem:[%s2073_s1 + $0x394] ss:$8 sps:$4 sm:$0xff]  }
  0x30   :  { %1032 = vmatpush1.bf16.msra.mxu0 %v1425_v49  ;;  %951 = vmatprep.subr.bf16.mxu1 %v1426_v51  ;;  %v1511_v49 = vld [vmem:[%s2073_s1 + $0x390] ss:$8 sps:$4 sm:$0xff]   ;;  %v1519_v51 = vld [vmem:[%s2073_s1 + $0x3a4] ss:$8 sps:$4 sm:$0xff]  }
  0x31   :  { %1033 = vmatprep.subr.bf16.mxu0 %v1428_v52  ;;  %v1514_v52 = vld [vmem:[%s2073_s1 + $0x1a0] ss:$8 sps:$4 sm:$0xff]  }
  0x33   :  { %952 = vmatpush1.bf16.msra.mxu1 %v1430_v54  ;;  %v1522_v54 = vld [vmem:[%s2073_s1 + $0x1b4] ss:$8 sps:$4 sm:$0xff]  }
  0x34   :  { %1034 = vmatpush1.bf16.msra.mxu0 %v1431_v55  ;;  %953 = vmatprep.subr.bf16.mxu1 %v1432_v56  ;;  %v1525_v55 = vld [vmem:[%s2073_s1 + $0x3b4] ss:$8 sps:$4 sm:$0xff]   ;;  %v1520_v56 = vld [vmem:[%s2073_s1 + $0x1b0] ss:$8 sps:$4 sm:$0xff]  }
  0x35   :  { %1035 = vmatprep.subr.bf16.mxu0 %v1434_v57  ;;  %v1523_v57 = vld [vmem:[%s2073_s1 + $0x3b0] ss:$8 sps:$4 sm:$0xff]  }
  0x37   :  { %954 = vmatpush1.bf16.msra.mxu1 %v1436_v58  ;;  %v1528_v58 = vld [vmem:[%s2073_s1 + $0x1c4] ss:$8 sps:$4 sm:$0xff]  }
  0x38   :  { %1036 = vmatpush1.bf16.msra.mxu0 %v1437_v59  ;;  %955 = vmatprep.subr.bf16.mxu1 %v1438_v60  ;;  %v1531_v59 = vld [vmem:[%s2073_s1 + $0x3c4] ss:$8 sps:$4 sm:$0xff]   ;;  %v1526_v60 = vld [vmem:[%s2073_s1 + $0x1c0] ss:$8 sps:$4 sm:$0xff]  }
  0x39   :  { %1037 = vmatprep.subr.bf16.mxu0 %v1440_v61  ;;  %v1529_v61 = vld [vmem:[%s2073_s1 + $0x3c0] ss:$8 sps:$4 sm:$0xff]  }
  0x3b   :  { %956 = vmatpush1.bf16.msra.mxu1 %v1442_v62  ;;  %v1534_v62 = vld [vmem:[%s2073_s1 + $0x1d4] ss:$8 sps:$4 sm:$0xff]  }
  0x3c   :  { %1038 = vmatpush1.bf16.msra.mxu0 %v1443_v63  ;;  %957 = vmatprep.subr.bf16.mxu1 %v1444_v0  ;;  %v1537_v63 = vld [vmem:[%s2073_s1 + $0x3d4] ss:$8 sps:$4 sm:$0xff]   ;;  %v1532_v0 = vld [vmem:[%s2073_s1 + $0x1d0] ss:$8 sps:$4 sm:$0xff]  }
  0x3d   :  { %1039 = vmatprep.subr.bf16.mxu0 %v1446_v1  ;;  %v1535_v1 = vld [vmem:[%s2073_s1 + $0x3d0] ss:$8 sps:$4 sm:$0xff]  }
  0x3f   :  { %958 = vmatpush1.bf16.msra.mxu1 %v1448_v2  ;;  %v1540_v2 = vld [vmem:[%s2073_s1 + $0x1e4] ss:$8 sps:$4 sm:$0xff]  }
  0x40   :  { %1040 = vmatpush1.bf16.msra.mxu0 %v1449_v3  ;;  %968 = vmatprep.subr.bf16.mxu1 %v1454_v4  ;;  %v1543_v3 = vld [vmem:[%s2073_s1 + $0x3e4] ss:$8 sps:$4 sm:$0xff]   ;;  %v1538_v4 = vld [vmem:[%s2073_s1 + $0x1e0] ss:$8 sps:$4 sm:$0xff]  }
  0x41   :  { %1050 = vmatprep.subr.bf16.mxu0 %v1459_v5  ;;  %v1541_v5 = vld [vmem:[%s2073_s1 + $0x3e0] ss:$8 sps:$4 sm:$0xff]  }
  0x42   :  { %960 = vmatmul.mubr.bf16.vlgmr.msra.gmra.mrb[0].mxu1 %v1184_v6  ;;  %v1546_v6 = vld [vmem:[%s2073_s1 + $0x1f4] ss:$8 sps:$4 sm:$0xff]  }
  0x43   :  { %1042 = vmatmul.mubr.bf16.vlgmr.msra.gmra.mrb[0].mxu0 %v1188_v7  ;;  %969 = vmatpush1.bf16.msra.mxu1 %v1452_v8  ;;  %v1549_v7 = vld [vmem:[%s2073_s1 + $0x3f4] ss:$8 sps:$4 sm:$0xff]   ;;  %v1544_v8 = vld [vmem:[%s2073_s1 + $0x1f0] ss:$8 sps:$4 sm:$0xff]  }
  0x44   :  { %1051 = vmatpush1.bf16.msra.mxu0 %v1457_v9  ;;  %970 = vmatprep.subr.bf16.mxu1 %v1462_v10  ;;  %v1547_v9 = vld [vmem:[%s2073_s1 + $0x3f0] ss:$8 sps:$4 sm:$0xff]   ;;  %v1556_v10 = vld [vmem:[%s2073_s1 + $0x404] ss:$8 sps:$4 sm:$0xff]  }
  0x45   :  { %1052 = vmatprep.subr.bf16.mxu0 %v1465_v11  ;;  %1000 = vmatprep.mubr.bf16.mxu1 %v1187_v36  ;;  %v1186_v11 = vcombine.low %v1884_v32, %v1884_v32 }
  0x46   :  { %1082 = vmatprep.mubr.bf16.mxu0 %v1191_v37  ;;  %v1141_v37 = vld [vmem:[%s2075_s2] sm:$0x3] }
  0x47   :  { %971 = vmatpush1.bf16.msra.mxu1 %v1460_v12  ;;  %v1190_v12 = vcombine.low %v1889_v33, %v1889_v33 }
  0x48   :  { %1053 = vmatpush1.bf16.msra.mxu0 %v1463_v13  ;;  %972 = vmatprep.subr.bf16.mxu1 %v1468_v14  ;;  %v1554_v13 = vld [vmem:[%s2073_s1 + $0x400] ss:$8 sps:$4 sm:$0xff]   ;;  %v1559_v14 = vld [vmem:[%s2073_s1 + $0x414] ss:$8 sps:$4 sm:$0xff]  }
  0x49   :  { %1054 = vmatprep.subr.bf16.mxu0 %v1471_v15  ;;  %v1557_v15 = vld [vmem:[%s2073_s1 + $0x410] ss:$8 sps:$4 sm:$0xff]  }
  0x4b   :  { %973 = vmatpush1.bf16.msra.mxu1 %v1466_v16  ;;  %v1579_v16 = vmov 0  }
  0x4c   :  { %1055 = vmatpush1.bf16.msra.mxu0 %v1469_v17  ;;  %974 = vmatprep.subr.bf16.mxu1 %v1474_v18  ;;  %v1562_v17 = vld [vmem:[%s2073_s1 + $0x424] ss:$8 sps:$4 sm:$0xff]   ;;  %v1560_v18 = vld [vmem:[%s2073_s1 + $0x420] ss:$8 sps:$4 sm:$0xff]  }
  0x4d   :  { %1056 = vmatprep.subr.bf16.mxu0 %v1477_v19  ;;  %v1565_v19 = vld [vmem:[%s2073_s1 + $0x434] ss:$8 sps:$4 sm:$0xff]  }
  0x4f   :  { %975 = vmatpush1.bf16.msra.mxu1 %v1472_v20  ;;  %v1563_v20 = vld [vmem:[%s2073_s1 + $0x430] ss:$8 sps:$4 sm:$0xff]  }
  0x50   :  { %1057 = vmatpush1.bf16.msra.mxu0 %v1475_v21  ;;  %976 = vmatprep.subr.bf16.mxu1 %v1480_v22  ;;  %v1568_v21 = vld [vmem:[%s2073_s1 + $0x444] ss:$8 sps:$4 sm:$0xff]   ;;  %v1566_v22 = vld [vmem:[%s2073_s1 + $0x440] ss:$8 sps:$4 sm:$0xff]  }
  0x51   :  { %1058 = vmatprep.subr.bf16.mxu0 %v1483_v23  ;;  %v1571_v23 = vld [vmem:[%s2073_s1 + $0x454] ss:$8 sps:$4 sm:$0xff]  }
  0x53   :  { %977 = vmatpush1.bf16.msra.mxu1 %v1478_v24  ;;  %v1569_v24 = vld [vmem:[%s2073_s1 + $0x450] ss:$8 sps:$4 sm:$0xff]  }
  0x54   :  { %1059 = vmatpush1.bf16.msra.mxu0 %v1481_v25  ;;  %978 = vmatprep.subr.bf16.mxu1 %v1486_v26  ;;  %v1574_v25 = vld [vmem:[%s2073_s1 + $0x464] ss:$8 sps:$4 sm:$0xff]   ;;  %v1572_v26 = vld [vmem:[%s2073_s1 + $0x460] ss:$8 sps:$4 sm:$0xff]  }
  0x55   :  { %1060 = vmatprep.subr.bf16.mxu0 %v1489_v27  ;;  %v1577_v27 = vld [vmem:[%s2073_s1 + $0x474] ss:$8 sps:$4 sm:$0xff]  }
  0x57   :  { %979 = vmatpush1.bf16.msra.mxu1 %v1484_v28  ;;  %v1575_v28 = vld [vmem:[%s2073_s1 + $0x470] ss:$8 sps:$4 sm:$0xff]  }
  0x58   :  { %1061 = vmatpush1.bf16.msra.mxu0 %v1487_v29  ;;  %980 = vmatprep.subr.bf16.mxu1 %v1492_v30  ;;  %v1578_v29 = vld [vmem:[%s2074_s0 + $0x20] ss:$0 sps:$4 sm:$0xff]  }
  0x59   :  { %1062 = vmatprep.subr.bf16.mxu0 %v1495_v31 }
  0x5b   :  { %981 = vmatpush1.bf16.msra.mxu1 %v1490_v34  ;;  %v1143_v34 = vlaneseq }
  0x5c   :  { %1063 = vmatpush1.bf16.msra.mxu0 %v1493_v35  ;;  %982 = vmatprep.subr.bf16.mxu1 %v1498_v38 }
  0x5d   :  { %1064 = vmatprep.subr.bf16.mxu0 %v1501_v39  ;;  %v1144_v35 = vshrl.u32 %v1143_v34, 7  ;;  %v1155_v39 = vld [vmem:[%s2076_s3] sm:$0x3] }
  0x5f   :  { %983 = vmatpush1.bf16.msra.mxu1 %v1496_v40  ;;  %v1145_v36 = vsub.s32 0, %v1144_v35  ;;  %v1149_v38 = vsub.s32 1, %v1144_v35 }
  0x60   :  { %1065 = vmatpush1.bf16.msra.mxu0 %v1499_v41  ;;  %984 = vmatprep.subr.bf16.mxu1 %v1504_v42 }
  0x61   :  { %1066 = vmatprep.subr.bf16.mxu0 %v1507_v43  ;;  %v1146_v40 = vrot.slane %v1141_v37, %v1145_v36  ;;  %v1150_v42 = vrot.slane %v1141_v37, %v1149_v38 }
  0x63   :  { %985 = vmatpush1.bf16.msra.mxu1 %v1502_v44  ;;  %v1160_v44 = vrot.slane %v1155_v39, %v1145_v36 }
  0x64   :  { %1067 = vmatpush1.bf16.msra.mxu0 %v1505_v45  ;;  %986 = vmatprep.subr.bf16.mxu1 %v1510_v46 }
  0x65   :  { %1068 = vmatprep.subr.bf16.mxu0 %v1513_v47  ;;  %v1164_v47 = vrot.slane %v1155_v39, %v1149_v38 }
  0x67   :  { %987 = vmatpush1.bf16.msra.mxu1 %v1508_v48 }
  0x68   :  { %1069 = vmatpush1.bf16.msra.mxu0 %v1511_v49  ;;  %988 = vmatprep.subr.bf16.mxu1 %v1516_v50 }
  0x69   :  { %1070 = vmatprep.subr.bf16.mxu0 %v1519_v51 }
  0x6b   :  { %989 = vmatpush1.bf16.msra.mxu1 %v1514_v52 }
  0x6c   :  { %1071 = vmatpush1.bf16.msra.mxu0 %v1517_v53  ;;  %990 = vmatprep.subr.bf16.mxu1 %v1522_v54 }
  0x6d   :  { %1072 = vmatprep.subr.bf16.mxu0 %v1525_v55 }
  0x6f   :  { %991 = vmatpush1.bf16.msra.mxu1 %v1520_v56 }
  0x70   :  { %1073 = vmatpush1.bf16.msra.mxu0 %v1523_v57  ;;  %992 = vmatprep.subr.bf16.mxu1 %v1528_v58 }
  0x71   :  { %1074 = vmatprep.subr.bf16.mxu0 %v1531_v59 }
  0x73   :  { %993 = vmatpush1.bf16.msra.mxu1 %v1526_v60 }
  0x74   :  { %1075 = vmatpush1.bf16.msra.mxu0 %v1529_v61  ;;  %994 = vmatprep.subr.bf16.mxu1 %v1534_v62 }
  0x75   :  { %1076 = vmatprep.subr.bf16.mxu0 %v1537_v63 }
  0x77   :  { %995 = vmatpush1.bf16.msra.mxu1 %v1532_v0 }
  0x78   :  { %1077 = vmatpush1.bf16.msra.mxu0 %v1535_v1  ;;  %996 = vmatprep.subr.bf16.mxu1 %v1540_v2 }
  0x79   :  { %1078 = vmatprep.subr.bf16.mxu0 %v1543_v3 }
  0x7b   :  { %997 = vmatpush1.bf16.msra.mxu1 %v1538_v4 }
  0x7c   :  { %1079 = vmatpush1.bf16.msra.mxu0 %v1541_v5  ;;  %998 = vmatprep.subr.bf16.mxu1 %v1546_v6 }
  0x7d   :  { %1080 = vmatprep.subr.bf16.mxu0 %v1549_v7 }
  0x7f   :  { %999 = vmatpush1.bf16.msra.mxu1 %v1544_v8 }
  0x80   :  { %1081 = vmatpush1.bf16.msra.mxu0 %v1547_v9 }
  0x81   :  { %1091 = vmatprep.subr.bf16.mxu0 %v1556_v10 }
  0x82   :  { %1001 = vmatmul.mubr.bf16.vlgmr.msra.gmra.mrb[0].mxu1 %v1186_v11 }
  0x83   :  { %1083 = vmatmul.mubr.bf16.vlgmr.msra.gmra.mrb[0].mxu0 %v1190_v12 }
  0x84   :  { %1092 = vmatpush1.bf16.msra.mxu0 %v1554_v13  ;;  %1123 = vmatprep.mubr.bf16.mxu0 %v1579_v16 }
  0x85   :  { %1093 = vmatprep.subr.bf16.mxu0 %v1559_v14 }
  0x88   :  { %1094 = vmatpush1.bf16.msra.mxu0 %v1557_v15 }
  0x89   :  { %1095 = vmatprep.subr.bf16.mxu0 %v1562_v17 }
  0x8c   :  { %1096 = vmatpush1.bf16.msra.mxu0 %v1560_v18 }
  0x8d   :  { %1097 = vmatprep.subr.bf16.mxu0 %v1565_v19 }
  0x90   :  { %1098 = vmatpush1.bf16.msra.mxu0 %v1563_v20 }
  0x91   :  { %1099 = vmatprep.subr.bf16.mxu0 %v1568_v21 }
  0x94   :  { %1100 = vmatpush1.bf16.msra.mxu0 %v1566_v22 }
  0x95   :  { %1101 = vmatprep.subr.bf16.mxu0 %v1571_v23 }
  0x98   :  { %1102 = vmatpush1.bf16.msra.mxu0 %v1569_v24 }
  0x99   :  { %1103 = vmatprep.subr.bf16.mxu0 %v1574_v25 }
  0x9c   :  { %1104 = vmatpush1.bf16.msra.mxu0 %v1572_v26 }
  0x9d   :  { %1105 = vmatprep.subr.bf16.mxu0 %v1577_v27 }
  0xa0   :  { %1106 = vmatpush1.bf16.msra.mxu0 %v1575_v28 }
  0xa3   :  { %1124 = vmatmul.mubr.bf16.vlgmr.msra.gmra.mrb[0].mxu0 %v1578_v29 }
 0x155   :  { %v1002_v30 = vpop.f32.mrb[0].mxu1 }
 0x156   :  { %v1004_v31 = vpop.f32.mrb[1].mxu1 }
 0x157   :  { %v1006_v32 = vpop.f32.mrb[2].mxu1 }
 0x158   :  { %v1007_v33 = vpop.f32.mrb[3].mxu1 }
 0x176   :  { %v1125_v41 = vpop.f32.mrb[0].mxu0 }
 0x177   :  { %v1339_v43 = vadd.f32 %v1125_v41, %v1002_v30  ;;  %v1127_v45 = vpop.f32.mrb[1].mxu0 }
 0x178   :  { %v1340_v46 = vadd.f32 %v1127_v45, %v1004_v31  ;;  %v1129_v48 = vpop.f32.mrb[2].mxu0 }
 0x179   :  { %v1153_v49 = vmul.f32 %v1339_v43, %v1146_v40  ;;  %v1130_v50 = vpop.f32.mrb[3].mxu0 }
 0x17a   :  { %v1154_v51 = vmul.f32 %v1340_v46, %v1150_v42 }
 0x17b   :  { %v1167_v52 = vadd.f32 %v1160_v44, %v1153_v49 }
 0x17c   :  { %v1168_v53 = vadd.f32 %v1164_v47, %v1154_v51 }
 0x17d   :  { %v1169_v54 = vmax.f32 %v1167_v52, 0.0 }
 0x17e   :  { %v1170_v55 = vmax.f32 %v1168_v53, 0.0 }
 0x180   :  { %v1338_v56 = vpack.c.bf16 %v1170_v55, %v1169_v54 }
 0x182   :  { %1179 = vst [vmem:[%s2077_s4] sm:$0xff] %v1338_v56 }

// kernel: resnet_forward.39
= control target key start
LH: loop header
LB: loop body
LE: loop exit
PB: predicated region body
PF: predicated region fallthrough
CT: control target
= control target key end

     0   :  { %s1598_s15 = smov 0   ;;  %s1600_s16 = smov 0   ;;  %s1918_s0 = inlined_call_operand.vmem [shape: bf16[8,2560], index: 0, kind: input, shape index: {}]   ;;  %s1919_s1 = inlined_call_operand.vmem [shape: bf16[2560,512], index: 1, kind: input, shape index: {}]   ;;  %s1920_s2 = inlined_call_operand.vmem [shape: f32[1,512], index: 2, kind: input, shape index: {}]   ;;  %s1921_s3 = inlined_call_operand.vmem [shape: f32[1,512], index: 3, kind: input, shape index: {}]   ;;  %s1922_s4 = inlined_call_operand.vmem [shape: bf16[8,512], index: 4, kind: output, shape index: {}]  }
   0x1   :  { %s1602_s17 = smov 0   ;;  %s1604_s18 = smov 0  }
   0x2   :  { %s1606_s19 = smov 0   ;;  %s1608_s20 = smov 0  }
   0x3   :  { %s1610_s21 = smov 0  }
   0x4 LB: > { %s26_s22 = sadd.s32 1, %s1562_s19  ;;  %s29_s23 = sadd.s32 1, %s1566_s20  ;;  %s1570_s21 = sphi %s1610_s21, %s14_s21   ;;  %s1566_s20 = sphi %s1608_s20, %s1928_s20   ;;  %s1562_s19 = sphi %s1606_s19, %s1927_s19   ;;  %s1558_s18 = sphi %s1604_s18, %s1926_s18   ;;  %s1554_s17 = sphi %s1602_s17, %s1925_s17   ;;  %s1550_s16 = sphi %s1600_s16, %s1924_s16   ;;  %s1546_s15 = sphi %s1598_s15, %s1923_s15  }
   0x5   : > { %p27_p0 = scmp.ge.s32.totalorder %s26_s22, 5  ;;  %p77_p1 = scmp.ne.s32.totalorder %s1550_s16, %s1546_s15 }
   0x6   : > { %p78_p2 = scmp.eq.s32.totalorder %s1570_s21, 0  ;;  %s70_s27 = sadd.s32 1, %s1550_s16 }
   0x7   : > { %s1930_s22 = smov (%p27_p0, %s26_s22), 0  ;;  %s1932_s23 = smov (!%p27_p0, %s29_s23), %s1566_s20 }
   0x8   : > { %p79_p3 = por %p78_p2, %p77_p1  ;;  %p31_p4 = scmp.ge.s32.totalorder %s1932_s23, 2 }
   0x9   : > { %s65_s24 = ssub.s32 %s1562_s19, %s1930_s22  ;;  %p1270_p6 = scmp.ge.s32.totalorder %s1570_s21, 10 }
   0xa   : > { %s1934_s23 = smov (%p31_p4, %s1932_s23), 0 }
   0xb   : > { %s66_s25 = ssub.s32 %s1566_s20, %s1934_s23  ;;  %183 = sbr.rel (%p1270_p6) target bundleno = 57 (0x39), region = 16 }
   0xc   : > { %s67_s26 = sor.u32 %s66_s25, %s65_s24 }
   0xd   : > { %p68_p5 = scmp.eq.s32.totalorder %s67_s26, 0 }
   0xf   : > { %s1649_s28 = scalar_select %p68_p5, %s1550_s16, %s70_s27  }
  0x12   : > { %199 = sbr.rel (!%p79_p3) target bundleno = 57 (0x39), region = 24  ;;  %s201_s29 = sand.u32 (%p79_p3), 1, %s1550_s16  }
  0x13   : > { %s1273_s30 = sshll.u32 (%p79_p3), %s1566_s20, 1  ;;  %s1271_s5 = sshll.u32 (%p79_p3), %s201_s29, 9 }
  0x14   : > { %s1357_s6 = sshll.u32 (%p79_p3), %s1562_s19, 8  ;;  %s1663_s12 = scalar_lea.vmem (%p79_p3), [#allocation3], %s1271_s5 }
  0x15   : > { %s207_s7 = sadd.s32 (%p79_p3), %s1357_s6, %s1273_s30 }
  0x16   : > { %s1275_s8 = sshll.u32 (%p79_p3), %s207_s7, 2 }
  0x17   : > { %s1658_s11 = scalar_lea.vmem (%p79_p3), %s1919_s1, %s1275_s8 }
  0x18   : > { %v363_v0 = vld [vmem:[%s1658_s11] sm:$0xff] (%p79_p3)  ;;  %v365_v1 = vld [vmem:[%s1658_s11 + $0x10] sm:$0xff] (%p79_p3) }
  0x19   : > { %v367_v2 = vld [vmem:[%s1658_s11 + $0x20] sm:$0xff]  ;;  %364 = vst [vmem:[%s1663_s12] sm:$0xff] %v363_v0  ;;  %366 = vst [vmem:[%s1663_s12 + $0x8] sm:$0xff] %v365_v1  ;;  %v369_v3 = vld [vmem:[%s1658_s11 + $0x30] sm:$0xff] }
  0x1a   : > { %368 = vst [vmem:[%s1663_s12 + $0x10] sm:$0xff] %v367_v2  ;;  %v371_v4 = vld [vmem:[%s1658_s11 + $0x40] sm:$0xff]  ;;  %v373_v5 = vld [vmem:[%s1658_s11 + $0x50] sm:$0xff]  ;;  %370 = vst [vmem:[%s1663_s12 + $0x18] sm:$0xff] %v369_v3 }
  0x1b   : > { %372 = vst [vmem:[%s1663_s12 + $0x20] sm:$0xff] %v371_v4  ;;  %374 = vst [vmem:[%s1663_s12 + $0x28] sm:$0xff] %v373_v5  ;;  %v375_v6 = vld [vmem:[%s1658_s11 + $0x60] sm:$0xff]  ;;  %v377_v7 = vld [vmem:[%s1658_s11 + $0x70] sm:$0xff] }
  0x1c   : > { %v379_v8 = vld [vmem:[%s1658_s11 + $0x80] sm:$0xff]  ;;  %376 = vst [vmem:[%s1663_s12 + $0x30] sm:$0xff] %v375_v6  ;;  %378 = vst [vmem:[%s1663_s12 + $0x38] sm:$0xff] %v377_v7  ;;  %v381_v9 = vld [vmem:[%s1658_s11 + $0x90] sm:$0xff] }
  0x1d   : > { %380 = vst [vmem:[%s1663_s12 + $0x40] sm:$0xff] %v379_v8  ;;  %v383_v10 = vld [vmem:[%s1658_s11 + $0xa0] sm:$0xff]  ;;  %v385_v11 = vld [vmem:[%s1658_s11 + $0xb0] sm:$0xff]  ;;  %382 = vst [vmem:[%s1663_s12 + $0x48] sm:$0xff] %v381_v9 }
  0x1e   : > { %384 = vst [vmem:[%s1663_s12 + $0x50] sm:$0xff] %v383_v10  ;;  %386 = vst [vmem:[%s1663_s12 + $0x58] sm:$0xff] %v385_v11  ;;  %v387_v12 = vld [vmem:[%s1658_s11 + $0xc0] sm:$0xff]  ;;  %v389_v13 = vld [vmem:[%s1658_s11 + $0xd0] sm:$0xff] }
  0x1f   : > { %v391_v14 = vld [vmem:[%s1658_s11 + $0xe0] sm:$0xff]  ;;  %388 = vst [vmem:[%s1663_s12 + $0x60] sm:$0xff] %v387_v12  ;;  %390 = vst [vmem:[%s1663_s12 + $0x68] sm:$0xff] %v389_v13  ;;  %v393_v15 = vld [vmem:[%s1658_s11 + $0xf0] sm:$0xff] }
  0x20   : > { %392 = vst [vmem:[%s1663_s12 + $0x70] sm:$0xff] %v391_v14  ;;  %v395_v16 = vld [vmem:[%s1658_s11 + $0x100] sm:$0xff]  ;;  %v397_v17 = vld [vmem:[%s1658_s11 + $0x110] sm:$0xff]  ;;  %394 = vst [vmem:[%s1663_s12 + $0x78] sm:$0xff] %v393_v15 }
  0x21   : > { %396 = vst [vmem:[%s1663_s12 + $0x80] sm:$0xff] %v395_v16  ;;  %398 = vst [vmem:[%s1663_s12 + $0x88] sm:$0xff] %v397_v17  ;;  %v399_v18 = vld [vmem:[%s1658_s11 + $0x120] sm:$0xff]  ;;  %v401_v19 = vld [vmem:[%s1658_s11 + $0x130] sm:$0xff] }
  0x22   : > { %v403_v20 = vld [vmem:[%s1658_s11 + $0x140] sm:$0xff]  ;;  %400 = vst [vmem:[%s1663_s12 + $0x90] sm:$0xff] %v399_v18  ;;  %402 = vst [vmem:[%s1663_s12 + $0x98] sm:$0xff] %v401_v19  ;;  %v405_v21 = vld [vmem:[%s1658_s11 + $0x150] sm:$0xff] }
  0x23   : > { %404 = vst [vmem:[%s1663_s12 + $0xa0] sm:$0xff] %v403_v20  ;;  %v407_v22 = vld [vmem:[%s1658_s11 + $0x160] sm:$0xff]  ;;  %v409_v23 = vld [vmem:[%s1658_s11 + $0x170] sm:$0xff]  ;;  %406 = vst [vmem:[%s1663_s12 + $0xa8] sm:$0xff] %v405_v21 }
  0x24   : > { %408 = vst [vmem:[%s1663_s12 + $0xb0] sm:$0xff] %v407_v22  ;;  %410 = vst [vmem:[%s1663_s12 + $0xb8] sm:$0xff] %v409_v23  ;;  %v411_v24 = vld [vmem:[%s1658_s11 + $0x180] sm:$0xff]  ;;  %v413_v25 = vld [vmem:[%s1658_s11 + $0x190] sm:$0xff] }
  0x25   : > { %v415_v26 = vld [vmem:[%s1658_s11 + $0x1a0] sm:$0xff]  ;;  %412 = vst [vmem:[%s1663_s12 + $0xc0] sm:$0xff] %v411_v24  ;;  %414 = vst [vmem:[%s1663_s12 + $0xc8] sm:$0xff] %v413_v25  ;;  %v417_v27 = vld [vmem:[%s1658_s11 + $0x1b0] sm:$0xff] }
  0x26   : > { %416 = vst [vmem:[%s1663_s12 + $0xd0] sm:$0xff] %v415_v26  ;;  %v419_v28 = vld [vmem:[%s1658_s11 + $0x1c0] sm:$0xff]  ;;  %v421_v29 = vld [vmem:[%s1658_s11 + $0x1d0] sm:$0xff]  ;;  %418 = vst [vmem:[%s1663_s12 + $0xd8] sm:$0xff] %v417_v27 }
  0x27   : > { %420 = vst [vmem:[%s1663_s12 + $0xe0] sm:$0xff] %v419_v28  ;;  %422 = vst [vmem:[%s1663_s12 + $0xe8] sm:$0xff] %v421_v29  ;;  %v423_v30 = vld [vmem:[%s1658_s11 + $0x1e0] sm:$0xff]  ;;  %v425_v31 = vld [vmem:[%s1658_s11 + $0x1f0] sm:$0xff] }
  0x28   : > { %v427_v32 = vld [vmem:[%s1658_s11 + $0x200] sm:$0xff]  ;;  %424 = vst [vmem:[%s1663_s12 + $0xf0] sm:$0xff] %v423_v30  ;;  %426 = vst [vmem:[%s1663_s12 + $0xf8] sm:$0xff] %v425_v31  ;;  %v429_v33 = vld [vmem:[%s1658_s11 + $0x210] sm:$0xff] }
  0x29   : > { %428 = vst [vmem:[%s1663_s12 + $0x100] sm:$0xff] %v427_v32  ;;  %v431_v34 = vld [vmem:[%s1658_s11 + $0x220] sm:$0xff]  ;;  %v433_v35 = vld [vmem:[%s1658_s11 + $0x230] sm:$0xff]  ;;  %430 = vst [vmem:[%s1663_s12 + $0x108] sm:$0xff] %v429_v33 }
  0x2a   : > { %432 = vst [vmem:[%s1663_s12 + $0x110] sm:$0xff] %v431_v34  ;;  %434 = vst [vmem:[%s1663_s12 + $0x118] sm:$0xff] %v433_v35  ;;  %v435_v36 = vld [vmem:[%s1658_s11 + $0x240] sm:$0xff]  ;;  %v437_v37 = vld [vmem:[%s1658_s11 + $0x250] sm:$0xff] }
  0x2b   : > { %v439_v38 = vld [vmem:[%s1658_s11 + $0x260] sm:$0xff]  ;;  %436 = vst [vmem:[%s1663_s12 + $0x120] sm:$0xff] %v435_v36  ;;  %438 = vst [vmem:[%s1663_s12 + $0x128] sm:$0xff] %v437_v37  ;;  %v441_v39 = vld [vmem:[%s1658_s11 + $0x270] sm:$0xff] }
  0x2c   : > { %440 = vst [vmem:[%s1663_s12 + $0x130] sm:$0xff] %v439_v38  ;;  %v443_v40 = vld [vmem:[%s1658_s11 + $0x280] sm:$0xff]  ;;  %v445_v41 = vld [vmem:[%s1658_s11 + $0x290] sm:$0xff]  ;;  %442 = vst [vmem:[%s1663_s12 + $0x138] sm:$0xff] %v441_v39 }
  0x2d   : > { %444 = vst [vmem:[%s1663_s12 + $0x140] sm:$0xff] %v443_v40  ;;  %446 = vst [vmem:[%s1663_s12 + $0x148] sm:$0xff] %v445_v41  ;;  %v447_v42 = vld [vmem:[%s1658_s11 + $0x2a0] sm:$0xff]  ;;  %v449_v43 = vld [vmem:[%s1658_s11 + $0x2b0] sm:$0xff] }
  0x2e   : > { %v451_v44 = vld [vmem:[%s1658_s11 + $0x2c0] sm:$0xff]  ;;  %448 = vst [vmem:[%s1663_s12 + $0x150] sm:$0xff] %v447_v42  ;;  %450 = vst [vmem:[%s1663_s12 + $0x158] sm:$0xff] %v449_v43  ;;  %v453_v45 = vld [vmem:[%s1658_s11 + $0x2d0] sm:$0xff] }
  0x2f   : > { %452 = vst [vmem:[%s1663_s12 + $0x160] sm:$0xff] %v451_v44  ;;  %v455_v46 = vld [vmem:[%s1658_s11 + $0x2e0] sm:$0xff]  ;;  %v457_v47 = vld [vmem:[%s1658_s11 + $0x2f0] sm:$0xff]  ;;  %454 = vst [vmem:[%s1663_s12 + $0x168] sm:$0xff] %v453_v45 }
  0x30   : > { %456 = vst [vmem:[%s1663_s12 + $0x170] sm:$0xff] %v455_v46  ;;  %458 = vst [vmem:[%s1663_s12 + $0x178] sm:$0xff] %v457_v47  ;;  %v459_v48 = vld [vmem:[%s1658_s11 + $0x300] sm:$0xff]  ;;  %v461_v49 = vld [vmem:[%s1658_s11 + $0x310] sm:$0xff] }
  0x31   : > { %v463_v50 = vld [vmem:[%s1658_s11 + $0x320] sm:$0xff]  ;;  %460 = vst [vmem:[%s1663_s12 + $0x180] sm:$0xff] %v459_v48  ;;  %462 = vst [vmem:[%s1663_s12 + $0x188] sm:$0xff] %v461_v49  ;;  %v465_v51 = vld [vmem:[%s1658_s11 + $0x330] sm:$0xff] }
  0x32   : > { %464 = vst [vmem:[%s1663_s12 + $0x190] sm:$0xff] %v463_v50  ;;  %v467_v52 = vld [vmem:[%s1658_s11 + $0x340] sm:$0xff]  ;;  %v469_v53 = vld [vmem:[%s1658_s11 + $0x350] sm:$0xff]  ;;  %466 = vst [vmem:[%s1663_s12 + $0x198] sm:$0xff] %v465_v51 }
  0x33   : > { %468 = vst [vmem:[%s1663_s12 + $0x1a0] sm:$0xff] %v467_v52  ;;  %470 = vst [vmem:[%s1663_s12 + $0x1a8] sm:$0xff] %v469_v53  ;;  %v471_v54 = vld [vmem:[%s1658_s11 + $0x360] sm:$0xff]  ;;  %v473_v55 = vld [vmem:[%s1658_s11 + $0x370] sm:$0xff] }
  0x34   : > { %v475_v56 = vld [vmem:[%s1658_s11 + $0x380] sm:$0xff]  ;;  %472 = vst [vmem:[%s1663_s12 + $0x1b0] sm:$0xff] %v471_v54  ;;  %474 = vst [vmem:[%s1663_s12 + $0x1b8] sm:$0xff] %v473_v55  ;;  %v477_v57 = vld [vmem:[%s1658_s11 + $0x390] sm:$0xff] }
  0x35   : > { %476 = vst [vmem:[%s1663_s12 + $0x1c0] sm:$0xff] %v475_v56  ;;  %v479_v58 = vld [vmem:[%s1658_s11 + $0x3a0] sm:$0xff]  ;;  %v481_v59 = vld [vmem:[%s1658_s11 + $0x3b0] sm:$0xff]  ;;  %478 = vst [vmem:[%s1663_s12 + $0x1c8] sm:$0xff] %v477_v57 }
  0x36   : > { %480 = vst [vmem:[%s1663_s12 + $0x1d0] sm:$0xff] %v479_v58  ;;  %482 = vst [vmem:[%s1663_s12 + $0x1d8] sm:$0xff] %v481_v59  ;;  %v483_v60 = vld [vmem:[%s1658_s11 + $0x3c0] sm:$0xff]  ;;  %v485_v61 = vld [vmem:[%s1658_s11 + $0x3d0] sm:$0xff] }
  0x37   : > { %v487_v62 = vld [vmem:[%s1658_s11 + $0x3e0] sm:$0xff]  ;;  %484 = vst [vmem:[%s1663_s12 + $0x1e0] sm:$0xff] %v483_v60  ;;  %486 = vst [vmem:[%s1663_s12 + $0x1e8] sm:$0xff] %v485_v61  ;;  %v489_v63 = vld [vmem:[%s1658_s11 + $0x3f0] sm:$0xff] }
  0x38   : > { %488 = vst [vmem:[%s1663_s12 + $0x1f0] sm:$0xff] %v487_v62  ;;  %490 = vst [vmem:[%s1663_s12 + $0x1f8] sm:$0xff] %v489_v63 }
  0x39 PF: > { %p1276_p7 = scmp.ge.s32.totalorder %s1570_s21, 1  ;;  %p511_p8 = scmp.lt.s32.totalorder %s1570_s21, 11 }
  0x3b   : > { %p512_p9 = pnand %p1276_p7, %p511_p8 }
  0x3c   : > { %s518_s13 = sand.u32 (!%p512_p9), 1, %s1546_s15   ;;  %s1278_s14 = sshll.u32 (!%p512_p9), %s1554_s17, 2 }
  0x3d   : > { %515 = sbr.rel (%p512_p9) target bundleno = 378 (0x17a), region = 70  ;;  %s1277_s24 = sshll.u32 (!%p512_p9), %s518_s13, 9 }
  0x3e   : > { %p567_p10 = scmp.lt.s32.totalorder (!%p512_p9), %s1278_s14, 19  ;;  %s1280_s25 = sshll.u32 (!%p512_p9), %s1558_s18, 1 }
  0x3f   : > { %p577_p11 = scmp.lt.s32.totalorder (!%p512_p9), %s1280_s25, 3  ;;  %s1816_s13 = scalar_lea.vmem (!%p512_p9), [#allocation3], %s1277_s24 }
  0x40   : > { %p1284_p12 = scmp.ne.s32.totalorder (!%p512_p9), %s1554_s17, 0 }
  0x44   : > { %s1936_s14 = smov (!%p567_p10, %s1278_s14), 19  ;;  %s1938_s25 = smov (!%p577_p11, %s1280_s25), 3 }
  0x45   : > { %s1279_s26 = sshll.u32 %s1936_s14, 2  ;;  %s579_s15 = scalar_lea.vmem %s1920_s2, %s1938_s25  ;;  %v1572_v0 = vmov (!%p1284_p12), 0.0  }
  0x46   : > { %s1798_s30 = scalar_lea.vmem %s1918_s0, %s1279_s26  ;;  %s584_s18 = scalar_lea.vmem %s1921_s3, %s1938_s25  ;;  %600 = vst [vmem:[#allocation2] sm:$0xff] (!%p1284_p12), %v1572_v0  ;;  %601 = vst [vmem:[#allocation2 + $0x8] sm:$0xff] (!%p1284_p12), %v1572_v0 }
  0x47   : > { %s1283_s9 = sshll.u32 %s1938_s25, 2  ;;  %599 = sbr.rel (%p1284_p12) target bundleno = 78 (0x4e), region = 78 }
  0x48   : > { %s1814_s12 = scalar_lea.vmem %s1922_s4, %s1283_s9 }
  0x4e PF: > { %v1416_v1 = vld [vmem:[%s1816_s13 + $0x4] ss:$8 sps:$4 sm:$0xff]   ;;  %v1420_v3 = vld [vmem:[%s1816_s13] ss:$8 sps:$4 sm:$0xff]   ;;  %v1422_v5 = vld [vmem:[%s1816_s13 + $0x14] ss:$8 sps:$4 sm:$0xff]  }
  0x4f   : > { %v1418_v2 = vld [vmem:[%s1816_s13 + $0x104] ss:$8 sps:$4 sm:$0xff]   ;;  %1004 = vmatprep.subr.bf16.mxu0 %v1416_v1  ;;  %v1421_v4 = vld [vmem:[%s1816_s13 + $0x100] ss:$8 sps:$4 sm:$0xff]   ;;  %v1424_v6 = vld [vmem:[%s1816_s13 + $0x114] ss:$8 sps:$4 sm:$0xff]  }
  0x50   : > { %1045 = vmatprep.subr.bf16.mxu1 %v1418_v2  ;;  %1005 = vmatpush1.bf16.msra.mxu0 %v1420_v3  ;;  %v1426_v7 = vld [vmem:[%s1816_s13 + $0x10] ss:$8 sps:$4 sm:$0xff]   ;;  %v1428_v9 = vld [vmem:[%s1816_s13 + $0x24] ss:$8 sps:$4 sm:$0xff]   ;;  %v1432_v11 = vld [vmem:[%s1816_s13 + $0x20] ss:$8 sps:$4 sm:$0xff]  }
  0x51   : > { %1046 = vmatpush1.bf16.msra.mxu1 %v1421_v4  ;;  %1006 = vmatprep.subr.bf16.mxu0 %v1422_v5  ;;  %v1427_v8 = vld [vmem:[%s1816_s13 + $0x110] ss:$8 sps:$4 sm:$0xff]   ;;  %v1430_v10 = vld [vmem:[%s1816_s13 + $0x124] ss:$8 sps:$4 sm:$0xff]   ;;  %v1433_v12 = vld [vmem:[%s1816_s13 + $0x120] ss:$8 sps:$4 sm:$0xff]  }
  0x52   : > { %1047 = vmatprep.subr.bf16.mxu1 %v1424_v6  ;;  %v1434_v13 = vld [vmem:[%s1816_s13 + $0x34] ss:$8 sps:$4 sm:$0xff]   ;;  %v1438_v15 = vld [vmem:[%s1816_s13 + $0x30] ss:$8 sps:$4 sm:$0xff]   ;;  %v1440_v17 = vld [vmem:[%s1816_s13 + $0x44] ss:$8 sps:$4 sm:$0xff]  }
  0x53   : > { %v1436_v14 = vld [vmem:[%s1816_s13 + $0x134] ss:$8 sps:$4 sm:$0xff]   ;;  %v1439_v16 = vld [vmem:[%s1816_s13 + $0x130] ss:$8 sps:$4 sm:$0xff]   ;;  %v1442_v18 = vld [vmem:[%s1816_s13 + $0x144] ss:$8 sps:$4 sm:$0xff]  }
  0x54   : > { %1007 = vmatpush1.bf16.msra.mxu0 %v1426_v7  ;;  %v1444_v19 = vld [vmem:[%s1816_s13 + $0x40] ss:$8 sps:$4 sm:$0xff]   ;;  %v1446_v21 = vld [vmem:[%s1816_s13 + $0x54] ss:$8 sps:$4 sm:$0xff]   ;;  %v1450_v23 = vld [vmem:[%s1816_s13 + $0x50] ss:$8 sps:$4 sm:$0xff]  }
  0x55   : > { %1048 = vmatpush1.bf16.msra.mxu1 %v1427_v8  ;;  %1008 = vmatprep.subr.bf16.mxu0 %v1428_v9  ;;  %v1445_v20 = vld [vmem:[%s1816_s13 + $0x140] ss:$8 sps:$4 sm:$0xff]   ;;  %v1448_v22 = vld [vmem:[%s1816_s13 + $0x154] ss:$8 sps:$4 sm:$0xff]   ;;  %v1451_v24 = vld [vmem:[%s1816_s13 + $0x150] ss:$8 sps:$4 sm:$0xff]  }
  0x56   : > { %1049 = vmatprep.subr.bf16.mxu1 %v1430_v10  ;;  %v1452_v25 = vld [vmem:[%s1816_s13 + $0x64] ss:$8 sps:$4 sm:$0xff]   ;;  %v1456_v27 = vld [vmem:[%s1816_s13 + $0x60] ss:$8 sps:$4 sm:$0xff]   ;;  %v1458_v29 = vld [vmem:[%s1816_s13 + $0x74] ss:$8 sps:$4 sm:$0xff]  }
  0x57   : > { %v1454_v26 = vld [vmem:[%s1816_s13 + $0x164] ss:$8 sps:$4 sm:$0xff]   ;;  %v1457_v28 = vld [vmem:[%s1816_s13 + $0x160] ss:$8 sps:$4 sm:$0xff]   ;;  %v1460_v30 = vld [vmem:[%s1816_s13 + $0x174] ss:$8 sps:$4 sm:$0xff]  }
  0x58   : > { %1009 = vmatpush1.bf16.msra.mxu0 %v1432_v11  ;;  %v1462_v31 = vld [vmem:[%s1816_s13 + $0x70] ss:$8 sps:$4 sm:$0xff]   ;;  %v1464_v33 = vld [vmem:[%s1816_s13 + $0x84] ss:$8 sps:$4 sm:$0xff]   ;;  %v1468_v35 = vld [vmem:[%s1816_s13 + $0x80] ss:$8 sps:$4 sm:$0xff]  }
  0x59   : > { %1050 = vmatpush1.bf16.msra.mxu1 %v1433_v12  ;;  %1010 = vmatprep.subr.bf16.mxu0 %v1434_v13  ;;  %v1463_v32 = vld [vmem:[%s1816_s13 + $0x170] ss:$8 sps:$4 sm:$0xff]   ;;  %v1466_v34 = vld [vmem:[%s1816_s13 + $0x184] ss:$8 sps:$4 sm:$0xff]   ;;  %v1469_v36 = vld [vmem:[%s1816_s13 + $0x180] ss:$8 sps:$4 sm:$0xff]  }
  0x5a   : > { %1051 = vmatprep.subr.bf16.mxu1 %v1436_v14  ;;  %v1470_v37 = vld [vmem:[%s1816_s13 + $0x94] ss:$8 sps:$4 sm:$0xff]   ;;  %v1474_v39 = vld [vmem:[%s1816_s13 + $0x90] ss:$8 sps:$4 sm:$0xff]   ;;  %v1476_v41 = vld [vmem:[%s1816_s13 + $0xa4] ss:$8 sps:$4 sm:$0xff]  }
  0x5b   : > { %v1472_v38 = vld [vmem:[%s1816_s13 + $0x194] ss:$8 sps:$4 sm:$0xff]   ;;  %v1475_v40 = vld [vmem:[%s1816_s13 + $0x190] ss:$8 sps:$4 sm:$0xff]   ;;  %v1478_v42 = vld [vmem:[%s1816_s13 + $0x1a4] ss:$8 sps:$4 sm:$0xff]  }
  0x5c   : > { %1011 = vmatpush1.bf16.msra.mxu0 %v1438_v15  ;;  %v1480_v43 = vld [vmem:[%s1816_s13 + $0xa0] ss:$8 sps:$4 sm:$0xff]   ;;  %v1482_v45 = vld [vmem:[%s1816_s13 + $0xb4] ss:$8 sps:$4 sm:$0xff]   ;;  %v1486_v50 = vld [vmem:[%s1816_s13 + $0xb0] ss:$8 sps:$4 sm:$0xff]  }
  0x5d   : > { %1052 = vmatpush1.bf16.msra.mxu1 %v1439_v16  ;;  %1012 = vmatprep.subr.bf16.mxu0 %v1440_v17  ;;  %v1481_v44 = vld [vmem:[%s1816_s13 + $0x1a0] ss:$8 sps:$4 sm:$0xff]   ;;  %v1484_v46 = vld [vmem:[%s1816_s13 + $0x1b4] ss:$8 sps:$4 sm:$0xff]   ;;  %v1487_v51 = vld [vmem:[%s1816_s13 + $0x1b0] ss:$8 sps:$4 sm:$0xff]  }
  0x5e   : > { %1053 = vmatprep.subr.bf16.mxu1 %v1442_v18  ;;  %v604_v47 = vld [vmem:[%s1798_s30] sm:$0xff]  ;;  %v605_v49 = vld [vmem:[%s1798_s30 + $0x8] sm:$0xff]  ;;  %v1488_v53 = vld [vmem:[%s1816_s13 + $0xc4] ss:$8 sps:$4 sm:$0xff]   ;;  %p1353_p13 = scmp.ne.s32.totalorder %s1554_s17, 4 }
  0x5f   : > { %v1286_v48 = vcombine.high %v604_v47, %v604_v47  ;;  %v1288_v52 = vcombine.high %v605_v49, %v605_v49  ;;  %v1490_v54 = vld [vmem:[%s1816_s13 + $0x1c4] ss:$8 sps:$4 sm:$0xff]   ;;  %v1492_v55 = vld [vmem:[%s1816_s13 + $0xc0] ss:$8 sps:$4 sm:$0xff]   ;;  %v1494_v57 = vld [vmem:[%s1816_s13 + $0xd4] ss:$8 sps:$4 sm:$0xff]   ;;  %v1285_v5 = vcombine.low %v604_v47, %v604_v47  ;;  %v1287_v6 = vcombine.low %v605_v49, %v605_v49 }
  0x60   : > { %1013 = vmatpush1.bf16.msra.mxu0 %v1444_v19  ;;  %v1493_v56 = vld [vmem:[%s1816_s13 + $0x1c0] ss:$8 sps:$4 sm:$0xff]   ;;  %v1496_v58 = vld [vmem:[%s1816_s13 + $0x1d4] ss:$8 sps:$4 sm:$0xff]   ;;  %v1498_v59 = vld [vmem:[%s1816_s13 + $0xd0] ss:$8 sps:$4 sm:$0xff]  }
  0x61   : > { %1054 = vmatpush1.bf16.msra.mxu1 %v1445_v20  ;;  %1014 = vmatprep.subr.bf16.mxu0 %v1446_v21  ;;  %v1499_v60 = vld [vmem:[%s1816_s13 + $0x1d0] ss:$8 sps:$4 sm:$0xff]   ;;  %v1500_v61 = vld [vmem:[%s1816_s13 + $0xe4] ss:$8 sps:$4 sm:$0xff]   ;;  %v1504_v63 = vld [vmem:[%s1816_s13 + $0xe0] ss:$8 sps:$4 sm:$0xff]   ;;  %v1098_v21 = vlaneseq (!%p1353_p13) }
  0x62   : > { %1055 = vmatprep.subr.bf16.mxu1 %v1448_v22  ;;  %1036 = vmatprep.mubr.bf16.mxu0 %v1286_v48  ;;  %v1502_v62 = vld [vmem:[%s1816_s13 + $0x1e4] ss:$8 sps:$4 sm:$0xff]   ;;  %v1505_v0 = vld [vmem:[%s1816_s13 + $0x1e0] ss:$8 sps:$4 sm:$0xff]   ;;  %v1506_v1 = vld [vmem:[%s1816_s13 + $0xf4] ss:$8 sps:$4 sm:$0xff]  }
  0x63   : > { %1077 = vmatprep.mubr.bf16.mxu1 %v1288_v52  ;;  %v1508_v2 = vld [vmem:[%s1816_s13 + $0x1f4] ss:$8 sps:$4 sm:$0xff]   ;;  %v1510_v3 = vld [vmem:[%s1816_s13 + $0xf0] ss:$8 sps:$4 sm:$0xff]   ;;  %v1099_v22 = vshrl.u32 (!%p1353_p13), %v1098_v21, 7 }
  0x64   : > { %1015 = vmatpush1.bf16.msra.mxu0 %v1450_v23  ;;  %v1511_v4 = vld [vmem:[%s1816_s13 + $0x1f0] ss:$8 sps:$4 sm:$0xff]  }
  0x65   : > { %1056 = vmatpush1.bf16.msra.mxu1 %v1451_v24  ;;  %1016 = vmatprep.subr.bf16.mxu0 %v1452_v25  ;;  %v602_v8 = vld [vmem:[#allocation2] sm:$0xff]  ;;  %v603_v12 = vld [vmem:[#allocation2 + $0x8] sm:$0xff]  ;;  %v1100_v25 = vsub.s32 (!%p1353_p13), 0, %v1099_v22 }
  0x66   : > { %1057 = vmatprep.subr.bf16.mxu1 %v1454_v26  ;;  %v1096_v23 = vld [vmem:[%s579_s15] sm:$0x3] (!%p1353_p13)  ;;  %v1104_v26 = vsub.s32 (!%p1353_p13), 1, %v1099_v22 }
  0x67   : > { %v1110_v24 = vld [vmem:[%s584_s18] sm:$0x3] (!%p1353_p13) }
  0x68   : > { %1017 = vmatpush1.bf16.msra.mxu0 %v1456_v27 }
  0x69   : > { %1058 = vmatpush1.bf16.msra.mxu1 %v1457_v28  ;;  %1018 = vmatprep.subr.bf16.mxu0 %v1458_v29  ;;  %v1101_v29 = vrot.slane (!%p1353_p13), %v1096_v23, %v1100_v25 }
  0x6a   : > { %1059 = vmatprep.subr.bf16.mxu1 %v1460_v30  ;;  %v1105_v30 = vrot.slane (!%p1353_p13), %v1096_v23, %v1104_v26 }
  0x6c   : > { %1019 = vmatpush1.bf16.msra.mxu0 %v1462_v31  ;;  %v1115_v31 = vrot.slane (!%p1353_p13), %v1110_v24, %v1100_v25 }
  0x6d   : > { %1060 = vmatpush1.bf16.msra.mxu1 %v1463_v32  ;;  %1020 = vmatprep.subr.bf16.mxu0 %v1464_v33  ;;  %v1119_v32 = vrot.slane (!%p1353_p13), %v1110_v24, %v1104_v26 }
  0x6e   : > { %1061 = vmatprep.subr.bf16.mxu1 %v1466_v34 }
  0x70   : > { %1021 = vmatpush1.bf16.msra.mxu0 %v1468_v35 }
  0x71   : > { %1062 = vmatpush1.bf16.msra.mxu1 %v1469_v36  ;;  %1022 = vmatprep.subr.bf16.mxu0 %v1470_v37 }
  0x72   : > { %1063 = vmatprep.subr.bf16.mxu1 %v1472_v38 }
  0x74   : > { %1023 = vmatpush1.bf16.msra.mxu0 %v1474_v39 }
  0x75   : > { %1064 = vmatpush1.bf16.msra.mxu1 %v1475_v40  ;;  %1024 = vmatprep.subr.bf16.mxu0 %v1476_v41 }
  0x76   : > { %1065 = vmatprep.subr.bf16.mxu1 %v1478_v42 }
  0x78   : > { %1025 = vmatpush1.bf16.msra.mxu0 %v1480_v43 }
  0x79   : > { %1066 = vmatpush1.bf16.msra.mxu1 %v1481_v44  ;;  %1026 = vmatprep.subr.bf16.mxu0 %v1482_v45 }
  0x7a   : > { %1067 = vmatprep.subr.bf16.mxu1 %v1484_v46 }
  0x7c   : > { %1027 = vmatpush1.bf16.msra.mxu0 %v1486_v50 }
  0x7d   : > { %1068 = vmatpush1.bf16.msra.mxu1 %v1487_v51  ;;  %1028 = vmatprep.subr.bf16.mxu0 %v1488_v53 }
  0x7e   : > { %1069 = vmatprep.subr.bf16.mxu1 %v1490_v54 }
  0x80   : > { %1029 = vmatpush1.bf16.msra.mxu0 %v1492_v55 }
  0x81   : > { %1070 = vmatpush1.bf16.msra.mxu1 %v1493_v56  ;;  %1030 = vmatprep.subr.bf16.mxu0 %v1494_v57 }
  0x82   : > { %1071 = vmatprep.subr.bf16.mxu1 %v1496_v58 }
  0x84   : > { %1031 = vmatpush1.bf16.msra.mxu0 %v1498_v59 }
  0x85   : > { %1072 = vmatpush1.bf16.msra.mxu1 %v1499_v60  ;;  %1032 = vmatprep.subr.bf16.mxu0 %v1500_v61 }
  0x86   : > { %1073 = vmatprep.subr.bf16.mxu1 %v1502_v62 }
  0x88   : > { %1033 = vmatpush1.bf16.msra.mxu0 %v1504_v63 }
  0x89   : > { %1074 = vmatpush1.bf16.msra.mxu1 %v1505_v0  ;;  %1034 = vmatprep.subr.bf16.mxu0 %v1506_v1 }
  0x8a   : > { %1075 = vmatprep.subr.bf16.mxu1 %v1508_v2 }
  0x8c   : > { %1035 = vmatpush1.bf16.msra.mxu0 %v1510_v3 }
  0x8d   : > { %1076 = vmatpush1.bf16.msra.mxu1 %v1511_v4 }
  0x8f   : > { %1037 = vmatmul.mubr.bf16.vlgmr.msra.gmra.mrb[0].mxu0 %v1285_v5 }
  0x90   : > { %1078 = vmatmul.mubr.bf16.vlgmr.msra.gmra.mrb[0].mxu1 %v1287_v6 }
 0x162   : > { %v1038_v7 = vpop.f32.mrb[0].mxu0 }
 0x163   : > { %v1079_v9 = vpop.f32.mrb[0].mxu1  ;;  %v1040_v11 = vpop.f32.mrb[1].mxu0  ;;  %1093 = sbr.rel (%p1353_p13) target bundleno = 378 (0x17a), region = 82 }
 0x164   : > { %v1080_v10 = vadd.f32 %v1079_v9, %v1038_v7  ;;  %v1081_v13 = vpop.f32.mrb[1].mxu1  ;;  %v1042_v15 = vpop.f32.mrb[2].mxu0 }
 0x165   : > { %v1082_v14 = vadd.f32 %v1081_v13, %v1040_v11  ;;  %v1083_v16 = vpop.f32.mrb[2].mxu1  ;;  %v1043_v18 = vpop.f32.mrb[3].mxu0 }
 0x166   : > { %v1086_v17 = vadd.f32 %v1080_v10, %v602_v8  ;;  %v1084_v19 = vpop.f32.mrb[3].mxu1 }
 0x167   : > { %v1087_v20 = vadd.f32 %v1082_v14, %v603_v12 }
 0x168   : > { %1088 = vst [vmem:[#allocation2] sm:$0xff] %v1086_v17 }
 0x169   : > { %1089 = vst [vmem:[#allocation2 + $0x8] sm:$0xff] %v1087_v20 }
 0x16f   : > { %v1094_v27 = vld [vmem:[#allocation2] sm:$0xff] }
 0x170   : > { %v1095_v28 = vld [vmem:[#allocation2 + $0x8] sm:$0xff]  ;;  %v1108_v33 = vmul.f32 %v1101_v29, %v1094_v27 }
 0x171   : > { %v1109_v34 = vmul.f32 %v1105_v30, %v1095_v28 }
 0x172   : > { %v1122_v35 = vadd.f32 %v1115_v31, %v1108_v33 }
 0x173   : > { %v1123_v36 = vadd.f32 %v1119_v32, %v1109_v34 }
 0x174   : > { %v1124_v37 = vmax.f32 %v1122_v35, 0.0 }
 0x175   : > { %v1125_v38 = vmax.f32 %v1123_v36, 0.0 }
 0x177   : > { %v1358_v39 = vpack.c.bf16 %v1125_v38, %v1124_v37 }
 0x179   : > { %1134 = vst [vmem:[%s1814_s12] sm:$0xff] %v1358_v39 }
 0x17a PF: > { %s14_s21 = sadd.s32 1, %s1570_s21   ;;  %s1923_s15 = smov %s1550_s16 }
 0x17b   : > { %p11_p0 = scmp.ge.s32.totalorder %s14_s21, 12   ;;  %s1924_s16 = smov %s1649_s28 }
 0x17c   : > { %s1925_s17 = smov %s1562_s19  ;;  %s1926_s18 = smov %s1566_s20 }
 0x17d   : > { %s1927_s19 = smov %s1930_s22  ;;  %s1928_s20 = smov %s1934_s23 }
 0x17e   :  { %13 = sbr.rel (!%p11_p0) target bundleno = 4 (0x4), region = 126 }

// kernel: resnet_forward.41
= control target key start
LH: loop header
LB: loop body
LE: loop exit
PB: predicated region body
PF: predicated region fallthrough
CT: control target
= control target key end

     0   :  { %s1691_s18 = smov 0   ;;  %s1693_s19 = smov 0   ;;  %s2017_s0 = inlined_call_operand.vmem [shape: bf16[8,4608], index: 0, kind: input, shape index: {}]   ;;  %s2018_s1 = inlined_call_operand.vmem [shape: bf16[4608,512], index: 1, kind: input, shape index: {}]   ;;  %s2019_s2 = inlined_call_operand.vmem [shape: f32[1,512], index: 2, kind: input, shape index: {}]   ;;  %s2020_s3 = inlined_call_operand.vmem [shape: f32[1,512], index: 3, kind: input, shape index: {}]   ;;  %s2021_s4 = inlined_call_operand.vmem [shape: bf16[8,512], index: 4, kind: input, shape index: {}]   ;;  %s2022_s5 = inlined_call_operand.vmem [shape: bf16[8,512], index: 5, kind: output, shape index: {}]  }
   0x1   :  { %s1695_s20 = smov 0   ;;  %s1697_s21 = smov 0  }
   0x2   :  { %s1699_s22 = smov 0   ;;  %s1701_s23 = smov 0  }
   0x3   :  { %s1703_s24 = smov 0  }
   0x4 LB: > { %s27_s25 = sadd.s32 1, %s1650_s22  ;;  %s30_s26 = sadd.s32 1, %s1654_s23  ;;  %s1658_s24 = sphi %s1703_s24, %s15_s24   ;;  %s1654_s23 = sphi %s1701_s23, %s2028_s23   ;;  %s1650_s22 = sphi %s1699_s22, %s2027_s22   ;;  %s1646_s21 = sphi %s1697_s21, %s2026_s21   ;;  %s1642_s20 = sphi %s1695_s20, %s2025_s20   ;;  %s1638_s19 = sphi %s1693_s19, %s2024_s19   ;;  %s1634_s18 = sphi %s1691_s18, %s2023_s18  }
   0x5   : > { %p28_p0 = scmp.ge.s32.totalorder %s27_s25, 9  ;;  %p78_p1 = scmp.ne.s32.totalorder %s1638_s19, %s1634_s18 }
   0x6   : > { %p79_p2 = scmp.eq.s32.totalorder %s1658_s24, 0  ;;  %s71_s30 = sadd.s32 1, %s1638_s19 }
   0x7   : > { %s2030_s25 = smov (%p28_p0, %s27_s25), 0  ;;  %s2032_s26 = smov (!%p28_p0, %s30_s26), %s1654_s23 }
   0x8   : > { %p80_p3 = por %p79_p2, %p78_p1  ;;  %p32_p4 = scmp.ge.s32.totalorder %s2032_s26, 2 }
   0x9   : > { %s66_s27 = ssub.s32 %s1650_s22, %s2030_s25  ;;  %p1356_p6 = scmp.ge.s32.totalorder %s1658_s24, 18 }
   0xa   : > { %s2034_s26 = smov (%p32_p4, %s2032_s26), 0 }
   0xb   : > { %s67_s28 = ssub.s32 %s1654_s23, %s2034_s26  ;;  %212 = sbr.rel (%p1356_p6) target bundleno = 57 (0x39), region = 16 }
   0xc   : > { %s68_s29 = sor.u32 %s67_s28, %s66_s27 }
   0xd   : > { %p69_p5 = scmp.eq.s32.totalorder %s68_s29, 0 }
   0xf   : > { %s1742_s6 = scalar_select %p69_p5, %s1638_s19, %s71_s30  }
  0x12   : > { %228 = sbr.rel (!%p80_p3) target bundleno = 57 (0x39), region = 24  ;;  %s230_s7 = sand.u32 (%p80_p3), 1, %s1638_s19  }
  0x13   : > { %s1359_s8 = sshll.u32 (%p80_p3), %s1654_s23, 1  ;;  %s1357_s9 = sshll.u32 (%p80_p3), %s230_s7, 9 }
  0x14   : > { %s1445_s10 = sshll.u32 (%p80_p3), %s1650_s22, 8  ;;  %s1756_s16 = scalar_lea.vmem (%p80_p3), [#allocation3], %s1357_s9 }
  0x15   : > { %s236_s11 = sadd.s32 (%p80_p3), %s1445_s10, %s1359_s8 }
  0x16   : > { %s1361_s12 = sshll.u32 (%p80_p3), %s236_s11, 2 }
  0x17   : > { %s1751_s15 = scalar_lea.vmem (%p80_p3), %s2018_s1, %s1361_s12 }
  0x18   : > { %v392_v0 = vld [vmem:[%s1751_s15] sm:$0xff] (%p80_p3)  ;;  %v394_v1 = vld [vmem:[%s1751_s15 + $0x10] sm:$0xff] (%p80_p3) }
  0x19   : > { %v396_v2 = vld [vmem:[%s1751_s15 + $0x20] sm:$0xff]  ;;  %393 = vst [vmem:[%s1756_s16] sm:$0xff] %v392_v0  ;;  %395 = vst [vmem:[%s1756_s16 + $0x8] sm:$0xff] %v394_v1  ;;  %v398_v3 = vld [vmem:[%s1751_s15 + $0x30] sm:$0xff] }
  0x1a   : > { %397 = vst [vmem:[%s1756_s16 + $0x10] sm:$0xff] %v396_v2  ;;  %v400_v4 = vld [vmem:[%s1751_s15 + $0x40] sm:$0xff]  ;;  %v402_v5 = vld [vmem:[%s1751_s15 + $0x50] sm:$0xff]  ;;  %399 = vst [vmem:[%s1756_s16 + $0x18] sm:$0xff] %v398_v3 }
  0x1b   : > { %401 = vst [vmem:[%s1756_s16 + $0x20] sm:$0xff] %v400_v4  ;;  %403 = vst [vmem:[%s1756_s16 + $0x28] sm:$0xff] %v402_v5  ;;  %v404_v6 = vld [vmem:[%s1751_s15 + $0x60] sm:$0xff]  ;;  %v406_v7 = vld [vmem:[%s1751_s15 + $0x70] sm:$0xff] }
  0x1c   : > { %v408_v8 = vld [vmem:[%s1751_s15 + $0x80] sm:$0xff]  ;;  %405 = vst [vmem:[%s1756_s16 + $0x30] sm:$0xff] %v404_v6  ;;  %407 = vst [vmem:[%s1756_s16 + $0x38] sm:$0xff] %v406_v7  ;;  %v410_v9 = vld [vmem:[%s1751_s15 + $0x90] sm:$0xff] }
  0x1d   : > { %409 = vst [vmem:[%s1756_s16 + $0x40] sm:$0xff] %v408_v8  ;;  %v412_v10 = vld [vmem:[%s1751_s15 + $0xa0] sm:$0xff]  ;;  %v414_v11 = vld [vmem:[%s1751_s15 + $0xb0] sm:$0xff]  ;;  %411 = vst [vmem:[%s1756_s16 + $0x48] sm:$0xff] %v410_v9 }
  0x1e   : > { %413 = vst [vmem:[%s1756_s16 + $0x50] sm:$0xff] %v412_v10  ;;  %415 = vst [vmem:[%s1756_s16 + $0x58] sm:$0xff] %v414_v11  ;;  %v416_v12 = vld [vmem:[%s1751_s15 + $0xc0] sm:$0xff]  ;;  %v418_v13 = vld [vmem:[%s1751_s15 + $0xd0] sm:$0xff] }
  0x1f   : > { %v420_v14 = vld [vmem:[%s1751_s15 + $0xe0] sm:$0xff]  ;;  %417 = vst [vmem:[%s1756_s16 + $0x60] sm:$0xff] %v416_v12  ;;  %419 = vst [vmem:[%s1756_s16 + $0x68] sm:$0xff] %v418_v13  ;;  %v422_v15 = vld [vmem:[%s1751_s15 + $0xf0] sm:$0xff] }
  0x20   : > { %421 = vst [vmem:[%s1756_s16 + $0x70] sm:$0xff] %v420_v14  ;;  %v424_v16 = vld [vmem:[%s1751_s15 + $0x100] sm:$0xff]  ;;  %v426_v17 = vld [vmem:[%s1751_s15 + $0x110] sm:$0xff]  ;;  %423 = vst [vmem:[%s1756_s16 + $0x78] sm:$0xff] %v422_v15 }
  0x21   : > { %425 = vst [vmem:[%s1756_s16 + $0x80] sm:$0xff] %v424_v16  ;;  %427 = vst [vmem:[%s1756_s16 + $0x88] sm:$0xff] %v426_v17  ;;  %v428_v18 = vld [vmem:[%s1751_s15 + $0x120] sm:$0xff]  ;;  %v430_v19 = vld [vmem:[%s1751_s15 + $0x130] sm:$0xff] }
  0x22   : > { %v432_v20 = vld [vmem:[%s1751_s15 + $0x140] sm:$0xff]  ;;  %429 = vst [vmem:[%s1756_s16 + $0x90] sm:$0xff] %v428_v18  ;;  %431 = vst [vmem:[%s1756_s16 + $0x98] sm:$0xff] %v430_v19  ;;  %v434_v21 = vld [vmem:[%s1751_s15 + $0x150] sm:$0xff] }
  0x23   : > { %433 = vst [vmem:[%s1756_s16 + $0xa0] sm:$0xff] %v432_v20  ;;  %v436_v22 = vld [vmem:[%s1751_s15 + $0x160] sm:$0xff]  ;;  %v438_v23 = vld [vmem:[%s1751_s15 + $0x170] sm:$0xff]  ;;  %435 = vst [vmem:[%s1756_s16 + $0xa8] sm:$0xff] %v434_v21 }
  0x24   : > { %437 = vst [vmem:[%s1756_s16 + $0xb0] sm:$0xff] %v436_v22  ;;  %439 = vst [vmem:[%s1756_s16 + $0xb8] sm:$0xff] %v438_v23  ;;  %v440_v24 = vld [vmem:[%s1751_s15 + $0x180] sm:$0xff]  ;;  %v442_v25 = vld [vmem:[%s1751_s15 + $0x190] sm:$0xff] }
  0x25   : > { %v444_v26 = vld [vmem:[%s1751_s15 + $0x1a0] sm:$0xff]  ;;  %441 = vst [vmem:[%s1756_s16 + $0xc0] sm:$0xff] %v440_v24  ;;  %443 = vst [vmem:[%s1756_s16 + $0xc8] sm:$0xff] %v442_v25  ;;  %v446_v27 = vld [vmem:[%s1751_s15 + $0x1b0] sm:$0xff] }
  0x26   : > { %445 = vst [vmem:[%s1756_s16 + $0xd0] sm:$0xff] %v444_v26  ;;  %v448_v28 = vld [vmem:[%s1751_s15 + $0x1c0] sm:$0xff]  ;;  %v450_v29 = vld [vmem:[%s1751_s15 + $0x1d0] sm:$0xff]  ;;  %447 = vst [vmem:[%s1756_s16 + $0xd8] sm:$0xff] %v446_v27 }
  0x27   : > { %449 = vst [vmem:[%s1756_s16 + $0xe0] sm:$0xff] %v448_v28  ;;  %451 = vst [vmem:[%s1756_s16 + $0xe8] sm:$0xff] %v450_v29  ;;  %v452_v30 = vld [vmem:[%s1751_s15 + $0x1e0] sm:$0xff]  ;;  %v454_v31 = vld [vmem:[%s1751_s15 + $0x1f0] sm:$0xff] }
  0x28   : > { %v456_v32 = vld [vmem:[%s1751_s15 + $0x200] sm:$0xff]  ;;  %453 = vst [vmem:[%s1756_s16 + $0xf0] sm:$0xff] %v452_v30  ;;  %455 = vst [vmem:[%s1756_s16 + $0xf8] sm:$0xff] %v454_v31  ;;  %v458_v33 = vld [vmem:[%s1751_s15 + $0x210] sm:$0xff] }
  0x29   : > { %457 = vst [vmem:[%s1756_s16 + $0x100] sm:$0xff] %v456_v32  ;;  %v460_v34 = vld [vmem:[%s1751_s15 + $0x220] sm:$0xff]  ;;  %v462_v35 = vld [vmem:[%s1751_s15 + $0x230] sm:$0xff]  ;;  %459 = vst [vmem:[%s1756_s16 + $0x108] sm:$0xff] %v458_v33 }
  0x2a   : > { %461 = vst [vmem:[%s1756_s16 + $0x110] sm:$0xff] %v460_v34  ;;  %463 = vst [vmem:[%s1756_s16 + $0x118] sm:$0xff] %v462_v35  ;;  %v464_v36 = vld [vmem:[%s1751_s15 + $0x240] sm:$0xff]  ;;  %v466_v37 = vld [vmem:[%s1751_s15 + $0x250] sm:$0xff] }
  0x2b   : > { %v468_v38 = vld [vmem:[%s1751_s15 + $0x260] sm:$0xff]  ;;  %465 = vst [vmem:[%s1756_s16 + $0x120] sm:$0xff] %v464_v36  ;;  %467 = vst [vmem:[%s1756_s16 + $0x128] sm:$0xff] %v466_v37  ;;  %v470_v39 = vld [vmem:[%s1751_s15 + $0x270] sm:$0xff] }
  0x2c   : > { %469 = vst [vmem:[%s1756_s16 + $0x130] sm:$0xff] %v468_v38  ;;  %v472_v40 = vld [vmem:[%s1751_s15 + $0x280] sm:$0xff]  ;;  %v474_v41 = vld [vmem:[%s1751_s15 + $0x290] sm:$0xff]  ;;  %471 = vst [vmem:[%s1756_s16 + $0x138] sm:$0xff] %v470_v39 }
  0x2d   : > { %473 = vst [vmem:[%s1756_s16 + $0x140] sm:$0xff] %v472_v40  ;;  %475 = vst [vmem:[%s1756_s16 + $0x148] sm:$0xff] %v474_v41  ;;  %v476_v42 = vld [vmem:[%s1751_s15 + $0x2a0] sm:$0xff]  ;;  %v478_v43 = vld [vmem:[%s1751_s15 + $0x2b0] sm:$0xff] }
  0x2e   : > { %v480_v44 = vld [vmem:[%s1751_s15 + $0x2c0] sm:$0xff]  ;;  %477 = vst [vmem:[%s1756_s16 + $0x150] sm:$0xff] %v476_v42  ;;  %479 = vst [vmem:[%s1756_s16 + $0x158] sm:$0xff] %v478_v43  ;;  %v482_v45 = vld [vmem:[%s1751_s15 + $0x2d0] sm:$0xff] }
  0x2f   : > { %481 = vst [vmem:[%s1756_s16 + $0x160] sm:$0xff] %v480_v44  ;;  %v484_v46 = vld [vmem:[%s1751_s15 + $0x2e0] sm:$0xff]  ;;  %v486_v47 = vld [vmem:[%s1751_s15 + $0x2f0] sm:$0xff]  ;;  %483 = vst [vmem:[%s1756_s16 + $0x168] sm:$0xff] %v482_v45 }
  0x30   : > { %485 = vst [vmem:[%s1756_s16 + $0x170] sm:$0xff] %v484_v46  ;;  %487 = vst [vmem:[%s1756_s16 + $0x178] sm:$0xff] %v486_v47  ;;  %v488_v48 = vld [vmem:[%s1751_s15 + $0x300] sm:$0xff]  ;;  %v490_v49 = vld [vmem:[%s1751_s15 + $0x310] sm:$0xff] }
  0x31   : > { %v492_v50 = vld [vmem:[%s1751_s15 + $0x320] sm:$0xff]  ;;  %489 = vst [vmem:[%s1756_s16 + $0x180] sm:$0xff] %v488_v48  ;;  %491 = vst [vmem:[%s1756_s16 + $0x188] sm:$0xff] %v490_v49  ;;  %v494_v51 = vld [vmem:[%s1751_s15 + $0x330] sm:$0xff] }
  0x32   : > { %493 = vst [vmem:[%s1756_s16 + $0x190] sm:$0xff] %v492_v50  ;;  %v496_v52 = vld [vmem:[%s1751_s15 + $0x340] sm:$0xff]  ;;  %v498_v53 = vld [vmem:[%s1751_s15 + $0x350] sm:$0xff]  ;;  %495 = vst [vmem:[%s1756_s16 + $0x198] sm:$0xff] %v494_v51 }
  0x33   : > { %497 = vst [vmem:[%s1756_s16 + $0x1a0] sm:$0xff] %v496_v52  ;;  %499 = vst [vmem:[%s1756_s16 + $0x1a8] sm:$0xff] %v498_v53  ;;  %v500_v54 = vld [vmem:[%s1751_s15 + $0x360] sm:$0xff]  ;;  %v502_v55 = vld [vmem:[%s1751_s15 + $0x370] sm:$0xff] }
  0x34   : > { %v504_v56 = vld [vmem:[%s1751_s15 + $0x380] sm:$0xff]  ;;  %501 = vst [vmem:[%s1756_s16 + $0x1b0] sm:$0xff] %v500_v54  ;;  %503 = vst [vmem:[%s1756_s16 + $0x1b8] sm:$0xff] %v502_v55  ;;  %v506_v57 = vld [vmem:[%s1751_s15 + $0x390] sm:$0xff] }
  0x35   : > { %505 = vst [vmem:[%s1756_s16 + $0x1c0] sm:$0xff] %v504_v56  ;;  %v508_v58 = vld [vmem:[%s1751_s15 + $0x3a0] sm:$0xff]  ;;  %v510_v59 = vld [vmem:[%s1751_s15 + $0x3b0] sm:$0xff]  ;;  %507 = vst [vmem:[%s1756_s16 + $0x1c8] sm:$0xff] %v506_v57 }
  0x36   : > { %509 = vst [vmem:[%s1756_s16 + $0x1d0] sm:$0xff] %v508_v58  ;;  %511 = vst [vmem:[%s1756_s16 + $0x1d8] sm:$0xff] %v510_v59  ;;  %v512_v60 = vld [vmem:[%s1751_s15 + $0x3c0] sm:$0xff]  ;;  %v514_v61 = vld [vmem:[%s1751_s15 + $0x3d0] sm:$0xff] }
  0x37   : > { %v516_v62 = vld [vmem:[%s1751_s15 + $0x3e0] sm:$0xff]  ;;  %513 = vst [vmem:[%s1756_s16 + $0x1e0] sm:$0xff] %v512_v60  ;;  %515 = vst [vmem:[%s1756_s16 + $0x1e8] sm:$0xff] %v514_v61  ;;  %v518_v63 = vld [vmem:[%s1751_s15 + $0x3f0] sm:$0xff] }
  0x38   : > { %517 = vst [vmem:[%s1756_s16 + $0x1f0] sm:$0xff] %v516_v62  ;;  %519 = vst [vmem:[%s1756_s16 + $0x1f8] sm:$0xff] %v518_v63 }
  0x39 PF: > { %p1362_p7 = scmp.ge.s32.totalorder %s1658_s24, 1  ;;  %p553_p8 = scmp.lt.s32.totalorder %s1658_s24, 19 }
  0x3b   : > { %p554_p9 = pnand %p1362_p7, %p553_p8 }
  0x3c   : > { %s560_s17 = sand.u32 (!%p554_p9), 1, %s1634_s18   ;;  %s1364_s27 = sshll.u32 (!%p554_p9), %s1642_s20, 2 }
  0x3d   : > { %557 = sbr.rel (%p554_p9) target bundleno = 380 (0x17c), region = 74  ;;  %s1363_s28 = sshll.u32 (!%p554_p9), %s560_s17, 9 }
  0x3e   : > { %p620_p10 = scmp.lt.s32.totalorder (!%p554_p9), %s1364_s27, 35  ;;  %s1366_s29 = sshll.u32 (!%p554_p9), %s1646_s21, 1 }
  0x3f   : > { %p630_p11 = scmp.lt.s32.totalorder (!%p554_p9), %s1366_s29, 3  ;;  %s1914_s8 = scalar_lea.vmem (!%p554_p9), [#allocation3], %s1363_s28 }
  0x40   : > { %p1372_p12 = scmp.ne.s32.totalorder (!%p554_p9), %s1642_s20, 0 }
  0x44   : > { %s2036_s27 = smov (!%p620_p10, %s1364_s27), 35  ;;  %s2038_s29 = smov (!%p630_p11, %s1366_s29), 3 }
  0x45   : > { %s1365_s30 = sshll.u32 %s2036_s27, 2  ;;  %s632_s18 = scalar_lea.vmem %s2019_s2, %s2038_s29  ;;  %v1660_v0 = vmov (!%p1372_p12), 0.0  }
  0x46   : > { %s1891_s9 = scalar_lea.vmem %s2017_s0, %s1365_s30  ;;  %s637_s21 = scalar_lea.vmem %s2020_s3, %s2038_s29  ;;  %663 = vst [vmem:[#allocation2] sm:$0xff] (!%p1372_p12), %v1660_v0  ;;  %664 = vst [vmem:[#allocation2 + $0x8] sm:$0xff] (!%p1372_p12), %v1660_v0 }
  0x47   : > { %s1369_s14 = sshll.u32 %s2038_s29, 2  ;;  %662 = sbr.rel (%p1372_p12) target bundleno = 78 (0x4e), region = 82 }
  0x48   : > { %s1907_s17 = scalar_lea.vmem %s2021_s4, %s1369_s14  ;;  %s1912_s7 = scalar_lea.vmem %s2022_s5, %s1369_s14 }
  0x4e PF: > { %v1504_v1 = vld [vmem:[%s1914_s8 + $0x4] ss:$8 sps:$4 sm:$0xff]   ;;  %v1508_v3 = vld [vmem:[%s1914_s8] ss:$8 sps:$4 sm:$0xff]   ;;  %v1510_v5 = vld [vmem:[%s1914_s8 + $0x14] ss:$8 sps:$4 sm:$0xff]  }
  0x4f   : > { %v1506_v2 = vld [vmem:[%s1914_s8 + $0x104] ss:$8 sps:$4 sm:$0xff]   ;;  %1067 = vmatprep.subr.bf16.mxu0 %v1504_v1  ;;  %v1509_v4 = vld [vmem:[%s1914_s8 + $0x100] ss:$8 sps:$4 sm:$0xff]   ;;  %v1512_v6 = vld [vmem:[%s1914_s8 + $0x114] ss:$8 sps:$4 sm:$0xff]  }
  0x50   : > { %1108 = vmatprep.subr.bf16.mxu1 %v1506_v2  ;;  %1068 = vmatpush1.bf16.msra.mxu0 %v1508_v3  ;;  %v1514_v7 = vld [vmem:[%s1914_s8 + $0x10] ss:$8 sps:$4 sm:$0xff]   ;;  %v1516_v9 = vld [vmem:[%s1914_s8 + $0x24] ss:$8 sps:$4 sm:$0xff]   ;;  %v1520_v11 = vld [vmem:[%s1914_s8 + $0x20] ss:$8 sps:$4 sm:$0xff]  }
  0x51   : > { %1109 = vmatpush1.bf16.msra.mxu1 %v1509_v4  ;;  %1069 = vmatprep.subr.bf16.mxu0 %v1510_v5  ;;  %v1515_v8 = vld [vmem:[%s1914_s8 + $0x110] ss:$8 sps:$4 sm:$0xff]   ;;  %v1518_v10 = vld [vmem:[%s1914_s8 + $0x124] ss:$8 sps:$4 sm:$0xff]   ;;  %v1521_v12 = vld [vmem:[%s1914_s8 + $0x120] ss:$8 sps:$4 sm:$0xff]  }
  0x52   : > { %1110 = vmatprep.subr.bf16.mxu1 %v1512_v6  ;;  %v1522_v13 = vld [vmem:[%s1914_s8 + $0x34] ss:$8 sps:$4 sm:$0xff]   ;;  %v1526_v15 = vld [vmem:[%s1914_s8 + $0x30] ss:$8 sps:$4 sm:$0xff]   ;;  %v1528_v17 = vld [vmem:[%s1914_s8 + $0x44] ss:$8 sps:$4 sm:$0xff]  }
  0x53   : > { %v1524_v14 = vld [vmem:[%s1914_s8 + $0x134] ss:$8 sps:$4 sm:$0xff]   ;;  %v1527_v16 = vld [vmem:[%s1914_s8 + $0x130] ss:$8 sps:$4 sm:$0xff]   ;;  %v1530_v18 = vld [vmem:[%s1914_s8 + $0x144] ss:$8 sps:$4 sm:$0xff]  }
  0x54   : > { %1070 = vmatpush1.bf16.msra.mxu0 %v1514_v7  ;;  %v1532_v19 = vld [vmem:[%s1914_s8 + $0x40] ss:$8 sps:$4 sm:$0xff]   ;;  %v1534_v21 = vld [vmem:[%s1914_s8 + $0x54] ss:$8 sps:$4 sm:$0xff]   ;;  %v1538_v23 = vld [vmem:[%s1914_s8 + $0x50] ss:$8 sps:$4 sm:$0xff]  }
  0x55   : > { %1111 = vmatpush1.bf16.msra.mxu1 %v1515_v8  ;;  %1071 = vmatprep.subr.bf16.mxu0 %v1516_v9  ;;  %v1533_v20 = vld [vmem:[%s1914_s8 + $0x140] ss:$8 sps:$4 sm:$0xff]   ;;  %v1536_v22 = vld [vmem:[%s1914_s8 + $0x154] ss:$8 sps:$4 sm:$0xff]   ;;  %v1539_v24 = vld [vmem:[%s1914_s8 + $0x150] ss:$8 sps:$4 sm:$0xff]  }
  0x56   : > { %1112 = vmatprep.subr.bf16.mxu1 %v1518_v10  ;;  %v1540_v25 = vld [vmem:[%s1914_s8 + $0x64] ss:$8 sps:$4 sm:$0xff]   ;;  %v1544_v27 = vld [vmem:[%s1914_s8 + $0x60] ss:$8 sps:$4 sm:$0xff]   ;;  %v1546_v29 = vld [vmem:[%s1914_s8 + $0x74] ss:$8 sps:$4 sm:$0xff]  }
  0x57   : > { %v1542_v26 = vld [vmem:[%s1914_s8 + $0x164] ss:$8 sps:$4 sm:$0xff]   ;;  %v1545_v28 = vld [vmem:[%s1914_s8 + $0x160] ss:$8 sps:$4 sm:$0xff]   ;;  %v1548_v30 = vld [vmem:[%s1914_s8 + $0x174] ss:$8 sps:$4 sm:$0xff]  }
  0x58   : > { %1072 = vmatpush1.bf16.msra.mxu0 %v1520_v11  ;;  %v1550_v31 = vld [vmem:[%s1914_s8 + $0x70] ss:$8 sps:$4 sm:$0xff]   ;;  %v1552_v33 = vld [vmem:[%s1914_s8 + $0x84] ss:$8 sps:$4 sm:$0xff]   ;;  %v1556_v35 = vld [vmem:[%s1914_s8 + $0x80] ss:$8 sps:$4 sm:$0xff]  }
  0x59   : > { %1113 = vmatpush1.bf16.msra.mxu1 %v1521_v12  ;;  %1073 = vmatprep.subr.bf16.mxu0 %v1522_v13  ;;  %v1551_v32 = vld [vmem:[%s1914_s8 + $0x170] ss:$8 sps:$4 sm:$0xff]   ;;  %v1554_v34 = vld [vmem:[%s1914_s8 + $0x184] ss:$8 sps:$4 sm:$0xff]   ;;  %v1557_v36 = vld [vmem:[%s1914_s8 + $0x180] ss:$8 sps:$4 sm:$0xff]  }
  0x5a   : > { %1114 = vmatprep.subr.bf16.mxu1 %v1524_v14  ;;  %v1558_v37 = vld [vmem:[%s1914_s8 + $0x94] ss:$8 sps:$4 sm:$0xff]   ;;  %v1562_v39 = vld [vmem:[%s1914_s8 + $0x90] ss:$8 sps:$4 sm:$0xff]   ;;  %v1564_v41 = vld [vmem:[%s1914_s8 + $0xa4] ss:$8 sps:$4 sm:$0xff]  }
  0x5b   : > { %v1560_v38 = vld [vmem:[%s1914_s8 + $0x194] ss:$8 sps:$4 sm:$0xff]   ;;  %v1563_v40 = vld [vmem:[%s1914_s8 + $0x190] ss:$8 sps:$4 sm:$0xff]   ;;  %v1566_v42 = vld [vmem:[%s1914_s8 + $0x1a4] ss:$8 sps:$4 sm:$0xff]  }
  0x5c   : > { %1074 = vmatpush1.bf16.msra.mxu0 %v1526_v15  ;;  %v1568_v43 = vld [vmem:[%s1914_s8 + $0xa0] ss:$8 sps:$4 sm:$0xff]   ;;  %v1570_v45 = vld [vmem:[%s1914_s8 + $0xb4] ss:$8 sps:$4 sm:$0xff]   ;;  %v1574_v50 = vld [vmem:[%s1914_s8 + $0xb0] ss:$8 sps:$4 sm:$0xff]  }
  0x5d   : > { %1115 = vmatpush1.bf16.msra.mxu1 %v1527_v16  ;;  %1075 = vmatprep.subr.bf16.mxu0 %v1528_v17  ;;  %v1569_v44 = vld [vmem:[%s1914_s8 + $0x1a0] ss:$8 sps:$4 sm:$0xff]   ;;  %v1572_v46 = vld [vmem:[%s1914_s8 + $0x1b4] ss:$8 sps:$4 sm:$0xff]   ;;  %v1575_v51 = vld [vmem:[%s1914_s8 + $0x1b0] ss:$8 sps:$4 sm:$0xff]  }
  0x5e   : > { %1116 = vmatprep.subr.bf16.mxu1 %v1530_v18  ;;  %v667_v47 = vld [vmem:[%s1891_s9] sm:$0xff]  ;;  %v668_v49 = vld [vmem:[%s1891_s9 + $0x8] sm:$0xff]  ;;  %v1576_v53 = vld [vmem:[%s1914_s8 + $0xc4] ss:$8 sps:$4 sm:$0xff]   ;;  %p1441_p13 = scmp.ne.s32.totalorder %s1642_s20, 8 }
  0x5f   : > { %v1374_v48 = vcombine.high %v667_v47, %v667_v47  ;;  %v1376_v52 = vcombine.high %v668_v49, %v668_v49  ;;  %v1578_v54 = vld [vmem:[%s1914_s8 + $0x1c4] ss:$8 sps:$4 sm:$0xff]   ;;  %v1580_v55 = vld [vmem:[%s1914_s8 + $0xc0] ss:$8 sps:$4 sm:$0xff]   ;;  %v1582_v57 = vld [vmem:[%s1914_s8 + $0xd4] ss:$8 sps:$4 sm:$0xff]   ;;  %v1373_v5 = vcombine.low %v667_v47, %v667_v47  ;;  %v1375_v6 = vcombine.low %v668_v49, %v668_v49 }
  0x60   : > { %1076 = vmatpush1.bf16.msra.mxu0 %v1532_v19  ;;  %v1581_v56 = vld [vmem:[%s1914_s8 + $0x1c0] ss:$8 sps:$4 sm:$0xff]   ;;  %v1584_v58 = vld [vmem:[%s1914_s8 + $0x1d4] ss:$8 sps:$4 sm:$0xff]   ;;  %v1586_v59 = vld [vmem:[%s1914_s8 + $0xd0] ss:$8 sps:$4 sm:$0xff]  }
  0x61   : > { %1117 = vmatpush1.bf16.msra.mxu1 %v1533_v20  ;;  %1077 = vmatprep.subr.bf16.mxu0 %v1534_v21  ;;  %v1587_v60 = vld [vmem:[%s1914_s8 + $0x1d0] ss:$8 sps:$4 sm:$0xff]   ;;  %v1588_v61 = vld [vmem:[%s1914_s8 + $0xe4] ss:$8 sps:$4 sm:$0xff]   ;;  %v1592_v63 = vld [vmem:[%s1914_s8 + $0xe0] ss:$8 sps:$4 sm:$0xff]   ;;  %v1161_v21 = vlaneseq (!%p1441_p13) }
  0x62   : > { %1118 = vmatprep.subr.bf16.mxu1 %v1536_v22  ;;  %1099 = vmatprep.mubr.bf16.mxu0 %v1374_v48  ;;  %v1590_v62 = vld [vmem:[%s1914_s8 + $0x1e4] ss:$8 sps:$4 sm:$0xff]   ;;  %v1593_v0 = vld [vmem:[%s1914_s8 + $0x1e0] ss:$8 sps:$4 sm:$0xff]   ;;  %v1594_v1 = vld [vmem:[%s1914_s8 + $0xf4] ss:$8 sps:$4 sm:$0xff]  }
  0x63   : > { %1140 = vmatprep.mubr.bf16.mxu1 %v1376_v52  ;;  %v1596_v2 = vld [vmem:[%s1914_s8 + $0x1f4] ss:$8 sps:$4 sm:$0xff]   ;;  %v1598_v3 = vld [vmem:[%s1914_s8 + $0xf0] ss:$8 sps:$4 sm:$0xff]   ;;  %v1162_v22 = vshrl.u32 (!%p1441_p13), %v1161_v21, 7 }
  0x64   : > { %1078 = vmatpush1.bf16.msra.mxu0 %v1538_v23  ;;  %v1599_v4 = vld [vmem:[%s1914_s8 + $0x1f0] ss:$8 sps:$4 sm:$0xff]  }
  0x65   : > { %1119 = vmatpush1.bf16.msra.mxu1 %v1539_v24  ;;  %1079 = vmatprep.subr.bf16.mxu0 %v1540_v25  ;;  %v665_v8 = vld [vmem:[#allocation2] sm:$0xff]  ;;  %v666_v12 = vld [vmem:[#allocation2 + $0x8] sm:$0xff]  ;;  %v1163_v25 = vsub.s32 (!%p1441_p13), 0, %v1162_v22 }
  0x66   : > { %1120 = vmatprep.subr.bf16.mxu1 %v1542_v26  ;;  %v1159_v23 = vld [vmem:[%s632_s18] sm:$0x3] (!%p1441_p13)  ;;  %v1167_v26 = vsub.s32 (!%p1441_p13), 1, %v1162_v22 }
  0x67   : > { %v1173_v24 = vld [vmem:[%s637_s21] sm:$0x3] (!%p1441_p13) }
  0x68   : > { %1080 = vmatpush1.bf16.msra.mxu0 %v1544_v27 }
  0x69   : > { %1121 = vmatpush1.bf16.msra.mxu1 %v1545_v28  ;;  %1081 = vmatprep.subr.bf16.mxu0 %v1546_v29  ;;  %v1187_v29 = vld [vmem:[%s1907_s17] sm:$0xff] (!%p1441_p13) }
  0x6a   : > { %1122 = vmatprep.subr.bf16.mxu1 %v1548_v30  ;;  %v1164_v30 = vrot.slane (!%p1441_p13), %v1159_v23, %v1163_v25 }
  0x6c   : > { %1082 = vmatpush1.bf16.msra.mxu0 %v1550_v31  ;;  %v1168_v31 = vrot.slane (!%p1441_p13), %v1159_v23, %v1167_v26 }
  0x6d   : > { %1123 = vmatpush1.bf16.msra.mxu1 %v1551_v32  ;;  %1083 = vmatprep.subr.bf16.mxu0 %v1552_v33  ;;  %v1178_v32 = vrot.slane (!%p1441_p13), %v1173_v24, %v1163_v25  ;;  %v1182_v33 = vrot.slane (!%p1441_p13), %v1173_v24, %v1167_v26 }
  0x6e   : > { %1124 = vmatprep.subr.bf16.mxu1 %v1554_v34 }
  0x70   : > { %1084 = vmatpush1.bf16.msra.mxu0 %v1556_v35 }
  0x71   : > { %1125 = vmatpush1.bf16.msra.mxu1 %v1557_v36  ;;  %1085 = vmatprep.subr.bf16.mxu0 %v1558_v37  ;;  %v1188_v36 = vunpack.c.l.bf16 (!%p1441_p13), %v1187_v29  ;;  %v1189_v37 = vunpack.c.h.bf16 (!%p1441_p13), %v1187_v29 }
  0x72   : > { %1126 = vmatprep.subr.bf16.mxu1 %v1560_v38 }
  0x74   : > { %1086 = vmatpush1.bf16.msra.mxu0 %v1562_v39 }
  0x75   : > { %1127 = vmatpush1.bf16.msra.mxu1 %v1563_v40  ;;  %1087 = vmatprep.subr.bf16.mxu0 %v1564_v41 }
  0x76   : > { %1128 = vmatprep.subr.bf16.mxu1 %v1566_v42 }
  0x78   : > { %1088 = vmatpush1.bf16.msra.mxu0 %v1568_v43 }
  0x79   : > { %1129 = vmatpush1.bf16.msra.mxu1 %v1569_v44  ;;  %1089 = vmatprep.subr.bf16.mxu0 %v1570_v45 }
  0x7a   : > { %1130 = vmatprep.subr.bf16.mxu1 %v1572_v46 }
  0x7c   : > { %1090 = vmatpush1.bf16.msra.mxu0 %v1574_v50 }
  0x7d   : > { %1131 = vmatpush1.bf16.msra.mxu1 %v1575_v51  ;;  %1091 = vmatprep.subr.bf16.mxu0 %v1576_v53 }
  0x7e   : > { %1132 = vmatprep.subr.bf16.mxu1 %v1578_v54 }
  0x80   : > { %1092 = vmatpush1.bf16.msra.mxu0 %v1580_v55 }
  0x81   : > { %1133 = vmatpush1.bf16.msra.mxu1 %v1581_v56  ;;  %1093 = vmatprep.subr.bf16.mxu0 %v1582_v57 }
  0x82   : > { %1134 = vmatprep.subr.bf16.mxu1 %v1584_v58 }
  0x84   : > { %1094 = vmatpush1.bf16.msra.mxu0 %v1586_v59 }
  0x85   : > { %1135 = vmatpush1.bf16.msra.mxu1 %v1587_v60  ;;  %1095 = vmatprep.subr.bf16.mxu0 %v1588_v61 }
  0x86   : > { %1136 = vmatprep.subr.bf16.mxu1 %v1590_v62 }
  0x88   : > { %1096 = vmatpush1.bf16.msra.mxu0 %v1592_v63 }
  0x89   : > { %1137 = vmatpush1.bf16.msra.mxu1 %v1593_v0  ;;  %1097 = vmatprep.subr.bf16.mxu0 %v1594_v1 }
  0x8a   : > { %1138 = vmatprep.subr.bf16.mxu1 %v1596_v2 }
  0x8c   : > { %1098 = vmatpush1.bf16.msra.mxu0 %v1598_v3 }
  0x8d   : > { %1139 = vmatpush1.bf16.msra.mxu1 %v1599_v4 }
  0x8f   : > { %1100 = vmatmul.mubr.bf16.vlgmr.msra.gmra.mrb[0].mxu0 %v1373_v5 }
  0x90   : > { %1141 = vmatmul.mubr.bf16.vlgmr.msra.gmra.mrb[0].mxu1 %v1375_v6 }
 0x162   : > { %v1101_v7 = vpop.f32.mrb[0].mxu0 }
 0x163   : > { %v1142_v9 = vpop.f32.mrb[0].mxu1  ;;  %v1103_v11 = vpop.f32.mrb[1].mxu0  ;;  %1156 = sbr.rel (%p1441_p13) target bundleno = 380 (0x17c), region = 86 }
 0x164   : > { %v1143_v10 = vadd.f32 %v1142_v9, %v1101_v7  ;;  %v1144_v13 = vpop.f32.mrb[1].mxu1  ;;  %v1105_v15 = vpop.f32.mrb[2].mxu0 }
 0x165   : > { %v1145_v14 = vadd.f32 %v1144_v13, %v1103_v11  ;;  %v1146_v16 = vpop.f32.mrb[2].mxu1  ;;  %v1106_v18 = vpop.f32.mrb[3].mxu0 }
 0x166   : > { %v1149_v17 = vadd.f32 %v1143_v10, %v665_v8  ;;  %v1147_v19 = vpop.f32.mrb[3].mxu1 }
 0x167   : > { %v1150_v20 = vadd.f32 %v1145_v14, %v666_v12 }
 0x168   : > { %1151 = vst [vmem:[#allocation2] sm:$0xff] %v1149_v17 }
 0x169   : > { %1152 = vst [vmem:[#allocation2 + $0x8] sm:$0xff] %v1150_v20 }
 0x16f   : > { %v1157_v27 = vld [vmem:[#allocation2] sm:$0xff] }
 0x170   : > { %v1158_v28 = vld [vmem:[#allocation2 + $0x8] sm:$0xff]  ;;  %v1171_v34 = vmul.f32 %v1164_v30, %v1157_v27 }
 0x171   : > { %v1172_v35 = vmul.f32 %v1168_v31, %v1158_v28 }
 0x172   : > { %v1185_v38 = vadd.f32 %v1178_v32, %v1171_v34 }
 0x173   : > { %v1186_v39 = vadd.f32 %v1182_v33, %v1172_v35 }
 0x174   : > { %v1190_v40 = vadd.f32 %v1188_v36, %v1185_v38 }
 0x175   : > { %v1191_v41 = vadd.f32 %v1189_v37, %v1186_v39 }
 0x176   : > { %v1192_v42 = vmax.f32 %v1190_v40, 0.0 }
 0x177   : > { %v1193_v43 = vmax.f32 %v1191_v41, 0.0 }
 0x179   : > { %v1446_v44 = vpack.c.bf16 %v1193_v43, %v1192_v42 }
 0x17b   : > { %1202 = vst [vmem:[%s1912_s7] sm:$0xff] %v1446_v44 }
 0x17c PF: > { %s15_s24 = sadd.s32 1, %s1658_s24   ;;  %s2023_s18 = smov %s1638_s19 }
 0x17d   : > { %p12_p0 = scmp.ge.s32.totalorder %s15_s24, 20   ;;  %s2024_s19 = smov %s1742_s6 }
 0x17e   : > { %s2025_s20 = smov %s1650_s22  ;;  %s2026_s21 = smov %s1654_s23 }
 0x17f   : > { %s2027_s22 = smov %s2030_s25  ;;  %s2028_s23 = smov %s2034_s26 }
 0x180   :  { %14 = sbr.rel (!%p12_p0) target bundleno = 4 (0x4), region = 133 }

// kernel: resnet_forward.42
= control target key start
LH: loop header
LB: loop body
LE: loop exit
PB: predicated region body
PF: predicated region fallthrough
CT: control target
= control target key end

     0   :  { %s1598_s15 = smov 0   ;;  %s1600_s16 = smov 0   ;;  %s1918_s0 = inlined_call_operand.vmem [shape: bf16[8,4608], index: 0, kind: input, shape index: {}]   ;;  %s1919_s1 = inlined_call_operand.vmem [shape: bf16[4608,512], index: 1, kind: input, shape index: {}]   ;;  %s1920_s2 = inlined_call_operand.vmem [shape: f32[1,512], index: 2, kind: input, shape index: {}]   ;;  %s1921_s3 = inlined_call_operand.vmem [shape: f32[1,512], index: 3, kind: input, shape index: {}]   ;;  %s1922_s4 = inlined_call_operand.vmem [shape: bf16[8,512], index: 4, kind: output, shape index: {}]  }
   0x1   :  { %s1602_s17 = smov 0   ;;  %s1604_s18 = smov 0  }
   0x2   :  { %s1606_s19 = smov 0   ;;  %s1608_s20 = smov 0  }
   0x3   :  { %s1610_s21 = smov 0  }
   0x4 LB: > { %s26_s22 = sadd.s32 1, %s1562_s19  ;;  %s29_s23 = sadd.s32 1, %s1566_s20  ;;  %s1570_s21 = sphi %s1610_s21, %s14_s21   ;;  %s1566_s20 = sphi %s1608_s20, %s1928_s20   ;;  %s1562_s19 = sphi %s1606_s19, %s1927_s19   ;;  %s1558_s18 = sphi %s1604_s18, %s1926_s18   ;;  %s1554_s17 = sphi %s1602_s17, %s1925_s17   ;;  %s1550_s16 = sphi %s1600_s16, %s1924_s16   ;;  %s1546_s15 = sphi %s1598_s15, %s1923_s15  }
   0x5   : > { %p27_p0 = scmp.ge.s32.totalorder %s26_s22, 9  ;;  %p77_p1 = scmp.ne.s32.totalorder %s1550_s16, %s1546_s15 }
   0x6   : > { %p78_p2 = scmp.eq.s32.totalorder %s1570_s21, 0  ;;  %s70_s27 = sadd.s32 1, %s1550_s16 }
   0x7   : > { %s1930_s22 = smov (%p27_p0, %s26_s22), 0  ;;  %s1932_s23 = smov (!%p27_p0, %s29_s23), %s1566_s20 }
   0x8   : > { %p79_p3 = por %p78_p2, %p77_p1  ;;  %p31_p4 = scmp.ge.s32.totalorder %s1932_s23, 2 }
   0x9   : > { %s65_s24 = ssub.s32 %s1562_s19, %s1930_s22  ;;  %p1270_p6 = scmp.ge.s32.totalorder %s1570_s21, 18 }
   0xa   : > { %s1934_s23 = smov (%p31_p4, %s1932_s23), 0 }
   0xb   : > { %s66_s25 = ssub.s32 %s1566_s20, %s1934_s23  ;;  %183 = sbr.rel (%p1270_p6) target bundleno = 57 (0x39), region = 16 }
   0xc   : > { %s67_s26 = sor.u32 %s66_s25, %s65_s24 }
   0xd   : > { %p68_p5 = scmp.eq.s32.totalorder %s67_s26, 0 }
   0xf   : > { %s1649_s28 = scalar_select %p68_p5, %s1550_s16, %s70_s27  }
  0x12   : > { %199 = sbr.rel (!%p79_p3) target bundleno = 57 (0x39), region = 24  ;;  %s201_s29 = sand.u32 (%p79_p3), 1, %s1550_s16  }
  0x13   : > { %s1273_s30 = sshll.u32 (%p79_p3), %s1566_s20, 1  ;;  %s1271_s5 = sshll.u32 (%p79_p3), %s201_s29, 9 }
  0x14   : > { %s1357_s6 = sshll.u32 (%p79_p3), %s1562_s19, 8  ;;  %s1663_s12 = scalar_lea.vmem (%p79_p3), [#allocation3], %s1271_s5 }
  0x15   : > { %s207_s7 = sadd.s32 (%p79_p3), %s1357_s6, %s1273_s30 }
  0x16   : > { %s1275_s8 = sshll.u32 (%p79_p3), %s207_s7, 2 }
  0x17   : > { %s1658_s11 = scalar_lea.vmem (%p79_p3), %s1919_s1, %s1275_s8 }
  0x18   : > { %v363_v0 = vld [vmem:[%s1658_s11] sm:$0xff] (%p79_p3)  ;;  %v365_v1 = vld [vmem:[%s1658_s11 + $0x10] sm:$0xff] (%p79_p3) }
  0x19   : > { %v367_v2 = vld [vmem:[%s1658_s11 + $0x20] sm:$0xff]  ;;  %364 = vst [vmem:[%s1663_s12] sm:$0xff] %v363_v0  ;;  %366 = vst [vmem:[%s1663_s12 + $0x8] sm:$0xff] %v365_v1  ;;  %v369_v3 = vld [vmem:[%s1658_s11 + $0x30] sm:$0xff] }
  0x1a   : > { %368 = vst [vmem:[%s1663_s12 + $0x10] sm:$0xff] %v367_v2  ;;  %v371_v4 = vld [vmem:[%s1658_s11 + $0x40] sm:$0xff]  ;;  %v373_v5 = vld [vmem:[%s1658_s11 + $0x50] sm:$0xff]  ;;  %370 = vst [vmem:[%s1663_s12 + $0x18] sm:$0xff] %v369_v3 }
  0x1b   : > { %372 = vst [vmem:[%s1663_s12 + $0x20] sm:$0xff] %v371_v4  ;;  %374 = vst [vmem:[%s1663_s12 + $0x28] sm:$0xff] %v373_v5  ;;  %v375_v6 = vld [vmem:[%s1658_s11 + $0x60] sm:$0xff]  ;;  %v377_v7 = vld [vmem:[%s1658_s11 + $0x70] sm:$0xff] }
  0x1c   : > { %v379_v8 = vld [vmem:[%s1658_s11 + $0x80] sm:$0xff]  ;;  %376 = vst [vmem:[%s1663_s12 + $0x30] sm:$0xff] %v375_v6  ;;  %378 = vst [vmem:[%s1663_s12 + $0x38] sm:$0xff] %v377_v7  ;;  %v381_v9 = vld [vmem:[%s1658_s11 + $0x90] sm:$0xff] }
  0x1d   : > { %380 = vst [vmem:[%s1663_s12 + $0x40] sm:$0xff] %v379_v8  ;;  %v383_v10 = vld [vmem:[%s1658_s11 + $0xa0] sm:$0xff]  ;;  %v385_v11 = vld [vmem:[%s1658_s11 + $0xb0] sm:$0xff]  ;;  %382 = vst [vmem:[%s1663_s12 + $0x48] sm:$0xff] %v381_v9 }
  0x1e   : > { %384 = vst [vmem:[%s1663_s12 + $0x50] sm:$0xff] %v383_v10  ;;  %386 = vst [vmem:[%s1663_s12 + $0x58] sm:$0xff] %v385_v11  ;;  %v387_v12 = vld [vmem:[%s1658_s11 + $0xc0] sm:$0xff]  ;;  %v389_v13 = vld [vmem:[%s1658_s11 + $0xd0] sm:$0xff] }
  0x1f   : > { %v391_v14 = vld [vmem:[%s1658_s11 + $0xe0] sm:$0xff]  ;;  %388 = vst [vmem:[%s1663_s12 + $0x60] sm:$0xff] %v387_v12  ;;  %390 = vst [vmem:[%s1663_s12 + $0x68] sm:$0xff] %v389_v13  ;;  %v393_v15 = vld [vmem:[%s1658_s11 + $0xf0] sm:$0xff] }
  0x20   : > { %392 = vst [vmem:[%s1663_s12 + $0x70] sm:$0xff] %v391_v14  ;;  %v395_v16 = vld [vmem:[%s1658_s11 + $0x100] sm:$0xff]  ;;  %v397_v17 = vld [vmem:[%s1658_s11 + $0x110] sm:$0xff]  ;;  %394 = vst [vmem:[%s1663_s12 + $0x78] sm:$0xff] %v393_v15 }
  0x21   : > { %396 = vst [vmem:[%s1663_s12 + $0x80] sm:$0xff] %v395_v16  ;;  %398 = vst [vmem:[%s1663_s12 + $0x88] sm:$0xff] %v397_v17  ;;  %v399_v18 = vld [vmem:[%s1658_s11 + $0x120] sm:$0xff]  ;;  %v401_v19 = vld [vmem:[%s1658_s11 + $0x130] sm:$0xff] }
  0x22   : > { %v403_v20 = vld [vmem:[%s1658_s11 + $0x140] sm:$0xff]  ;;  %400 = vst [vmem:[%s1663_s12 + $0x90] sm:$0xff] %v399_v18  ;;  %402 = vst [vmem:[%s1663_s12 + $0x98] sm:$0xff] %v401_v19  ;;  %v405_v21 = vld [vmem:[%s1658_s11 + $0x150] sm:$0xff] }
  0x23   : > { %404 = vst [vmem:[%s1663_s12 + $0xa0] sm:$0xff] %v403_v20  ;;  %v407_v22 = vld [vmem:[%s1658_s11 + $0x160] sm:$0xff]  ;;  %v409_v23 = vld [vmem:[%s1658_s11 + $0x170] sm:$0xff]  ;;  %406 = vst [vmem:[%s1663_s12 + $0xa8] sm:$0xff] %v405_v21 }
  0x24   : > { %408 = vst [vmem:[%s1663_s12 + $0xb0] sm:$0xff] %v407_v22  ;;  %410 = vst [vmem:[%s1663_s12 + $0xb8] sm:$0xff] %v409_v23  ;;  %v411_v24 = vld [vmem:[%s1658_s11 + $0x180] sm:$0xff]  ;;  %v413_v25 = vld [vmem:[%s1658_s11 + $0x190] sm:$0xff] }
  0x25   : > { %v415_v26 = vld [vmem:[%s1658_s11 + $0x1a0] sm:$0xff]  ;;  %412 = vst [vmem:[%s1663_s12 + $0xc0] sm:$0xff] %v411_v24  ;;  %414 = vst [vmem:[%s1663_s12 + $0xc8] sm:$0xff] %v413_v25  ;;  %v417_v27 = vld [vmem:[%s1658_s11 + $0x1b0] sm:$0xff] }
  0x26   : > { %416 = vst [vmem:[%s1663_s12 + $0xd0] sm:$0xff] %v415_v26  ;;  %v419_v28 = vld [vmem:[%s1658_s11 + $0x1c0] sm:$0xff]  ;;  %v421_v29 = vld [vmem:[%s1658_s11 + $0x1d0] sm:$0xff]  ;;  %418 = vst [vmem:[%s1663_s12 + $0xd8] sm:$0xff] %v417_v27 }
  0x27   : > { %420 = vst [vmem:[%s1663_s12 + $0xe0] sm:$0xff] %v419_v28  ;;  %422 = vst [vmem:[%s1663_s12 + $0xe8] sm:$0xff] %v421_v29  ;;  %v423_v30 = vld [vmem:[%s1658_s11 + $0x1e0] sm:$0xff]  ;;  %v425_v31 = vld [vmem:[%s1658_s11 + $0x1f0] sm:$0xff] }
  0x28   : > { %v427_v32 = vld [vmem:[%s1658_s11 + $0x200] sm:$0xff]  ;;  %424 = vst [vmem:[%s1663_s12 + $0xf0] sm:$0xff] %v423_v30  ;;  %426 = vst [vmem:[%s1663_s12 + $0xf8] sm:$0xff] %v425_v31  ;;  %v429_v33 = vld [vmem:[%s1658_s11 + $0x210] sm:$0xff] }
  0x29   : > { %428 = vst [vmem:[%s1663_s12 + $0x100] sm:$0xff] %v427_v32  ;;  %v431_v34 = vld [vmem:[%s1658_s11 + $0x220] sm:$0xff]  ;;  %v433_v35 = vld [vmem:[%s1658_s11 + $0x230] sm:$0xff]  ;;  %430 = vst [vmem:[%s1663_s12 + $0x108] sm:$0xff] %v429_v33 }
  0x2a   : > { %432 = vst [vmem:[%s1663_s12 + $0x110] sm:$0xff] %v431_v34  ;;  %434 = vst [vmem:[%s1663_s12 + $0x118] sm:$0xff] %v433_v35  ;;  %v435_v36 = vld [vmem:[%s1658_s11 + $0x240] sm:$0xff]  ;;  %v437_v37 = vld [vmem:[%s1658_s11 + $0x250] sm:$0xff] }
  0x2b   : > { %v439_v38 = vld [vmem:[%s1658_s11 + $0x260] sm:$0xff]  ;;  %436 = vst [vmem:[%s1663_s12 + $0x120] sm:$0xff] %v435_v36  ;;  %438 = vst [vmem:[%s1663_s12 + $0x128] sm:$0xff] %v437_v37  ;;  %v441_v39 = vld [vmem:[%s1658_s11 + $0x270] sm:$0xff] }
  0x2c   : > { %440 = vst [vmem:[%s1663_s12 + $0x130] sm:$0xff] %v439_v38  ;;  %v443_v40 = vld [vmem:[%s1658_s11 + $0x280] sm:$0xff]  ;;  %v445_v41 = vld [vmem:[%s1658_s11 + $0x290] sm:$0xff]  ;;  %442 = vst [vmem:[%s1663_s12 + $0x138] sm:$0xff] %v441_v39 }
  0x2d   : > { %444 = vst [vmem:[%s1663_s12 + $0x140] sm:$0xff] %v443_v40  ;;  %446 = vst [vmem:[%s1663_s12 + $0x148] sm:$0xff] %v445_v41  ;;  %v447_v42 = vld [vmem:[%s1658_s11 + $0x2a0] sm:$0xff]  ;;  %v449_v43 = vld [vmem:[%s1658_s11 + $0x2b0] sm:$0xff] }
  0x2e   : > { %v451_v44 = vld [vmem:[%s1658_s11 + $0x2c0] sm:$0xff]  ;;  %448 = vst [vmem:[%s1663_s12 + $0x150] sm:$0xff] %v447_v42  ;;  %450 = vst [vmem:[%s1663_s12 + $0x158] sm:$0xff] %v449_v43  ;;  %v453_v45 = vld [vmem:[%s1658_s11 + $0x2d0] sm:$0xff] }
  0x2f   : > { %452 = vst [vmem:[%s1663_s12 + $0x160] sm:$0xff] %v451_v44  ;;  %v455_v46 = vld [vmem:[%s1658_s11 + $0x2e0] sm:$0xff]  ;;  %v457_v47 = vld [vmem:[%s1658_s11 + $0x2f0] sm:$0xff]  ;;  %454 = vst [vmem:[%s1663_s12 + $0x168] sm:$0xff] %v453_v45 }
  0x30   : > { %456 = vst [vmem:[%s1663_s12 + $0x170] sm:$0xff] %v455_v46  ;;  %458 = vst [vmem:[%s1663_s12 + $0x178] sm:$0xff] %v457_v47  ;;  %v459_v48 = vld [vmem:[%s1658_s11 + $0x300] sm:$0xff]  ;;  %v461_v49 = vld [vmem:[%s1658_s11 + $0x310] sm:$0xff] }
  0x31   : > { %v463_v50 = vld [vmem:[%s1658_s11 + $0x320] sm:$0xff]  ;;  %460 = vst [vmem:[%s1663_s12 + $0x180] sm:$0xff] %v459_v48  ;;  %462 = vst [vmem:[%s1663_s12 + $0x188] sm:$0xff] %v461_v49  ;;  %v465_v51 = vld [vmem:[%s1658_s11 + $0x330] sm:$0xff] }
  0x32   : > { %464 = vst [vmem:[%s1663_s12 + $0x190] sm:$0xff] %v463_v50  ;;  %v467_v52 = vld [vmem:[%s1658_s11 + $0x340] sm:$0xff]  ;;  %v469_v53 = vld [vmem:[%s1658_s11 + $0x350] sm:$0xff]  ;;  %466 = vst [vmem:[%s1663_s12 + $0x198] sm:$0xff] %v465_v51 }
  0x33   : > { %468 = vst [vmem:[%s1663_s12 + $0x1a0] sm:$0xff] %v467_v52  ;;  %470 = vst [vmem:[%s1663_s12 + $0x1a8] sm:$0xff] %v469_v53  ;;  %v471_v54 = vld [vmem:[%s1658_s11 + $0x360] sm:$0xff]  ;;  %v473_v55 = vld [vmem:[%s1658_s11 + $0x370] sm:$0xff] }
  0x34   : > { %v475_v56 = vld [vmem:[%s1658_s11 + $0x380] sm:$0xff]  ;;  %472 = vst [vmem:[%s1663_s12 + $0x1b0] sm:$0xff] %v471_v54  ;;  %474 = vst [vmem:[%s1663_s12 + $0x1b8] sm:$0xff] %v473_v55  ;;  %v477_v57 = vld [vmem:[%s1658_s11 + $0x390] sm:$0xff] }
  0x35   : > { %476 = vst [vmem:[%s1663_s12 + $0x1c0] sm:$0xff] %v475_v56  ;;  %v479_v58 = vld [vmem:[%s1658_s11 + $0x3a0] sm:$0xff]  ;;  %v481_v59 = vld [vmem:[%s1658_s11 + $0x3b0] sm:$0xff]  ;;  %478 = vst [vmem:[%s1663_s12 + $0x1c8] sm:$0xff] %v477_v57 }
  0x36   : > { %480 = vst [vmem:[%s1663_s12 + $0x1d0] sm:$0xff] %v479_v58  ;;  %482 = vst [vmem:[%s1663_s12 + $0x1d8] sm:$0xff] %v481_v59  ;;  %v483_v60 = vld [vmem:[%s1658_s11 + $0x3c0] sm:$0xff]  ;;  %v485_v61 = vld [vmem:[%s1658_s11 + $0x3d0] sm:$0xff] }
  0x37   : > { %v487_v62 = vld [vmem:[%s1658_s11 + $0x3e0] sm:$0xff]  ;;  %484 = vst [vmem:[%s1663_s12 + $0x1e0] sm:$0xff] %v483_v60  ;;  %486 = vst [vmem:[%s1663_s12 + $0x1e8] sm:$0xff] %v485_v61  ;;  %v489_v63 = vld [vmem:[%s1658_s11 + $0x3f0] sm:$0xff] }
  0x38   : > { %488 = vst [vmem:[%s1663_s12 + $0x1f0] sm:$0xff] %v487_v62  ;;  %490 = vst [vmem:[%s1663_s12 + $0x1f8] sm:$0xff] %v489_v63 }
  0x39 PF: > { %p1276_p7 = scmp.ge.s32.totalorder %s1570_s21, 1  ;;  %p511_p8 = scmp.lt.s32.totalorder %s1570_s21, 19 }
  0x3b   : > { %p512_p9 = pnand %p1276_p7, %p511_p8 }
  0x3c   : > { %s518_s13 = sand.u32 (!%p512_p9), 1, %s1546_s15   ;;  %s1278_s14 = sshll.u32 (!%p512_p9), %s1554_s17, 2 }
  0x3d   : > { %515 = sbr.rel (%p512_p9) target bundleno = 378 (0x17a), region = 70  ;;  %s1277_s24 = sshll.u32 (!%p512_p9), %s518_s13, 9 }
  0x3e   : > { %p567_p10 = scmp.lt.s32.totalorder (!%p512_p9), %s1278_s14, 35  ;;  %s1280_s25 = sshll.u32 (!%p512_p9), %s1558_s18, 1 }
  0x3f   : > { %p577_p11 = scmp.lt.s32.totalorder (!%p512_p9), %s1280_s25, 3  ;;  %s1816_s13 = scalar_lea.vmem (!%p512_p9), [#allocation3], %s1277_s24 }
  0x40   : > { %p1284_p12 = scmp.ne.s32.totalorder (!%p512_p9), %s1554_s17, 0 }
  0x44   : > { %s1936_s14 = smov (!%p567_p10, %s1278_s14), 35  ;;  %s1938_s25 = smov (!%p577_p11, %s1280_s25), 3 }
  0x45   : > { %s1279_s26 = sshll.u32 %s1936_s14, 2  ;;  %s579_s15 = scalar_lea.vmem %s1920_s2, %s1938_s25  ;;  %v1572_v0 = vmov (!%p1284_p12), 0.0  }
  0x46   : > { %s1798_s30 = scalar_lea.vmem %s1918_s0, %s1279_s26  ;;  %s584_s18 = scalar_lea.vmem %s1921_s3, %s1938_s25  ;;  %600 = vst [vmem:[#allocation2] sm:$0xff] (!%p1284_p12), %v1572_v0  ;;  %601 = vst [vmem:[#allocation2 + $0x8] sm:$0xff] (!%p1284_p12), %v1572_v0 }
  0x47   : > { %s1283_s9 = sshll.u32 %s1938_s25, 2  ;;  %599 = sbr.rel (%p1284_p12) target bundleno = 78 (0x4e), region = 78 }
  0x48   : > { %s1814_s12 = scalar_lea.vmem %s1922_s4, %s1283_s9 }
  0x4e PF: > { %v1416_v1 = vld [vmem:[%s1816_s13 + $0x4] ss:$8 sps:$4 sm:$0xff]   ;;  %v1420_v3 = vld [vmem:[%s1816_s13] ss:$8 sps:$4 sm:$0xff]   ;;  %v1422_v5 = vld [vmem:[%s1816_s13 + $0x14] ss:$8 sps:$4 sm:$0xff]  }
  0x4f   : > { %v1418_v2 = vld [vmem:[%s1816_s13 + $0x104] ss:$8 sps:$4 sm:$0xff]   ;;  %1004 = vmatprep.subr.bf16.mxu0 %v1416_v1  ;;  %v1421_v4 = vld [vmem:[%s1816_s13 + $0x100] ss:$8 sps:$4 sm:$0xff]   ;;  %v1424_v6 = vld [vmem:[%s1816_s13 + $0x114] ss:$8 sps:$4 sm:$0xff]  }
  0x50   : > { %1045 = vmatprep.subr.bf16.mxu1 %v1418_v2  ;;  %1005 = vmatpush1.bf16.msra.mxu0 %v1420_v3  ;;  %v1426_v7 = vld [vmem:[%s1816_s13 + $0x10] ss:$8 sps:$4 sm:$0xff]   ;;  %v1428_v9 = vld [vmem:[%s1816_s13 + $0x24] ss:$8 sps:$4 sm:$0xff]   ;;  %v1432_v11 = vld [vmem:[%s1816_s13 + $0x20] ss:$8 sps:$4 sm:$0xff]  }
  0x51   : > { %1046 = vmatpush1.bf16.msra.mxu1 %v1421_v4  ;;  %1006 = vmatprep.subr.bf16.mxu0 %v1422_v5  ;;  %v1427_v8 = vld [vmem:[%s1816_s13 + $0x110] ss:$8 sps:$4 sm:$0xff]   ;;  %v1430_v10 = vld [vmem:[%s1816_s13 + $0x124] ss:$8 sps:$4 sm:$0xff]   ;;  %v1433_v12 = vld [vmem:[%s1816_s13 + $0x120] ss:$8 sps:$4 sm:$0xff]  }
  0x52   : > { %1047 = vmatprep.subr.bf16.mxu1 %v1424_v6  ;;  %v1434_v13 = vld [vmem:[%s1816_s13 + $0x34] ss:$8 sps:$4 sm:$0xff]   ;;  %v1438_v15 = vld [vmem:[%s1816_s13 + $0x30] ss:$8 sps:$4 sm:$0xff]   ;;  %v1440_v17 = vld [vmem:[%s1816_s13 + $0x44] ss:$8 sps:$4 sm:$0xff]  }
  0x53   : > { %v1436_v14 = vld [vmem:[%s1816_s13 + $0x134] ss:$8 sps:$4 sm:$0xff]   ;;  %v1439_v16 = vld [vmem:[%s1816_s13 + $0x130] ss:$8 sps:$4 sm:$0xff]   ;;  %v1442_v18 = vld [vmem:[%s1816_s13 + $0x144] ss:$8 sps:$4 sm:$0xff]  }
  0x54   : > { %1007 = vmatpush1.bf16.msra.mxu0 %v1426_v7  ;;  %v1444_v19 = vld [vmem:[%s1816_s13 + $0x40] ss:$8 sps:$4 sm:$0xff]   ;;  %v1446_v21 = vld [vmem:[%s1816_s13 + $0x54] ss:$8 sps:$4 sm:$0xff]   ;;  %v1450_v23 = vld [vmem:[%s1816_s13 + $0x50] ss:$8 sps:$4 sm:$0xff]  }
  0x55   : > { %1048 = vmatpush1.bf16.msra.mxu1 %v1427_v8  ;;  %1008 = vmatprep.subr.bf16.mxu0 %v1428_v9  ;;  %v1445_v20 = vld [vmem:[%s1816_s13 + $0x140] ss:$8 sps:$4 sm:$0xff]   ;;  %v1448_v22 = vld [vmem:[%s1816_s13 + $0x154] ss:$8 sps:$4 sm:$0xff]   ;;  %v1451_v24 = vld [vmem:[%s1816_s13 + $0x150] ss:$8 sps:$4 sm:$0xff]  }
  0x56   : > { %1049 = vmatprep.subr.bf16.mxu1 %v1430_v10  ;;  %v1452_v25 = vld [vmem:[%s1816_s13 + $0x64] ss:$8 sps:$4 sm:$0xff]   ;;  %v1456_v27 = vld [vmem:[%s1816_s13 + $0x60] ss:$8 sps:$4 sm:$0xff]   ;;  %v1458_v29 = vld [vmem:[%s1816_s13 + $0x74] ss:$8 sps:$4 sm:$0xff]  }
  0x57   : > { %v1454_v26 = vld [vmem:[%s1816_s13 + $0x164] ss:$8 sps:$4 sm:$0xff]   ;;  %v1457_v28 = vld [vmem:[%s1816_s13 + $0x160] ss:$8 sps:$4 sm:$0xff]   ;;  %v1460_v30 = vld [vmem:[%s1816_s13 + $0x174] ss:$8 sps:$4 sm:$0xff]  }
  0x58   : > { %1009 = vmatpush1.bf16.msra.mxu0 %v1432_v11  ;;  %v1462_v31 = vld [vmem:[%s1816_s13 + $0x70] ss:$8 sps:$4 sm:$0xff]   ;;  %v1464_v33 = vld [vmem:[%s1816_s13 + $0x84] ss:$8 sps:$4 sm:$0xff]   ;;  %v1468_v35 = vld [vmem:[%s1816_s13 + $0x80] ss:$8 sps:$4 sm:$0xff]  }
  0x59   : > { %1050 = vmatpush1.bf16.msra.mxu1 %v1433_v12  ;;  %1010 = vmatprep.subr.bf16.mxu0 %v1434_v13  ;;  %v1463_v32 = vld [vmem:[%s1816_s13 + $0x170] ss:$8 sps:$4 sm:$0xff]   ;;  %v1466_v34 = vld [vmem:[%s1816_s13 + $0x184] ss:$8 sps:$4 sm:$0xff]   ;;  %v1469_v36 = vld [vmem:[%s1816_s13 + $0x180] ss:$8 sps:$4 sm:$0xff]  }
  0x5a   : > { %1051 = vmatprep.subr.bf16.mxu1 %v1436_v14  ;;  %v1470_v37 = vld [vmem:[%s1816_s13 + $0x94] ss:$8 sps:$4 sm:$0xff]   ;;  %v1474_v39 = vld [vmem:[%s1816_s13 + $0x90] ss:$8 sps:$4 sm:$0xff]   ;;  %v1476_v41 = vld [vmem:[%s1816_s13 + $0xa4] ss:$8 sps:$4 sm:$0xff]  }
  0x5b   : > { %v1472_v38 = vld [vmem:[%s1816_s13 + $0x194] ss:$8 sps:$4 sm:$0xff]   ;;  %v1475_v40 = vld [vmem:[%s1816_s13 + $0x190] ss:$8 sps:$4 sm:$0xff]   ;;  %v1478_v42 = vld [vmem:[%s1816_s13 + $0x1a4] ss:$8 sps:$4 sm:$0xff]  }
  0x5c   : > { %1011 = vmatpush1.bf16.msra.mxu0 %v1438_v15  ;;  %v1480_v43 = vld [vmem:[%s1816_s13 + $0xa0] ss:$8 sps:$4 sm:$0xff]   ;;  %v1482_v45 = vld [vmem:[%s1816_s13 + $0xb4] ss:$8 sps:$4 sm:$0xff]   ;;  %v1486_v50 = vld [vmem:[%s1816_s13 + $0xb0] ss:$8 sps:$4 sm:$0xff]  }
  0x5d   : > { %1052 = vmatpush1.bf16.msra.mxu1 %v1439_v16  ;;  %1012 = vmatprep.subr.bf16.mxu0 %v1440_v17  ;;  %v1481_v44 = vld [vmem:[%s1816_s13 + $0x1a0] ss:$8 sps:$4 sm:$0xff]   ;;  %v1484_v46 = vld [vmem:[%s1816_s13 + $0x1b4] ss:$8 sps:$4 sm:$0xff]   ;;  %v1487_v51 = vld [vmem:[%s1816_s13 + $0x1b0] ss:$8 sps:$4 sm:$0xff]  }
  0x5e   : > { %1053 = vmatprep.subr.bf16.mxu1 %v1442_v18  ;;  %v604_v47 = vld [vmem:[%s1798_s30] sm:$0xff]  ;;  %v605_v49 = vld [vmem:[%s1798_s30 + $0x8] sm:$0xff]  ;;  %v1488_v53 = vld [vmem:[%s1816_s13 + $0xc4] ss:$8 sps:$4 sm:$0xff]   ;;  %p1353_p13 = scmp.ne.s32.totalorder %s1554_s17, 8 }
  0x5f   : > { %v1286_v48 = vcombine.high %v604_v47, %v604_v47  ;;  %v1288_v52 = vcombine.high %v605_v49, %v605_v49  ;;  %v1490_v54 = vld [vmem:[%s1816_s13 + $0x1c4] ss:$8 sps:$4 sm:$0xff]   ;;  %v1492_v55 = vld [vmem:[%s1816_s13 + $0xc0] ss:$8 sps:$4 sm:$0xff]   ;;  %v1494_v57 = vld [vmem:[%s1816_s13 + $0xd4] ss:$8 sps:$4 sm:$0xff]   ;;  %v1285_v5 = vcombine.low %v604_v47, %v604_v47  ;;  %v1287_v6 = vcombine.low %v605_v49, %v605_v49 }
  0x60   : > { %1013 = vmatpush1.bf16.msra.mxu0 %v1444_v19  ;;  %v1493_v56 = vld [vmem:[%s1816_s13 + $0x1c0] ss:$8 sps:$4 sm:$0xff]   ;;  %v1496_v58 = vld [vmem:[%s1816_s13 + $0x1d4] ss:$8 sps:$4 sm:$0xff]   ;;  %v1498_v59 = vld [vmem:[%s1816_s13 + $0xd0] ss:$8 sps:$4 sm:$0xff]  }
  0x61   : > { %1054 = vmatpush1.bf16.msra.mxu1 %v1445_v20  ;;  %1014 = vmatprep.subr.bf16.mxu0 %v1446_v21  ;;  %v1499_v60 = vld [vmem:[%s1816_s13 + $0x1d0] ss:$8 sps:$4 sm:$0xff]   ;;  %v1500_v61 = vld [vmem:[%s1816_s13 + $0xe4] ss:$8 sps:$4 sm:$0xff]   ;;  %v1504_v63 = vld [vmem:[%s1816_s13 + $0xe0] ss:$8 sps:$4 sm:$0xff]   ;;  %v1098_v21 = vlaneseq (!%p1353_p13) }
  0x62   : > { %1055 = vmatprep.subr.bf16.mxu1 %v1448_v22  ;;  %1036 = vmatprep.mubr.bf16.mxu0 %v1286_v48  ;;  %v1502_v62 = vld [vmem:[%s1816_s13 + $0x1e4] ss:$8 sps:$4 sm:$0xff]   ;;  %v1505_v0 = vld [vmem:[%s1816_s13 + $0x1e0] ss:$8 sps:$4 sm:$0xff]   ;;  %v1506_v1 = vld [vmem:[%s1816_s13 + $0xf4] ss:$8 sps:$4 sm:$0xff]  }
  0x63   : > { %1077 = vmatprep.mubr.bf16.mxu1 %v1288_v52  ;;  %v1508_v2 = vld [vmem:[%s1816_s13 + $0x1f4] ss:$8 sps:$4 sm:$0xff]   ;;  %v1510_v3 = vld [vmem:[%s1816_s13 + $0xf0] ss:$8 sps:$4 sm:$0xff]   ;;  %v1099_v22 = vshrl.u32 (!%p1353_p13), %v1098_v21, 7 }
  0x64   : > { %1015 = vmatpush1.bf16.msra.mxu0 %v1450_v23  ;;  %v1511_v4 = vld [vmem:[%s1816_s13 + $0x1f0] ss:$8 sps:$4 sm:$0xff]  }
  0x65   : > { %1056 = vmatpush1.bf16.msra.mxu1 %v1451_v24  ;;  %1016 = vmatprep.subr.bf16.mxu0 %v1452_v25  ;;  %v602_v8 = vld [vmem:[#allocation2] sm:$0xff]  ;;  %v603_v12 = vld [vmem:[#allocation2 + $0x8] sm:$0xff]  ;;  %v1100_v25 = vsub.s32 (!%p1353_p13), 0, %v1099_v22 }
  0x66   : > { %1057 = vmatprep.subr.bf16.mxu1 %v1454_v26  ;;  %v1096_v23 = vld [vmem:[%s579_s15] sm:$0x3] (!%p1353_p13)  ;;  %v1104_v26 = vsub.s32 (!%p1353_p13), 1, %v1099_v22 }
  0x67   : > { %v1110_v24 = vld [vmem:[%s584_s18] sm:$0x3] (!%p1353_p13) }
  0x68   : > { %1017 = vmatpush1.bf16.msra.mxu0 %v1456_v27 }
  0x69   : > { %1058 = vmatpush1.bf16.msra.mxu1 %v1457_v28  ;;  %1018 = vmatprep.subr.bf16.mxu0 %v1458_v29  ;;  %v1101_v29 = vrot.slane (!%p1353_p13), %v1096_v23, %v1100_v25 }
  0x6a   : > { %1059 = vmatprep.subr.bf16.mxu1 %v1460_v30  ;;  %v1105_v30 = vrot.slane (!%p1353_p13), %v1096_v23, %v1104_v26 }
  0x6c   : > { %1019 = vmatpush1.bf16.msra.mxu0 %v1462_v31  ;;  %v1115_v31 = vrot.slane (!%p1353_p13), %v1110_v24, %v1100_v25 }
  0x6d   : > { %1060 = vmatpush1.bf16.msra.mxu1 %v1463_v32  ;;  %1020 = vmatprep.subr.bf16.mxu0 %v1464_v33  ;;  %v1119_v32 = vrot.slane (!%p1353_p13), %v1110_v24, %v1104_v26 }
  0x6e   : > { %1061 = vmatprep.subr.bf16.mxu1 %v1466_v34 }
  0x70   : > { %1021 = vmatpush1.bf16.msra.mxu0 %v1468_v35 }
  0x71   : > { %1062 = vmatpush1.bf16.msra.mxu1 %v1469_v36  ;;  %1022 = vmatprep.subr.bf16.mxu0 %v1470_v37 }
  0x72   : > { %1063 = vmatprep.subr.bf16.mxu1 %v1472_v38 }
  0x74   : > { %1023 = vmatpush1.bf16.msra.mxu0 %v1474_v39 }
  0x75   : > { %1064 = vmatpush1.bf16.msra.mxu1 %v1475_v40  ;;  %1024 = vmatprep.subr.bf16.mxu0 %v1476_v41 }
  0x76   : > { %1065 = vmatprep.subr.bf16.mxu1 %v1478_v42 }
  0x78   : > { %1025 = vmatpush1.bf16.msra.mxu0 %v1480_v43 }
  0x79   : > { %1066 = vmatpush1.bf16.msra.mxu1 %v1481_v44  ;;  %1026 = vmatprep.subr.bf16.mxu0 %v1482_v45 }
  0x7a   : > { %1067 = vmatprep.subr.bf16.mxu1 %v1484_v46 }
  0x7c   : > { %1027 = vmatpush1.bf16.msra.mxu0 %v1486_v50 }
  0x7d   : > { %1068 = vmatpush1.bf16.msra.mxu1 %v1487_v51  ;;  %1028 = vmatprep.subr.bf16.mxu0 %v1488_v53 }
  0x7e   : > { %1069 = vmatprep.subr.bf16.mxu1 %v1490_v54 }
  0x80   : > { %1029 = vmatpush1.bf16.msra.mxu0 %v1492_v55 }
  0x81   : > { %1070 = vmatpush1.bf16.msra.mxu1 %v1493_v56  ;;  %1030 = vmatprep.subr.bf16.mxu0 %v1494_v57 }
  0x82   : > { %1071 = vmatprep.subr.bf16.mxu1 %v1496_v58 }
  0x84   : > { %1031 = vmatpush1.bf16.msra.mxu0 %v1498_v59 }
  0x85   : > { %1072 = vmatpush1.bf16.msra.mxu1 %v1499_v60  ;;  %1032 = vmatprep.subr.bf16.mxu0 %v1500_v61 }
  0x86   : > { %1073 = vmatprep.subr.bf16.mxu1 %v1502_v62 }
  0x88   : > { %1033 = vmatpush1.bf16.msra.mxu0 %v1504_v63 }
  0x89   : > { %1074 = vmatpush1.bf16.msra.mxu1 %v1505_v0  ;;  %1034 = vmatprep.subr.bf16.mxu0 %v1506_v1 }
  0x8a   : > { %1075 = vmatprep.subr.bf16.mxu1 %v1508_v2 }
  0x8c   : > { %1035 = vmatpush1.bf16.msra.mxu0 %v1510_v3 }
  0x8d   : > { %1076 = vmatpush1.bf16.msra.mxu1 %v1511_v4 }
  0x8f   : > { %1037 = vmatmul.mubr.bf16.vlgmr.msra.gmra.mrb[0].mxu0 %v1285_v5 }
  0x90   : > { %1078 = vmatmul.mubr.bf16.vlgmr.msra.gmra.mrb[0].mxu1 %v1287_v6 }
 0x162   : > { %v1038_v7 = vpop.f32.mrb[0].mxu0 }
 0x163   : > { %v1079_v9 = vpop.f32.mrb[0].mxu1  ;;  %v1040_v11 = vpop.f32.mrb[1].mxu0  ;;  %1093 = sbr.rel (%p1353_p13) target bundleno = 378 (0x17a), region = 82 }
 0x164   : > { %v1080_v10 = vadd.f32 %v1079_v9, %v1038_v7  ;;  %v1081_v13 = vpop.f32.mrb[1].mxu1  ;;  %v1042_v15 = vpop.f32.mrb[2].mxu0 }
 0x165   : > { %v1082_v14 = vadd.f32 %v1081_v13, %v1040_v11  ;;  %v1083_v16 = vpop.f32.mrb[2].mxu1  ;;  %v1043_v18 = vpop.f32.mrb[3].mxu0 }
 0x166   : > { %v1086_v17 = vadd.f32 %v1080_v10, %v602_v8  ;;  %v1084_v19 = vpop.f32.mrb[3].mxu1 }
 0x167   : > { %v1087_v20 = vadd.f32 %v1082_v14, %v603_v12 }
 0x168   : > { %1088 = vst [vmem:[#allocation2] sm:$0xff] %v1086_v17 }
 0x169   : > { %1089 = vst [vmem:[#allocation2 + $0x8] sm:$0xff] %v1087_v20 }
 0x16f   : > { %v1094_v27 = vld [vmem:[#allocation2] sm:$0xff] }
 0x170   : > { %v1095_v28 = vld [vmem:[#allocation2 + $0x8] sm:$0xff]  ;;  %v1108_v33 = vmul.f32 %v1101_v29, %v1094_v27 }
 0x171   : > { %v1109_v34 = vmul.f32 %v1105_v30, %v1095_v28 }
 0x172   : > { %v1122_v35 = vadd.f32 %v1115_v31, %v1108_v33 }
 0x173   : > { %v1123_v36 = vadd.f32 %v1119_v32, %v1109_v34 }
 0x174   : > { %v1124_v37 = vmax.f32 %v1122_v35, 0.0 }
 0x175   : > { %v1125_v38 = vmax.f32 %v1123_v36, 0.0 }
 0x177   : > { %v1358_v39 = vpack.c.bf16 %v1125_v38, %v1124_v37 }
 0x179   : > { %1134 = vst [vmem:[%s1814_s12] sm:$0xff] %v1358_v39 }
 0x17a PF: > { %s14_s21 = sadd.s32 1, %s1570_s21   ;;  %s1923_s15 = smov %s1550_s16 }
 0x17b   : > { %p11_p0 = scmp.ge.s32.totalorder %s14_s21, 20   ;;  %s1924_s16 = smov %s1649_s28 }
 0x17c   : > { %s1925_s17 = smov %s1562_s19  ;;  %s1926_s18 = smov %s1566_s20 }
 0x17d   : > { %s1927_s19 = smov %s1930_s22  ;;  %s1928_s20 = smov %s1934_s23 }
 0x17e   :  { %13 = sbr.rel (!%p11_p0) target bundleno = 4 (0x4), region = 126 }

// kernel: resnet_forward.40
= control target key start
LH: loop header
LB: loop body
LE: loop exit
PB: predicated region body
PF: predicated region fallthrough
CT: control target
= control target key end

     0   :  { %s1103_s15 = smov 0   ;;  %s1105_s16 = smov 0   ;;  %s1285_s0 = inlined_call_operand.vmem [shape: bf16[8,256], index: 0, kind: input, shape index: {}]   ;;  %s1286_s1 = inlined_call_operand.vmem [shape: bf16[256,512], index: 1, kind: input, shape index: {}]   ;;  %s1287_s2 = inlined_call_operand.vmem [shape: f32[1,512], index: 2, kind: input, shape index: {}]   ;;  %s1288_s3 = inlined_call_operand.vmem [shape: f32[1,512], index: 3, kind: input, shape index: {}]   ;;  %s1289_s4 = inlined_call_operand.vmem [shape: bf16[8,512], index: 4, kind: output, shape index: {}]  }
   0x1   :  { %s1107_s17 = smov 0   ;;  %s1109_s18 = smov 0  }
   0x2   :  { %s1111_s19 = smov 0  }
   0x3 LB: > { %s29_s20 = sadd.s32 1, %s1072_s18  ;;  %p77_p1 = scmp.ne.s32.totalorder %s1064_s16, %s1060_s15  ;;  %s1076_s19 = sphi %s1111_s19, %s14_s19   ;;  %s1072_s18 = sphi %s1109_s18, %s1293_s18   ;;  %s1068_s17 = sphi %s1107_s17, %s1292_s17   ;;  %s1064_s16 = sphi %s1105_s16, %s1291_s16   ;;  %s1060_s15 = sphi %s1103_s15, %s1290_s15  }
   0x4   : > { %p31_p0 = scmp.ge.s32.totalorder %s29_s20, 2  ;;  %p78_p2 = scmp.eq.s32.totalorder %s1076_s19, 0 }
   0x5   : > { %s70_s22 = sadd.s32 1, %s1064_s16  ;;  %p899_p5 = scmp.ge.s32.totalorder %s1076_s19, 2 }
   0x6   : > { %s1295_s20 = smov (%p31_p0, %s29_s20), 0  ;;  %p79_p3 = por %p78_p2, %p77_p1 }
   0x7   : > { %s66_s21 = ssub.s32 %s1072_s18, %s1295_s20  ;;  %196 = sbr.rel (%p899_p5) target bundleno = 34 (0x22), region = 20 }
   0x8   : > { %p68_p4 = scmp.eq.s32.totalorder %s66_s21, 0 }
   0xa   : > { %s1138_s23 = scalar_select %p68_p4, %s1064_s16, %s70_s22  }
   0xe   : > { %199 = sbr.rel (!%p79_p3) target bundleno = 34 (0x22), region = 24  ;;  %s201_s24 = sand.u32 (%p79_p3), 1, %s1064_s16  }
   0xf   : > { %s946_s25 = sshll.u32 (%p79_p3), %s1072_s18, 3  ;;  %s900_s26 = sshll.u32 (%p79_p3), %s201_s24, 8 }
  0x10   : > { %s1146_s29 = scalar_lea.vmem (%p79_p3), %s1286_s1, %s946_s25  ;;  %s1151_s30 = scalar_lea.vmem (%p79_p3), [#allocation3], %s900_s26 }
  0x11   : > { %v299_v0 = vld [vmem:[%s1146_s29] sm:$0xff] (%p79_p3)  ;;  %v301_v1 = vld [vmem:[%s1146_s29 + $0x10] sm:$0xff] (%p79_p3) }
  0x12   : > { %v303_v2 = vld [vmem:[%s1146_s29 + $0x20] sm:$0xff] (%p79_p3)  ;;  %300 = vst [vmem:[%s1151_s30] sm:$0xff] (%p79_p3), %v299_v0  ;;  %302 = vst [vmem:[%s1151_s30 + $0x8] sm:$0xff] (%p79_p3), %v301_v1  ;;  %v305_v3 = vld [vmem:[%s1146_s29 + $0x30] sm:$0xff] (%p79_p3) }
  0x13   : > { %304 = vst [vmem:[%s1151_s30 + $0x10] sm:$0xff] (%p79_p3), %v303_v2  ;;  %v307_v4 = vld [vmem:[%s1146_s29 + $0x40] sm:$0xff] (%p79_p3)  ;;  %v309_v5 = vld [vmem:[%s1146_s29 + $0x50] sm:$0xff] (%p79_p3)  ;;  %306 = vst [vmem:[%s1151_s30 + $0x18] sm:$0xff] (%p79_p3), %v305_v3 }
  0x14   : > { %308 = vst [vmem:[%s1151_s30 + $0x20] sm:$0xff] (%p79_p3), %v307_v4  ;;  %310 = vst [vmem:[%s1151_s30 + $0x28] sm:$0xff] (%p79_p3), %v309_v5  ;;  %v311_v6 = vld [vmem:[%s1146_s29 + $0x60] sm:$0xff] (%p79_p3)  ;;  %v313_v7 = vld [vmem:[%s1146_s29 + $0x70] sm:$0xff] (%p79_p3) }
  0x15   : > { %v315_v8 = vld [vmem:[%s1146_s29 + $0x80] sm:$0xff]  ;;  %312 = vst [vmem:[%s1151_s30 + $0x30] sm:$0xff] %v311_v6  ;;  %314 = vst [vmem:[%s1151_s30 + $0x38] sm:$0xff] %v313_v7  ;;  %v317_v9 = vld [vmem:[%s1146_s29 + $0x90] sm:$0xff] }
  0x16   : > { %316 = vst [vmem:[%s1151_s30 + $0x40] sm:$0xff] %v315_v8  ;;  %v319_v10 = vld [vmem:[%s1146_s29 + $0xa0] sm:$0xff]  ;;  %v321_v11 = vld [vmem:[%s1146_s29 + $0xb0] sm:$0xff]  ;;  %318 = vst [vmem:[%s1151_s30 + $0x48] sm:$0xff] %v317_v9 }
  0x17   : > { %320 = vst [vmem:[%s1151_s30 + $0x50] sm:$0xff] %v319_v10  ;;  %322 = vst [vmem:[%s1151_s30 + $0x58] sm:$0xff] %v321_v11  ;;  %v323_v12 = vld [vmem:[%s1146_s29 + $0xc0] sm:$0xff]  ;;  %v325_v13 = vld [vmem:[%s1146_s29 + $0xd0] sm:$0xff] }
  0x18   : > { %v327_v14 = vld [vmem:[%s1146_s29 + $0xe0] sm:$0xff]  ;;  %324 = vst [vmem:[%s1151_s30 + $0x60] sm:$0xff] %v323_v12  ;;  %326 = vst [vmem:[%s1151_s30 + $0x68] sm:$0xff] %v325_v13  ;;  %v329_v15 = vld [vmem:[%s1146_s29 + $0xf0] sm:$0xff] }
  0x19   : > { %328 = vst [vmem:[%s1151_s30 + $0x70] sm:$0xff] %v327_v14  ;;  %v331_v16 = vld [vmem:[%s1146_s29 + $0x100] sm:$0xff]  ;;  %v333_v17 = vld [vmem:[%s1146_s29 + $0x110] sm:$0xff]  ;;  %330 = vst [vmem:[%s1151_s30 + $0x78] sm:$0xff] %v329_v15 }
  0x1a   : > { %332 = vst [vmem:[%s1151_s30 + $0x80] sm:$0xff] %v331_v16  ;;  %334 = vst [vmem:[%s1151_s30 + $0x88] sm:$0xff] %v333_v17  ;;  %v335_v18 = vld [vmem:[%s1146_s29 + $0x120] sm:$0xff]  ;;  %v337_v19 = vld [vmem:[%s1146_s29 + $0x130] sm:$0xff] }
  0x1b   : > { %v339_v20 = vld [vmem:[%s1146_s29 + $0x140] sm:$0xff]  ;;  %336 = vst [vmem:[%s1151_s30 + $0x90] sm:$0xff] %v335_v18  ;;  %338 = vst [vmem:[%s1151_s30 + $0x98] sm:$0xff] %v337_v19  ;;  %v341_v21 = vld [vmem:[%s1146_s29 + $0x150] sm:$0xff] }
  0x1c   : > { %340 = vst [vmem:[%s1151_s30 + $0xa0] sm:$0xff] %v339_v20  ;;  %v343_v22 = vld [vmem:[%s1146_s29 + $0x160] sm:$0xff]  ;;  %v345_v23 = vld [vmem:[%s1146_s29 + $0x170] sm:$0xff]  ;;  %342 = vst [vmem:[%s1151_s30 + $0xa8] sm:$0xff] %v341_v21 }
  0x1d   : > { %344 = vst [vmem:[%s1151_s30 + $0xb0] sm:$0xff] %v343_v22  ;;  %346 = vst [vmem:[%s1151_s30 + $0xb8] sm:$0xff] %v345_v23  ;;  %v347_v24 = vld [vmem:[%s1146_s29 + $0x180] sm:$0xff]  ;;  %v349_v25 = vld [vmem:[%s1146_s29 + $0x190] sm:$0xff] }
  0x1e   : > { %v351_v26 = vld [vmem:[%s1146_s29 + $0x1a0] sm:$0xff]  ;;  %348 = vst [vmem:[%s1151_s30 + $0xc0] sm:$0xff] %v347_v24  ;;  %350 = vst [vmem:[%s1151_s30 + $0xc8] sm:$0xff] %v349_v25  ;;  %v353_v27 = vld [vmem:[%s1146_s29 + $0x1b0] sm:$0xff] }
  0x1f   : > { %352 = vst [vmem:[%s1151_s30 + $0xd0] sm:$0xff] %v351_v26  ;;  %v355_v28 = vld [vmem:[%s1146_s29 + $0x1c0] sm:$0xff]  ;;  %v357_v29 = vld [vmem:[%s1146_s29 + $0x1d0] sm:$0xff]  ;;  %354 = vst [vmem:[%s1151_s30 + $0xd8] sm:$0xff] %v353_v27 }
  0x20   : > { %356 = vst [vmem:[%s1151_s30 + $0xe0] sm:$0xff] %v355_v28  ;;  %358 = vst [vmem:[%s1151_s30 + $0xe8] sm:$0xff] %v357_v29  ;;  %v359_v30 = vld [vmem:[%s1146_s29 + $0x1e0] sm:$0xff]  ;;  %v361_v31 = vld [vmem:[%s1146_s29 + $0x1f0] sm:$0xff] }
  0x21   : > { %360 = vst [vmem:[%s1151_s30 + $0xf0] sm:$0xff] %v359_v30  ;;  %362 = vst [vmem:[%s1151_s30 + $0xf8] sm:$0xff] %v361_v31 }
  0x22 PF: > { %p903_p6 = scmp.ge.s32.totalorder %s1076_s19, 1  ;;  %p383_p7 = scmp.lt.s32.totalorder %s1076_s19, 3 }
  0x24   : > { %p384_p8 = pnand %p903_p6, %p383_p7 }
  0x25   : > { %s390_s5 = sand.u32 (!%p384_p8), 1, %s1060_s15   ;;  %v1220_v32 = vld [vmem:[%s1285_s0] sm:$0xff] (!%p384_p8)  ;;  %s905_s10 = sshll.u32 (!%p384_p8), %s1068_s17, 1  ;;  %v728_v3 = vlaneseq (!%p384_p8) }
  0x26   : > { %387 = sbr.rel (%p384_p8) target bundleno = 325 (0x145), region = 70  ;;  %s904_s8 = sshll.u32 (!%p384_p8), %s390_s5, 8  ;;  %v910_v33 = vcombine.high (!%p384_p8), %v1220_v32, %v1220_v32  ;;  %v909_v2 = vcombine.low (!%p384_p8), %v1220_v32, %v1220_v32 }
  0x27   : > { %s1224_s9 = scalar_lea.vmem (!%p384_p8), [#allocation3], %s904_s8  ;;  %p449_p9 = scmp.lt.s32.totalorder (!%p384_p8), %s905_s10, 3  ;;  %v729_v4 = vshrl.u32 (!%p384_p8), %v728_v3, 7 }
  0x28   : > { %v988_v34 = vld [vmem:[%s1224_s9 + $0x4] ss:$8 sps:$4 sm:$0xff] (!%p384_p8)   ;;  %708 = vmatprep.mubr.bf16.mxu0 (!%p384_p8), %v910_v33  ;;  %v990_v35 = vld [vmem:[%s1224_s9] ss:$8 sps:$4 sm:$0xff] (!%p384_p8)   ;;  %v991_v36 = vld [vmem:[%s1224_s9 + $0x14] ss:$8 sps:$4 sm:$0xff] (!%p384_p8)  }
  0x29   : > { %676 = vmatprep.subr.bf16.mxu0 (!%p384_p8), %v988_v34  ;;  %v993_v37 = vld [vmem:[%s1224_s9 + $0x10] ss:$8 sps:$4 sm:$0xff] (!%p384_p8)   ;;  %v994_v38 = vld [vmem:[%s1224_s9 + $0x24] ss:$8 sps:$4 sm:$0xff] (!%p384_p8)   ;;  %v996_v39 = vld [vmem:[%s1224_s9 + $0x20] ss:$8 sps:$4 sm:$0xff] (!%p384_p8)  }
  0x2a   : > { %677 = vmatpush1.bf16.msra.mxu0 (!%p384_p8), %v990_v35  ;;  %v997_v40 = vld [vmem:[%s1224_s9 + $0x34] ss:$8 sps:$4 sm:$0xff] (!%p384_p8)   ;;  %v999_v41 = vld [vmem:[%s1224_s9 + $0x30] ss:$8 sps:$4 sm:$0xff] (!%p384_p8)   ;;  %v1000_v42 = vld [vmem:[%s1224_s9 + $0x44] ss:$8 sps:$4 sm:$0xff] (!%p384_p8)  }
  0x2b   : > { %678 = vmatprep.subr.bf16.mxu0 (!%p384_p8), %v991_v36  ;;  %v1002_v43 = vld [vmem:[%s1224_s9 + $0x40] ss:$8 sps:$4 sm:$0xff] (!%p384_p8)   ;;  %v1003_v44 = vld [vmem:[%s1224_s9 + $0x54] ss:$8 sps:$4 sm:$0xff] (!%p384_p8)   ;;  %v1005_v45 = vld [vmem:[%s1224_s9 + $0x50] ss:$8 sps:$4 sm:$0xff] (!%p384_p8)  }
  0x2c   : > { %v1006_v46 = vld [vmem:[%s1224_s9 + $0x64] ss:$8 sps:$4 sm:$0xff] (!%p384_p8)   ;;  %v1008_v47 = vld [vmem:[%s1224_s9 + $0x60] ss:$8 sps:$4 sm:$0xff] (!%p384_p8)   ;;  %v1009_v48 = vld [vmem:[%s1224_s9 + $0x74] ss:$8 sps:$4 sm:$0xff] (!%p384_p8)  }
  0x2d   : > { %v1011_v49 = vld [vmem:[%s1224_s9 + $0x70] ss:$8 sps:$4 sm:$0xff]   ;;  %v1012_v50 = vld [vmem:[%s1224_s9 + $0x84] ss:$8 sps:$4 sm:$0xff]   ;;  %v1014_v51 = vld [vmem:[%s1224_s9 + $0x80] ss:$8 sps:$4 sm:$0xff]  }
  0x2e   : > { %679 = vmatpush1.bf16.msra.mxu0 %v993_v37  ;;  %v1015_v52 = vld [vmem:[%s1224_s9 + $0x94] ss:$8 sps:$4 sm:$0xff]   ;;  %v1017_v53 = vld [vmem:[%s1224_s9 + $0x90] ss:$8 sps:$4 sm:$0xff]   ;;  %v1018_v54 = vld [vmem:[%s1224_s9 + $0xa4] ss:$8 sps:$4 sm:$0xff]  }
  0x2f   : > { %680 = vmatprep.subr.bf16.mxu0 %v994_v38  ;;  %v1020_v55 = vld [vmem:[%s1224_s9 + $0xa0] ss:$8 sps:$4 sm:$0xff]   ;;  %v1021_v56 = vld [vmem:[%s1224_s9 + $0xb4] ss:$8 sps:$4 sm:$0xff]   ;;  %v1023_v57 = vld [vmem:[%s1224_s9 + $0xb0] ss:$8 sps:$4 sm:$0xff]  }
  0x30   : > { %v1024_v58 = vld [vmem:[%s1224_s9 + $0xc4] ss:$8 sps:$4 sm:$0xff]   ;;  %v1026_v59 = vld [vmem:[%s1224_s9 + $0xc0] ss:$8 sps:$4 sm:$0xff]   ;;  %v1027_v60 = vld [vmem:[%s1224_s9 + $0xd4] ss:$8 sps:$4 sm:$0xff]  }
  0x31   : > { %v1029_v61 = vld [vmem:[%s1224_s9 + $0xd0] ss:$8 sps:$4 sm:$0xff]   ;;  %v1030_v62 = vld [vmem:[%s1224_s9 + $0xe4] ss:$8 sps:$4 sm:$0xff]   ;;  %v1032_v63 = vld [vmem:[%s1224_s9 + $0xe0] ss:$8 sps:$4 sm:$0xff]  }
  0x32   : > { %681 = vmatpush1.bf16.msra.mxu0 %v996_v39  ;;  %v1033_v0 = vld [vmem:[%s1224_s9 + $0xf4] ss:$8 sps:$4 sm:$0xff]   ;;  %v1035_v1 = vld [vmem:[%s1224_s9 + $0xf0] ss:$8 sps:$4 sm:$0xff]   ;;  %s1297_s10 = smov (!%p449_p9, %s905_s10), 3  ;;  %v730_v5 = vsub.s32 0, %v729_v4 }
  0x33   : > { %682 = vmatprep.subr.bf16.mxu0 %v997_v40  ;;  %s451_s13 = scalar_lea.vmem %s1287_s2, %s1297_s10  ;;  %s456_s21 = scalar_lea.vmem %s1288_s3, %s1297_s10  ;;  %v734_v7 = vsub.s32 1, %v729_v4 }
  0x34   : > { %v726_v6 = vld [vmem:[%s451_s13] sm:$0x3]  ;;  %s908_s17 = sshll.u32 %s1297_s10, 2 }
  0x35   : > { %v740_v8 = vld [vmem:[%s456_s21] sm:$0x3]  ;;  %v731_v9 = vrot.slane %v726_v6, %v730_v5  ;;  %v735_v10 = vrot.slane %v726_v6, %v734_v7  ;;  %s466_s25 = scalar_lea.vmem %s1289_s4, %s908_s17 }
  0x36   : > { %683 = vmatpush1.bf16.msra.mxu0 %v999_v41  ;;  %v745_v11 = vrot.slane %v740_v8, %v730_v5  ;;  %v749_v13 = vrot.slane %v740_v8, %v734_v7 }
  0x37   : > { %684 = vmatprep.subr.bf16.mxu0 %v1000_v42 }
  0x3a   : > { %685 = vmatpush1.bf16.msra.mxu0 %v1002_v43 }
  0x3b   : > { %686 = vmatprep.subr.bf16.mxu0 %v1003_v44 }
  0x3e   : > { %687 = vmatpush1.bf16.msra.mxu0 %v1005_v45 }
  0x3f   : > { %688 = vmatprep.subr.bf16.mxu0 %v1006_v46 }
  0x42   : > { %689 = vmatpush1.bf16.msra.mxu0 %v1008_v47 }
  0x43   : > { %690 = vmatprep.subr.bf16.mxu0 %v1009_v48 }
  0x46   : > { %691 = vmatpush1.bf16.msra.mxu0 %v1011_v49 }
  0x47   : > { %692 = vmatprep.subr.bf16.mxu0 %v1012_v50 }
  0x4a   : > { %693 = vmatpush1.bf16.msra.mxu0 %v1014_v51 }
  0x4b   : > { %694 = vmatprep.subr.bf16.mxu0 %v1015_v52 }
  0x4e   : > { %695 = vmatpush1.bf16.msra.mxu0 %v1017_v53 }
  0x4f   : > { %696 = vmatprep.subr.bf16.mxu0 %v1018_v54 }
  0x52   : > { %697 = vmatpush1.bf16.msra.mxu0 %v1020_v55 }
  0x53   : > { %698 = vmatprep.subr.bf16.mxu0 %v1021_v56 }
  0x56   : > { %699 = vmatpush1.bf16.msra.mxu0 %v1023_v57 }
  0x57   : > { %700 = vmatprep.subr.bf16.mxu0 %v1024_v58 }
  0x5a   : > { %701 = vmatpush1.bf16.msra.mxu0 %v1026_v59 }
  0x5b   : > { %702 = vmatprep.subr.bf16.mxu0 %v1027_v60 }
  0x5e   : > { %703 = vmatpush1.bf16.msra.mxu0 %v1029_v61 }
  0x5f   : > { %704 = vmatprep.subr.bf16.mxu0 %v1030_v62 }
  0x62   : > { %705 = vmatpush1.bf16.msra.mxu0 %v1032_v63 }
  0x63   : > { %706 = vmatprep.subr.bf16.mxu0 %v1033_v0 }
  0x66   : > { %707 = vmatpush1.bf16.msra.mxu0 %v1035_v1 }
  0x69   : > { %709 = vmatmul.mubr.bf16.vlgmr.msra.gmra.mrb[0].mxu0 %v909_v2 }
 0x13c   : > { %v710_v12 = vpop.f32.mrb[0].mxu0 }
 0x13d   : > { %v738_v14 = vmul.f32 %v731_v9, %v710_v12  ;;  %v712_v15 = vpop.f32.mrb[1].mxu0 }
 0x13e   : > { %v739_v16 = vmul.f32 %v735_v10, %v712_v15  ;;  %v714_v17 = vpop.f32.mrb[2].mxu0 }
 0x13f   : > { %v752_v18 = vadd.f32 %v745_v11, %v738_v14  ;;  %v715_v19 = vpop.f32.mrb[3].mxu0 }
 0x140   : > { %v753_v20 = vadd.f32 %v749_v13, %v739_v16 }
 0x142   : > { %v947_v21 = vpack.c.bf16 %v753_v20, %v752_v18 }
 0x144   : > { %762 = vst [vmem:[%s466_s25] sm:$0xff] %v947_v21 }
 0x145 PF: > { %s14_s19 = sadd.s32 1, %s1076_s19   ;;  %s1290_s15 = smov %s1064_s16 }
 0x146   : > { %p11_p10 = scmp.ge.s32.totalorder %s14_s19, 4   ;;  %s1291_s16 = smov %s1138_s23 }
 0x147   : > { %s1292_s17 = smov %s1072_s18  ;;  %s1293_s18 = smov %s1295_s20 }
 0x148   :  { %13 = sbr.rel (!%p11_p10) target bundleno = 3 (0x3), region = 126 }

// kernel: resnet_forward.44
= control target key start
LH: loop header
LB: loop body
LE: loop exit
PB: predicated region body
PF: predicated region fallthrough
CT: control target
= control target key end

     0   :  { %s30_s0 = inlined_call_operand.vmem [shape: bf16[1,2,512], index: 0, kind: input, shape index: {}]   ;;  %s31_s1 = inlined_call_operand.vmem [shape: bf16[2,512], index: 1, kind: output, shape index: {}]  }
   0x1   :  { %v8_v0 = vld [vmem:[%s30_s0] sm:$0xf] }
   0x2   :  { %9 = vst [vmem:[%s31_s1] sm:$0xf] %v8_v0 }

// kernel: resnet_forward.45
= control target key start
LH: loop header
LB: loop body
LE: loop exit
PB: predicated region body
PF: predicated region fallthrough
CT: control target
= control target key end

     0   :  { %s955_s1 = inlined_call_operand.vmem [shape: bf16[512,256], index: 1, kind: input, shape index: {}]   ;;  %s956_s0 = inlined_call_operand.vmem [shape: bf16[8,512], index: 0, kind: input, shape index: {}]   ;;  %s957_s2 = inlined_call_operand.vmem [shape: f32[1,256], index: 2, kind: input, shape index: {}]   ;;  %s958_s3 = inlined_call_operand.vmem [shape: f32[1,256], index: 3, kind: input, shape index: {}]   ;;  %s959_s4 = inlined_call_operand.vmem [shape: f32[8,256], index: 4, kind: output, shape index: {}]  }
   0x1   :  { %v620_v0 = vld [vmem:[%s955_s1 + $0x4] ss:$8 sps:$4 sm:$0xff]   ;;  %v624_v2 = vld [vmem:[%s955_s1] ss:$8 sps:$4 sm:$0xff]   ;;  %v626_v4 = vld [vmem:[%s955_s1 + $0x14] ss:$8 sps:$4 sm:$0xff]  }
   0x2   :  { %v622_v1 = vld [vmem:[%s955_s1 + $0x104] ss:$8 sps:$4 sm:$0xff]   ;;  %425 = vmatprep.subr.bf16.mxu1 %v620_v0  ;;  %v625_v3 = vld [vmem:[%s955_s1 + $0x100] ss:$8 sps:$4 sm:$0xff]   ;;  %v628_v5 = vld [vmem:[%s955_s1 + $0x114] ss:$8 sps:$4 sm:$0xff]  }
   0x3   :  { %466 = vmatprep.subr.bf16.mxu0 %v622_v1  ;;  %426 = vmatpush1.bf16.msra.mxu1 %v624_v2  ;;  %v630_v6 = vld [vmem:[%s955_s1 + $0x10] ss:$8 sps:$4 sm:$0xff]   ;;  %v632_v8 = vld [vmem:[%s955_s1 + $0x24] ss:$8 sps:$4 sm:$0xff]   ;;  %v636_v10 = vld [vmem:[%s955_s1 + $0x20] ss:$8 sps:$4 sm:$0xff]  }
   0x4   :  { %467 = vmatpush1.bf16.msra.mxu0 %v625_v3  ;;  %427 = vmatprep.subr.bf16.mxu1 %v626_v4  ;;  %v631_v7 = vld [vmem:[%s955_s1 + $0x110] ss:$8 sps:$4 sm:$0xff]   ;;  %v634_v9 = vld [vmem:[%s955_s1 + $0x124] ss:$8 sps:$4 sm:$0xff]   ;;  %v637_v11 = vld [vmem:[%s955_s1 + $0x120] ss:$8 sps:$4 sm:$0xff]  }
   0x5   :  { %468 = vmatprep.subr.bf16.mxu0 %v628_v5  ;;  %v638_v12 = vld [vmem:[%s955_s1 + $0x34] ss:$8 sps:$4 sm:$0xff]   ;;  %v642_v14 = vld [vmem:[%s955_s1 + $0x30] ss:$8 sps:$4 sm:$0xff]   ;;  %v644_v16 = vld [vmem:[%s955_s1 + $0x44] ss:$8 sps:$4 sm:$0xff]  }
   0x6   :  { %v640_v13 = vld [vmem:[%s955_s1 + $0x134] ss:$8 sps:$4 sm:$0xff]   ;;  %v643_v15 = vld [vmem:[%s955_s1 + $0x130] ss:$8 sps:$4 sm:$0xff]   ;;  %v646_v17 = vld [vmem:[%s955_s1 + $0x144] ss:$8 sps:$4 sm:$0xff]  }
   0x7   :  { %428 = vmatpush1.bf16.msra.mxu1 %v630_v6  ;;  %v648_v18 = vld [vmem:[%s955_s1 + $0x40] ss:$8 sps:$4 sm:$0xff]   ;;  %v650_v20 = vld [vmem:[%s955_s1 + $0x54] ss:$8 sps:$4 sm:$0xff]   ;;  %v654_v22 = vld [vmem:[%s955_s1 + $0x50] ss:$8 sps:$4 sm:$0xff]   ;;  %v518_v6 = vlaneseq }
   0x8   :  { %469 = vmatpush1.bf16.msra.mxu0 %v631_v7  ;;  %429 = vmatprep.subr.bf16.mxu1 %v632_v8  ;;  %v649_v19 = vld [vmem:[%s955_s1 + $0x140] ss:$8 sps:$4 sm:$0xff]   ;;  %v652_v21 = vld [vmem:[%s955_s1 + $0x154] ss:$8 sps:$4 sm:$0xff]   ;;  %v655_v23 = vld [vmem:[%s955_s1 + $0x150] ss:$8 sps:$4 sm:$0xff]  }
   0x9   :  { %470 = vmatprep.subr.bf16.mxu0 %v634_v9  ;;  %v656_v24 = vld [vmem:[%s955_s1 + $0x64] ss:$8 sps:$4 sm:$0xff]   ;;  %v660_v26 = vld [vmem:[%s955_s1 + $0x60] ss:$8 sps:$4 sm:$0xff]   ;;  %v662_v28 = vld [vmem:[%s955_s1 + $0x74] ss:$8 sps:$4 sm:$0xff]  }
   0xa   :  { %v658_v25 = vld [vmem:[%s955_s1 + $0x164] ss:$8 sps:$4 sm:$0xff]   ;;  %v661_v27 = vld [vmem:[%s955_s1 + $0x160] ss:$8 sps:$4 sm:$0xff]   ;;  %v664_v29 = vld [vmem:[%s955_s1 + $0x174] ss:$8 sps:$4 sm:$0xff]  }
   0xb   :  { %430 = vmatpush1.bf16.msra.mxu1 %v636_v10  ;;  %v666_v30 = vld [vmem:[%s955_s1 + $0x70] ss:$8 sps:$4 sm:$0xff]   ;;  %v668_v32 = vld [vmem:[%s955_s1 + $0x84] ss:$8 sps:$4 sm:$0xff]   ;;  %v672_v34 = vld [vmem:[%s955_s1 + $0x80] ss:$8 sps:$4 sm:$0xff]  }
   0xc   :  { %471 = vmatpush1.bf16.msra.mxu0 %v637_v11  ;;  %431 = vmatprep.subr.bf16.mxu1 %v638_v12  ;;  %v667_v31 = vld [vmem:[%s955_s1 + $0x170] ss:$8 sps:$4 sm:$0xff]   ;;  %v670_v33 = vld [vmem:[%s955_s1 + $0x184] ss:$8 sps:$4 sm:$0xff]   ;;  %v673_v35 = vld [vmem:[%s955_s1 + $0x180] ss:$8 sps:$4 sm:$0xff]  }
   0xd   :  { %472 = vmatprep.subr.bf16.mxu0 %v640_v13  ;;  %v674_v36 = vld [vmem:[%s955_s1 + $0x94] ss:$8 sps:$4 sm:$0xff]   ;;  %v678_v38 = vld [vmem:[%s955_s1 + $0x90] ss:$8 sps:$4 sm:$0xff]   ;;  %v680_v40 = vld [vmem:[%s955_s1 + $0xa4] ss:$8 sps:$4 sm:$0xff]  }
   0xe   :  { %v676_v37 = vld [vmem:[%s955_s1 + $0x194] ss:$8 sps:$4 sm:$0xff]   ;;  %v679_v39 = vld [vmem:[%s955_s1 + $0x190] ss:$8 sps:$4 sm:$0xff]   ;;  %v682_v41 = vld [vmem:[%s955_s1 + $0x1a4] ss:$8 sps:$4 sm:$0xff]  }
   0xf   :  { %432 = vmatpush1.bf16.msra.mxu1 %v642_v14  ;;  %v684_v42 = vld [vmem:[%s955_s1 + $0xa0] ss:$8 sps:$4 sm:$0xff]   ;;  %v686_v44 = vld [vmem:[%s955_s1 + $0xb4] ss:$8 sps:$4 sm:$0xff]   ;;  %v690_v49 = vld [vmem:[%s955_s1 + $0xb0] ss:$8 sps:$4 sm:$0xff]  }
  0x10   :  { %473 = vmatpush1.bf16.msra.mxu0 %v643_v15  ;;  %433 = vmatprep.subr.bf16.mxu1 %v644_v16  ;;  %v685_v43 = vld [vmem:[%s955_s1 + $0x1a0] ss:$8 sps:$4 sm:$0xff]   ;;  %v688_v45 = vld [vmem:[%s955_s1 + $0x1b4] ss:$8 sps:$4 sm:$0xff]   ;;  %v691_v50 = vld [vmem:[%s955_s1 + $0x1b0] ss:$8 sps:$4 sm:$0xff]  }
  0x11   :  { %474 = vmatprep.subr.bf16.mxu0 %v646_v17  ;;  %v25_v46 = vld [vmem:[%s956_s0] sm:$0xff]  ;;  %v26_v48 = vld [vmem:[%s956_s0 + $0x8] sm:$0xff]  ;;  %v698_v56 = vld [vmem:[%s955_s1 + $0xd4] ss:$8 sps:$4 sm:$0xff]   ;;  %v519_v7 = vshrl.u32 %v518_v6, 7 }
  0x12   :  { %v551_v47 = vcombine.high %v25_v46, %v25_v46  ;;  %v553_v51 = vcombine.high %v26_v48, %v26_v48  ;;  %v692_v52 = vld [vmem:[%s955_s1 + $0xc4] ss:$8 sps:$4 sm:$0xff]   ;;  %v696_v54 = vld [vmem:[%s955_s1 + $0xc0] ss:$8 sps:$4 sm:$0xff]   ;;  %v700_v57 = vld [vmem:[%s955_s1 + $0x1d4] ss:$8 sps:$4 sm:$0xff]   ;;  %v550_v4 = vcombine.low %v25_v46, %v25_v46  ;;  %v552_v5 = vcombine.low %v26_v48, %v26_v48 }
  0x13   :  { %434 = vmatpush1.bf16.msra.mxu1 %v648_v18  ;;  %v694_v53 = vld [vmem:[%s955_s1 + $0x1c4] ss:$8 sps:$4 sm:$0xff]   ;;  %v697_v55 = vld [vmem:[%s955_s1 + $0x1c0] ss:$8 sps:$4 sm:$0xff]   ;;  %v702_v58 = vld [vmem:[%s955_s1 + $0xd0] ss:$8 sps:$4 sm:$0xff]  }
  0x14   :  { %475 = vmatpush1.bf16.msra.mxu0 %v649_v19  ;;  %435 = vmatprep.subr.bf16.mxu1 %v650_v20  ;;  %v703_v59 = vld [vmem:[%s955_s1 + $0x1d0] ss:$8 sps:$4 sm:$0xff]   ;;  %v704_v60 = vld [vmem:[%s955_s1 + $0xe4] ss:$8 sps:$4 sm:$0xff]   ;;  %v708_v62 = vld [vmem:[%s955_s1 + $0xe0] ss:$8 sps:$4 sm:$0xff]  }
  0x15   :  { %476 = vmatprep.subr.bf16.mxu0 %v652_v21  ;;  %457 = vmatprep.mubr.bf16.mxu1 %v551_v47  ;;  %v706_v61 = vld [vmem:[%s955_s1 + $0x1e4] ss:$8 sps:$4 sm:$0xff]   ;;  %v709_v63 = vld [vmem:[%s955_s1 + $0x1e0] ss:$8 sps:$4 sm:$0xff]   ;;  %v710_v0 = vld [vmem:[%s955_s1 + $0xf4] ss:$8 sps:$4 sm:$0xff]  }
  0x16   :  { %498 = vmatprep.mubr.bf16.mxu0 %v553_v51  ;;  %v712_v1 = vld [vmem:[%s955_s1 + $0x1f4] ss:$8 sps:$4 sm:$0xff]   ;;  %v714_v2 = vld [vmem:[%s955_s1 + $0xf0] ss:$8 sps:$4 sm:$0xff]   ;;  %v520_v8 = vsub.s32 0, %v519_v7  ;;  %v524_v10 = vsub.s32 1, %v519_v7 }
  0x17   :  { %436 = vmatpush1.bf16.msra.mxu1 %v654_v22  ;;  %v715_v3 = vld [vmem:[%s955_s1 + $0x1f0] ss:$8 sps:$4 sm:$0xff]   ;;  %v516_v9 = vld [vmem:[%s957_s2] sm:$0x3] }
  0x18   :  { %477 = vmatpush1.bf16.msra.mxu0 %v655_v23  ;;  %437 = vmatprep.subr.bf16.mxu1 %v656_v24  ;;  %v530_v11 = vld [vmem:[%s958_s3] sm:$0x3]  ;;  %v521_v12 = vrot.slane %v516_v9, %v520_v8  ;;  %v525_v15 = vrot.slane %v516_v9, %v524_v10 }
  0x19   :  { %478 = vmatprep.subr.bf16.mxu0 %v658_v25  ;;  %v535_v17 = vrot.slane %v530_v11, %v520_v8  ;;  %v539_v21 = vrot.slane %v530_v11, %v524_v10 }
  0x1b   :  { %438 = vmatpush1.bf16.msra.mxu1 %v660_v26 }
  0x1c   :  { %479 = vmatpush1.bf16.msra.mxu0 %v661_v27  ;;  %439 = vmatprep.subr.bf16.mxu1 %v662_v28 }
  0x1d   :  { %480 = vmatprep.subr.bf16.mxu0 %v664_v29 }
  0x1f   :  { %440 = vmatpush1.bf16.msra.mxu1 %v666_v30 }
  0x20   :  { %481 = vmatpush1.bf16.msra.mxu0 %v667_v31  ;;  %441 = vmatprep.subr.bf16.mxu1 %v668_v32 }
  0x21   :  { %482 = vmatprep.subr.bf16.mxu0 %v670_v33 }
  0x23   :  { %442 = vmatpush1.bf16.msra.mxu1 %v672_v34 }
  0x24   :  { %483 = vmatpush1.bf16.msra.mxu0 %v673_v35  ;;  %443 = vmatprep.subr.bf16.mxu1 %v674_v36 }
  0x25   :  { %484 = vmatprep.subr.bf16.mxu0 %v676_v37 }
  0x27   :  { %444 = vmatpush1.bf16.msra.mxu1 %v678_v38 }
  0x28   :  { %485 = vmatpush1.bf16.msra.mxu0 %v679_v39  ;;  %445 = vmatprep.subr.bf16.mxu1 %v680_v40 }
  0x29   :  { %486 = vmatprep.subr.bf16.mxu0 %v682_v41 }
  0x2b   :  { %446 = vmatpush1.bf16.msra.mxu1 %v684_v42 }
  0x2c   :  { %487 = vmatpush1.bf16.msra.mxu0 %v685_v43  ;;  %447 = vmatprep.subr.bf16.mxu1 %v686_v44 }
  0x2d   :  { %488 = vmatprep.subr.bf16.mxu0 %v688_v45 }
  0x2f   :  { %448 = vmatpush1.bf16.msra.mxu1 %v690_v49 }
  0x30   :  { %489 = vmatpush1.bf16.msra.mxu0 %v691_v50  ;;  %449 = vmatprep.subr.bf16.mxu1 %v692_v52 }
  0x31   :  { %490 = vmatprep.subr.bf16.mxu0 %v694_v53 }
  0x33   :  { %450 = vmatpush1.bf16.msra.mxu1 %v696_v54 }
  0x34   :  { %491 = vmatpush1.bf16.msra.mxu0 %v697_v55  ;;  %451 = vmatprep.subr.bf16.mxu1 %v698_v56 }
  0x35   :  { %492 = vmatprep.subr.bf16.mxu0 %v700_v57 }
  0x37   :  { %452 = vmatpush1.bf16.msra.mxu1 %v702_v58 }
  0x38   :  { %493 = vmatpush1.bf16.msra.mxu0 %v703_v59  ;;  %453 = vmatprep.subr.bf16.mxu1 %v704_v60 }
  0x39   :  { %494 = vmatprep.subr.bf16.mxu0 %v706_v61 }
  0x3b   :  { %454 = vmatpush1.bf16.msra.mxu1 %v708_v62 }
  0x3c   :  { %495 = vmatpush1.bf16.msra.mxu0 %v709_v63  ;;  %455 = vmatprep.subr.bf16.mxu1 %v710_v0 }
  0x3d   :  { %496 = vmatprep.subr.bf16.mxu0 %v712_v1 }
  0x3f   :  { %456 = vmatpush1.bf16.msra.mxu1 %v714_v2 }
  0x40   :  { %497 = vmatpush1.bf16.msra.mxu0 %v715_v3 }
  0x42   :  { %458 = vmatmul.mubr.bf16.vlgmr.msra.gmra.mrb[0].mxu1 %v550_v4 }
  0x43   :  { %499 = vmatmul.mubr.bf16.vlgmr.msra.gmra.mrb[0].mxu0 %v552_v5 }
 0x115   :  { %v459_v13 = vpop.f32.mrb[0].mxu1 }
 0x116   :  { %v500_v14 = vpop.f32.mrb[0].mxu0  ;;  %v461_v18 = vpop.f32.mrb[1].mxu1 }
 0x117   :  { %v501_v16 = vadd.f32 %v500_v14, %v459_v13  ;;  %v502_v19 = vpop.f32.mrb[1].mxu0  ;;  %v463_v22 = vpop.f32.mrb[2].mxu1 }
 0x118   :  { %v503_v20 = vadd.f32 %v502_v19, %v461_v18  ;;  %v504_v23 = vpop.f32.mrb[2].mxu0  ;;  %v464_v25 = vpop.f32.mrb[3].mxu1 }
 0x119   :  { %v528_v24 = vmul.f32 %v521_v12, %v501_v16  ;;  %v505_v26 = vpop.f32.mrb[3].mxu0 }
 0x11a   :  { %v529_v27 = vmul.f32 %v525_v15, %v503_v20 }
 0x11b   :  { %v542_v28 = vadd.f32 %v535_v17, %v528_v24 }
 0x11c   :  { %v543_v29 = vadd.f32 %v539_v21, %v529_v27 }
 0x11d   :  { %544 = vst [vmem:[%s959_s4] sm:$0xff] %v542_v28 }
 0x11e   :  { %545 = vst [vmem:[%s959_s4 + $0x8] sm:$0xff] %v543_v29 }

</bundles_post_ra>
